<compile_context>
chip_gen: v5e
topology: v5e:2x2
jax: 0.10.0
libtpu: 0.0.40
codegen_flags: <defaults>
</compile_context>

<pallas_src>
import jax
import jax.numpy as jnp
from jax import lax
from jax.experimental import pallas as pl
from jax.experimental.pallas import tpu as pltpu

_LANES = 128
_CHUNK_ROWS = 8          # one f32 vreg (8 sublanes x 128 lanes) per tile op
_BLOCK_ROWS = 1024       # 128K pixels / 512 KB f32 per input/output block


def _round_up(v, m):
    return ((v + m - 1) // m) * m


# ----------------------------------------------------------------------------
# Pallas kernel: per-element MLP  sigmoid(MLP(x, xf)*0.1 + x), pixels on lanes
# ----------------------------------------------------------------------------
def _make_crf_kernel(n_extra, chunk_rows, n_chunks):
    """Builds the kernel.  Weights (layer 4 already 0.1-folded) are read as
    scalars from SMEM and broadcast into VPU FMAs; the hidden state is 16
    lane-dense (chunk_rows, 128) f32 tiles."""

    def kernel(x_ref, *rest):
        if n_extra > 0:
            xf_ref = rest[0]
            rest = rest[1:]
        else:
            xf_ref = None
        (w1_ref, b1_ref, w2_ref, b2_ref, w3_ref, b3_ref,
         w4_ref, b4_ref, o_ref) = rest

        def dense16(h, w_ref, b_ref):
            # 16 -> 16 dense layer + ReLU, fully unrolled broadcast FMAs.
            out = []
            for j in range(16):
                acc = h[0] * w_ref[0, j]
                for k in range(1, 16):
                    acc = acc + h[k] * w_ref[k, j]
                out.append(jnp.maximum(acc + b_ref[j], 0.0))
            return out

        def body(ci, carry):
            r = pl.multiple_of(ci * chunk_rows, chunk_rows)
            xc = x_ref[pl.ds(r, chunk_rows), :]                  # (chunk, 128)
            if n_extra > 0:
                xfc = [xf_ref[e, pl.ds(r, chunk_rows), :]
                       for e in range(n_extra)]
            # layer 1: (1+E) -> 16  (pure broadcast FMAs, no MXU)
            h = []
            for j in range(16):
                acc = xc * w1_ref[0, j]
                for e in range(n_extra):
                    acc = acc + xfc[e] * w1_ref[1 + e, j]
                h.append(jnp.maximum(acc + b1_ref[j], 0.0))
            # layers 2, 3: 16 -> 16 (256 VPU FMAs each, unrolled)
            h = dense16(h, w2_ref, b2_ref)
            h = dense16(h, w3_ref, b3_ref)
            # layer 4: 16 -> 1 (0.1 scale already folded into w4/b4)
            res = h[0] * w4_ref[0, 0]
            for k in range(1, 16):
                res = res + h[k] * w4_ref[k, 0]
            res = res + b4_ref[0]
            # residual + sigmoid (exp on the EUP), lane-dense store
            o_ref[pl.ds(r, chunk_rows), :] = 1.0 / (1.0 + jnp.exp(-(res + xc)))
            return carry

        lax.fori_loop(0, n_chunks, body, 0)

    return kernel


def _crf_forward_pallas(x_flat, xf, params, *, block_rows=_BLOCK_ROWS,
                        chunk_rows=_CHUNK_ROWS):
    """x_flat: (N,) f32.  xf: None or (E, N) f32.  Returns (N,) f32."""
    w1, b1, w2, b2, w3, b3, w4, b4 = params
    n = x_flat.shape[0]
    p = _round_up(n, _LANES * chunk_rows)
    if p != n:                                  # pad only when unavoidable
        x_flat = jnp.pad(x_flat, (0, p - n))
        if xf is not None:
            xf = jnp.pad(xf, ((0, 0), (0, p - n)))
    rows = p // _LANES                          # always a multiple of 8
    br = min(block_rows, rows)
    grid = (pl.cdiv(rows, br),)                 # ragged last block is clipped
    n_chunks = br // chunk_rows
    n_extra = 0 if xf is None else xf.shape[0]

    x2 = x_flat.reshape(rows, _LANES)
    smem = pl.BlockSpec(memory_space=pltpu.MemorySpace.SMEM)

    in_specs = [pl.BlockSpec((br, _LANES), lambda i: (i, 0))]
    args = [x2]
    if n_extra > 0:
        xf3 = xf.reshape(n_extra, rows, _LANES)
        in_specs.append(pl.BlockSpec((n_extra, br, _LANES),
                                     lambda i: (0, i, 0)))
        args.append(xf3)
    in_specs += [smem] * 8
    args += [w1, b1, w2, b2, w3, b3, w4, b4]

    out = pl.pallas_call(
        _make_crf_kernel(n_extra, chunk_rows, n_chunks),
        out_shape=jax.ShapeDtypeStruct((rows, _LANES), jnp.float32),
        grid=grid,
        in_specs=in_specs,
        out_specs=pl.BlockSpec((br, _LANES), lambda i: (i, 0)),
        compiler_params=pltpu.CompilerParams(
            dimension_semantics=("parallel",)),
    )(*args)
    return out.reshape(p)[:n]


# ----------------------------------------------------------------------------
# CRF module (forward semantics of the PyTorch class)
# ----------------------------------------------------------------------------
class CRF:
    def __init__(self, map_type: str, gamma: float = 2.2, init_identity=False,
                 extra_features: int = 0, key=None):
        assert map_type in ["none", "gamma", "learn"]
        self.map_type = map_type
        self.gamma = gamma
        self.extra_features = extra_features
        self.params = None
        if map_type == "learn":
            self.linear_ch_in = 1 + extra_features
            if key is None:
                key = jax.random.PRNGKey(0)
            self.params = self._init_mlp(key, self.linear_ch_in)
            # TODO(synk): init_identity is an Adam training loop (not part of
            # the forward pass); not implemented here.

    @staticmethod
    def _init_mlp(key, in_ch):
        # nn.Linear default init: U(-1/sqrt(fan_in), 1/sqrt(fan_in)).
        # Weights are stored transposed as (in, out) for x @ W.
        dims = [(in_ch, 16), (16, 16), (16, 16), (16, 1)]
        params = []
        for fi, fo in dims:
            key, kw, kb = jax.random.split(key, 3)
            bound = 1.0 / (fi ** 0.5)
            params.append(jax.random.uniform(kw, (fi, fo), jnp.float32,
                                             -bound, bound))
            params.append(jax.random.uniform(kb, (fo,), jnp.float32,
                                             -bound, bound))
        return tuple(params)

    def __call__(self, x, x_feat=None, skip_learn=False):
        if self.map_type == "none":
            return x
        if "gamma" in self.map_type:
            x = x ** (1.0 / self.gamma)
        if skip_learn or self.map_type != "learn":
            return x

        ori_shape = x.shape
        x_flat = x.reshape(-1).astype(jnp.float32)

        xf_t = None
        if x_feat is not None and self.extra_features > 0:
            xf = x_feat.astype(jnp.float32)
            if xf.ndim != 3:
                xf = jnp.repeat(xf[:, None, :], 3, axis=1)
            xf = xf.reshape(-1, self.extra_features)   # (N, E) per-pixel feats
            xf_t = xf.T                                # (E, N): pixels -> lanes
        # x_feat is None with extra_features > 0: PyTorch zero-pads the extra
        # columns; zeros contribute nothing through w1[1:], so the fused base
        # path below is exactly equivalent (no concat/pad HBM traffic).

        w1, b1, w2, b2, w3, b3, w4, b4 = self.params
        folded = (w1, b1, w2, b2, w3, b3, w4 * 0.1, b4 * 0.1)  # fold 0.1 scale
        out = _crf_forward_pallas(x_flat, xf_t, folded)
        return out.reshape(ori_shape).astype(x.dtype)


# ----------------------------------------------------------------------------
# Pure-JAX reference (mirrors the PyTorch forward) for correctness checks
# ----------------------------------------------------------------------------
def _reference_forward(params, x, x_feat=None, extra_features=0):
    w1, b1, w2, b2, w3, b3, w4, b4 = params
    x_in = x.reshape(-1, 1).astype(jnp.float32)
    if x_feat is not None and extra_features > 0:
        xf = x_feat.astype(jnp.float32)
        if xf.ndim != 3:
            xf = jnp.repeat(xf[:, None, :], 3, axis=1)
        xf = xf.reshape(-1, extra_features)
        feat = jnp.concatenate([x_in, xf], axis=-1)
    else:
        feat = x_in
        if extra_features > 0:
            feat = jnp.concatenate(
                [feat, jnp.zeros((feat.shape[0], extra_features), feat.dtype)],
                axis=-1)
    h = jnp.maximum(feat @ w1 + b1, 0.0)
    h = jnp.maximum(h @ w2 + b2, 0.0)
    h = jnp.maximum(h @ w3 + b3, 0.0)
    res = (h @ w4 + b4) * 0.1
    return (1.0 / (1.0 + jnp.exp(-(res + x_in)))).reshape(x.shape)


if __name__ == "__main__":
    key = jax.random.PRNGKey(0)
    k_x, k_p, k_f, k_p2 = jax.random.split(key, 4)

    # small NCHW input, as the PyTorch module would receive
    x = jax.random.uniform(k_x, (2, 4, 16, 16), jnp.float32)

    # base path (extra_features = 0)
    crf = CRF("learn", extra_features=0, key=k_p)
    y = jax.block_until_ready(crf(x))
    y_ref = _reference_forward(crf.params, x)
    assert y.shape == x.shape
    assert jnp.allclose(y, y_ref, atol=1e-5, rtol=1e-5), \
        float(jnp.max(jnp.abs(y - y_ref)))

    # fused extra-features path (x_feat provided, ndim == 3)
    crf2 = CRF("learn", extra_features=2, key=k_p2)
    x_feat = jax.random.uniform(k_f, (2, 4 * 16 * 16, 2), jnp.float32)
    y2 = jax.block_until_ready(crf2(x, x_feat))
    y2_ref = _reference_forward(crf2.params, x, x_feat=x_feat, extra_features=2)
    assert jnp.allclose(y2, y2_ref, atol=1e-5, rtol=1e-5), \
        float(jnp.max(jnp.abs(y2 - y2_ref)))

    # extra_features declared but x_feat=None (torch zero-pads == base path)
    y3 = jax.block_until_ready(crf2(x))
    y3_ref = _reference_forward(crf2.params, x, x_feat=None, extra_features=2)
    assert jnp.allclose(y3, y3_ref, atol=1e-5, rtol=1e-5), \
        float(jnp.max(jnp.abs(y3 - y3_ref)))

    # trivial paths (no kernel)
    _ = jax.block_until_ready(CRF("gamma")(x))
    _ = jax.block_until_ready(CRF("none")(x))

    print("KERNEL_OK")
</pallas_src>

<mosaic_0001>
module attributes {stable_mosaic.version = 11 : i64} {
  func.func @kernel(%arg0: i32, %arg1: memref<16x128xf32, #tpu.memory_space<vmem>>, %arg2: memref<1x16xf32, #tpu.memory_space<smem>>, %arg3: memref<16xf32, #tpu.memory_space<smem>>, %arg4: memref<16x16xf32, #tpu.memory_space<smem>>, %arg5: memref<16xf32, #tpu.memory_space<smem>>, %arg6: memref<16x16xf32, #tpu.memory_space<smem>>, %arg7: memref<16xf32, #tpu.memory_space<smem>>, %arg8: memref<16x1xf32, #tpu.memory_space<smem>>, %arg9: memref<1xf32, #tpu.memory_space<smem>>, %arg10: memref<16x128xf32, #tpu.memory_space<vmem>>) attributes {dimension_semantics = [#tpu.dimension_semantics<parallel>], iteration_bounds = array<i64: 1>, scalar_prefetch = 0 : i64, scratch_operands = 0 : i64, tpu.core_type = #tpu.core_type<tc>, window_params = [{transform_indices = @transform_0, window_bounds = array<i64: 16, 128>}, {transform_indices = @transform_1, window_bounds = array<i64: 1, 16>}, {transform_indices = @transform_2, window_bounds = array<i64: 16>}, {transform_indices = @transform_3, window_bounds = array<i64: 16, 16>}, {transform_indices = @transform_4, window_bounds = array<i64: 16>}, {transform_indices = @transform_5, window_bounds = array<i64: 16, 16>}, {transform_indices = @transform_6, window_bounds = array<i64: 16>}, {transform_indices = @transform_7, window_bounds = array<i64: 16, 1>}, {transform_indices = @transform_8, window_bounds = array<i64: 1>}, {transform_indices = @transform_9, window_bounds = array<i64: 16, 128>}]} {
    %c0_i32 = arith.constant 0 : i32
    %c2_i32 = arith.constant 2 : i32
    %0 = arith.addi %c0_i32, %c2_i32 : i32
    %c1_i32 = arith.constant 1 : i32
    scf.for %arg11 = %c0_i32 to %0 step %c1_i32  : i32 {
      %c8_i32 = arith.constant 8 : i32
      %1 = arith.muli %arg11, %c8_i32 : i32
      %2 = tpu.assume_multiple %1, 8 : i32
      %3 = arith.index_cast %2 : i32 to index
      %c0 = arith.constant 0 : index
      %4 = vector.load %arg1[%3, %c0] : memref<16x128xf32, #tpu.memory_space<vmem>>, vector<8x128xf32>
      %c0_1 = arith.constant 0 : index
      %c0_2 = arith.constant 0 : index
      %5 = memref.load %arg2[%c0_1, %c0_2] : memref<1x16xf32, #tpu.memory_space<smem>>
      %6 = vector.broadcast %5 : f32 to vector<8x128xf32>
      %7 = arith.mulf %4, %6 : vector<8x128xf32>
      %c0_3 = arith.constant 0 : index
      %8 = memref.load %arg3[%c0_3] : memref<16xf32, #tpu.memory_space<smem>>
      %9 = vector.broadcast %8 : f32 to vector<8x128xf32>
      %10 = arith.addf %7, %9 : vector<8x128xf32>
      %cst = arith.constant 0.000000e+00 : f32
      %11 = vector.broadcast %cst : f32 to vector<8x128xf32>
      %12 = arith.maximumf %10, %11 : vector<8x128xf32>
      %c0_4 = arith.constant 0 : index
      %c1 = arith.constant 1 : index
      %13 = memref.load %arg2[%c0_4, %c1] : memref<1x16xf32, #tpu.memory_space<smem>>
      %14 = vector.broadcast %13 : f32 to vector<8x128xf32>
      %15 = arith.mulf %4, %14 : vector<8x128xf32>
      %c1_5 = arith.constant 1 : index
      %16 = memref.load %arg3[%c1_5] : memref<16xf32, #tpu.memory_space<smem>>
      %17 = vector.broadcast %16 : f32 to vector<8x128xf32>
      %18 = arith.addf %15, %17 : vector<8x128xf32>
      %cst_6 = arith.constant 0.000000e+00 : f32
      %19 = vector.broadcast %cst_6 : f32 to vector<8x128xf32>
      %20 = arith.maximumf %18, %19 : vector<8x128xf32>
      %c0_7 = arith.constant 0 : index
      %c2 = arith.constant 2 : index
      %21 = memref.load %arg2[%c0_7, %c2] : memref<1x16xf32, #tpu.memory_space<smem>>
      %22 = vector.broadcast %21 : f32 to vector<8x128xf32>
      %23 = arith.mulf %4, %22 : vector<8x128xf32>
      %c2_8 = arith.constant 2 : index
      %24 = memref.load %arg3[%c2_8] : memref<16xf32, #tpu.memory_space<smem>>
      %25 = vector.broadcast %24 : f32 to vector<8x128xf32>
      %26 = arith.addf %23, %25 : vector<8x128xf32>
      %cst_9 = arith.constant 0.000000e+00 : f32
      %27 = vector.broadcast %cst_9 : f32 to vector<8x128xf32>
      %28 = arith.maximumf %26, %27 : vector<8x128xf32>
      %c0_10 = arith.constant 0 : index
      %c3 = arith.constant 3 : index
      %29 = memref.load %arg2[%c0_10, %c3] : memref<1x16xf32, #tpu.memory_space<smem>>
      %30 = vector.broadcast %29 : f32 to vector<8x128xf32>
      %31 = arith.mulf %4, %30 : vector<8x128xf32>
      %c3_11 = arith.constant 3 : index
      %32 = memref.load %arg3[%c3_11] : memref<16xf32, #tpu.memory_space<smem>>
      %33 = vector.broadcast %32 : f32 to vector<8x128xf32>
      %34 = arith.addf %31, %33 : vector<8x128xf32>
      %cst_12 = arith.constant 0.000000e+00 : f32
      %35 = vector.broadcast %cst_12 : f32 to vector<8x128xf32>
      %36 = arith.maximumf %34, %35 : vector<8x128xf32>
      %c0_13 = arith.constant 0 : index
      %c4 = arith.constant 4 : index
      %37 = memref.load %arg2[%c0_13, %c4] : memref<1x16xf32, #tpu.memory_space<smem>>
      %38 = vector.broadcast %37 : f32 to vector<8x128xf32>
      %39 = arith.mulf %4, %38 : vector<8x128xf32>
      %c4_14 = arith.constant 4 : index
      %40 = memref.load %arg3[%c4_14] : memref<16xf32, #tpu.memory_space<smem>>
      %41 = vector.broadcast %40 : f32 to vector<8x128xf32>
      %42 = arith.addf %39, %41 : vector<8x128xf32>
      %cst_15 = arith.constant 0.000000e+00 : f32
      %43 = vector.broadcast %cst_15 : f32 to vector<8x128xf32>
      %44 = arith.maximumf %42, %43 : vector<8x128xf32>
      %c0_16 = arith.constant 0 : index
      %c5 = arith.constant 5 : index
      %45 = memref.load %arg2[%c0_16, %c5] : memref<1x16xf32, #tpu.memory_space<smem>>
      %46 = vector.broadcast %45 : f32 to vector<8x128xf32>
      %47 = arith.mulf %4, %46 : vector<8x128xf32>
      %c5_17 = arith.constant 5 : index
      %48 = memref.load %arg3[%c5_17] : memref<16xf32, #tpu.memory_space<smem>>
      %49 = vector.broadcast %48 : f32 to vector<8x128xf32>
      %50 = arith.addf %47, %49 : vector<8x128xf32>
      %cst_18 = arith.constant 0.000000e+00 : f32
      %51 = vector.broadcast %cst_18 : f32 to vector<8x128xf32>
      %52 = arith.maximumf %50, %51 : vector<8x128xf32>
      %c0_19 = arith.constant 0 : index
      %c6 = arith.constant 6 : index
      %53 = memref.load %arg2[%c0_19, %c6] : memref<1x16xf32, #tpu.memory_space<smem>>
      %54 = vector.broadcast %53 : f32 to vector<8x128xf32>
      %55 = arith.mulf %4, %54 : vector<8x128xf32>
      %c6_20 = arith.constant 6 : index
      %56 = memref.load %arg3[%c6_20] : memref<16xf32, #tpu.memory_space<smem>>
      %57 = vector.broadcast %56 : f32 to vector<8x128xf32>
      %58 = arith.addf %55, %57 : vector<8x128xf32>
      %cst_21 = arith.constant 0.000000e+00 : f32
      %59 = vector.broadcast %cst_21 : f32 to vector<8x128xf32>
      %60 = arith.maximumf %58, %59 : vector<8x128xf32>
      %c0_22 = arith.constant 0 : index
      %c7 = arith.constant 7 : index
      %61 = memref.load %arg2[%c0_22, %c7] : memref<1x16xf32, #tpu.memory_space<smem>>
      %62 = vector.broadcast %61 : f32 to vector<8x128xf32>
      %63 = arith.mulf %4, %62 : vector<8x128xf32>
      %c7_23 = arith.constant 7 : index
      %64 = memref.load %arg3[%c7_23] : memref<16xf32, #tpu.memory_space<smem>>
      %65 = vector.broadcast %64 : f32 to vector<8x128xf32>
      %66 = arith.addf %63, %65 : vector<8x128xf32>
      %cst_24 = arith.constant 0.000000e+00 : f32
      %67 = vector.broadcast %cst_24 : f32 to vector<8x128xf32>
      %68 = arith.maximumf %66, %67 : vector<8x128xf32>
      %c0_25 = arith.constant 0 : index
      %c8 = arith.constant 8 : index
      %69 = memref.load %arg2[%c0_25, %c8] : memref<1x16xf32, #tpu.memory_space<smem>>
      %70 = vector.broadcast %69 : f32 to vector<8x128xf32>
      %71 = arith.mulf %4, %70 : vector<8x128xf32>
      %c8_26 = arith.constant 8 : index
      %72 = memref.load %arg3[%c8_26] : memref<16xf32, #tpu.memory_space<smem>>
      %73 = vector.broadcast %72 : f32 to vector<8x128xf32>
      %74 = arith.addf %71, %73 : vector<8x128xf32>
      %cst_27 = arith.constant 0.000000e+00 : f32
      %75 = vector.broadcast %cst_27 : f32 to vector<8x128xf32>
      %76 = arith.maximumf %74, %75 : vector<8x128xf32>
      %c0_28 = arith.constant 0 : index
      %c9 = arith.constant 9 : index
      %77 = memref.load %arg2[%c0_28, %c9] : memref<1x16xf32, #tpu.memory_space<smem>>
      %78 = vector.broadcast %77 : f32 to vector<8x128xf32>
      %79 = arith.mulf %4, %78 : vector<8x128xf32>
      %c9_29 = arith.constant 9 : index
      %80 = memref.load %arg3[%c9_29] : memref<16xf32, #tpu.memory_space<smem>>
      %81 = vector.broadcast %80 : f32 to vector<8x128xf32>
      %82 = arith.addf %79, %81 : vector<8x128xf32>
      %cst_30 = arith.constant 0.000000e+00 : f32
      %83 = vector.broadcast %cst_30 : f32 to vector<8x128xf32>
      %84 = arith.maximumf %82, %83 : vector<8x128xf32>
      %c0_31 = arith.constant 0 : index
      %c10 = arith.constant 10 : index
      %85 = memref.load %arg2[%c0_31, %c10] : memref<1x16xf32, #tpu.memory_space<smem>>
      %86 = vector.broadcast %85 : f32 to vector<8x128xf32>
      %87 = arith.mulf %4, %86 : vector<8x128xf32>
      %c10_32 = arith.constant 10 : index
      %88 = memref.load %arg3[%c10_32] : memref<16xf32, #tpu.memory_space<smem>>
      %89 = vector.broadcast %88 : f32 to vector<8x128xf32>
      %90 = arith.addf %87, %89 : vector<8x128xf32>
      %cst_33 = arith.constant 0.000000e+00 : f32
      %91 = vector.broadcast %cst_33 : f32 to vector<8x128xf32>
      %92 = arith.maximumf %90, %91 : vector<8x128xf32>
      %c0_34 = arith.constant 0 : index
      %c11 = arith.constant 11 : index
      %93 = memref.load %arg2[%c0_34, %c11] : memref<1x16xf32, #tpu.memory_space<smem>>
      %94 = vector.broadcast %93 : f32 to vector<8x128xf32>
      %95 = arith.mulf %4, %94 : vector<8x128xf32>
      %c11_35 = arith.constant 11 : index
      %96 = memref.load %arg3[%c11_35] : memref<16xf32, #tpu.memory_space<smem>>
      %97 = vector.broadcast %96 : f32 to vector<8x128xf32>
      %98 = arith.addf %95, %97 : vector<8x128xf32>
      %cst_36 = arith.constant 0.000000e+00 : f32
      %99 = vector.broadcast %cst_36 : f32 to vector<8x128xf32>
      %100 = arith.maximumf %98, %99 : vector<8x128xf32>
      %c0_37 = arith.constant 0 : index
      %c12 = arith.constant 12 : index
      %101 = memref.load %arg2[%c0_37, %c12] : memref<1x16xf32, #tpu.memory_space<smem>>
      %102 = vector.broadcast %101 : f32 to vector<8x128xf32>
      %103 = arith.mulf %4, %102 : vector<8x128xf32>
      %c12_38 = arith.constant 12 : index
      %104 = memref.load %arg3[%c12_38] : memref<16xf32, #tpu.memory_space<smem>>
      %105 = vector.broadcast %104 : f32 to vector<8x128xf32>
      %106 = arith.addf %103, %105 : vector<8x128xf32>
      %cst_39 = arith.constant 0.000000e+00 : f32
      %107 = vector.broadcast %cst_39 : f32 to vector<8x128xf32>
      %108 = arith.maximumf %106, %107 : vector<8x128xf32>
      %c0_40 = arith.constant 0 : index
      %c13 = arith.constant 13 : index
      %109 = memref.load %arg2[%c0_40, %c13] : memref<1x16xf32, #tpu.memory_space<smem>>
      %110 = vector.broadcast %109 : f32 to vector<8x128xf32>
      %111 = arith.mulf %4, %110 : vector<8x128xf32>
      %c13_41 = arith.constant 13 : index
      %112 = memref.load %arg3[%c13_41] : memref<16xf32, #tpu.memory_space<smem>>
      %113 = vector.broadcast %112 : f32 to vector<8x128xf32>
      %114 = arith.addf %111, %113 : vector<8x128xf32>
      %cst_42 = arith.constant 0.000000e+00 : f32
      %115 = vector.broadcast %cst_42 : f32 to vector<8x128xf32>
      %116 = arith.maximumf %114, %115 : vector<8x128xf32>
      %c0_43 = arith.constant 0 : index
      %c14 = arith.constant 14 : index
      %117 = memref.load %arg2[%c0_43, %c14] : memref<1x16xf32, #tpu.memory_space<smem>>
      %118 = vector.broadcast %117 : f32 to vector<8x128xf32>
      %119 = arith.mulf %4, %118 : vector<8x128xf32>
      %c14_44 = arith.constant 14 : index
      %120 = memref.load %arg3[%c14_44] : memref<16xf32, #tpu.memory_space<smem>>
      %121 = vector.broadcast %120 : f32 to vector<8x128xf32>
      %122 = arith.addf %119, %121 : vector<8x128xf32>
      %cst_45 = arith.constant 0.000000e+00 : f32
      %123 = vector.broadcast %cst_45 : f32 to vector<8x128xf32>
      %124 = arith.maximumf %122, %123 : vector<8x128xf32>
      %c0_46 = arith.constant 0 : index
      %c15 = arith.constant 15 : index
      %125 = memref.load %arg2[%c0_46, %c15] : memref<1x16xf32, #tpu.memory_space<smem>>
      %126 = vector.broadcast %125 : f32 to vector<8x128xf32>
      %127 = arith.mulf %4, %126 : vector<8x128xf32>
      %c15_47 = arith.constant 15 : index
      %128 = memref.load %arg3[%c15_47] : memref<16xf32, #tpu.memory_space<smem>>
      %129 = vector.broadcast %128 : f32 to vector<8x128xf32>
      %130 = arith.addf %127, %129 : vector<8x128xf32>
      %cst_48 = arith.constant 0.000000e+00 : f32
      %131 = vector.broadcast %cst_48 : f32 to vector<8x128xf32>
      %132 = arith.maximumf %130, %131 : vector<8x128xf32>
      %c0_49 = arith.constant 0 : index
      %c0_50 = arith.constant 0 : index
      %133 = memref.load %arg4[%c0_49, %c0_50] : memref<16x16xf32, #tpu.memory_space<smem>>
      %134 = vector.broadcast %133 : f32 to vector<8x128xf32>
      %135 = arith.mulf %12, %134 : vector<8x128xf32>
      %c1_51 = arith.constant 1 : index
      %c0_52 = arith.constant 0 : index
      %136 = memref.load %arg4[%c1_51, %c0_52] : memref<16x16xf32, #tpu.memory_space<smem>>
      %137 = vector.broadcast %136 : f32 to vector<8x128xf32>
      %138 = arith.mulf %20, %137 : vector<8x128xf32>
      %139 = arith.addf %135, %138 : vector<8x128xf32>
      %c2_53 = arith.constant 2 : index
      %c0_54 = arith.constant 0 : index
      %140 = memref.load %arg4[%c2_53, %c0_54] : memref<16x16xf32, #tpu.memory_space<smem>>
      %141 = vector.broadcast %140 : f32 to vector<8x128xf32>
      %142 = arith.mulf %28, %141 : vector<8x128xf32>
      %143 = arith.addf %139, %142 : vector<8x128xf32>
      %c3_55 = arith.constant 3 : index
      %c0_56 = arith.constant 0 : index
      %144 = memref.load %arg4[%c3_55, %c0_56] : memref<16x16xf32, #tpu.memory_space<smem>>
      %145 = vector.broadcast %144 : f32 to vector<8x128xf32>
      %146 = arith.mulf %36, %145 : vector<8x128xf32>
      %147 = arith.addf %143, %146 : vector<8x128xf32>
      %c4_57 = arith.constant 4 : index
      %c0_58 = arith.constant 0 : index
      %148 = memref.load %arg4[%c4_57, %c0_58] : memref<16x16xf32, #tpu.memory_space<smem>>
      %149 = vector.broadcast %148 : f32 to vector<8x128xf32>
      %150 = arith.mulf %44, %149 : vector<8x128xf32>
      %151 = arith.addf %147, %150 : vector<8x128xf32>
      %c5_59 = arith.constant 5 : index
      %c0_60 = arith.constant 0 : index
      %152 = memref.load %arg4[%c5_59, %c0_60] : memref<16x16xf32, #tpu.memory_space<smem>>
      %153 = vector.broadcast %152 : f32 to vector<8x128xf32>
      %154 = arith.mulf %52, %153 : vector<8x128xf32>
      %155 = arith.addf %151, %154 : vector<8x128xf32>
      %c6_61 = arith.constant 6 : index
      %c0_62 = arith.constant 0 : index
      %156 = memref.load %arg4[%c6_61, %c0_62] : memref<16x16xf32, #tpu.memory_space<smem>>
      %157 = vector.broadcast %156 : f32 to vector<8x128xf32>
      %158 = arith.mulf %60, %157 : vector<8x128xf32>
      %159 = arith.addf %155, %158 : vector<8x128xf32>
      %c7_63 = arith.constant 7 : index
      %c0_64 = arith.constant 0 : index
      %160 = memref.load %arg4[%c7_63, %c0_64] : memref<16x16xf32, #tpu.memory_space<smem>>
      %161 = vector.broadcast %160 : f32 to vector<8x128xf32>
      %162 = arith.mulf %68, %161 : vector<8x128xf32>
      %163 = arith.addf %159, %162 : vector<8x128xf32>
      %c8_65 = arith.constant 8 : index
      %c0_66 = arith.constant 0 : index
      %164 = memref.load %arg4[%c8_65, %c0_66] : memref<16x16xf32, #tpu.memory_space<smem>>
      %165 = vector.broadcast %164 : f32 to vector<8x128xf32>
      %166 = arith.mulf %76, %165 : vector<8x128xf32>
      %167 = arith.addf %163, %166 : vector<8x128xf32>
      %c9_67 = arith.constant 9 : index
      %c0_68 = arith.constant 0 : index
      %168 = memref.load %arg4[%c9_67, %c0_68] : memref<16x16xf32, #tpu.memory_space<smem>>
      %169 = vector.broadcast %168 : f32 to vector<8x128xf32>
      %170 = arith.mulf %84, %169 : vector<8x128xf32>
      %171 = arith.addf %167, %170 : vector<8x128xf32>
      %c10_69 = arith.constant 10 : index
      %c0_70 = arith.constant 0 : index
      %172 = memref.load %arg4[%c10_69, %c0_70] : memref<16x16xf32, #tpu.memory_space<smem>>
      %173 = vector.broadcast %172 : f32 to vector<8x128xf32>
      %174 = arith.mulf %92, %173 : vector<8x128xf32>
      %175 = arith.addf %171, %174 : vector<8x128xf32>
      %c11_71 = arith.constant 11 : index
      %c0_72 = arith.constant 0 : index
      %176 = memref.load %arg4[%c11_71, %c0_72] : memref<16x16xf32, #tpu.memory_space<smem>>
      %177 = vector.broadcast %176 : f32 to vector<8x128xf32>
      %178 = arith.mulf %100, %177 : vector<8x128xf32>
      %179 = arith.addf %175, %178 : vector<8x128xf32>
      %c12_73 = arith.constant 12 : index
      %c0_74 = arith.constant 0 : index
      %180 = memref.load %arg4[%c12_73, %c0_74] : memref<16x16xf32, #tpu.memory_space<smem>>
      %181 = vector.broadcast %180 : f32 to vector<8x128xf32>
      %182 = arith.mulf %108, %181 : vector<8x128xf32>
      %183 = arith.addf %179, %182 : vector<8x128xf32>
      %c13_75 = arith.constant 13 : index
      %c0_76 = arith.constant 0 : index
      %184 = memref.load %arg4[%c13_75, %c0_76] : memref<16x16xf32, #tpu.memory_space<smem>>
      %185 = vector.broadcast %184 : f32 to vector<8x128xf32>
      %186 = arith.mulf %116, %185 : vector<8x128xf32>
      %187 = arith.addf %183, %186 : vector<8x128xf32>
      %c14_77 = arith.constant 14 : index
      %c0_78 = arith.constant 0 : index
      %188 = memref.load %arg4[%c14_77, %c0_78] : memref<16x16xf32, #tpu.memory_space<smem>>
      %189 = vector.broadcast %188 : f32 to vector<8x128xf32>
      %190 = arith.mulf %124, %189 : vector<8x128xf32>
      %191 = arith.addf %187, %190 : vector<8x128xf32>
      %c15_79 = arith.constant 15 : index
      %c0_80 = arith.constant 0 : index
      %192 = memref.load %arg4[%c15_79, %c0_80] : memref<16x16xf32, #tpu.memory_space<smem>>
      %193 = vector.broadcast %192 : f32 to vector<8x128xf32>
      %194 = arith.mulf %132, %193 : vector<8x128xf32>
      %195 = arith.addf %191, %194 : vector<8x128xf32>
      %c0_81 = arith.constant 0 : index
      %196 = memref.load %arg5[%c0_81] : memref<16xf32, #tpu.memory_space<smem>>
      %197 = vector.broadcast %196 : f32 to vector<8x128xf32>
      %198 = arith.addf %195, %197 : vector<8x128xf32>
      %cst_82 = arith.constant 0.000000e+00 : f32
      %199 = vector.broadcast %cst_82 : f32 to vector<8x128xf32>
      %200 = arith.maximumf %198, %199 : vector<8x128xf32>
      %c0_83 = arith.constant 0 : index
      %c1_84 = arith.constant 1 : index
      %201 = memref.load %arg4[%c0_83, %c1_84] : memref<16x16xf32, #tpu.memory_space<smem>>
      %202 = vector.broadcast %201 : f32 to vector<8x128xf32>
      %203 = arith.mulf %12, %202 : vector<8x128xf32>
      %c1_85 = arith.constant 1 : index
      %c1_86 = arith.constant 1 : index
      %204 = memref.load %arg4[%c1_85, %c1_86] : memref<16x16xf32, #tpu.memory_space<smem>>
      %205 = vector.broadcast %204 : f32 to vector<8x128xf32>
      %206 = arith.mulf %20, %205 : vector<8x128xf32>
      %207 = arith.addf %203, %206 : vector<8x128xf32>
      %c2_87 = arith.constant 2 : index
      %c1_88 = arith.constant 1 : index
      %208 = memref.load %arg4[%c2_87, %c1_88] : memref<16x16xf32, #tpu.memory_space<smem>>
      %209 = vector.broadcast %208 : f32 to vector<8x128xf32>
      %210 = arith.mulf %28, %209 : vector<8x128xf32>
      %211 = arith.addf %207, %210 : vector<8x128xf32>
      %c3_89 = arith.constant 3 : index
      %c1_90 = arith.constant 1 : index
      %212 = memref.load %arg4[%c3_89, %c1_90] : memref<16x16xf32, #tpu.memory_space<smem>>
      %213 = vector.broadcast %212 : f32 to vector<8x128xf32>
      %214 = arith.mulf %36, %213 : vector<8x128xf32>
      %215 = arith.addf %211, %214 : vector<8x128xf32>
      %c4_91 = arith.constant 4 : index
      %c1_92 = arith.constant 1 : index
      %216 = memref.load %arg4[%c4_91, %c1_92] : memref<16x16xf32, #tpu.memory_space<smem>>
      %217 = vector.broadcast %216 : f32 to vector<8x128xf32>
      %218 = arith.mulf %44, %217 : vector<8x128xf32>
      %219 = arith.addf %215, %218 : vector<8x128xf32>
      %c5_93 = arith.constant 5 : index
      %c1_94 = arith.constant 1 : index
      %220 = memref.load %arg4[%c5_93, %c1_94] : memref<16x16xf32, #tpu.memory_space<smem>>
      %221 = vector.broadcast %220 : f32 to vector<8x128xf32>
      %222 = arith.mulf %52, %221 : vector<8x128xf32>
      %223 = arith.addf %219, %222 : vector<8x128xf32>
      %c6_95 = arith.constant 6 : index
      %c1_96 = arith.constant 1 : index
      %224 = memref.load %arg4[%c6_95, %c1_96] : memref<16x16xf32, #tpu.memory_space<smem>>
      %225 = vector.broadcast %224 : f32 to vector<8x128xf32>
      %226 = arith.mulf %60, %225 : vector<8x128xf32>
      %227 = arith.addf %223, %226 : vector<8x128xf32>
      %c7_97 = arith.constant 7 : index
      %c1_98 = arith.constant 1 : index
      %228 = memref.load %arg4[%c7_97, %c1_98] : memref<16x16xf32, #tpu.memory_space<smem>>
      %229 = vector.broadcast %228 : f32 to vector<8x128xf32>
      %230 = arith.mulf %68, %229 : vector<8x128xf32>
      %231 = arith.addf %227, %230 : vector<8x128xf32>
      %c8_99 = arith.constant 8 : index
      %c1_100 = arith.constant 1 : index
      %232 = memref.load %arg4[%c8_99, %c1_100] : memref<16x16xf32, #tpu.memory_space<smem>>
      %233 = vector.broadcast %232 : f32 to vector<8x128xf32>
      %234 = arith.mulf %76, %233 : vector<8x128xf32>
      %235 = arith.addf %231, %234 : vector<8x128xf32>
      %c9_101 = arith.constant 9 : index
      %c1_102 = arith.constant 1 : index
      %236 = memref.load %arg4[%c9_101, %c1_102] : memref<16x16xf32, #tpu.memory_space<smem>>
      %237 = vector.broadcast %236 : f32 to vector<8x128xf32>
      %238 = arith.mulf %84, %237 : vector<8x128xf32>
      %239 = arith.addf %235, %238 : vector<8x128xf32>
      %c10_103 = arith.constant 10 : index
      %c1_104 = arith.constant 1 : index
      %240 = memref.load %arg4[%c10_103, %c1_104] : memref<16x16xf32, #tpu.memory_space<smem>>
      %241 = vector.broadcast %240 : f32 to vector<8x128xf32>
      %242 = arith.mulf %92, %241 : vector<8x128xf32>
      %243 = arith.addf %239, %242 : vector<8x128xf32>
      %c11_105 = arith.constant 11 : index
      %c1_106 = arith.constant 1 : index
      %244 = memref.load %arg4[%c11_105, %c1_106] : memref<16x16xf32, #tpu.memory_space<smem>>
      %245 = vector.broadcast %244 : f32 to vector<8x128xf32>
      %246 = arith.mulf %100, %245 : vector<8x128xf32>
      %247 = arith.addf %243, %246 : vector<8x128xf32>
      %c12_107 = arith.constant 12 : index
      %c1_108 = arith.constant 1 : index
      %248 = memref.load %arg4[%c12_107, %c1_108] : memref<16x16xf32, #tpu.memory_space<smem>>
      %249 = vector.broadcast %248 : f32 to vector<8x128xf32>
      %250 = arith.mulf %108, %249 : vector<8x128xf32>
      %251 = arith.addf %247, %250 : vector<8x128xf32>
      %c13_109 = arith.constant 13 : index
      %c1_110 = arith.constant 1 : index
      %252 = memref.load %arg4[%c13_109, %c1_110] : memref<16x16xf32, #tpu.memory_space<smem>>
      %253 = vector.broadcast %252 : f32 to vector<8x128xf32>
      %254 = arith.mulf %116, %253 : vector<8x128xf32>
      %255 = arith.addf %251, %254 : vector<8x128xf32>
      %c14_111 = arith.constant 14 : index
      %c1_112 = arith.constant 1 : index
      %256 = memref.load %arg4[%c14_111, %c1_112] : memref<16x16xf32, #tpu.memory_space<smem>>
      %257 = vector.broadcast %256 : f32 to vector<8x128xf32>
      %258 = arith.mulf %124, %257 : vector<8x128xf32>
      %259 = arith.addf %255, %258 : vector<8x128xf32>
      %c15_113 = arith.constant 15 : index
      %c1_114 = arith.constant 1 : index
      %260 = memref.load %arg4[%c15_113, %c1_114] : memref<16x16xf32, #tpu.memory_space<smem>>
      %261 = vector.broadcast %260 : f32 to vector<8x128xf32>
      %262 = arith.mulf %132, %261 : vector<8x128xf32>
      %263 = arith.addf %259, %262 : vector<8x128xf32>
      %c1_115 = arith.constant 1 : index
      %264 = memref.load %arg5[%c1_115] : memref<16xf32, #tpu.memory_space<smem>>
      %265 = vector.broadcast %264 : f32 to vector<8x128xf32>
      %266 = arith.addf %263, %265 : vector<8x128xf32>
      %cst_116 = arith.constant 0.000000e+00 : f32
      %267 = vector.broadcast %cst_116 : f32 to vector<8x128xf32>
      %268 = arith.maximumf %266, %267 : vector<8x128xf32>
      %c0_117 = arith.constant 0 : index
      %c2_118 = arith.constant 2 : index
      %269 = memref.load %arg4[%c0_117, %c2_118] : memref<16x16xf32, #tpu.memory_space<smem>>
      %270 = vector.broadcast %269 : f32 to vector<8x128xf32>
      %271 = arith.mulf %12, %270 : vector<8x128xf32>
      %c1_119 = arith.constant 1 : index
      %c2_120 = arith.constant 2 : index
      %272 = memref.load %arg4[%c1_119, %c2_120] : memref<16x16xf32, #tpu.memory_space<smem>>
      %273 = vector.broadcast %272 : f32 to vector<8x128xf32>
      %274 = arith.mulf %20, %273 : vector<8x128xf32>
      %275 = arith.addf %271, %274 : vector<8x128xf32>
      %c2_121 = arith.constant 2 : index
      %c2_122 = arith.constant 2 : index
      %276 = memref.load %arg4[%c2_121, %c2_122] : memref<16x16xf32, #tpu.memory_space<smem>>
      %277 = vector.broadcast %276 : f32 to vector<8x128xf32>
      %278 = arith.mulf %28, %277 : vector<8x128xf32>
      %279 = arith.addf %275, %278 : vector<8x128xf32>
      %c3_123 = arith.constant 3 : index
      %c2_124 = arith.constant 2 : index
      %280 = memref.load %arg4[%c3_123, %c2_124] : memref<16x16xf32, #tpu.memory_space<smem>>
      %281 = vector.broadcast %280 : f32 to vector<8x128xf32>
      %282 = arith.mulf %36, %281 : vector<8x128xf32>
      %283 = arith.addf %279, %282 : vector<8x128xf32>
      %c4_125 = arith.constant 4 : index
      %c2_126 = arith.constant 2 : index
      %284 = memref.load %arg4[%c4_125, %c2_126] : memref<16x16xf32, #tpu.memory_space<smem>>
      %285 = vector.broadcast %284 : f32 to vector<8x128xf32>
      %286 = arith.mulf %44, %285 : vector<8x128xf32>
      %287 = arith.addf %283, %286 : vector<8x128xf32>
      %c5_127 = arith.constant 5 : index
      %c2_128 = arith.constant 2 : index
      %288 = memref.load %arg4[%c5_127, %c2_128] : memref<16x16xf32, #tpu.memory_space<smem>>
      %289 = vector.broadcast %288 : f32 to vector<8x128xf32>
      %290 = arith.mulf %52, %289 : vector<8x128xf32>
      %291 = arith.addf %287, %290 : vector<8x128xf32>
      %c6_129 = arith.constant 6 : index
      %c2_130 = arith.constant 2 : index
      %292 = memref.load %arg4[%c6_129, %c2_130] : memref<16x16xf32, #tpu.memory_space<smem>>
      %293 = vector.broadcast %292 : f32 to vector<8x128xf32>
      %294 = arith.mulf %60, %293 : vector<8x128xf32>
      %295 = arith.addf %291, %294 : vector<8x128xf32>
      %c7_131 = arith.constant 7 : index
      %c2_132 = arith.constant 2 : index
      %296 = memref.load %arg4[%c7_131, %c2_132] : memref<16x16xf32, #tpu.memory_space<smem>>
      %297 = vector.broadcast %296 : f32 to vector<8x128xf32>
      %298 = arith.mulf %68, %297 : vector<8x128xf32>
      %299 = arith.addf %295, %298 : vector<8x128xf32>
      %c8_133 = arith.constant 8 : index
      %c2_134 = arith.constant 2 : index
      %300 = memref.load %arg4[%c8_133, %c2_134] : memref<16x16xf32, #tpu.memory_space<smem>>
      %301 = vector.broadcast %300 : f32 to vector<8x128xf32>
      %302 = arith.mulf %76, %301 : vector<8x128xf32>
      %303 = arith.addf %299, %302 : vector<8x128xf32>
      %c9_135 = arith.constant 9 : index
      %c2_136 = arith.constant 2 : index
      %304 = memref.load %arg4[%c9_135, %c2_136] : memref<16x16xf32, #tpu.memory_space<smem>>
      %305 = vector.broadcast %304 : f32 to vector<8x128xf32>
      %306 = arith.mulf %84, %305 : vector<8x128xf32>
      %307 = arith.addf %303, %306 : vector<8x128xf32>
      %c10_137 = arith.constant 10 : index
      %c2_138 = arith.constant 2 : index
      %308 = memref.load %arg4[%c10_137, %c2_138] : memref<16x16xf32, #tpu.memory_space<smem>>
      %309 = vector.broadcast %308 : f32 to vector<8x128xf32>
      %310 = arith.mulf %92, %309 : vector<8x128xf32>
      %311 = arith.addf %307, %310 : vector<8x128xf32>
      %c11_139 = arith.constant 11 : index
      %c2_140 = arith.constant 2 : index
      %312 = memref.load %arg4[%c11_139, %c2_140] : memref<16x16xf32, #tpu.memory_space<smem>>
      %313 = vector.broadcast %312 : f32 to vector<8x128xf32>
      %314 = arith.mulf %100, %313 : vector<8x128xf32>
      %315 = arith.addf %311, %314 : vector<8x128xf32>
      %c12_141 = arith.constant 12 : index
      %c2_142 = arith.constant 2 : index
      %316 = memref.load %arg4[%c12_141, %c2_142] : memref<16x16xf32, #tpu.memory_space<smem>>
      %317 = vector.broadcast %316 : f32 to vector<8x128xf32>
      %318 = arith.mulf %108, %317 : vector<8x128xf32>
      %319 = arith.addf %315, %318 : vector<8x128xf32>
      %c13_143 = arith.constant 13 : index
      %c2_144 = arith.constant 2 : index
      %320 = memref.load %arg4[%c13_143, %c2_144] : memref<16x16xf32, #tpu.memory_space<smem>>
      %321 = vector.broadcast %320 : f32 to vector<8x128xf32>
      %322 = arith.mulf %116, %321 : vector<8x128xf32>
      %323 = arith.addf %319, %322 : vector<8x128xf32>
      %c14_145 = arith.constant 14 : index
      %c2_146 = arith.constant 2 : index
      %324 = memref.load %arg4[%c14_145, %c2_146] : memref<16x16xf32, #tpu.memory_space<smem>>
      %325 = vector.broadcast %324 : f32 to vector<8x128xf32>
      %326 = arith.mulf %124, %325 : vector<8x128xf32>
      %327 = arith.addf %323, %326 : vector<8x128xf32>
      %c15_147 = arith.constant 15 : index
      %c2_148 = arith.constant 2 : index
      %328 = memref.load %arg4[%c15_147, %c2_148] : memref<16x16xf32, #tpu.memory_space<smem>>
      %329 = vector.broadcast %328 : f32 to vector<8x128xf32>
      %330 = arith.mulf %132, %329 : vector<8x128xf32>
      %331 = arith.addf %327, %330 : vector<8x128xf32>
      %c2_149 = arith.constant 2 : index
      %332 = memref.load %arg5[%c2_149] : memref<16xf32, #tpu.memory_space<smem>>
      %333 = vector.broadcast %332 : f32 to vector<8x128xf32>
      %334 = arith.addf %331, %333 : vector<8x128xf32>
      %cst_150 = arith.constant 0.000000e+00 : f32
      %335 = vector.broadcast %cst_150 : f32 to vector<8x128xf32>
      %336 = arith.maximumf %334, %335 : vector<8x128xf32>
      %c0_151 = arith.constant 0 : index
      %c3_152 = arith.constant 3 : index
      %337 = memref.load %arg4[%c0_151, %c3_152] : memref<16x16xf32, #tpu.memory_space<smem>>
      %338 = vector.broadcast %337 : f32 to vector<8x128xf32>
      %339 = arith.mulf %12, %338 : vector<8x128xf32>
      %c1_153 = arith.constant 1 : index
      %c3_154 = arith.constant 3 : index
      %340 = memref.load %arg4[%c1_153, %c3_154] : memref<16x16xf32, #tpu.memory_space<smem>>
      %341 = vector.broadcast %340 : f32 to vector<8x128xf32>
      %342 = arith.mulf %20, %341 : vector<8x128xf32>
      %343 = arith.addf %339, %342 : vector<8x128xf32>
      %c2_155 = arith.constant 2 : index
      %c3_156 = arith.constant 3 : index
      %344 = memref.load %arg4[%c2_155, %c3_156] : memref<16x16xf32, #tpu.memory_space<smem>>
      %345 = vector.broadcast %344 : f32 to vector<8x128xf32>
      %346 = arith.mulf %28, %345 : vector<8x128xf32>
      %347 = arith.addf %343, %346 : vector<8x128xf32>
      %c3_157 = arith.constant 3 : index
      %c3_158 = arith.constant 3 : index
      %348 = memref.load %arg4[%c3_157, %c3_158] : memref<16x16xf32, #tpu.memory_space<smem>>
      %349 = vector.broadcast %348 : f32 to vector<8x128xf32>
      %350 = arith.mulf %36, %349 : vector<8x128xf32>
      %351 = arith.addf %347, %350 : vector<8x128xf32>
      %c4_159 = arith.constant 4 : index
      %c3_160 = arith.constant 3 : index
      %352 = memref.load %arg4[%c4_159, %c3_160] : memref<16x16xf32, #tpu.memory_space<smem>>
      %353 = vector.broadcast %352 : f32 to vector<8x128xf32>
      %354 = arith.mulf %44, %353 : vector<8x128xf32>
      %355 = arith.addf %351, %354 : vector<8x128xf32>
      %c5_161 = arith.constant 5 : index
      %c3_162 = arith.constant 3 : index
      %356 = memref.load %arg4[%c5_161, %c3_162] : memref<16x16xf32, #tpu.memory_space<smem>>
      %357 = vector.broadcast %356 : f32 to vector<8x128xf32>
      %358 = arith.mulf %52, %357 : vector<8x128xf32>
      %359 = arith.addf %355, %358 : vector<8x128xf32>
      %c6_163 = arith.constant 6 : index
      %c3_164 = arith.constant 3 : index
      %360 = memref.load %arg4[%c6_163, %c3_164] : memref<16x16xf32, #tpu.memory_space<smem>>
      %361 = vector.broadcast %360 : f32 to vector<8x128xf32>
      %362 = arith.mulf %60, %361 : vector<8x128xf32>
      %363 = arith.addf %359, %362 : vector<8x128xf32>
      %c7_165 = arith.constant 7 : index
      %c3_166 = arith.constant 3 : index
      %364 = memref.load %arg4[%c7_165, %c3_166] : memref<16x16xf32, #tpu.memory_space<smem>>
      %365 = vector.broadcast %364 : f32 to vector<8x128xf32>
      %366 = arith.mulf %68, %365 : vector<8x128xf32>
      %367 = arith.addf %363, %366 : vector<8x128xf32>
      %c8_167 = arith.constant 8 : index
      %c3_168 = arith.constant 3 : index
      %368 = memref.load %arg4[%c8_167, %c3_168] : memref<16x16xf32, #tpu.memory_space<smem>>
      %369 = vector.broadcast %368 : f32 to vector<8x128xf32>
      %370 = arith.mulf %76, %369 : vector<8x128xf32>
      %371 = arith.addf %367, %370 : vector<8x128xf32>
      %c9_169 = arith.constant 9 : index
      %c3_170 = arith.constant 3 : index
      %372 = memref.load %arg4[%c9_169, %c3_170] : memref<16x16xf32, #tpu.memory_space<smem>>
      %373 = vector.broadcast %372 : f32 to vector<8x128xf32>
      %374 = arith.mulf %84, %373 : vector<8x128xf32>
      %375 = arith.addf %371, %374 : vector<8x128xf32>
      %c10_171 = arith.constant 10 : index
      %c3_172 = arith.constant 3 : index
      %376 = memref.load %arg4[%c10_171, %c3_172] : memref<16x16xf32, #tpu.memory_space<smem>>
      %377 = vector.broadcast %376 : f32 to vector<8x128xf32>
      %378 = arith.mulf %92, %377 : vector<8x128xf32>
      %379 = arith.addf %375, %378 : vector<8x128xf32>
      %c11_173 = arith.constant 11 : index
      %c3_174 = arith.constant 3 : index
      %380 = memref.load %arg4[%c11_173, %c3_174] : memref<16x16xf32, #tpu.memory_space<smem>>
      %381 = vector.broadcast %380 : f32 to vector<8x128xf32>
      %382 = arith.mulf %100, %381 : vector<8x128xf32>
      %383 = arith.addf %379, %382 : vector<8x128xf32>
      %c12_175 = arith.constant 12 : index
      %c3_176 = arith.constant 3 : index
      %384 = memref.load %arg4[%c12_175, %c3_176] : memref<16x16xf32, #tpu.memory_space<smem>>
      %385 = vector.broadcast %384 : f32 to vector<8x128xf32>
      %386 = arith.mulf %108, %385 : vector<8x128xf32>
      %387 = arith.addf %383, %386 : vector<8x128xf32>
      %c13_177 = arith.constant 13 : index
      %c3_178 = arith.constant 3 : index
      %388 = memref.load %arg4[%c13_177, %c3_178] : memref<16x16xf32, #tpu.memory_space<smem>>
      %389 = vector.broadcast %388 : f32 to vector<8x128xf32>
      %390 = arith.mulf %116, %389 : vector<8x128xf32>
      %391 = arith.addf %387, %390 : vector<8x128xf32>
      %c14_179 = arith.constant 14 : index
      %c3_180 = arith.constant 3 : index
      %392 = memref.load %arg4[%c14_179, %c3_180] : memref<16x16xf32, #tpu.memory_space<smem>>
      %393 = vector.broadcast %392 : f32 to vector<8x128xf32>
      %394 = arith.mulf %124, %393 : vector<8x128xf32>
      %395 = arith.addf %391, %394 : vector<8x128xf32>
      %c15_181 = arith.constant 15 : index
      %c3_182 = arith.constant 3 : index
      %396 = memref.load %arg4[%c15_181, %c3_182] : memref<16x16xf32, #tpu.memory_space<smem>>
      %397 = vector.broadcast %396 : f32 to vector<8x128xf32>
      %398 = arith.mulf %132, %397 : vector<8x128xf32>
      %399 = arith.addf %395, %398 : vector<8x128xf32>
      %c3_183 = arith.constant 3 : index
      %400 = memref.load %arg5[%c3_183] : memref<16xf32, #tpu.memory_space<smem>>
      %401 = vector.broadcast %400 : f32 to vector<8x128xf32>
      %402 = arith.addf %399, %401 : vector<8x128xf32>
      %cst_184 = arith.constant 0.000000e+00 : f32
      %403 = vector.broadcast %cst_184 : f32 to vector<8x128xf32>
      %404 = arith.maximumf %402, %403 : vector<8x128xf32>
      %c0_185 = arith.constant 0 : index
      %c4_186 = arith.constant 4 : index
      %405 = memref.load %arg4[%c0_185, %c4_186] : memref<16x16xf32, #tpu.memory_space<smem>>
      %406 = vector.broadcast %405 : f32 to vector<8x128xf32>
      %407 = arith.mulf %12, %406 : vector<8x128xf32>
      %c1_187 = arith.constant 1 : index
      %c4_188 = arith.constant 4 : index
      %408 = memref.load %arg4[%c1_187, %c4_188] : memref<16x16xf32, #tpu.memory_space<smem>>
      %409 = vector.broadcast %408 : f32 to vector<8x128xf32>
      %410 = arith.mulf %20, %409 : vector<8x128xf32>
      %411 = arith.addf %407, %410 : vector<8x128xf32>
      %c2_189 = arith.constant 2 : index
      %c4_190 = arith.constant 4 : index
      %412 = memref.load %arg4[%c2_189, %c4_190] : memref<16x16xf32, #tpu.memory_space<smem>>
      %413 = vector.broadcast %412 : f32 to vector<8x128xf32>
      %414 = arith.mulf %28, %413 : vector<8x128xf32>
      %415 = arith.addf %411, %414 : vector<8x128xf32>
      %c3_191 = arith.constant 3 : index
      %c4_192 = arith.constant 4 : index
      %416 = memref.load %arg4[%c3_191, %c4_192] : memref<16x16xf32, #tpu.memory_space<smem>>
      %417 = vector.broadcast %416 : f32 to vector<8x128xf32>
      %418 = arith.mulf %36, %417 : vector<8x128xf32>
      %419 = arith.addf %415, %418 : vector<8x128xf32>
      %c4_193 = arith.constant 4 : index
      %c4_194 = arith.constant 4 : index
      %420 = memref.load %arg4[%c4_193, %c4_194] : memref<16x16xf32, #tpu.memory_space<smem>>
      %421 = vector.broadcast %420 : f32 to vector<8x128xf32>
      %422 = arith.mulf %44, %421 : vector<8x128xf32>
      %423 = arith.addf %419, %422 : vector<8x128xf32>
      %c5_195 = arith.constant 5 : index
      %c4_196 = arith.constant 4 : index
      %424 = memref.load %arg4[%c5_195, %c4_196] : memref<16x16xf32, #tpu.memory_space<smem>>
      %425 = vector.broadcast %424 : f32 to vector<8x128xf32>
      %426 = arith.mulf %52, %425 : vector<8x128xf32>
      %427 = arith.addf %423, %426 : vector<8x128xf32>
      %c6_197 = arith.constant 6 : index
      %c4_198 = arith.constant 4 : index
      %428 = memref.load %arg4[%c6_197, %c4_198] : memref<16x16xf32, #tpu.memory_space<smem>>
      %429 = vector.broadcast %428 : f32 to vector<8x128xf32>
      %430 = arith.mulf %60, %429 : vector<8x128xf32>
      %431 = arith.addf %427, %430 : vector<8x128xf32>
      %c7_199 = arith.constant 7 : index
      %c4_200 = arith.constant 4 : index
      %432 = memref.load %arg4[%c7_199, %c4_200] : memref<16x16xf32, #tpu.memory_space<smem>>
      %433 = vector.broadcast %432 : f32 to vector<8x128xf32>
      %434 = arith.mulf %68, %433 : vector<8x128xf32>
      %435 = arith.addf %431, %434 : vector<8x128xf32>
      %c8_201 = arith.constant 8 : index
      %c4_202 = arith.constant 4 : index
      %436 = memref.load %arg4[%c8_201, %c4_202] : memref<16x16xf32, #tpu.memory_space<smem>>
      %437 = vector.broadcast %436 : f32 to vector<8x128xf32>
      %438 = arith.mulf %76, %437 : vector<8x128xf32>
      %439 = arith.addf %435, %438 : vector<8x128xf32>
      %c9_203 = arith.constant 9 : index
      %c4_204 = arith.constant 4 : index
      %440 = memref.load %arg4[%c9_203, %c4_204] : memref<16x16xf32, #tpu.memory_space<smem>>
      %441 = vector.broadcast %440 : f32 to vector<8x128xf32>
      %442 = arith.mulf %84, %441 : vector<8x128xf32>
      %443 = arith.addf %439, %442 : vector<8x128xf32>
      %c10_205 = arith.constant 10 : index
      %c4_206 = arith.constant 4 : index
      %444 = memref.load %arg4[%c10_205, %c4_206] : memref<16x16xf32, #tpu.memory_space<smem>>
      %445 = vector.broadcast %444 : f32 to vector<8x128xf32>
      %446 = arith.mulf %92, %445 : vector<8x128xf32>
      %447 = arith.addf %443, %446 : vector<8x128xf32>
      %c11_207 = arith.constant 11 : index
      %c4_208 = arith.constant 4 : index
      %448 = memref.load %arg4[%c11_207, %c4_208] : memref<16x16xf32, #tpu.memory_space<smem>>
      %449 = vector.broadcast %448 : f32 to vector<8x128xf32>
      %450 = arith.mulf %100, %449 : vector<8x128xf32>
      %451 = arith.addf %447, %450 : vector<8x128xf32>
      %c12_209 = arith.constant 12 : index
      %c4_210 = arith.constant 4 : index
      %452 = memref.load %arg4[%c12_209, %c4_210] : memref<16x16xf32, #tpu.memory_space<smem>>
      %453 = vector.broadcast %452 : f32 to vector<8x128xf32>
      %454 = arith.mulf %108, %453 : vector<8x128xf32>
      %455 = arith.addf %451, %454 : vector<8x128xf32>
      %c13_211 = arith.constant 13 : index
      %c4_212 = arith.constant 4 : index
      %456 = memref.load %arg4[%c13_211, %c4_212] : memref<16x16xf32, #tpu.memory_space<smem>>
      %457 = vector.broadcast %456 : f32 to vector<8x128xf32>
      %458 = arith.mulf %116, %457 : vector<8x128xf32>
      %459 = arith.addf %455, %458 : vector<8x128xf32>
      %c14_213 = arith.constant 14 : index
      %c4_214 = arith.constant 4 : index
      %460 = memref.load %arg4[%c14_213, %c4_214] : memref<16x16xf32, #tpu.memory_space<smem>>
      %461 = vector.broadcast %460 : f32 to vector<8x128xf32>
      %462 = arith.mulf %124, %461 : vector<8x128xf32>
      %463 = arith.addf %459, %462 : vector<8x128xf32>
      %c15_215 = arith.constant 15 : index
      %c4_216 = arith.constant 4 : index
      %464 = memref.load %arg4[%c15_215, %c4_216] : memref<16x16xf32, #tpu.memory_space<smem>>
      %465 = vector.broadcast %464 : f32 to vector<8x128xf32>
      %466 = arith.mulf %132, %465 : vector<8x128xf32>
      %467 = arith.addf %463, %466 : vector<8x128xf32>
      %c4_217 = arith.constant 4 : index
      %468 = memref.load %arg5[%c4_217] : memref<16xf32, #tpu.memory_space<smem>>
      %469 = vector.broadcast %468 : f32 to vector<8x128xf32>
      %470 = arith.addf %467, %469 : vector<8x128xf32>
      %cst_218 = arith.constant 0.000000e+00 : f32
      %471 = vector.broadcast %cst_218 : f32 to vector<8x128xf32>
      %472 = arith.maximumf %470, %471 : vector<8x128xf32>
      %c0_219 = arith.constant 0 : index
      %c5_220 = arith.constant 5 : index
      %473 = memref.load %arg4[%c0_219, %c5_220] : memref<16x16xf32, #tpu.memory_space<smem>>
      %474 = vector.broadcast %473 : f32 to vector<8x128xf32>
      %475 = arith.mulf %12, %474 : vector<8x128xf32>
      %c1_221 = arith.constant 1 : index
      %c5_222 = arith.constant 5 : index
      %476 = memref.load %arg4[%c1_221, %c5_222] : memref<16x16xf32, #tpu.memory_space<smem>>
      %477 = vector.broadcast %476 : f32 to vector<8x128xf32>
      %478 = arith.mulf %20, %477 : vector<8x128xf32>
      %479 = arith.addf %475, %478 : vector<8x128xf32>
      %c2_223 = arith.constant 2 : index
      %c5_224 = arith.constant 5 : index
      %480 = memref.load %arg4[%c2_223, %c5_224] : memref<16x16xf32, #tpu.memory_space<smem>>
      %481 = vector.broadcast %480 : f32 to vector<8x128xf32>
      %482 = arith.mulf %28, %481 : vector<8x128xf32>
      %483 = arith.addf %479, %482 : vector<8x128xf32>
      %c3_225 = arith.constant 3 : index
      %c5_226 = arith.constant 5 : index
      %484 = memref.load %arg4[%c3_225, %c5_226] : memref<16x16xf32, #tpu.memory_space<smem>>
      %485 = vector.broadcast %484 : f32 to vector<8x128xf32>
      %486 = arith.mulf %36, %485 : vector<8x128xf32>
      %487 = arith.addf %483, %486 : vector<8x128xf32>
      %c4_227 = arith.constant 4 : index
      %c5_228 = arith.constant 5 : index
      %488 = memref.load %arg4[%c4_227, %c5_228] : memref<16x16xf32, #tpu.memory_space<smem>>
      %489 = vector.broadcast %488 : f32 to vector<8x128xf32>
      %490 = arith.mulf %44, %489 : vector<8x128xf32>
      %491 = arith.addf %487, %490 : vector<8x128xf32>
      %c5_229 = arith.constant 5 : index
      %c5_230 = arith.constant 5 : index
      %492 = memref.load %arg4[%c5_229, %c5_230] : memref<16x16xf32, #tpu.memory_space<smem>>
      %493 = vector.broadcast %492 : f32 to vector<8x128xf32>
      %494 = arith.mulf %52, %493 : vector<8x128xf32>
      %495 = arith.addf %491, %494 : vector<8x128xf32>
      %c6_231 = arith.constant 6 : index
      %c5_232 = arith.constant 5 : index
      %496 = memref.load %arg4[%c6_231, %c5_232] : memref<16x16xf32, #tpu.memory_space<smem>>
      %497 = vector.broadcast %496 : f32 to vector<8x128xf32>
      %498 = arith.mulf %60, %497 : vector<8x128xf32>
      %499 = arith.addf %495, %498 : vector<8x128xf32>
      %c7_233 = arith.constant 7 : index
      %c5_234 = arith.constant 5 : index
      %500 = memref.load %arg4[%c7_233, %c5_234] : memref<16x16xf32, #tpu.memory_space<smem>>
      %501 = vector.broadcast %500 : f32 to vector<8x128xf32>
      %502 = arith.mulf %68, %501 : vector<8x128xf32>
      %503 = arith.addf %499, %502 : vector<8x128xf32>
      %c8_235 = arith.constant 8 : index
      %c5_236 = arith.constant 5 : index
      %504 = memref.load %arg4[%c8_235, %c5_236] : memref<16x16xf32, #tpu.memory_space<smem>>
      %505 = vector.broadcast %504 : f32 to vector<8x128xf32>
      %506 = arith.mulf %76, %505 : vector<8x128xf32>
      %507 = arith.addf %503, %506 : vector<8x128xf32>
      %c9_237 = arith.constant 9 : index
      %c5_238 = arith.constant 5 : index
      %508 = memref.load %arg4[%c9_237, %c5_238] : memref<16x16xf32, #tpu.memory_space<smem>>
      %509 = vector.broadcast %508 : f32 to vector<8x128xf32>
      %510 = arith.mulf %84, %509 : vector<8x128xf32>
      %511 = arith.addf %507, %510 : vector<8x128xf32>
      %c10_239 = arith.constant 10 : index
      %c5_240 = arith.constant 5 : index
      %512 = memref.load %arg4[%c10_239, %c5_240] : memref<16x16xf32, #tpu.memory_space<smem>>
      %513 = vector.broadcast %512 : f32 to vector<8x128xf32>
      %514 = arith.mulf %92, %513 : vector<8x128xf32>
      %515 = arith.addf %511, %514 : vector<8x128xf32>
      %c11_241 = arith.constant 11 : index
      %c5_242 = arith.constant 5 : index
      %516 = memref.load %arg4[%c11_241, %c5_242] : memref<16x16xf32, #tpu.memory_space<smem>>
      %517 = vector.broadcast %516 : f32 to vector<8x128xf32>
      %518 = arith.mulf %100, %517 : vector<8x128xf32>
      %519 = arith.addf %515, %518 : vector<8x128xf32>
      %c12_243 = arith.constant 12 : index
      %c5_244 = arith.constant 5 : index
      %520 = memref.load %arg4[%c12_243, %c5_244] : memref<16x16xf32, #tpu.memory_space<smem>>
      %521 = vector.broadcast %520 : f32 to vector<8x128xf32>
      %522 = arith.mulf %108, %521 : vector<8x128xf32>
      %523 = arith.addf %519, %522 : vector<8x128xf32>
      %c13_245 = arith.constant 13 : index
      %c5_246 = arith.constant 5 : index
      %524 = memref.load %arg4[%c13_245, %c5_246] : memref<16x16xf32, #tpu.memory_space<smem>>
      %525 = vector.broadcast %524 : f32 to vector<8x128xf32>
      %526 = arith.mulf %116, %525 : vector<8x128xf32>
      %527 = arith.addf %523, %526 : vector<8x128xf32>
      %c14_247 = arith.constant 14 : index
      %c5_248 = arith.constant 5 : index
      %528 = memref.load %arg4[%c14_247, %c5_248] : memref<16x16xf32, #tpu.memory_space<smem>>
      %529 = vector.broadcast %528 : f32 to vector<8x128xf32>
      %530 = arith.mulf %124, %529 : vector<8x128xf32>
      %531 = arith.addf %527, %530 : vector<8x128xf32>
      %c15_249 = arith.constant 15 : index
      %c5_250 = arith.constant 5 : index
      %532 = memref.load %arg4[%c15_249, %c5_250] : memref<16x16xf32, #tpu.memory_space<smem>>
      %533 = vector.broadcast %532 : f32 to vector<8x128xf32>
      %534 = arith.mulf %132, %533 : vector<8x128xf32>
      %535 = arith.addf %531, %534 : vector<8x128xf32>
      %c5_251 = arith.constant 5 : index
      %536 = memref.load %arg5[%c5_251] : memref<16xf32, #tpu.memory_space<smem>>
      %537 = vector.broadcast %536 : f32 to vector<8x128xf32>
      %538 = arith.addf %535, %537 : vector<8x128xf32>
      %cst_252 = arith.constant 0.000000e+00 : f32
      %539 = vector.broadcast %cst_252 : f32 to vector<8x128xf32>
      %540 = arith.maximumf %538, %539 : vector<8x128xf32>
      %c0_253 = arith.constant 0 : index
      %c6_254 = arith.constant 6 : index
      %541 = memref.load %arg4[%c0_253, %c6_254] : memref<16x16xf32, #tpu.memory_space<smem>>
      %542 = vector.broadcast %541 : f32 to vector<8x128xf32>
      %543 = arith.mulf %12, %542 : vector<8x128xf32>
      %c1_255 = arith.constant 1 : index
      %c6_256 = arith.constant 6 : index
      %544 = memref.load %arg4[%c1_255, %c6_256] : memref<16x16xf32, #tpu.memory_space<smem>>
      %545 = vector.broadcast %544 : f32 to vector<8x128xf32>
      %546 = arith.mulf %20, %545 : vector<8x128xf32>
      %547 = arith.addf %543, %546 : vector<8x128xf32>
      %c2_257 = arith.constant 2 : index
      %c6_258 = arith.constant 6 : index
      %548 = memref.load %arg4[%c2_257, %c6_258] : memref<16x16xf32, #tpu.memory_space<smem>>
      %549 = vector.broadcast %548 : f32 to vector<8x128xf32>
      %550 = arith.mulf %28, %549 : vector<8x128xf32>
      %551 = arith.addf %547, %550 : vector<8x128xf32>
      %c3_259 = arith.constant 3 : index
      %c6_260 = arith.constant 6 : index
      %552 = memref.load %arg4[%c3_259, %c6_260] : memref<16x16xf32, #tpu.memory_space<smem>>
      %553 = vector.broadcast %552 : f32 to vector<8x128xf32>
      %554 = arith.mulf %36, %553 : vector<8x128xf32>
      %555 = arith.addf %551, %554 : vector<8x128xf32>
      %c4_261 = arith.constant 4 : index
      %c6_262 = arith.constant 6 : index
      %556 = memref.load %arg4[%c4_261, %c6_262] : memref<16x16xf32, #tpu.memory_space<smem>>
      %557 = vector.broadcast %556 : f32 to vector<8x128xf32>
      %558 = arith.mulf %44, %557 : vector<8x128xf32>
      %559 = arith.addf %555, %558 : vector<8x128xf32>
      %c5_263 = arith.constant 5 : index
      %c6_264 = arith.constant 6 : index
      %560 = memref.load %arg4[%c5_263, %c6_264] : memref<16x16xf32, #tpu.memory_space<smem>>
      %561 = vector.broadcast %560 : f32 to vector<8x128xf32>
      %562 = arith.mulf %52, %561 : vector<8x128xf32>
      %563 = arith.addf %559, %562 : vector<8x128xf32>
      %c6_265 = arith.constant 6 : index
      %c6_266 = arith.constant 6 : index
      %564 = memref.load %arg4[%c6_265, %c6_266] : memref<16x16xf32, #tpu.memory_space<smem>>
      %565 = vector.broadcast %564 : f32 to vector<8x128xf32>
      %566 = arith.mulf %60, %565 : vector<8x128xf32>
      %567 = arith.addf %563, %566 : vector<8x128xf32>
      %c7_267 = arith.constant 7 : index
      %c6_268 = arith.constant 6 : index
      %568 = memref.load %arg4[%c7_267, %c6_268] : memref<16x16xf32, #tpu.memory_space<smem>>
      %569 = vector.broadcast %568 : f32 to vector<8x128xf32>
      %570 = arith.mulf %68, %569 : vector<8x128xf32>
      %571 = arith.addf %567, %570 : vector<8x128xf32>
      %c8_269 = arith.constant 8 : index
      %c6_270 = arith.constant 6 : index
      %572 = memref.load %arg4[%c8_269, %c6_270] : memref<16x16xf32, #tpu.memory_space<smem>>
      %573 = vector.broadcast %572 : f32 to vector<8x128xf32>
      %574 = arith.mulf %76, %573 : vector<8x128xf32>
      %575 = arith.addf %571, %574 : vector<8x128xf32>
      %c9_271 = arith.constant 9 : index
      %c6_272 = arith.constant 6 : index
      %576 = memref.load %arg4[%c9_271, %c6_272] : memref<16x16xf32, #tpu.memory_space<smem>>
      %577 = vector.broadcast %576 : f32 to vector<8x128xf32>
      %578 = arith.mulf %84, %577 : vector<8x128xf32>
      %579 = arith.addf %575, %578 : vector<8x128xf32>
      %c10_273 = arith.constant 10 : index
      %c6_274 = arith.constant 6 : index
      %580 = memref.load %arg4[%c10_273, %c6_274] : memref<16x16xf32, #tpu.memory_space<smem>>
      %581 = vector.broadcast %580 : f32 to vector<8x128xf32>
      %582 = arith.mulf %92, %581 : vector<8x128xf32>
      %583 = arith.addf %579, %582 : vector<8x128xf32>
      %c11_275 = arith.constant 11 : index
      %c6_276 = arith.constant 6 : index
      %584 = memref.load %arg4[%c11_275, %c6_276] : memref<16x16xf32, #tpu.memory_space<smem>>
      %585 = vector.broadcast %584 : f32 to vector<8x128xf32>
      %586 = arith.mulf %100, %585 : vector<8x128xf32>
      %587 = arith.addf %583, %586 : vector<8x128xf32>
      %c12_277 = arith.constant 12 : index
      %c6_278 = arith.constant 6 : index
      %588 = memref.load %arg4[%c12_277, %c6_278] : memref<16x16xf32, #tpu.memory_space<smem>>
      %589 = vector.broadcast %588 : f32 to vector<8x128xf32>
      %590 = arith.mulf %108, %589 : vector<8x128xf32>
      %591 = arith.addf %587, %590 : vector<8x128xf32>
      %c13_279 = arith.constant 13 : index
      %c6_280 = arith.constant 6 : index
      %592 = memref.load %arg4[%c13_279, %c6_280] : memref<16x16xf32, #tpu.memory_space<smem>>
      %593 = vector.broadcast %592 : f32 to vector<8x128xf32>
      %594 = arith.mulf %116, %593 : vector<8x128xf32>
      %595 = arith.addf %591, %594 : vector<8x128xf32>
      %c14_281 = arith.constant 14 : index
      %c6_282 = arith.constant 6 : index
      %596 = memref.load %arg4[%c14_281, %c6_282] : memref<16x16xf32, #tpu.memory_space<smem>>
      %597 = vector.broadcast %596 : f32 to vector<8x128xf32>
      %598 = arith.mulf %124, %597 : vector<8x128xf32>
      %599 = arith.addf %595, %598 : vector<8x128xf32>
      %c15_283 = arith.constant 15 : index
      %c6_284 = arith.constant 6 : index
      %600 = memref.load %arg4[%c15_283, %c6_284] : memref<16x16xf32, #tpu.memory_space<smem>>
      %601 = vector.broadcast %600 : f32 to vector<8x128xf32>
      %602 = arith.mulf %132, %601 : vector<8x128xf32>
      %603 = arith.addf %599, %602 : vector<8x128xf32>
      %c6_285 = arith.constant 6 : index
      %604 = memref.load %arg5[%c6_285] : memref<16xf32, #tpu.memory_space<smem>>
      %605 = vector.broadcast %604 : f32 to vector<8x128xf32>
      %606 = arith.addf %603, %605 : vector<8x128xf32>
      %cst_286 = arith.constant 0.000000e+00 : f32
      %607 = vector.broadcast %cst_286 : f32 to vector<8x128xf32>
      %608 = arith.maximumf %606, %607 : vector<8x128xf32>
      %c0_287 = arith.constant 0 : index
      %c7_288 = arith.constant 7 : index
      %609 = memref.load %arg4[%c0_287, %c7_288] : memref<16x16xf32, #tpu.memory_space<smem>>
      %610 = vector.broadcast %609 : f32 to vector<8x128xf32>
      %611 = arith.mulf %12, %610 : vector<8x128xf32>
      %c1_289 = arith.constant 1 : index
      %c7_290 = arith.constant 7 : index
      %612 = memref.load %arg4[%c1_289, %c7_290] : memref<16x16xf32, #tpu.memory_space<smem>>
      %613 = vector.broadcast %612 : f32 to vector<8x128xf32>
      %614 = arith.mulf %20, %613 : vector<8x128xf32>
      %615 = arith.addf %611, %614 : vector<8x128xf32>
      %c2_291 = arith.constant 2 : index
      %c7_292 = arith.constant 7 : index
      %616 = memref.load %arg4[%c2_291, %c7_292] : memref<16x16xf32, #tpu.memory_space<smem>>
      %617 = vector.broadcast %616 : f32 to vector<8x128xf32>
      %618 = arith.mulf %28, %617 : vector<8x128xf32>
      %619 = arith.addf %615, %618 : vector<8x128xf32>
      %c3_293 = arith.constant 3 : index
      %c7_294 = arith.constant 7 : index
      %620 = memref.load %arg4[%c3_293, %c7_294] : memref<16x16xf32, #tpu.memory_space<smem>>
      %621 = vector.broadcast %620 : f32 to vector<8x128xf32>
      %622 = arith.mulf %36, %621 : vector<8x128xf32>
      %623 = arith.addf %619, %622 : vector<8x128xf32>
      %c4_295 = arith.constant 4 : index
      %c7_296 = arith.constant 7 : index
      %624 = memref.load %arg4[%c4_295, %c7_296] : memref<16x16xf32, #tpu.memory_space<smem>>
      %625 = vector.broadcast %624 : f32 to vector<8x128xf32>
      %626 = arith.mulf %44, %625 : vector<8x128xf32>
      %627 = arith.addf %623, %626 : vector<8x128xf32>
      %c5_297 = arith.constant 5 : index
      %c7_298 = arith.constant 7 : index
      %628 = memref.load %arg4[%c5_297, %c7_298] : memref<16x16xf32, #tpu.memory_space<smem>>
      %629 = vector.broadcast %628 : f32 to vector<8x128xf32>
      %630 = arith.mulf %52, %629 : vector<8x128xf32>
      %631 = arith.addf %627, %630 : vector<8x128xf32>
      %c6_299 = arith.constant 6 : index
      %c7_300 = arith.constant 7 : index
      %632 = memref.load %arg4[%c6_299, %c7_300] : memref<16x16xf32, #tpu.memory_space<smem>>
      %633 = vector.broadcast %632 : f32 to vector<8x128xf32>
      %634 = arith.mulf %60, %633 : vector<8x128xf32>
      %635 = arith.addf %631, %634 : vector<8x128xf32>
      %c7_301 = arith.constant 7 : index
      %c7_302 = arith.constant 7 : index
      %636 = memref.load %arg4[%c7_301, %c7_302] : memref<16x16xf32, #tpu.memory_space<smem>>
      %637 = vector.broadcast %636 : f32 to vector<8x128xf32>
      %638 = arith.mulf %68, %637 : vector<8x128xf32>
      %639 = arith.addf %635, %638 : vector<8x128xf32>
      %c8_303 = arith.constant 8 : index
      %c7_304 = arith.constant 7 : index
      %640 = memref.load %arg4[%c8_303, %c7_304] : memref<16x16xf32, #tpu.memory_space<smem>>
      %641 = vector.broadcast %640 : f32 to vector<8x128xf32>
      %642 = arith.mulf %76, %641 : vector<8x128xf32>
      %643 = arith.addf %639, %642 : vector<8x128xf32>
      %c9_305 = arith.constant 9 : index
      %c7_306 = arith.constant 7 : index
      %644 = memref.load %arg4[%c9_305, %c7_306] : memref<16x16xf32, #tpu.memory_space<smem>>
      %645 = vector.broadcast %644 : f32 to vector<8x128xf32>
      %646 = arith.mulf %84, %645 : vector<8x128xf32>
      %647 = arith.addf %643, %646 : vector<8x128xf32>
      %c10_307 = arith.constant 10 : index
      %c7_308 = arith.constant 7 : index
      %648 = memref.load %arg4[%c10_307, %c7_308] : memref<16x16xf32, #tpu.memory_space<smem>>
      %649 = vector.broadcast %648 : f32 to vector<8x128xf32>
      %650 = arith.mulf %92, %649 : vector<8x128xf32>
      %651 = arith.addf %647, %650 : vector<8x128xf32>
      %c11_309 = arith.constant 11 : index
      %c7_310 = arith.constant 7 : index
      %652 = memref.load %arg4[%c11_309, %c7_310] : memref<16x16xf32, #tpu.memory_space<smem>>
      %653 = vector.broadcast %652 : f32 to vector<8x128xf32>
      %654 = arith.mulf %100, %653 : vector<8x128xf32>
      %655 = arith.addf %651, %654 : vector<8x128xf32>
      %c12_311 = arith.constant 12 : index
      %c7_312 = arith.constant 7 : index
      %656 = memref.load %arg4[%c12_311, %c7_312] : memref<16x16xf32, #tpu.memory_space<smem>>
      %657 = vector.broadcast %656 : f32 to vector<8x128xf32>
      %658 = arith.mulf %108, %657 : vector<8x128xf32>
      %659 = arith.addf %655, %658 : vector<8x128xf32>
      %c13_313 = arith.constant 13 : index
      %c7_314 = arith.constant 7 : index
      %660 = memref.load %arg4[%c13_313, %c7_314] : memref<16x16xf32, #tpu.memory_space<smem>>
      %661 = vector.broadcast %660 : f32 to vector<8x128xf32>
      %662 = arith.mulf %116, %661 : vector<8x128xf32>
      %663 = arith.addf %659, %662 : vector<8x128xf32>
      %c14_315 = arith.constant 14 : index
      %c7_316 = arith.constant 7 : index
      %664 = memref.load %arg4[%c14_315, %c7_316] : memref<16x16xf32, #tpu.memory_space<smem>>
      %665 = vector.broadcast %664 : f32 to vector<8x128xf32>
      %666 = arith.mulf %124, %665 : vector<8x128xf32>
      %667 = arith.addf %663, %666 : vector<8x128xf32>
      %c15_317 = arith.constant 15 : index
      %c7_318 = arith.constant 7 : index
      %668 = memref.load %arg4[%c15_317, %c7_318] : memref<16x16xf32, #tpu.memory_space<smem>>
      %669 = vector.broadcast %668 : f32 to vector<8x128xf32>
      %670 = arith.mulf %132, %669 : vector<8x128xf32>
      %671 = arith.addf %667, %670 : vector<8x128xf32>
      %c7_319 = arith.constant 7 : index
      %672 = memref.load %arg5[%c7_319] : memref<16xf32, #tpu.memory_space<smem>>
      %673 = vector.broadcast %672 : f32 to vector<8x128xf32>
      %674 = arith.addf %671, %673 : vector<8x128xf32>
      %cst_320 = arith.constant 0.000000e+00 : f32
      %675 = vector.broadcast %cst_320 : f32 to vector<8x128xf32>
      %676 = arith.maximumf %674, %675 : vector<8x128xf32>
      %c0_321 = arith.constant 0 : index
      %c8_322 = arith.constant 8 : index
      %677 = memref.load %arg4[%c0_321, %c8_322] : memref<16x16xf32, #tpu.memory_space<smem>>
      %678 = vector.broadcast %677 : f32 to vector<8x128xf32>
      %679 = arith.mulf %12, %678 : vector<8x128xf32>
      %c1_323 = arith.constant 1 : index
      %c8_324 = arith.constant 8 : index
      %680 = memref.load %arg4[%c1_323, %c8_324] : memref<16x16xf32, #tpu.memory_space<smem>>
      %681 = vector.broadcast %680 : f32 to vector<8x128xf32>
      %682 = arith.mulf %20, %681 : vector<8x128xf32>
      %683 = arith.addf %679, %682 : vector<8x128xf32>
      %c2_325 = arith.constant 2 : index
      %c8_326 = arith.constant 8 : index
      %684 = memref.load %arg4[%c2_325, %c8_326] : memref<16x16xf32, #tpu.memory_space<smem>>
      %685 = vector.broadcast %684 : f32 to vector<8x128xf32>
      %686 = arith.mulf %28, %685 : vector<8x128xf32>
      %687 = arith.addf %683, %686 : vector<8x128xf32>
      %c3_327 = arith.constant 3 : index
      %c8_328 = arith.constant 8 : index
      %688 = memref.load %arg4[%c3_327, %c8_328] : memref<16x16xf32, #tpu.memory_space<smem>>
      %689 = vector.broadcast %688 : f32 to vector<8x128xf32>
      %690 = arith.mulf %36, %689 : vector<8x128xf32>
      %691 = arith.addf %687, %690 : vector<8x128xf32>
      %c4_329 = arith.constant 4 : index
      %c8_330 = arith.constant 8 : index
      %692 = memref.load %arg4[%c4_329, %c8_330] : memref<16x16xf32, #tpu.memory_space<smem>>
      %693 = vector.broadcast %692 : f32 to vector<8x128xf32>
      %694 = arith.mulf %44, %693 : vector<8x128xf32>
      %695 = arith.addf %691, %694 : vector<8x128xf32>
      %c5_331 = arith.constant 5 : index
      %c8_332 = arith.constant 8 : index
      %696 = memref.load %arg4[%c5_331, %c8_332] : memref<16x16xf32, #tpu.memory_space<smem>>
      %697 = vector.broadcast %696 : f32 to vector<8x128xf32>
      %698 = arith.mulf %52, %697 : vector<8x128xf32>
      %699 = arith.addf %695, %698 : vector<8x128xf32>
      %c6_333 = arith.constant 6 : index
      %c8_334 = arith.constant 8 : index
      %700 = memref.load %arg4[%c6_333, %c8_334] : memref<16x16xf32, #tpu.memory_space<smem>>
      %701 = vector.broadcast %700 : f32 to vector<8x128xf32>
      %702 = arith.mulf %60, %701 : vector<8x128xf32>
      %703 = arith.addf %699, %702 : vector<8x128xf32>
      %c7_335 = arith.constant 7 : index
      %c8_336 = arith.constant 8 : index
      %704 = memref.load %arg4[%c7_335, %c8_336] : memref<16x16xf32, #tpu.memory_space<smem>>
      %705 = vector.broadcast %704 : f32 to vector<8x128xf32>
      %706 = arith.mulf %68, %705 : vector<8x128xf32>
      %707 = arith.addf %703, %706 : vector<8x128xf32>
      %c8_337 = arith.constant 8 : index
      %c8_338 = arith.constant 8 : index
      %708 = memref.load %arg4[%c8_337, %c8_338] : memref<16x16xf32, #tpu.memory_space<smem>>
      %709 = vector.broadcast %708 : f32 to vector<8x128xf32>
      %710 = arith.mulf %76, %709 : vector<8x128xf32>
      %711 = arith.addf %707, %710 : vector<8x128xf32>
      %c9_339 = arith.constant 9 : index
      %c8_340 = arith.constant 8 : index
      %712 = memref.load %arg4[%c9_339, %c8_340] : memref<16x16xf32, #tpu.memory_space<smem>>
      %713 = vector.broadcast %712 : f32 to vector<8x128xf32>
      %714 = arith.mulf %84, %713 : vector<8x128xf32>
      %715 = arith.addf %711, %714 : vector<8x128xf32>
      %c10_341 = arith.constant 10 : index
      %c8_342 = arith.constant 8 : index
      %716 = memref.load %arg4[%c10_341, %c8_342] : memref<16x16xf32, #tpu.memory_space<smem>>
      %717 = vector.broadcast %716 : f32 to vector<8x128xf32>
      %718 = arith.mulf %92, %717 : vector<8x128xf32>
      %719 = arith.addf %715, %718 : vector<8x128xf32>
      %c11_343 = arith.constant 11 : index
      %c8_344 = arith.constant 8 : index
      %720 = memref.load %arg4[%c11_343, %c8_344] : memref<16x16xf32, #tpu.memory_space<smem>>
      %721 = vector.broadcast %720 : f32 to vector<8x128xf32>
      %722 = arith.mulf %100, %721 : vector<8x128xf32>
      %723 = arith.addf %719, %722 : vector<8x128xf32>
      %c12_345 = arith.constant 12 : index
      %c8_346 = arith.constant 8 : index
      %724 = memref.load %arg4[%c12_345, %c8_346] : memref<16x16xf32, #tpu.memory_space<smem>>
      %725 = vector.broadcast %724 : f32 to vector<8x128xf32>
      %726 = arith.mulf %108, %725 : vector<8x128xf32>
      %727 = arith.addf %723, %726 : vector<8x128xf32>
      %c13_347 = arith.constant 13 : index
      %c8_348 = arith.constant 8 : index
      %728 = memref.load %arg4[%c13_347, %c8_348] : memref<16x16xf32, #tpu.memory_space<smem>>
      %729 = vector.broadcast %728 : f32 to vector<8x128xf32>
      %730 = arith.mulf %116, %729 : vector<8x128xf32>
      %731 = arith.addf %727, %730 : vector<8x128xf32>
      %c14_349 = arith.constant 14 : index
      %c8_350 = arith.constant 8 : index
      %732 = memref.load %arg4[%c14_349, %c8_350] : memref<16x16xf32, #tpu.memory_space<smem>>
      %733 = vector.broadcast %732 : f32 to vector<8x128xf32>
      %734 = arith.mulf %124, %733 : vector<8x128xf32>
      %735 = arith.addf %731, %734 : vector<8x128xf32>
      %c15_351 = arith.constant 15 : index
      %c8_352 = arith.constant 8 : index
      %736 = memref.load %arg4[%c15_351, %c8_352] : memref<16x16xf32, #tpu.memory_space<smem>>
      %737 = vector.broadcast %736 : f32 to vector<8x128xf32>
      %738 = arith.mulf %132, %737 : vector<8x128xf32>
      %739 = arith.addf %735, %738 : vector<8x128xf32>
      %c8_353 = arith.constant 8 : index
      %740 = memref.load %arg5[%c8_353] : memref<16xf32, #tpu.memory_space<smem>>
      %741 = vector.broadcast %740 : f32 to vector<8x128xf32>
      %742 = arith.addf %739, %741 : vector<8x128xf32>
      %cst_354 = arith.constant 0.000000e+00 : f32
      %743 = vector.broadcast %cst_354 : f32 to vector<8x128xf32>
      %744 = arith.maximumf %742, %743 : vector<8x128xf32>
      %c0_355 = arith.constant 0 : index
      %c9_356 = arith.constant 9 : index
      %745 = memref.load %arg4[%c0_355, %c9_356] : memref<16x16xf32, #tpu.memory_space<smem>>
      %746 = vector.broadcast %745 : f32 to vector<8x128xf32>
      %747 = arith.mulf %12, %746 : vector<8x128xf32>
      %c1_357 = arith.constant 1 : index
      %c9_358 = arith.constant 9 : index
      %748 = memref.load %arg4[%c1_357, %c9_358] : memref<16x16xf32, #tpu.memory_space<smem>>
      %749 = vector.broadcast %748 : f32 to vector<8x128xf32>
      %750 = arith.mulf %20, %749 : vector<8x128xf32>
      %751 = arith.addf %747, %750 : vector<8x128xf32>
      %c2_359 = arith.constant 2 : index
      %c9_360 = arith.constant 9 : index
      %752 = memref.load %arg4[%c2_359, %c9_360] : memref<16x16xf32, #tpu.memory_space<smem>>
      %753 = vector.broadcast %752 : f32 to vector<8x128xf32>
      %754 = arith.mulf %28, %753 : vector<8x128xf32>
      %755 = arith.addf %751, %754 : vector<8x128xf32>
      %c3_361 = arith.constant 3 : index
      %c9_362 = arith.constant 9 : index
      %756 = memref.load %arg4[%c3_361, %c9_362] : memref<16x16xf32, #tpu.memory_space<smem>>
      %757 = vector.broadcast %756 : f32 to vector<8x128xf32>
      %758 = arith.mulf %36, %757 : vector<8x128xf32>
      %759 = arith.addf %755, %758 : vector<8x128xf32>
      %c4_363 = arith.constant 4 : index
      %c9_364 = arith.constant 9 : index
      %760 = memref.load %arg4[%c4_363, %c9_364] : memref<16x16xf32, #tpu.memory_space<smem>>
      %761 = vector.broadcast %760 : f32 to vector<8x128xf32>
      %762 = arith.mulf %44, %761 : vector<8x128xf32>
      %763 = arith.addf %759, %762 : vector<8x128xf32>
      %c5_365 = arith.constant 5 : index
      %c9_366 = arith.constant 9 : index
      %764 = memref.load %arg4[%c5_365, %c9_366] : memref<16x16xf32, #tpu.memory_space<smem>>
      %765 = vector.broadcast %764 : f32 to vector<8x128xf32>
      %766 = arith.mulf %52, %765 : vector<8x128xf32>
      %767 = arith.addf %763, %766 : vector<8x128xf32>
      %c6_367 = arith.constant 6 : index
      %c9_368 = arith.constant 9 : index
      %768 = memref.load %arg4[%c6_367, %c9_368] : memref<16x16xf32, #tpu.memory_space<smem>>
      %769 = vector.broadcast %768 : f32 to vector<8x128xf32>
      %770 = arith.mulf %60, %769 : vector<8x128xf32>
      %771 = arith.addf %767, %770 : vector<8x128xf32>
      %c7_369 = arith.constant 7 : index
      %c9_370 = arith.constant 9 : index
      %772 = memref.load %arg4[%c7_369, %c9_370] : memref<16x16xf32, #tpu.memory_space<smem>>
      %773 = vector.broadcast %772 : f32 to vector<8x128xf32>
      %774 = arith.mulf %68, %773 : vector<8x128xf32>
      %775 = arith.addf %771, %774 : vector<8x128xf32>
      %c8_371 = arith.constant 8 : index
      %c9_372 = arith.constant 9 : index
      %776 = memref.load %arg4[%c8_371, %c9_372] : memref<16x16xf32, #tpu.memory_space<smem>>
      %777 = vector.broadcast %776 : f32 to vector<8x128xf32>
      %778 = arith.mulf %76, %777 : vector<8x128xf32>
      %779 = arith.addf %775, %778 : vector<8x128xf32>
      %c9_373 = arith.constant 9 : index
      %c9_374 = arith.constant 9 : index
      %780 = memref.load %arg4[%c9_373, %c9_374] : memref<16x16xf32, #tpu.memory_space<smem>>
      %781 = vector.broadcast %780 : f32 to vector<8x128xf32>
      %782 = arith.mulf %84, %781 : vector<8x128xf32>
      %783 = arith.addf %779, %782 : vector<8x128xf32>
      %c10_375 = arith.constant 10 : index
      %c9_376 = arith.constant 9 : index
      %784 = memref.load %arg4[%c10_375, %c9_376] : memref<16x16xf32, #tpu.memory_space<smem>>
      %785 = vector.broadcast %784 : f32 to vector<8x128xf32>
      %786 = arith.mulf %92, %785 : vector<8x128xf32>
      %787 = arith.addf %783, %786 : vector<8x128xf32>
      %c11_377 = arith.constant 11 : index
      %c9_378 = arith.constant 9 : index
      %788 = memref.load %arg4[%c11_377, %c9_378] : memref<16x16xf32, #tpu.memory_space<smem>>
      %789 = vector.broadcast %788 : f32 to vector<8x128xf32>
      %790 = arith.mulf %100, %789 : vector<8x128xf32>
      %791 = arith.addf %787, %790 : vector<8x128xf32>
      %c12_379 = arith.constant 12 : index
      %c9_380 = arith.constant 9 : index
      %792 = memref.load %arg4[%c12_379, %c9_380] : memref<16x16xf32, #tpu.memory_space<smem>>
      %793 = vector.broadcast %792 : f32 to vector<8x128xf32>
      %794 = arith.mulf %108, %793 : vector<8x128xf32>
      %795 = arith.addf %791, %794 : vector<8x128xf32>
      %c13_381 = arith.constant 13 : index
      %c9_382 = arith.constant 9 : index
      %796 = memref.load %arg4[%c13_381, %c9_382] : memref<16x16xf32, #tpu.memory_space<smem>>
      %797 = vector.broadcast %796 : f32 to vector<8x128xf32>
      %798 = arith.mulf %116, %797 : vector<8x128xf32>
      %799 = arith.addf %795, %798 : vector<8x128xf32>
      %c14_383 = arith.constant 14 : index
      %c9_384 = arith.constant 9 : index
      %800 = memref.load %arg4[%c14_383, %c9_384] : memref<16x16xf32, #tpu.memory_space<smem>>
      %801 = vector.broadcast %800 : f32 to vector<8x128xf32>
      %802 = arith.mulf %124, %801 : vector<8x128xf32>
      %803 = arith.addf %799, %802 : vector<8x128xf32>
      %c15_385 = arith.constant 15 : index
      %c9_386 = arith.constant 9 : index
      %804 = memref.load %arg4[%c15_385, %c9_386] : memref<16x16xf32, #tpu.memory_space<smem>>
      %805 = vector.broadcast %804 : f32 to vector<8x128xf32>
      %806 = arith.mulf %132, %805 : vector<8x128xf32>
      %807 = arith.addf %803, %806 : vector<8x128xf32>
      %c9_387 = arith.constant 9 : index
      %808 = memref.load %arg5[%c9_387] : memref<16xf32, #tpu.memory_space<smem>>
      %809 = vector.broadcast %808 : f32 to vector<8x128xf32>
      %810 = arith.addf %807, %809 : vector<8x128xf32>
      %cst_388 = arith.constant 0.000000e+00 : f32
      %811 = vector.broadcast %cst_388 : f32 to vector<8x128xf32>
      %812 = arith.maximumf %810, %811 : vector<8x128xf32>
      %c0_389 = arith.constant 0 : index
      %c10_390 = arith.constant 10 : index
      %813 = memref.load %arg4[%c0_389, %c10_390] : memref<16x16xf32, #tpu.memory_space<smem>>
      %814 = vector.broadcast %813 : f32 to vector<8x128xf32>
      %815 = arith.mulf %12, %814 : vector<8x128xf32>
      %c1_391 = arith.constant 1 : index
      %c10_392 = arith.constant 10 : index
      %816 = memref.load %arg4[%c1_391, %c10_392] : memref<16x16xf32, #tpu.memory_space<smem>>
      %817 = vector.broadcast %816 : f32 to vector<8x128xf32>
      %818 = arith.mulf %20, %817 : vector<8x128xf32>
      %819 = arith.addf %815, %818 : vector<8x128xf32>
      %c2_393 = arith.constant 2 : index
      %c10_394 = arith.constant 10 : index
      %820 = memref.load %arg4[%c2_393, %c10_394] : memref<16x16xf32, #tpu.memory_space<smem>>
      %821 = vector.broadcast %820 : f32 to vector<8x128xf32>
      %822 = arith.mulf %28, %821 : vector<8x128xf32>
      %823 = arith.addf %819, %822 : vector<8x128xf32>
      %c3_395 = arith.constant 3 : index
      %c10_396 = arith.constant 10 : index
      %824 = memref.load %arg4[%c3_395, %c10_396] : memref<16x16xf32, #tpu.memory_space<smem>>
      %825 = vector.broadcast %824 : f32 to vector<8x128xf32>
      %826 = arith.mulf %36, %825 : vector<8x128xf32>
      %827 = arith.addf %823, %826 : vector<8x128xf32>
      %c4_397 = arith.constant 4 : index
      %c10_398 = arith.constant 10 : index
      %828 = memref.load %arg4[%c4_397, %c10_398] : memref<16x16xf32, #tpu.memory_space<smem>>
      %829 = vector.broadcast %828 : f32 to vector<8x128xf32>
      %830 = arith.mulf %44, %829 : vector<8x128xf32>
      %831 = arith.addf %827, %830 : vector<8x128xf32>
      %c5_399 = arith.constant 5 : index
      %c10_400 = arith.constant 10 : index
      %832 = memref.load %arg4[%c5_399, %c10_400] : memref<16x16xf32, #tpu.memory_space<smem>>
      %833 = vector.broadcast %832 : f32 to vector<8x128xf32>
      %834 = arith.mulf %52, %833 : vector<8x128xf32>
      %835 = arith.addf %831, %834 : vector<8x128xf32>
      %c6_401 = arith.constant 6 : index
      %c10_402 = arith.constant 10 : index
      %836 = memref.load %arg4[%c6_401, %c10_402] : memref<16x16xf32, #tpu.memory_space<smem>>
      %837 = vector.broadcast %836 : f32 to vector<8x128xf32>
      %838 = arith.mulf %60, %837 : vector<8x128xf32>
      %839 = arith.addf %835, %838 : vector<8x128xf32>
      %c7_403 = arith.constant 7 : index
      %c10_404 = arith.constant 10 : index
      %840 = memref.load %arg4[%c7_403, %c10_404] : memref<16x16xf32, #tpu.memory_space<smem>>
      %841 = vector.broadcast %840 : f32 to vector<8x128xf32>
      %842 = arith.mulf %68, %841 : vector<8x128xf32>
      %843 = arith.addf %839, %842 : vector<8x128xf32>
      %c8_405 = arith.constant 8 : index
      %c10_406 = arith.constant 10 : index
      %844 = memref.load %arg4[%c8_405, %c10_406] : memref<16x16xf32, #tpu.memory_space<smem>>
      %845 = vector.broadcast %844 : f32 to vector<8x128xf32>
      %846 = arith.mulf %76, %845 : vector<8x128xf32>
      %847 = arith.addf %843, %846 : vector<8x128xf32>
      %c9_407 = arith.constant 9 : index
      %c10_408 = arith.constant 10 : index
      %848 = memref.load %arg4[%c9_407, %c10_408] : memref<16x16xf32, #tpu.memory_space<smem>>
      %849 = vector.broadcast %848 : f32 to vector<8x128xf32>
      %850 = arith.mulf %84, %849 : vector<8x128xf32>
      %851 = arith.addf %847, %850 : vector<8x128xf32>
      %c10_409 = arith.constant 10 : index
      %c10_410 = arith.constant 10 : index
      %852 = memref.load %arg4[%c10_409, %c10_410] : memref<16x16xf32, #tpu.memory_space<smem>>
      %853 = vector.broadcast %852 : f32 to vector<8x128xf32>
      %854 = arith.mulf %92, %853 : vector<8x128xf32>
      %855 = arith.addf %851, %854 : vector<8x128xf32>
      %c11_411 = arith.constant 11 : index
      %c10_412 = arith.constant 10 : index
      %856 = memref.load %arg4[%c11_411, %c10_412] : memref<16x16xf32, #tpu.memory_space<smem>>
      %857 = vector.broadcast %856 : f32 to vector<8x128xf32>
      %858 = arith.mulf %100, %857 : vector<8x128xf32>
      %859 = arith.addf %855, %858 : vector<8x128xf32>
      %c12_413 = arith.constant 12 : index
      %c10_414 = arith.constant 10 : index
      %860 = memref.load %arg4[%c12_413, %c10_414] : memref<16x16xf32, #tpu.memory_space<smem>>
      %861 = vector.broadcast %860 : f32 to vector<8x128xf32>
      %862 = arith.mulf %108, %861 : vector<8x128xf32>
      %863 = arith.addf %859, %862 : vector<8x128xf32>
      %c13_415 = arith.constant 13 : index
      %c10_416 = arith.constant 10 : index
      %864 = memref.load %arg4[%c13_415, %c10_416] : memref<16x16xf32, #tpu.memory_space<smem>>
      %865 = vector.broadcast %864 : f32 to vector<8x128xf32>
      %866 = arith.mulf %116, %865 : vector<8x128xf32>
      %867 = arith.addf %863, %866 : vector<8x128xf32>
      %c14_417 = arith.constant 14 : index
      %c10_418 = arith.constant 10 : index
      %868 = memref.load %arg4[%c14_417, %c10_418] : memref<16x16xf32, #tpu.memory_space<smem>>
      %869 = vector.broadcast %868 : f32 to vector<8x128xf32>
      %870 = arith.mulf %124, %869 : vector<8x128xf32>
      %871 = arith.addf %867, %870 : vector<8x128xf32>
      %c15_419 = arith.constant 15 : index
      %c10_420 = arith.constant 10 : index
      %872 = memref.load %arg4[%c15_419, %c10_420] : memref<16x16xf32, #tpu.memory_space<smem>>
      %873 = vector.broadcast %872 : f32 to vector<8x128xf32>
      %874 = arith.mulf %132, %873 : vector<8x128xf32>
      %875 = arith.addf %871, %874 : vector<8x128xf32>
      %c10_421 = arith.constant 10 : index
      %876 = memref.load %arg5[%c10_421] : memref<16xf32, #tpu.memory_space<smem>>
      %877 = vector.broadcast %876 : f32 to vector<8x128xf32>
      %878 = arith.addf %875, %877 : vector<8x128xf32>
      %cst_422 = arith.constant 0.000000e+00 : f32
      %879 = vector.broadcast %cst_422 : f32 to vector<8x128xf32>
      %880 = arith.maximumf %878, %879 : vector<8x128xf32>
      %c0_423 = arith.constant 0 : index
      %c11_424 = arith.constant 11 : index
      %881 = memref.load %arg4[%c0_423, %c11_424] : memref<16x16xf32, #tpu.memory_space<smem>>
      %882 = vector.broadcast %881 : f32 to vector<8x128xf32>
      %883 = arith.mulf %12, %882 : vector<8x128xf32>
      %c1_425 = arith.constant 1 : index
      %c11_426 = arith.constant 11 : index
      %884 = memref.load %arg4[%c1_425, %c11_426] : memref<16x16xf32, #tpu.memory_space<smem>>
      %885 = vector.broadcast %884 : f32 to vector<8x128xf32>
      %886 = arith.mulf %20, %885 : vector<8x128xf32>
      %887 = arith.addf %883, %886 : vector<8x128xf32>
      %c2_427 = arith.constant 2 : index
      %c11_428 = arith.constant 11 : index
      %888 = memref.load %arg4[%c2_427, %c11_428] : memref<16x16xf32, #tpu.memory_space<smem>>
      %889 = vector.broadcast %888 : f32 to vector<8x128xf32>
      %890 = arith.mulf %28, %889 : vector<8x128xf32>
      %891 = arith.addf %887, %890 : vector<8x128xf32>
      %c3_429 = arith.constant 3 : index
      %c11_430 = arith.constant 11 : index
      %892 = memref.load %arg4[%c3_429, %c11_430] : memref<16x16xf32, #tpu.memory_space<smem>>
      %893 = vector.broadcast %892 : f32 to vector<8x128xf32>
      %894 = arith.mulf %36, %893 : vector<8x128xf32>
      %895 = arith.addf %891, %894 : vector<8x128xf32>
      %c4_431 = arith.constant 4 : index
      %c11_432 = arith.constant 11 : index
      %896 = memref.load %arg4[%c4_431, %c11_432] : memref<16x16xf32, #tpu.memory_space<smem>>
      %897 = vector.broadcast %896 : f32 to vector<8x128xf32>
      %898 = arith.mulf %44, %897 : vector<8x128xf32>
      %899 = arith.addf %895, %898 : vector<8x128xf32>
      %c5_433 = arith.constant 5 : index
      %c11_434 = arith.constant 11 : index
      %900 = memref.load %arg4[%c5_433, %c11_434] : memref<16x16xf32, #tpu.memory_space<smem>>
      %901 = vector.broadcast %900 : f32 to vector<8x128xf32>
      %902 = arith.mulf %52, %901 : vector<8x128xf32>
      %903 = arith.addf %899, %902 : vector<8x128xf32>
      %c6_435 = arith.constant 6 : index
      %c11_436 = arith.constant 11 : index
      %904 = memref.load %arg4[%c6_435, %c11_436] : memref<16x16xf32, #tpu.memory_space<smem>>
      %905 = vector.broadcast %904 : f32 to vector<8x128xf32>
      %906 = arith.mulf %60, %905 : vector<8x128xf32>
      %907 = arith.addf %903, %906 : vector<8x128xf32>
      %c7_437 = arith.constant 7 : index
      %c11_438 = arith.constant 11 : index
      %908 = memref.load %arg4[%c7_437, %c11_438] : memref<16x16xf32, #tpu.memory_space<smem>>
      %909 = vector.broadcast %908 : f32 to vector<8x128xf32>
      %910 = arith.mulf %68, %909 : vector<8x128xf32>
      %911 = arith.addf %907, %910 : vector<8x128xf32>
      %c8_439 = arith.constant 8 : index
      %c11_440 = arith.constant 11 : index
      %912 = memref.load %arg4[%c8_439, %c11_440] : memref<16x16xf32, #tpu.memory_space<smem>>
      %913 = vector.broadcast %912 : f32 to vector<8x128xf32>
      %914 = arith.mulf %76, %913 : vector<8x128xf32>
      %915 = arith.addf %911, %914 : vector<8x128xf32>
      %c9_441 = arith.constant 9 : index
      %c11_442 = arith.constant 11 : index
      %916 = memref.load %arg4[%c9_441, %c11_442] : memref<16x16xf32, #tpu.memory_space<smem>>
      %917 = vector.broadcast %916 : f32 to vector<8x128xf32>
      %918 = arith.mulf %84, %917 : vector<8x128xf32>
      %919 = arith.addf %915, %918 : vector<8x128xf32>
      %c10_443 = arith.constant 10 : index
      %c11_444 = arith.constant 11 : index
      %920 = memref.load %arg4[%c10_443, %c11_444] : memref<16x16xf32, #tpu.memory_space<smem>>
      %921 = vector.broadcast %920 : f32 to vector<8x128xf32>
      %922 = arith.mulf %92, %921 : vector<8x128xf32>
      %923 = arith.addf %919, %922 : vector<8x128xf32>
      %c11_445 = arith.constant 11 : index
      %c11_446 = arith.constant 11 : index
      %924 = memref.load %arg4[%c11_445, %c11_446] : memref<16x16xf32, #tpu.memory_space<smem>>
      %925 = vector.broadcast %924 : f32 to vector<8x128xf32>
      %926 = arith.mulf %100, %925 : vector<8x128xf32>
      %927 = arith.addf %923, %926 : vector<8x128xf32>
      %c12_447 = arith.constant 12 : index
      %c11_448 = arith.constant 11 : index
      %928 = memref.load %arg4[%c12_447, %c11_448] : memref<16x16xf32, #tpu.memory_space<smem>>
      %929 = vector.broadcast %928 : f32 to vector<8x128xf32>
      %930 = arith.mulf %108, %929 : vector<8x128xf32>
      %931 = arith.addf %927, %930 : vector<8x128xf32>
      %c13_449 = arith.constant 13 : index
      %c11_450 = arith.constant 11 : index
      %932 = memref.load %arg4[%c13_449, %c11_450] : memref<16x16xf32, #tpu.memory_space<smem>>
      %933 = vector.broadcast %932 : f32 to vector<8x128xf32>
      %934 = arith.mulf %116, %933 : vector<8x128xf32>
      %935 = arith.addf %931, %934 : vector<8x128xf32>
      %c14_451 = arith.constant 14 : index
      %c11_452 = arith.constant 11 : index
      %936 = memref.load %arg4[%c14_451, %c11_452] : memref<16x16xf32, #tpu.memory_space<smem>>
      %937 = vector.broadcast %936 : f32 to vector<8x128xf32>
      %938 = arith.mulf %124, %937 : vector<8x128xf32>
      %939 = arith.addf %935, %938 : vector<8x128xf32>
      %c15_453 = arith.constant 15 : index
      %c11_454 = arith.constant 11 : index
      %940 = memref.load %arg4[%c15_453, %c11_454] : memref<16x16xf32, #tpu.memory_space<smem>>
      %941 = vector.broadcast %940 : f32 to vector<8x128xf32>
      %942 = arith.mulf %132, %941 : vector<8x128xf32>
      %943 = arith.addf %939, %942 : vector<8x128xf32>
      %c11_455 = arith.constant 11 : index
      %944 = memref.load %arg5[%c11_455] : memref<16xf32, #tpu.memory_space<smem>>
      %945 = vector.broadcast %944 : f32 to vector<8x128xf32>
      %946 = arith.addf %943, %945 : vector<8x128xf32>
      %cst_456 = arith.constant 0.000000e+00 : f32
      %947 = vector.broadcast %cst_456 : f32 to vector<8x128xf32>
      %948 = arith.maximumf %946, %947 : vector<8x128xf32>
      %c0_457 = arith.constant 0 : index
      %c12_458 = arith.constant 12 : index
      %949 = memref.load %arg4[%c0_457, %c12_458] : memref<16x16xf32, #tpu.memory_space<smem>>
      %950 = vector.broadcast %949 : f32 to vector<8x128xf32>
      %951 = arith.mulf %12, %950 : vector<8x128xf32>
      %c1_459 = arith.constant 1 : index
      %c12_460 = arith.constant 12 : index
      %952 = memref.load %arg4[%c1_459, %c12_460] : memref<16x16xf32, #tpu.memory_space<smem>>
      %953 = vector.broadcast %952 : f32 to vector<8x128xf32>
      %954 = arith.mulf %20, %953 : vector<8x128xf32>
      %955 = arith.addf %951, %954 : vector<8x128xf32>
      %c2_461 = arith.constant 2 : index
      %c12_462 = arith.constant 12 : index
      %956 = memref.load %arg4[%c2_461, %c12_462] : memref<16x16xf32, #tpu.memory_space<smem>>
      %957 = vector.broadcast %956 : f32 to vector<8x128xf32>
      %958 = arith.mulf %28, %957 : vector<8x128xf32>
      %959 = arith.addf %955, %958 : vector<8x128xf32>
      %c3_463 = arith.constant 3 : index
      %c12_464 = arith.constant 12 : index
      %960 = memref.load %arg4[%c3_463, %c12_464] : memref<16x16xf32, #tpu.memory_space<smem>>
      %961 = vector.broadcast %960 : f32 to vector<8x128xf32>
      %962 = arith.mulf %36, %961 : vector<8x128xf32>
      %963 = arith.addf %959, %962 : vector<8x128xf32>
      %c4_465 = arith.constant 4 : index
      %c12_466 = arith.constant 12 : index
      %964 = memref.load %arg4[%c4_465, %c12_466] : memref<16x16xf32, #tpu.memory_space<smem>>
      %965 = vector.broadcast %964 : f32 to vector<8x128xf32>
      %966 = arith.mulf %44, %965 : vector<8x128xf32>
      %967 = arith.addf %963, %966 : vector<8x128xf32>
      %c5_467 = arith.constant 5 : index
      %c12_468 = arith.constant 12 : index
      %968 = memref.load %arg4[%c5_467, %c12_468] : memref<16x16xf32, #tpu.memory_space<smem>>
      %969 = vector.broadcast %968 : f32 to vector<8x128xf32>
      %970 = arith.mulf %52, %969 : vector<8x128xf32>
      %971 = arith.addf %967, %970 : vector<8x128xf32>
      %c6_469 = arith.constant 6 : index
      %c12_470 = arith.constant 12 : index
      %972 = memref.load %arg4[%c6_469, %c12_470] : memref<16x16xf32, #tpu.memory_space<smem>>
      %973 = vector.broadcast %972 : f32 to vector<8x128xf32>
      %974 = arith.mulf %60, %973 : vector<8x128xf32>
      %975 = arith.addf %971, %974 : vector<8x128xf32>
      %c7_471 = arith.constant 7 : index
      %c12_472 = arith.constant 12 : index
      %976 = memref.load %arg4[%c7_471, %c12_472] : memref<16x16xf32, #tpu.memory_space<smem>>
      %977 = vector.broadcast %976 : f32 to vector<8x128xf32>
      %978 = arith.mulf %68, %977 : vector<8x128xf32>
      %979 = arith.addf %975, %978 : vector<8x128xf32>
      %c8_473 = arith.constant 8 : index
      %c12_474 = arith.constant 12 : index
      %980 = memref.load %arg4[%c8_473, %c12_474] : memref<16x16xf32, #tpu.memory_space<smem>>
      %981 = vector.broadcast %980 : f32 to vector<8x128xf32>
      %982 = arith.mulf %76, %981 : vector<8x128xf32>
      %983 = arith.addf %979, %982 : vector<8x128xf32>
      %c9_475 = arith.constant 9 : index
      %c12_476 = arith.constant 12 : index
      %984 = memref.load %arg4[%c9_475, %c12_476] : memref<16x16xf32, #tpu.memory_space<smem>>
      %985 = vector.broadcast %984 : f32 to vector<8x128xf32>
      %986 = arith.mulf %84, %985 : vector<8x128xf32>
      %987 = arith.addf %983, %986 : vector<8x128xf32>
      %c10_477 = arith.constant 10 : index
      %c12_478 = arith.constant 12 : index
      %988 = memref.load %arg4[%c10_477, %c12_478] : memref<16x16xf32, #tpu.memory_space<smem>>
      %989 = vector.broadcast %988 : f32 to vector<8x128xf32>
      %990 = arith.mulf %92, %989 : vector<8x128xf32>
      %991 = arith.addf %987, %990 : vector<8x128xf32>
      %c11_479 = arith.constant 11 : index
      %c12_480 = arith.constant 12 : index
      %992 = memref.load %arg4[%c11_479, %c12_480] : memref<16x16xf32, #tpu.memory_space<smem>>
      %993 = vector.broadcast %992 : f32 to vector<8x128xf32>
      %994 = arith.mulf %100, %993 : vector<8x128xf32>
      %995 = arith.addf %991, %994 : vector<8x128xf32>
      %c12_481 = arith.constant 12 : index
      %c12_482 = arith.constant 12 : index
      %996 = memref.load %arg4[%c12_481, %c12_482] : memref<16x16xf32, #tpu.memory_space<smem>>
      %997 = vector.broadcast %996 : f32 to vector<8x128xf32>
      %998 = arith.mulf %108, %997 : vector<8x128xf32>
      %999 = arith.addf %995, %998 : vector<8x128xf32>
      %c13_483 = arith.constant 13 : index
      %c12_484 = arith.constant 12 : index
      %1000 = memref.load %arg4[%c13_483, %c12_484] : memref<16x16xf32, #tpu.memory_space<smem>>
      %1001 = vector.broadcast %1000 : f32 to vector<8x128xf32>
      %1002 = arith.mulf %116, %1001 : vector<8x128xf32>
      %1003 = arith.addf %999, %1002 : vector<8x128xf32>
      %c14_485 = arith.constant 14 : index
      %c12_486 = arith.constant 12 : index
      %1004 = memref.load %arg4[%c14_485, %c12_486] : memref<16x16xf32, #tpu.memory_space<smem>>
      %1005 = vector.broadcast %1004 : f32 to vector<8x128xf32>
      %1006 = arith.mulf %124, %1005 : vector<8x128xf32>
      %1007 = arith.addf %1003, %1006 : vector<8x128xf32>
      %c15_487 = arith.constant 15 : index
      %c12_488 = arith.constant 12 : index
      %1008 = memref.load %arg4[%c15_487, %c12_488] : memref<16x16xf32, #tpu.memory_space<smem>>
      %1009 = vector.broadcast %1008 : f32 to vector<8x128xf32>
      %1010 = arith.mulf %132, %1009 : vector<8x128xf32>
      %1011 = arith.addf %1007, %1010 : vector<8x128xf32>
      %c12_489 = arith.constant 12 : index
      %1012 = memref.load %arg5[%c12_489] : memref<16xf32, #tpu.memory_space<smem>>
      %1013 = vector.broadcast %1012 : f32 to vector<8x128xf32>
      %1014 = arith.addf %1011, %1013 : vector<8x128xf32>
      %cst_490 = arith.constant 0.000000e+00 : f32
      %1015 = vector.broadcast %cst_490 : f32 to vector<8x128xf32>
      %1016 = arith.maximumf %1014, %1015 : vector<8x128xf32>
      %c0_491 = arith.constant 0 : index
      %c13_492 = arith.constant 13 : index
      %1017 = memref.load %arg4[%c0_491, %c13_492] : memref<16x16xf32, #tpu.memory_space<smem>>
      %1018 = vector.broadcast %1017 : f32 to vector<8x128xf32>
      %1019 = arith.mulf %12, %1018 : vector<8x128xf32>
      %c1_493 = arith.constant 1 : index
      %c13_494 = arith.constant 13 : index
      %1020 = memref.load %arg4[%c1_493, %c13_494] : memref<16x16xf32, #tpu.memory_space<smem>>
      %1021 = vector.broadcast %1020 : f32 to vector<8x128xf32>
      %1022 = arith.mulf %20, %1021 : vector<8x128xf32>
      %1023 = arith.addf %1019, %1022 : vector<8x128xf32>
      %c2_495 = arith.constant 2 : index
      %c13_496 = arith.constant 13 : index
      %1024 = memref.load %arg4[%c2_495, %c13_496] : memref<16x16xf32, #tpu.memory_space<smem>>
      %1025 = vector.broadcast %1024 : f32 to vector<8x128xf32>
      %1026 = arith.mulf %28, %1025 : vector<8x128xf32>
      %1027 = arith.addf %1023, %1026 : vector<8x128xf32>
      %c3_497 = arith.constant 3 : index
      %c13_498 = arith.constant 13 : index
      %1028 = memref.load %arg4[%c3_497, %c13_498] : memref<16x16xf32, #tpu.memory_space<smem>>
      %1029 = vector.broadcast %1028 : f32 to vector<8x128xf32>
      %1030 = arith.mulf %36, %1029 : vector<8x128xf32>
      %1031 = arith.addf %1027, %1030 : vector<8x128xf32>
      %c4_499 = arith.constant 4 : index
      %c13_500 = arith.constant 13 : index
      %1032 = memref.load %arg4[%c4_499, %c13_500] : memref<16x16xf32, #tpu.memory_space<smem>>
      %1033 = vector.broadcast %1032 : f32 to vector<8x128xf32>
      %1034 = arith.mulf %44, %1033 : vector<8x128xf32>
      %1035 = arith.addf %1031, %1034 : vector<8x128xf32>
      %c5_501 = arith.constant 5 : index
      %c13_502 = arith.constant 13 : index
      %1036 = memref.load %arg4[%c5_501, %c13_502] : memref<16x16xf32, #tpu.memory_space<smem>>
      %1037 = vector.broadcast %1036 : f32 to vector<8x128xf32>
      %1038 = arith.mulf %52, %1037 : vector<8x128xf32>
      %1039 = arith.addf %1035, %1038 : vector<8x128xf32>
      %c6_503 = arith.constant 6 : index
      %c13_504 = arith.constant 13 : index
      %1040 = memref.load %arg4[%c6_503, %c13_504] : memref<16x16xf32, #tpu.memory_space<smem>>
      %1041 = vector.broadcast %1040 : f32 to vector<8x128xf32>
      %1042 = arith.mulf %60, %1041 : vector<8x128xf32>
      %1043 = arith.addf %1039, %1042 : vector<8x128xf32>
      %c7_505 = arith.constant 7 : index
      %c13_506 = arith.constant 13 : index
      %1044 = memref.load %arg4[%c7_505, %c13_506] : memref<16x16xf32, #tpu.memory_space<smem>>
      %1045 = vector.broadcast %1044 : f32 to vector<8x128xf32>
      %1046 = arith.mulf %68, %1045 : vector<8x128xf32>
      %1047 = arith.addf %1043, %1046 : vector<8x128xf32>
      %c8_507 = arith.constant 8 : index
      %c13_508 = arith.constant 13 : index
      %1048 = memref.load %arg4[%c8_507, %c13_508] : memref<16x16xf32, #tpu.memory_space<smem>>
      %1049 = vector.broadcast %1048 : f32 to vector<8x128xf32>
      %1050 = arith.mulf %76, %1049 : vector<8x128xf32>
      %1051 = arith.addf %1047, %1050 : vector<8x128xf32>
      %c9_509 = arith.constant 9 : index
      %c13_510 = arith.constant 13 : index
      %1052 = memref.load %arg4[%c9_509, %c13_510] : memref<16x16xf32, #tpu.memory_space<smem>>
      %1053 = vector.broadcast %1052 : f32 to vector<8x128xf32>
      %1054 = arith.mulf %84, %1053 : vector<8x128xf32>
      %1055 = arith.addf %1051, %1054 : vector<8x128xf32>
      %c10_511 = arith.constant 10 : index
      %c13_512 = arith.constant 13 : index
      %1056 = memref.load %arg4[%c10_511, %c13_512] : memref<16x16xf32, #tpu.memory_space<smem>>
      %1057 = vector.broadcast %1056 : f32 to vector<8x128xf32>
      %1058 = arith.mulf %92, %1057 : vector<8x128xf32>
      %1059 = arith.addf %1055, %1058 : vector<8x128xf32>
      %c11_513 = arith.constant 11 : index
      %c13_514 = arith.constant 13 : index
      %1060 = memref.load %arg4[%c11_513, %c13_514] : memref<16x16xf32, #tpu.memory_space<smem>>
      %1061 = vector.broadcast %1060 : f32 to vector<8x128xf32>
      %1062 = arith.mulf %100, %1061 : vector<8x128xf32>
      %1063 = arith.addf %1059, %1062 : vector<8x128xf32>
      %c12_515 = arith.constant 12 : index
      %c13_516 = arith.constant 13 : index
      %1064 = memref.load %arg4[%c12_515, %c13_516] : memref<16x16xf32, #tpu.memory_space<smem>>
      %1065 = vector.broadcast %1064 : f32 to vector<8x128xf32>
      %1066 = arith.mulf %108, %1065 : vector<8x128xf32>
      %1067 = arith.addf %1063, %1066 : vector<8x128xf32>
      %c13_517 = arith.constant 13 : index
      %c13_518 = arith.constant 13 : index
      %1068 = memref.load %arg4[%c13_517, %c13_518] : memref<16x16xf32, #tpu.memory_space<smem>>
      %1069 = vector.broadcast %1068 : f32 to vector<8x128xf32>
      %1070 = arith.mulf %116, %1069 : vector<8x128xf32>
      %1071 = arith.addf %1067, %1070 : vector<8x128xf32>
      %c14_519 = arith.constant 14 : index
      %c13_520 = arith.constant 13 : index
      %1072 = memref.load %arg4[%c14_519, %c13_520] : memref<16x16xf32, #tpu.memory_space<smem>>
      %1073 = vector.broadcast %1072 : f32 to vector<8x128xf32>
      %1074 = arith.mulf %124, %1073 : vector<8x128xf32>
      %1075 = arith.addf %1071, %1074 : vector<8x128xf32>
      %c15_521 = arith.constant 15 : index
      %c13_522 = arith.constant 13 : index
      %1076 = memref.load %arg4[%c15_521, %c13_522] : memref<16x16xf32, #tpu.memory_space<smem>>
      %1077 = vector.broadcast %1076 : f32 to vector<8x128xf32>
      %1078 = arith.mulf %132, %1077 : vector<8x128xf32>
      %1079 = arith.addf %1075, %1078 : vector<8x128xf32>
      %c13_523 = arith.constant 13 : index
      %1080 = memref.load %arg5[%c13_523] : memref<16xf32, #tpu.memory_space<smem>>
      %1081 = vector.broadcast %1080 : f32 to vector<8x128xf32>
      %1082 = arith.addf %1079, %1081 : vector<8x128xf32>
      %cst_524 = arith.constant 0.000000e+00 : f32
      %1083 = vector.broadcast %cst_524 : f32 to vector<8x128xf32>
      %1084 = arith.maximumf %1082, %1083 : vector<8x128xf32>
      %c0_525 = arith.constant 0 : index
      %c14_526 = arith.constant 14 : index
      %1085 = memref.load %arg4[%c0_525, %c14_526] : memref<16x16xf32, #tpu.memory_space<smem>>
      %1086 = vector.broadcast %1085 : f32 to vector<8x128xf32>
      %1087 = arith.mulf %12, %1086 : vector<8x128xf32>
      %c1_527 = arith.constant 1 : index
      %c14_528 = arith.constant 14 : index
      %1088 = memref.load %arg4[%c1_527, %c14_528] : memref<16x16xf32, #tpu.memory_space<smem>>
      %1089 = vector.broadcast %1088 : f32 to vector<8x128xf32>
      %1090 = arith.mulf %20, %1089 : vector<8x128xf32>
      %1091 = arith.addf %1087, %1090 : vector<8x128xf32>
      %c2_529 = arith.constant 2 : index
      %c14_530 = arith.constant 14 : index
      %1092 = memref.load %arg4[%c2_529, %c14_530] : memref<16x16xf32, #tpu.memory_space<smem>>
      %1093 = vector.broadcast %1092 : f32 to vector<8x128xf32>
      %1094 = arith.mulf %28, %1093 : vector<8x128xf32>
      %1095 = arith.addf %1091, %1094 : vector<8x128xf32>
      %c3_531 = arith.constant 3 : index
      %c14_532 = arith.constant 14 : index
      %1096 = memref.load %arg4[%c3_531, %c14_532] : memref<16x16xf32, #tpu.memory_space<smem>>
      %1097 = vector.broadcast %1096 : f32 to vector<8x128xf32>
      %1098 = arith.mulf %36, %1097 : vector<8x128xf32>
      %1099 = arith.addf %1095, %1098 : vector<8x128xf32>
      %c4_533 = arith.constant 4 : index
      %c14_534 = arith.constant 14 : index
      %1100 = memref.load %arg4[%c4_533, %c14_534] : memref<16x16xf32, #tpu.memory_space<smem>>
      %1101 = vector.broadcast %1100 : f32 to vector<8x128xf32>
      %1102 = arith.mulf %44, %1101 : vector<8x128xf32>
      %1103 = arith.addf %1099, %1102 : vector<8x128xf32>
      %c5_535 = arith.constant 5 : index
      %c14_536 = arith.constant 14 : index
      %1104 = memref.load %arg4[%c5_535, %c14_536] : memref<16x16xf32, #tpu.memory_space<smem>>
      %1105 = vector.broadcast %1104 : f32 to vector<8x128xf32>
      %1106 = arith.mulf %52, %1105 : vector<8x128xf32>
      %1107 = arith.addf %1103, %1106 : vector<8x128xf32>
      %c6_537 = arith.constant 6 : index
      %c14_538 = arith.constant 14 : index
      %1108 = memref.load %arg4[%c6_537, %c14_538] : memref<16x16xf32, #tpu.memory_space<smem>>
      %1109 = vector.broadcast %1108 : f32 to vector<8x128xf32>
      %1110 = arith.mulf %60, %1109 : vector<8x128xf32>
      %1111 = arith.addf %1107, %1110 : vector<8x128xf32>
      %c7_539 = arith.constant 7 : index
      %c14_540 = arith.constant 14 : index
      %1112 = memref.load %arg4[%c7_539, %c14_540] : memref<16x16xf32, #tpu.memory_space<smem>>
      %1113 = vector.broadcast %1112 : f32 to vector<8x128xf32>
      %1114 = arith.mulf %68, %1113 : vector<8x128xf32>
      %1115 = arith.addf %1111, %1114 : vector<8x128xf32>
      %c8_541 = arith.constant 8 : index
      %c14_542 = arith.constant 14 : index
      %1116 = memref.load %arg4[%c8_541, %c14_542] : memref<16x16xf32, #tpu.memory_space<smem>>
      %1117 = vector.broadcast %1116 : f32 to vector<8x128xf32>
      %1118 = arith.mulf %76, %1117 : vector<8x128xf32>
      %1119 = arith.addf %1115, %1118 : vector<8x128xf32>
      %c9_543 = arith.constant 9 : index
      %c14_544 = arith.constant 14 : index
      %1120 = memref.load %arg4[%c9_543, %c14_544] : memref<16x16xf32, #tpu.memory_space<smem>>
      %1121 = vector.broadcast %1120 : f32 to vector<8x128xf32>
      %1122 = arith.mulf %84, %1121 : vector<8x128xf32>
      %1123 = arith.addf %1119, %1122 : vector<8x128xf32>
      %c10_545 = arith.constant 10 : index
      %c14_546 = arith.constant 14 : index
      %1124 = memref.load %arg4[%c10_545, %c14_546] : memref<16x16xf32, #tpu.memory_space<smem>>
      %1125 = vector.broadcast %1124 : f32 to vector<8x128xf32>
      %1126 = arith.mulf %92, %1125 : vector<8x128xf32>
      %1127 = arith.addf %1123, %1126 : vector<8x128xf32>
      %c11_547 = arith.constant 11 : index
      %c14_548 = arith.constant 14 : index
      %1128 = memref.load %arg4[%c11_547, %c14_548] : memref<16x16xf32, #tpu.memory_space<smem>>
      %1129 = vector.broadcast %1128 : f32 to vector<8x128xf32>
      %1130 = arith.mulf %100, %1129 : vector<8x128xf32>
      %1131 = arith.addf %1127, %1130 : vector<8x128xf32>
      %c12_549 = arith.constant 12 : index
      %c14_550 = arith.constant 14 : index
      %1132 = memref.load %arg4[%c12_549, %c14_550] : memref<16x16xf32, #tpu.memory_space<smem>>
      %1133 = vector.broadcast %1132 : f32 to vector<8x128xf32>
      %1134 = arith.mulf %108, %1133 : vector<8x128xf32>
      %1135 = arith.addf %1131, %1134 : vector<8x128xf32>
      %c13_551 = arith.constant 13 : index
      %c14_552 = arith.constant 14 : index
      %1136 = memref.load %arg4[%c13_551, %c14_552] : memref<16x16xf32, #tpu.memory_space<smem>>
      %1137 = vector.broadcast %1136 : f32 to vector<8x128xf32>
      %1138 = arith.mulf %116, %1137 : vector<8x128xf32>
      %1139 = arith.addf %1135, %1138 : vector<8x128xf32>
      %c14_553 = arith.constant 14 : index
      %c14_554 = arith.constant 14 : index
      %1140 = memref.load %arg4[%c14_553, %c14_554] : memref<16x16xf32, #tpu.memory_space<smem>>
      %1141 = vector.broadcast %1140 : f32 to vector<8x128xf32>
      %1142 = arith.mulf %124, %1141 : vector<8x128xf32>
      %1143 = arith.addf %1139, %1142 : vector<8x128xf32>
      %c15_555 = arith.constant 15 : index
      %c14_556 = arith.constant 14 : index
      %1144 = memref.load %arg4[%c15_555, %c14_556] : memref<16x16xf32, #tpu.memory_space<smem>>
      %1145 = vector.broadcast %1144 : f32 to vector<8x128xf32>
      %1146 = arith.mulf %132, %1145 : vector<8x128xf32>
      %1147 = arith.addf %1143, %1146 : vector<8x128xf32>
      %c14_557 = arith.constant 14 : index
      %1148 = memref.load %arg5[%c14_557] : memref<16xf32, #tpu.memory_space<smem>>
      %1149 = vector.broadcast %1148 : f32 to vector<8x128xf32>
      %1150 = arith.addf %1147, %1149 : vector<8x128xf32>
      %cst_558 = arith.constant 0.000000e+00 : f32
      %1151 = vector.broadcast %cst_558 : f32 to vector<8x128xf32>
      %1152 = arith.maximumf %1150, %1151 : vector<8x128xf32>
      %c0_559 = arith.constant 0 : index
      %c15_560 = arith.constant 15 : index
      %1153 = memref.load %arg4[%c0_559, %c15_560] : memref<16x16xf32, #tpu.memory_space<smem>>
      %1154 = vector.broadcast %1153 : f32 to vector<8x128xf32>
      %1155 = arith.mulf %12, %1154 : vector<8x128xf32>
      %c1_561 = arith.constant 1 : index
      %c15_562 = arith.constant 15 : index
      %1156 = memref.load %arg4[%c1_561, %c15_562] : memref<16x16xf32, #tpu.memory_space<smem>>
      %1157 = vector.broadcast %1156 : f32 to vector<8x128xf32>
      %1158 = arith.mulf %20, %1157 : vector<8x128xf32>
      %1159 = arith.addf %1155, %1158 : vector<8x128xf32>
      %c2_563 = arith.constant 2 : index
      %c15_564 = arith.constant 15 : index
      %1160 = memref.load %arg4[%c2_563, %c15_564] : memref<16x16xf32, #tpu.memory_space<smem>>
      %1161 = vector.broadcast %1160 : f32 to vector<8x128xf32>
      %1162 = arith.mulf %28, %1161 : vector<8x128xf32>
      %1163 = arith.addf %1159, %1162 : vector<8x128xf32>
      %c3_565 = arith.constant 3 : index
      %c15_566 = arith.constant 15 : index
      %1164 = memref.load %arg4[%c3_565, %c15_566] : memref<16x16xf32, #tpu.memory_space<smem>>
      %1165 = vector.broadcast %1164 : f32 to vector<8x128xf32>
      %1166 = arith.mulf %36, %1165 : vector<8x128xf32>
      %1167 = arith.addf %1163, %1166 : vector<8x128xf32>
      %c4_567 = arith.constant 4 : index
      %c15_568 = arith.constant 15 : index
      %1168 = memref.load %arg4[%c4_567, %c15_568] : memref<16x16xf32, #tpu.memory_space<smem>>
      %1169 = vector.broadcast %1168 : f32 to vector<8x128xf32>
      %1170 = arith.mulf %44, %1169 : vector<8x128xf32>
      %1171 = arith.addf %1167, %1170 : vector<8x128xf32>
      %c5_569 = arith.constant 5 : index
      %c15_570 = arith.constant 15 : index
      %1172 = memref.load %arg4[%c5_569, %c15_570] : memref<16x16xf32, #tpu.memory_space<smem>>
      %1173 = vector.broadcast %1172 : f32 to vector<8x128xf32>
      %1174 = arith.mulf %52, %1173 : vector<8x128xf32>
      %1175 = arith.addf %1171, %1174 : vector<8x128xf32>
      %c6_571 = arith.constant 6 : index
      %c15_572 = arith.constant 15 : index
      %1176 = memref.load %arg4[%c6_571, %c15_572] : memref<16x16xf32, #tpu.memory_space<smem>>
      %1177 = vector.broadcast %1176 : f32 to vector<8x128xf32>
      %1178 = arith.mulf %60, %1177 : vector<8x128xf32>
      %1179 = arith.addf %1175, %1178 : vector<8x128xf32>
      %c7_573 = arith.constant 7 : index
      %c15_574 = arith.constant 15 : index
      %1180 = memref.load %arg4[%c7_573, %c15_574] : memref<16x16xf32, #tpu.memory_space<smem>>
      %1181 = vector.broadcast %1180 : f32 to vector<8x128xf32>
      %1182 = arith.mulf %68, %1181 : vector<8x128xf32>
      %1183 = arith.addf %1179, %1182 : vector<8x128xf32>
      %c8_575 = arith.constant 8 : index
      %c15_576 = arith.constant 15 : index
      %1184 = memref.load %arg4[%c8_575, %c15_576] : memref<16x16xf32, #tpu.memory_space<smem>>
      %1185 = vector.broadcast %1184 : f32 to vector<8x128xf32>
      %1186 = arith.mulf %76, %1185 : vector<8x128xf32>
      %1187 = arith.addf %1183, %1186 : vector<8x128xf32>
      %c9_577 = arith.constant 9 : index
      %c15_578 = arith.constant 15 : index
      %1188 = memref.load %arg4[%c9_577, %c15_578] : memref<16x16xf32, #tpu.memory_space<smem>>
      %1189 = vector.broadcast %1188 : f32 to vector<8x128xf32>
      %1190 = arith.mulf %84, %1189 : vector<8x128xf32>
      %1191 = arith.addf %1187, %1190 : vector<8x128xf32>
      %c10_579 = arith.constant 10 : index
      %c15_580 = arith.constant 15 : index
      %1192 = memref.load %arg4[%c10_579, %c15_580] : memref<16x16xf32, #tpu.memory_space<smem>>
      %1193 = vector.broadcast %1192 : f32 to vector<8x128xf32>
      %1194 = arith.mulf %92, %1193 : vector<8x128xf32>
      %1195 = arith.addf %1191, %1194 : vector<8x128xf32>
      %c11_581 = arith.constant 11 : index
      %c15_582 = arith.constant 15 : index
      %1196 = memref.load %arg4[%c11_581, %c15_582] : memref<16x16xf32, #tpu.memory_space<smem>>
      %1197 = vector.broadcast %1196 : f32 to vector<8x128xf32>
      %1198 = arith.mulf %100, %1197 : vector<8x128xf32>
      %1199 = arith.addf %1195, %1198 : vector<8x128xf32>
      %c12_583 = arith.constant 12 : index
      %c15_584 = arith.constant 15 : index
      %1200 = memref.load %arg4[%c12_583, %c15_584] : memref<16x16xf32, #tpu.memory_space<smem>>
      %1201 = vector.broadcast %1200 : f32 to vector<8x128xf32>
      %1202 = arith.mulf %108, %1201 : vector<8x128xf32>
      %1203 = arith.addf %1199, %1202 : vector<8x128xf32>
      %c13_585 = arith.constant 13 : index
      %c15_586 = arith.constant 15 : index
      %1204 = memref.load %arg4[%c13_585, %c15_586] : memref<16x16xf32, #tpu.memory_space<smem>>
      %1205 = vector.broadcast %1204 : f32 to vector<8x128xf32>
      %1206 = arith.mulf %116, %1205 : vector<8x128xf32>
      %1207 = arith.addf %1203, %1206 : vector<8x128xf32>
      %c14_587 = arith.constant 14 : index
      %c15_588 = arith.constant 15 : index
      %1208 = memref.load %arg4[%c14_587, %c15_588] : memref<16x16xf32, #tpu.memory_space<smem>>
      %1209 = vector.broadcast %1208 : f32 to vector<8x128xf32>
      %1210 = arith.mulf %124, %1209 : vector<8x128xf32>
      %1211 = arith.addf %1207, %1210 : vector<8x128xf32>
      %c15_589 = arith.constant 15 : index
      %c15_590 = arith.constant 15 : index
      %1212 = memref.load %arg4[%c15_589, %c15_590] : memref<16x16xf32, #tpu.memory_space<smem>>
      %1213 = vector.broadcast %1212 : f32 to vector<8x128xf32>
      %1214 = arith.mulf %132, %1213 : vector<8x128xf32>
      %1215 = arith.addf %1211, %1214 : vector<8x128xf32>
      %c15_591 = arith.constant 15 : index
      %1216 = memref.load %arg5[%c15_591] : memref<16xf32, #tpu.memory_space<smem>>
      %1217 = vector.broadcast %1216 : f32 to vector<8x128xf32>
      %1218 = arith.addf %1215, %1217 : vector<8x128xf32>
      %cst_592 = arith.constant 0.000000e+00 : f32
      %1219 = vector.broadcast %cst_592 : f32 to vector<8x128xf32>
      %1220 = arith.maximumf %1218, %1219 : vector<8x128xf32>
      %c0_593 = arith.constant 0 : index
      %c0_594 = arith.constant 0 : index
      %1221 = memref.load %arg6[%c0_593, %c0_594] : memref<16x16xf32, #tpu.memory_space<smem>>
      %1222 = vector.broadcast %1221 : f32 to vector<8x128xf32>
      %1223 = arith.mulf %200, %1222 : vector<8x128xf32>
      %c1_595 = arith.constant 1 : index
      %c0_596 = arith.constant 0 : index
      %1224 = memref.load %arg6[%c1_595, %c0_596] : memref<16x16xf32, #tpu.memory_space<smem>>
      %1225 = vector.broadcast %1224 : f32 to vector<8x128xf32>
      %1226 = arith.mulf %268, %1225 : vector<8x128xf32>
      %1227 = arith.addf %1223, %1226 : vector<8x128xf32>
      %c2_597 = arith.constant 2 : index
      %c0_598 = arith.constant 0 : index
      %1228 = memref.load %arg6[%c2_597, %c0_598] : memref<16x16xf32, #tpu.memory_space<smem>>
      %1229 = vector.broadcast %1228 : f32 to vector<8x128xf32>
      %1230 = arith.mulf %336, %1229 : vector<8x128xf32>
      %1231 = arith.addf %1227, %1230 : vector<8x128xf32>
      %c3_599 = arith.constant 3 : index
      %c0_600 = arith.constant 0 : index
      %1232 = memref.load %arg6[%c3_599, %c0_600] : memref<16x16xf32, #tpu.memory_space<smem>>
      %1233 = vector.broadcast %1232 : f32 to vector<8x128xf32>
      %1234 = arith.mulf %404, %1233 : vector<8x128xf32>
      %1235 = arith.addf %1231, %1234 : vector<8x128xf32>
      %c4_601 = arith.constant 4 : index
      %c0_602 = arith.constant 0 : index
      %1236 = memref.load %arg6[%c4_601, %c0_602] : memref<16x16xf32, #tpu.memory_space<smem>>
      %1237 = vector.broadcast %1236 : f32 to vector<8x128xf32>
      %1238 = arith.mulf %472, %1237 : vector<8x128xf32>
      %1239 = arith.addf %1235, %1238 : vector<8x128xf32>
      %c5_603 = arith.constant 5 : index
      %c0_604 = arith.constant 0 : index
      %1240 = memref.load %arg6[%c5_603, %c0_604] : memref<16x16xf32, #tpu.memory_space<smem>>
      %1241 = vector.broadcast %1240 : f32 to vector<8x128xf32>
      %1242 = arith.mulf %540, %1241 : vector<8x128xf32>
      %1243 = arith.addf %1239, %1242 : vector<8x128xf32>
      %c6_605 = arith.constant 6 : index
      %c0_606 = arith.constant 0 : index
      %1244 = memref.load %arg6[%c6_605, %c0_606] : memref<16x16xf32, #tpu.memory_space<smem>>
      %1245 = vector.broadcast %1244 : f32 to vector<8x128xf32>
      %1246 = arith.mulf %608, %1245 : vector<8x128xf32>
      %1247 = arith.addf %1243, %1246 : vector<8x128xf32>
      %c7_607 = arith.constant 7 : index
      %c0_608 = arith.constant 0 : index
      %1248 = memref.load %arg6[%c7_607, %c0_608] : memref<16x16xf32, #tpu.memory_space<smem>>
      %1249 = vector.broadcast %1248 : f32 to vector<8x128xf32>
      %1250 = arith.mulf %676, %1249 : vector<8x128xf32>
      %1251 = arith.addf %1247, %1250 : vector<8x128xf32>
      %c8_609 = arith.constant 8 : index
      %c0_610 = arith.constant 0 : index
      %1252 = memref.load %arg6[%c8_609, %c0_610] : memref<16x16xf32, #tpu.memory_space<smem>>
      %1253 = vector.broadcast %1252 : f32 to vector<8x128xf32>
      %1254 = arith.mulf %744, %1253 : vector<8x128xf32>
      %1255 = arith.addf %1251, %1254 : vector<8x128xf32>
      %c9_611 = arith.constant 9 : index
      %c0_612 = arith.constant 0 : index
      %1256 = memref.load %arg6[%c9_611, %c0_612] : memref<16x16xf32, #tpu.memory_space<smem>>
      %1257 = vector.broadcast %1256 : f32 to vector<8x128xf32>
      %1258 = arith.mulf %812, %1257 : vector<8x128xf32>
      %1259 = arith.addf %1255, %1258 : vector<8x128xf32>
      %c10_613 = arith.constant 10 : index
      %c0_614 = arith.constant 0 : index
      %1260 = memref.load %arg6[%c10_613, %c0_614] : memref<16x16xf32, #tpu.memory_space<smem>>
      %1261 = vector.broadcast %1260 : f32 to vector<8x128xf32>
      %1262 = arith.mulf %880, %1261 : vector<8x128xf32>
      %1263 = arith.addf %1259, %1262 : vector<8x128xf32>
      %c11_615 = arith.constant 11 : index
      %c0_616 = arith.constant 0 : index
      %1264 = memref.load %arg6[%c11_615, %c0_616] : memref<16x16xf32, #tpu.memory_space<smem>>
      %1265 = vector.broadcast %1264 : f32 to vector<8x128xf32>
      %1266 = arith.mulf %948, %1265 : vector<8x128xf32>
      %1267 = arith.addf %1263, %1266 : vector<8x128xf32>
      %c12_617 = arith.constant 12 : index
      %c0_618 = arith.constant 0 : index
      %1268 = memref.load %arg6[%c12_617, %c0_618] : memref<16x16xf32, #tpu.memory_space<smem>>
      %1269 = vector.broadcast %1268 : f32 to vector<8x128xf32>
      %1270 = arith.mulf %1016, %1269 : vector<8x128xf32>
      %1271 = arith.addf %1267, %1270 : vector<8x128xf32>
      %c13_619 = arith.constant 13 : index
      %c0_620 = arith.constant 0 : index
      %1272 = memref.load %arg6[%c13_619, %c0_620] : memref<16x16xf32, #tpu.memory_space<smem>>
      %1273 = vector.broadcast %1272 : f32 to vector<8x128xf32>
      %1274 = arith.mulf %1084, %1273 : vector<8x128xf32>
      %1275 = arith.addf %1271, %1274 : vector<8x128xf32>
      %c14_621 = arith.constant 14 : index
      %c0_622 = arith.constant 0 : index
      %1276 = memref.load %arg6[%c14_621, %c0_622] : memref<16x16xf32, #tpu.memory_space<smem>>
      %1277 = vector.broadcast %1276 : f32 to vector<8x128xf32>
      %1278 = arith.mulf %1152, %1277 : vector<8x128xf32>
      %1279 = arith.addf %1275, %1278 : vector<8x128xf32>
      %c15_623 = arith.constant 15 : index
      %c0_624 = arith.constant 0 : index
      %1280 = memref.load %arg6[%c15_623, %c0_624] : memref<16x16xf32, #tpu.memory_space<smem>>
      %1281 = vector.broadcast %1280 : f32 to vector<8x128xf32>
      %1282 = arith.mulf %1220, %1281 : vector<8x128xf32>
      %1283 = arith.addf %1279, %1282 : vector<8x128xf32>
      %c0_625 = arith.constant 0 : index
      %1284 = memref.load %arg7[%c0_625] : memref<16xf32, #tpu.memory_space<smem>>
      %1285 = vector.broadcast %1284 : f32 to vector<8x128xf32>
      %1286 = arith.addf %1283, %1285 : vector<8x128xf32>
      %cst_626 = arith.constant 0.000000e+00 : f32
      %1287 = vector.broadcast %cst_626 : f32 to vector<8x128xf32>
      %1288 = arith.maximumf %1286, %1287 : vector<8x128xf32>
      %c0_627 = arith.constant 0 : index
      %c1_628 = arith.constant 1 : index
      %1289 = memref.load %arg6[%c0_627, %c1_628] : memref<16x16xf32, #tpu.memory_space<smem>>
      %1290 = vector.broadcast %1289 : f32 to vector<8x128xf32>
      %1291 = arith.mulf %200, %1290 : vector<8x128xf32>
      %c1_629 = arith.constant 1 : index
      %c1_630 = arith.constant 1 : index
      %1292 = memref.load %arg6[%c1_629, %c1_630] : memref<16x16xf32, #tpu.memory_space<smem>>
      %1293 = vector.broadcast %1292 : f32 to vector<8x128xf32>
      %1294 = arith.mulf %268, %1293 : vector<8x128xf32>
      %1295 = arith.addf %1291, %1294 : vector<8x128xf32>
      %c2_631 = arith.constant 2 : index
      %c1_632 = arith.constant 1 : index
      %1296 = memref.load %arg6[%c2_631, %c1_632] : memref<16x16xf32, #tpu.memory_space<smem>>
      %1297 = vector.broadcast %1296 : f32 to vector<8x128xf32>
      %1298 = arith.mulf %336, %1297 : vector<8x128xf32>
      %1299 = arith.addf %1295, %1298 : vector<8x128xf32>
      %c3_633 = arith.constant 3 : index
      %c1_634 = arith.constant 1 : index
      %1300 = memref.load %arg6[%c3_633, %c1_634] : memref<16x16xf32, #tpu.memory_space<smem>>
      %1301 = vector.broadcast %1300 : f32 to vector<8x128xf32>
      %1302 = arith.mulf %404, %1301 : vector<8x128xf32>
      %1303 = arith.addf %1299, %1302 : vector<8x128xf32>
      %c4_635 = arith.constant 4 : index
      %c1_636 = arith.constant 1 : index
      %1304 = memref.load %arg6[%c4_635, %c1_636] : memref<16x16xf32, #tpu.memory_space<smem>>
      %1305 = vector.broadcast %1304 : f32 to vector<8x128xf32>
      %1306 = arith.mulf %472, %1305 : vector<8x128xf32>
      %1307 = arith.addf %1303, %1306 : vector<8x128xf32>
      %c5_637 = arith.constant 5 : index
      %c1_638 = arith.constant 1 : index
      %1308 = memref.load %arg6[%c5_637, %c1_638] : memref<16x16xf32, #tpu.memory_space<smem>>
      %1309 = vector.broadcast %1308 : f32 to vector<8x128xf32>
      %1310 = arith.mulf %540, %1309 : vector<8x128xf32>
      %1311 = arith.addf %1307, %1310 : vector<8x128xf32>
      %c6_639 = arith.constant 6 : index
      %c1_640 = arith.constant 1 : index
      %1312 = memref.load %arg6[%c6_639, %c1_640] : memref<16x16xf32, #tpu.memory_space<smem>>
      %1313 = vector.broadcast %1312 : f32 to vector<8x128xf32>
      %1314 = arith.mulf %608, %1313 : vector<8x128xf32>
      %1315 = arith.addf %1311, %1314 : vector<8x128xf32>
      %c7_641 = arith.constant 7 : index
      %c1_642 = arith.constant 1 : index
      %1316 = memref.load %arg6[%c7_641, %c1_642] : memref<16x16xf32, #tpu.memory_space<smem>>
      %1317 = vector.broadcast %1316 : f32 to vector<8x128xf32>
      %1318 = arith.mulf %676, %1317 : vector<8x128xf32>
      %1319 = arith.addf %1315, %1318 : vector<8x128xf32>
      %c8_643 = arith.constant 8 : index
      %c1_644 = arith.constant 1 : index
      %1320 = memref.load %arg6[%c8_643, %c1_644] : memref<16x16xf32, #tpu.memory_space<smem>>
      %1321 = vector.broadcast %1320 : f32 to vector<8x128xf32>
      %1322 = arith.mulf %744, %1321 : vector<8x128xf32>
      %1323 = arith.addf %1319, %1322 : vector<8x128xf32>
      %c9_645 = arith.constant 9 : index
      %c1_646 = arith.constant 1 : index
      %1324 = memref.load %arg6[%c9_645, %c1_646] : memref<16x16xf32, #tpu.memory_space<smem>>
      %1325 = vector.broadcast %1324 : f32 to vector<8x128xf32>
      %1326 = arith.mulf %812, %1325 : vector<8x128xf32>
      %1327 = arith.addf %1323, %1326 : vector<8x128xf32>
      %c10_647 = arith.constant 10 : index
      %c1_648 = arith.constant 1 : index
      %1328 = memref.load %arg6[%c10_647, %c1_648] : memref<16x16xf32, #tpu.memory_space<smem>>
      %1329 = vector.broadcast %1328 : f32 to vector<8x128xf32>
      %1330 = arith.mulf %880, %1329 : vector<8x128xf32>
      %1331 = arith.addf %1327, %1330 : vector<8x128xf32>
      %c11_649 = arith.constant 11 : index
      %c1_650 = arith.constant 1 : index
      %1332 = memref.load %arg6[%c11_649, %c1_650] : memref<16x16xf32, #tpu.memory_space<smem>>
      %1333 = vector.broadcast %1332 : f32 to vector<8x128xf32>
      %1334 = arith.mulf %948, %1333 : vector<8x128xf32>
      %1335 = arith.addf %1331, %1334 : vector<8x128xf32>
      %c12_651 = arith.constant 12 : index
      %c1_652 = arith.constant 1 : index
      %1336 = memref.load %arg6[%c12_651, %c1_652] : memref<16x16xf32, #tpu.memory_space<smem>>
      %1337 = vector.broadcast %1336 : f32 to vector<8x128xf32>
      %1338 = arith.mulf %1016, %1337 : vector<8x128xf32>
      %1339 = arith.addf %1335, %1338 : vector<8x128xf32>
      %c13_653 = arith.constant 13 : index
      %c1_654 = arith.constant 1 : index
      %1340 = memref.load %arg6[%c13_653, %c1_654] : memref<16x16xf32, #tpu.memory_space<smem>>
      %1341 = vector.broadcast %1340 : f32 to vector<8x128xf32>
      %1342 = arith.mulf %1084, %1341 : vector<8x128xf32>
      %1343 = arith.addf %1339, %1342 : vector<8x128xf32>
      %c14_655 = arith.constant 14 : index
      %c1_656 = arith.constant 1 : index
      %1344 = memref.load %arg6[%c14_655, %c1_656] : memref<16x16xf32, #tpu.memory_space<smem>>
      %1345 = vector.broadcast %1344 : f32 to vector<8x128xf32>
      %1346 = arith.mulf %1152, %1345 : vector<8x128xf32>
      %1347 = arith.addf %1343, %1346 : vector<8x128xf32>
      %c15_657 = arith.constant 15 : index
      %c1_658 = arith.constant 1 : index
      %1348 = memref.load %arg6[%c15_657, %c1_658] : memref<16x16xf32, #tpu.memory_space<smem>>
      %1349 = vector.broadcast %1348 : f32 to vector<8x128xf32>
      %1350 = arith.mulf %1220, %1349 : vector<8x128xf32>
      %1351 = arith.addf %1347, %1350 : vector<8x128xf32>
      %c1_659 = arith.constant 1 : index
      %1352 = memref.load %arg7[%c1_659] : memref<16xf32, #tpu.memory_space<smem>>
      %1353 = vector.broadcast %1352 : f32 to vector<8x128xf32>
      %1354 = arith.addf %1351, %1353 : vector<8x128xf32>
      %cst_660 = arith.constant 0.000000e+00 : f32
      %1355 = vector.broadcast %cst_660 : f32 to vector<8x128xf32>
      %1356 = arith.maximumf %1354, %1355 : vector<8x128xf32>
      %c0_661 = arith.constant 0 : index
      %c2_662 = arith.constant 2 : index
      %1357 = memref.load %arg6[%c0_661, %c2_662] : memref<16x16xf32, #tpu.memory_space<smem>>
      %1358 = vector.broadcast %1357 : f32 to vector<8x128xf32>
      %1359 = arith.mulf %200, %1358 : vector<8x128xf32>
      %c1_663 = arith.constant 1 : index
      %c2_664 = arith.constant 2 : index
      %1360 = memref.load %arg6[%c1_663, %c2_664] : memref<16x16xf32, #tpu.memory_space<smem>>
      %1361 = vector.broadcast %1360 : f32 to vector<8x128xf32>
      %1362 = arith.mulf %268, %1361 : vector<8x128xf32>
      %1363 = arith.addf %1359, %1362 : vector<8x128xf32>
      %c2_665 = arith.constant 2 : index
      %c2_666 = arith.constant 2 : index
      %1364 = memref.load %arg6[%c2_665, %c2_666] : memref<16x16xf32, #tpu.memory_space<smem>>
      %1365 = vector.broadcast %1364 : f32 to vector<8x128xf32>
      %1366 = arith.mulf %336, %1365 : vector<8x128xf32>
      %1367 = arith.addf %1363, %1366 : vector<8x128xf32>
      %c3_667 = arith.constant 3 : index
      %c2_668 = arith.constant 2 : index
      %1368 = memref.load %arg6[%c3_667, %c2_668] : memref<16x16xf32, #tpu.memory_space<smem>>
      %1369 = vector.broadcast %1368 : f32 to vector<8x128xf32>
      %1370 = arith.mulf %404, %1369 : vector<8x128xf32>
      %1371 = arith.addf %1367, %1370 : vector<8x128xf32>
      %c4_669 = arith.constant 4 : index
      %c2_670 = arith.constant 2 : index
      %1372 = memref.load %arg6[%c4_669, %c2_670] : memref<16x16xf32, #tpu.memory_space<smem>>
      %1373 = vector.broadcast %1372 : f32 to vector<8x128xf32>
      %1374 = arith.mulf %472, %1373 : vector<8x128xf32>
      %1375 = arith.addf %1371, %1374 : vector<8x128xf32>
      %c5_671 = arith.constant 5 : index
      %c2_672 = arith.constant 2 : index
      %1376 = memref.load %arg6[%c5_671, %c2_672] : memref<16x16xf32, #tpu.memory_space<smem>>
      %1377 = vector.broadcast %1376 : f32 to vector<8x128xf32>
      %1378 = arith.mulf %540, %1377 : vector<8x128xf32>
      %1379 = arith.addf %1375, %1378 : vector<8x128xf32>
      %c6_673 = arith.constant 6 : index
      %c2_674 = arith.constant 2 : index
      %1380 = memref.load %arg6[%c6_673, %c2_674] : memref<16x16xf32, #tpu.memory_space<smem>>
      %1381 = vector.broadcast %1380 : f32 to vector<8x128xf32>
      %1382 = arith.mulf %608, %1381 : vector<8x128xf32>
      %1383 = arith.addf %1379, %1382 : vector<8x128xf32>
      %c7_675 = arith.constant 7 : index
      %c2_676 = arith.constant 2 : index
      %1384 = memref.load %arg6[%c7_675, %c2_676] : memref<16x16xf32, #tpu.memory_space<smem>>
      %1385 = vector.broadcast %1384 : f32 to vector<8x128xf32>
      %1386 = arith.mulf %676, %1385 : vector<8x128xf32>
      %1387 = arith.addf %1383, %1386 : vector<8x128xf32>
      %c8_677 = arith.constant 8 : index
      %c2_678 = arith.constant 2 : index
      %1388 = memref.load %arg6[%c8_677, %c2_678] : memref<16x16xf32, #tpu.memory_space<smem>>
      %1389 = vector.broadcast %1388 : f32 to vector<8x128xf32>
      %1390 = arith.mulf %744, %1389 : vector<8x128xf32>
      %1391 = arith.addf %1387, %1390 : vector<8x128xf32>
      %c9_679 = arith.constant 9 : index
      %c2_680 = arith.constant 2 : index
      %1392 = memref.load %arg6[%c9_679, %c2_680] : memref<16x16xf32, #tpu.memory_space<smem>>
      %1393 = vector.broadcast %1392 : f32 to vector<8x128xf32>
      %1394 = arith.mulf %812, %1393 : vector<8x128xf32>
      %1395 = arith.addf %1391, %1394 : vector<8x128xf32>
      %c10_681 = arith.constant 10 : index
      %c2_682 = arith.constant 2 : index
      %1396 = memref.load %arg6[%c10_681, %c2_682] : memref<16x16xf32, #tpu.memory_space<smem>>
      %1397 = vector.broadcast %1396 : f32 to vector<8x128xf32>
      %1398 = arith.mulf %880, %1397 : vector<8x128xf32>
      %1399 = arith.addf %1395, %1398 : vector<8x128xf32>
      %c11_683 = arith.constant 11 : index
      %c2_684 = arith.constant 2 : index
      %1400 = memref.load %arg6[%c11_683, %c2_684] : memref<16x16xf32, #tpu.memory_space<smem>>
      %1401 = vector.broadcast %1400 : f32 to vector<8x128xf32>
      %1402 = arith.mulf %948, %1401 : vector<8x128xf32>
      %1403 = arith.addf %1399, %1402 : vector<8x128xf32>
      %c12_685 = arith.constant 12 : index
      %c2_686 = arith.constant 2 : index
      %1404 = memref.load %arg6[%c12_685, %c2_686] : memref<16x16xf32, #tpu.memory_space<smem>>
      %1405 = vector.broadcast %1404 : f32 to vector<8x128xf32>
      %1406 = arith.mulf %1016, %1405 : vector<8x128xf32>
      %1407 = arith.addf %1403, %1406 : vector<8x128xf32>
      %c13_687 = arith.constant 13 : index
      %c2_688 = arith.constant 2 : index
      %1408 = memref.load %arg6[%c13_687, %c2_688] : memref<16x16xf32, #tpu.memory_space<smem>>
      %1409 = vector.broadcast %1408 : f32 to vector<8x128xf32>
      %1410 = arith.mulf %1084, %1409 : vector<8x128xf32>
      %1411 = arith.addf %1407, %1410 : vector<8x128xf32>
      %c14_689 = arith.constant 14 : index
      %c2_690 = arith.constant 2 : index
      %1412 = memref.load %arg6[%c14_689, %c2_690] : memref<16x16xf32, #tpu.memory_space<smem>>
      %1413 = vector.broadcast %1412 : f32 to vector<8x128xf32>
      %1414 = arith.mulf %1152, %1413 : vector<8x128xf32>
      %1415 = arith.addf %1411, %1414 : vector<8x128xf32>
      %c15_691 = arith.constant 15 : index
      %c2_692 = arith.constant 2 : index
      %1416 = memref.load %arg6[%c15_691, %c2_692] : memref<16x16xf32, #tpu.memory_space<smem>>
      %1417 = vector.broadcast %1416 : f32 to vector<8x128xf32>
      %1418 = arith.mulf %1220, %1417 : vector<8x128xf32>
      %1419 = arith.addf %1415, %1418 : vector<8x128xf32>
      %c2_693 = arith.constant 2 : index
      %1420 = memref.load %arg7[%c2_693] : memref<16xf32, #tpu.memory_space<smem>>
      %1421 = vector.broadcast %1420 : f32 to vector<8x128xf32>
      %1422 = arith.addf %1419, %1421 : vector<8x128xf32>
      %cst_694 = arith.constant 0.000000e+00 : f32
      %1423 = vector.broadcast %cst_694 : f32 to vector<8x128xf32>
      %1424 = arith.maximumf %1422, %1423 : vector<8x128xf32>
      %c0_695 = arith.constant 0 : index
      %c3_696 = arith.constant 3 : index
      %1425 = memref.load %arg6[%c0_695, %c3_696] : memref<16x16xf32, #tpu.memory_space<smem>>
      %1426 = vector.broadcast %1425 : f32 to vector<8x128xf32>
      %1427 = arith.mulf %200, %1426 : vector<8x128xf32>
      %c1_697 = arith.constant 1 : index
      %c3_698 = arith.constant 3 : index
      %1428 = memref.load %arg6[%c1_697, %c3_698] : memref<16x16xf32, #tpu.memory_space<smem>>
      %1429 = vector.broadcast %1428 : f32 to vector<8x128xf32>
      %1430 = arith.mulf %268, %1429 : vector<8x128xf32>
      %1431 = arith.addf %1427, %1430 : vector<8x128xf32>
      %c2_699 = arith.constant 2 : index
      %c3_700 = arith.constant 3 : index
      %1432 = memref.load %arg6[%c2_699, %c3_700] : memref<16x16xf32, #tpu.memory_space<smem>>
      %1433 = vector.broadcast %1432 : f32 to vector<8x128xf32>
      %1434 = arith.mulf %336, %1433 : vector<8x128xf32>
      %1435 = arith.addf %1431, %1434 : vector<8x128xf32>
      %c3_701 = arith.constant 3 : index
      %c3_702 = arith.constant 3 : index
      %1436 = memref.load %arg6[%c3_701, %c3_702] : memref<16x16xf32, #tpu.memory_space<smem>>
      %1437 = vector.broadcast %1436 : f32 to vector<8x128xf32>
      %1438 = arith.mulf %404, %1437 : vector<8x128xf32>
      %1439 = arith.addf %1435, %1438 : vector<8x128xf32>
      %c4_703 = arith.constant 4 : index
      %c3_704 = arith.constant 3 : index
      %1440 = memref.load %arg6[%c4_703, %c3_704] : memref<16x16xf32, #tpu.memory_space<smem>>
      %1441 = vector.broadcast %1440 : f32 to vector<8x128xf32>
      %1442 = arith.mulf %472, %1441 : vector<8x128xf32>
      %1443 = arith.addf %1439, %1442 : vector<8x128xf32>
      %c5_705 = arith.constant 5 : index
      %c3_706 = arith.constant 3 : index
      %1444 = memref.load %arg6[%c5_705, %c3_706] : memref<16x16xf32, #tpu.memory_space<smem>>
      %1445 = vector.broadcast %1444 : f32 to vector<8x128xf32>
      %1446 = arith.mulf %540, %1445 : vector<8x128xf32>
      %1447 = arith.addf %1443, %1446 : vector<8x128xf32>
      %c6_707 = arith.constant 6 : index
      %c3_708 = arith.constant 3 : index
      %1448 = memref.load %arg6[%c6_707, %c3_708] : memref<16x16xf32, #tpu.memory_space<smem>>
      %1449 = vector.broadcast %1448 : f32 to vector<8x128xf32>
      %1450 = arith.mulf %608, %1449 : vector<8x128xf32>
      %1451 = arith.addf %1447, %1450 : vector<8x128xf32>
      %c7_709 = arith.constant 7 : index
      %c3_710 = arith.constant 3 : index
      %1452 = memref.load %arg6[%c7_709, %c3_710] : memref<16x16xf32, #tpu.memory_space<smem>>
      %1453 = vector.broadcast %1452 : f32 to vector<8x128xf32>
      %1454 = arith.mulf %676, %1453 : vector<8x128xf32>
      %1455 = arith.addf %1451, %1454 : vector<8x128xf32>
      %c8_711 = arith.constant 8 : index
      %c3_712 = arith.constant 3 : index
      %1456 = memref.load %arg6[%c8_711, %c3_712] : memref<16x16xf32, #tpu.memory_space<smem>>
      %1457 = vector.broadcast %1456 : f32 to vector<8x128xf32>
      %1458 = arith.mulf %744, %1457 : vector<8x128xf32>
      %1459 = arith.addf %1455, %1458 : vector<8x128xf32>
      %c9_713 = arith.constant 9 : index
      %c3_714 = arith.constant 3 : index
      %1460 = memref.load %arg6[%c9_713, %c3_714] : memref<16x16xf32, #tpu.memory_space<smem>>
      %1461 = vector.broadcast %1460 : f32 to vector<8x128xf32>
      %1462 = arith.mulf %812, %1461 : vector<8x128xf32>
      %1463 = arith.addf %1459, %1462 : vector<8x128xf32>
      %c10_715 = arith.constant 10 : index
      %c3_716 = arith.constant 3 : index
      %1464 = memref.load %arg6[%c10_715, %c3_716] : memref<16x16xf32, #tpu.memory_space<smem>>
      %1465 = vector.broadcast %1464 : f32 to vector<8x128xf32>
      %1466 = arith.mulf %880, %1465 : vector<8x128xf32>
      %1467 = arith.addf %1463, %1466 : vector<8x128xf32>
      %c11_717 = arith.constant 11 : index
      %c3_718 = arith.constant 3 : index
      %1468 = memref.load %arg6[%c11_717, %c3_718] : memref<16x16xf32, #tpu.memory_space<smem>>
      %1469 = vector.broadcast %1468 : f32 to vector<8x128xf32>
      %1470 = arith.mulf %948, %1469 : vector<8x128xf32>
      %1471 = arith.addf %1467, %1470 : vector<8x128xf32>
      %c12_719 = arith.constant 12 : index
      %c3_720 = arith.constant 3 : index
      %1472 = memref.load %arg6[%c12_719, %c3_720] : memref<16x16xf32, #tpu.memory_space<smem>>
      %1473 = vector.broadcast %1472 : f32 to vector<8x128xf32>
      %1474 = arith.mulf %1016, %1473 : vector<8x128xf32>
      %1475 = arith.addf %1471, %1474 : vector<8x128xf32>
      %c13_721 = arith.constant 13 : index
      %c3_722 = arith.constant 3 : index
      %1476 = memref.load %arg6[%c13_721, %c3_722] : memref<16x16xf32, #tpu.memory_space<smem>>
      %1477 = vector.broadcast %1476 : f32 to vector<8x128xf32>
      %1478 = arith.mulf %1084, %1477 : vector<8x128xf32>
      %1479 = arith.addf %1475, %1478 : vector<8x128xf32>
      %c14_723 = arith.constant 14 : index
      %c3_724 = arith.constant 3 : index
      %1480 = memref.load %arg6[%c14_723, %c3_724] : memref<16x16xf32, #tpu.memory_space<smem>>
      %1481 = vector.broadcast %1480 : f32 to vector<8x128xf32>
      %1482 = arith.mulf %1152, %1481 : vector<8x128xf32>
      %1483 = arith.addf %1479, %1482 : vector<8x128xf32>
      %c15_725 = arith.constant 15 : index
      %c3_726 = arith.constant 3 : index
      %1484 = memref.load %arg6[%c15_725, %c3_726] : memref<16x16xf32, #tpu.memory_space<smem>>
      %1485 = vector.broadcast %1484 : f32 to vector<8x128xf32>
      %1486 = arith.mulf %1220, %1485 : vector<8x128xf32>
      %1487 = arith.addf %1483, %1486 : vector<8x128xf32>
      %c3_727 = arith.constant 3 : index
      %1488 = memref.load %arg7[%c3_727] : memref<16xf32, #tpu.memory_space<smem>>
      %1489 = vector.broadcast %1488 : f32 to vector<8x128xf32>
      %1490 = arith.addf %1487, %1489 : vector<8x128xf32>
      %cst_728 = arith.constant 0.000000e+00 : f32
      %1491 = vector.broadcast %cst_728 : f32 to vector<8x128xf32>
      %1492 = arith.maximumf %1490, %1491 : vector<8x128xf32>
      %c0_729 = arith.constant 0 : index
      %c4_730 = arith.constant 4 : index
      %1493 = memref.load %arg6[%c0_729, %c4_730] : memref<16x16xf32, #tpu.memory_space<smem>>
      %1494 = vector.broadcast %1493 : f32 to vector<8x128xf32>
      %1495 = arith.mulf %200, %1494 : vector<8x128xf32>
      %c1_731 = arith.constant 1 : index
      %c4_732 = arith.constant 4 : index
      %1496 = memref.load %arg6[%c1_731, %c4_732] : memref<16x16xf32, #tpu.memory_space<smem>>
      %1497 = vector.broadcast %1496 : f32 to vector<8x128xf32>
      %1498 = arith.mulf %268, %1497 : vector<8x128xf32>
      %1499 = arith.addf %1495, %1498 : vector<8x128xf32>
      %c2_733 = arith.constant 2 : index
      %c4_734 = arith.constant 4 : index
      %1500 = memref.load %arg6[%c2_733, %c4_734] : memref<16x16xf32, #tpu.memory_space<smem>>
      %1501 = vector.broadcast %1500 : f32 to vector<8x128xf32>
      %1502 = arith.mulf %336, %1501 : vector<8x128xf32>
      %1503 = arith.addf %1499, %1502 : vector<8x128xf32>
      %c3_735 = arith.constant 3 : index
      %c4_736 = arith.constant 4 : index
      %1504 = memref.load %arg6[%c3_735, %c4_736] : memref<16x16xf32, #tpu.memory_space<smem>>
      %1505 = vector.broadcast %1504 : f32 to vector<8x128xf32>
      %1506 = arith.mulf %404, %1505 : vector<8x128xf32>
      %1507 = arith.addf %1503, %1506 : vector<8x128xf32>
      %c4_737 = arith.constant 4 : index
      %c4_738 = arith.constant 4 : index
      %1508 = memref.load %arg6[%c4_737, %c4_738] : memref<16x16xf32, #tpu.memory_space<smem>>
      %1509 = vector.broadcast %1508 : f32 to vector<8x128xf32>
      %1510 = arith.mulf %472, %1509 : vector<8x128xf32>
      %1511 = arith.addf %1507, %1510 : vector<8x128xf32>
      %c5_739 = arith.constant 5 : index
      %c4_740 = arith.constant 4 : index
      %1512 = memref.load %arg6[%c5_739, %c4_740] : memref<16x16xf32, #tpu.memory_space<smem>>
      %1513 = vector.broadcast %1512 : f32 to vector<8x128xf32>
      %1514 = arith.mulf %540, %1513 : vector<8x128xf32>
      %1515 = arith.addf %1511, %1514 : vector<8x128xf32>
      %c6_741 = arith.constant 6 : index
      %c4_742 = arith.constant 4 : index
      %1516 = memref.load %arg6[%c6_741, %c4_742] : memref<16x16xf32, #tpu.memory_space<smem>>
      %1517 = vector.broadcast %1516 : f32 to vector<8x128xf32>
      %1518 = arith.mulf %608, %1517 : vector<8x128xf32>
      %1519 = arith.addf %1515, %1518 : vector<8x128xf32>
      %c7_743 = arith.constant 7 : index
      %c4_744 = arith.constant 4 : index
      %1520 = memref.load %arg6[%c7_743, %c4_744] : memref<16x16xf32, #tpu.memory_space<smem>>
      %1521 = vector.broadcast %1520 : f32 to vector<8x128xf32>
      %1522 = arith.mulf %676, %1521 : vector<8x128xf32>
      %1523 = arith.addf %1519, %1522 : vector<8x128xf32>
      %c8_745 = arith.constant 8 : index
      %c4_746 = arith.constant 4 : index
      %1524 = memref.load %arg6[%c8_745, %c4_746] : memref<16x16xf32, #tpu.memory_space<smem>>
      %1525 = vector.broadcast %1524 : f32 to vector<8x128xf32>
      %1526 = arith.mulf %744, %1525 : vector<8x128xf32>
      %1527 = arith.addf %1523, %1526 : vector<8x128xf32>
      %c9_747 = arith.constant 9 : index
      %c4_748 = arith.constant 4 : index
      %1528 = memref.load %arg6[%c9_747, %c4_748] : memref<16x16xf32, #tpu.memory_space<smem>>
      %1529 = vector.broadcast %1528 : f32 to vector<8x128xf32>
      %1530 = arith.mulf %812, %1529 : vector<8x128xf32>
      %1531 = arith.addf %1527, %1530 : vector<8x128xf32>
      %c10_749 = arith.constant 10 : index
      %c4_750 = arith.constant 4 : index
      %1532 = memref.load %arg6[%c10_749, %c4_750] : memref<16x16xf32, #tpu.memory_space<smem>>
      %1533 = vector.broadcast %1532 : f32 to vector<8x128xf32>
      %1534 = arith.mulf %880, %1533 : vector<8x128xf32>
      %1535 = arith.addf %1531, %1534 : vector<8x128xf32>
      %c11_751 = arith.constant 11 : index
      %c4_752 = arith.constant 4 : index
      %1536 = memref.load %arg6[%c11_751, %c4_752] : memref<16x16xf32, #tpu.memory_space<smem>>
      %1537 = vector.broadcast %1536 : f32 to vector<8x128xf32>
      %1538 = arith.mulf %948, %1537 : vector<8x128xf32>
      %1539 = arith.addf %1535, %1538 : vector<8x128xf32>
      %c12_753 = arith.constant 12 : index
      %c4_754 = arith.constant 4 : index
      %1540 = memref.load %arg6[%c12_753, %c4_754] : memref<16x16xf32, #tpu.memory_space<smem>>
      %1541 = vector.broadcast %1540 : f32 to vector<8x128xf32>
      %1542 = arith.mulf %1016, %1541 : vector<8x128xf32>
      %1543 = arith.addf %1539, %1542 : vector<8x128xf32>
      %c13_755 = arith.constant 13 : index
      %c4_756 = arith.constant 4 : index
      %1544 = memref.load %arg6[%c13_755, %c4_756] : memref<16x16xf32, #tpu.memory_space<smem>>
      %1545 = vector.broadcast %1544 : f32 to vector<8x128xf32>
      %1546 = arith.mulf %1084, %1545 : vector<8x128xf32>
      %1547 = arith.addf %1543, %1546 : vector<8x128xf32>
      %c14_757 = arith.constant 14 : index
      %c4_758 = arith.constant 4 : index
      %1548 = memref.load %arg6[%c14_757, %c4_758] : memref<16x16xf32, #tpu.memory_space<smem>>
      %1549 = vector.broadcast %1548 : f32 to vector<8x128xf32>
      %1550 = arith.mulf %1152, %1549 : vector<8x128xf32>
      %1551 = arith.addf %1547, %1550 : vector<8x128xf32>
      %c15_759 = arith.constant 15 : index
      %c4_760 = arith.constant 4 : index
      %1552 = memref.load %arg6[%c15_759, %c4_760] : memref<16x16xf32, #tpu.memory_space<smem>>
      %1553 = vector.broadcast %1552 : f32 to vector<8x128xf32>
      %1554 = arith.mulf %1220, %1553 : vector<8x128xf32>
      %1555 = arith.addf %1551, %1554 : vector<8x128xf32>
      %c4_761 = arith.constant 4 : index
      %1556 = memref.load %arg7[%c4_761] : memref<16xf32, #tpu.memory_space<smem>>
      %1557 = vector.broadcast %1556 : f32 to vector<8x128xf32>
      %1558 = arith.addf %1555, %1557 : vector<8x128xf32>
      %cst_762 = arith.constant 0.000000e+00 : f32
      %1559 = vector.broadcast %cst_762 : f32 to vector<8x128xf32>
      %1560 = arith.maximumf %1558, %1559 : vector<8x128xf32>
      %c0_763 = arith.constant 0 : index
      %c5_764 = arith.constant 5 : index
      %1561 = memref.load %arg6[%c0_763, %c5_764] : memref<16x16xf32, #tpu.memory_space<smem>>
      %1562 = vector.broadcast %1561 : f32 to vector<8x128xf32>
      %1563 = arith.mulf %200, %1562 : vector<8x128xf32>
      %c1_765 = arith.constant 1 : index
      %c5_766 = arith.constant 5 : index
      %1564 = memref.load %arg6[%c1_765, %c5_766] : memref<16x16xf32, #tpu.memory_space<smem>>
      %1565 = vector.broadcast %1564 : f32 to vector<8x128xf32>
      %1566 = arith.mulf %268, %1565 : vector<8x128xf32>
      %1567 = arith.addf %1563, %1566 : vector<8x128xf32>
      %c2_767 = arith.constant 2 : index
      %c5_768 = arith.constant 5 : index
      %1568 = memref.load %arg6[%c2_767, %c5_768] : memref<16x16xf32, #tpu.memory_space<smem>>
      %1569 = vector.broadcast %1568 : f32 to vector<8x128xf32>
      %1570 = arith.mulf %336, %1569 : vector<8x128xf32>
      %1571 = arith.addf %1567, %1570 : vector<8x128xf32>
      %c3_769 = arith.constant 3 : index
      %c5_770 = arith.constant 5 : index
      %1572 = memref.load %arg6[%c3_769, %c5_770] : memref<16x16xf32, #tpu.memory_space<smem>>
      %1573 = vector.broadcast %1572 : f32 to vector<8x128xf32>
      %1574 = arith.mulf %404, %1573 : vector<8x128xf32>
      %1575 = arith.addf %1571, %1574 : vector<8x128xf32>
      %c4_771 = arith.constant 4 : index
      %c5_772 = arith.constant 5 : index
      %1576 = memref.load %arg6[%c4_771, %c5_772] : memref<16x16xf32, #tpu.memory_space<smem>>
      %1577 = vector.broadcast %1576 : f32 to vector<8x128xf32>
      %1578 = arith.mulf %472, %1577 : vector<8x128xf32>
      %1579 = arith.addf %1575, %1578 : vector<8x128xf32>
      %c5_773 = arith.constant 5 : index
      %c5_774 = arith.constant 5 : index
      %1580 = memref.load %arg6[%c5_773, %c5_774] : memref<16x16xf32, #tpu.memory_space<smem>>
      %1581 = vector.broadcast %1580 : f32 to vector<8x128xf32>
      %1582 = arith.mulf %540, %1581 : vector<8x128xf32>
      %1583 = arith.addf %1579, %1582 : vector<8x128xf32>
      %c6_775 = arith.constant 6 : index
      %c5_776 = arith.constant 5 : index
      %1584 = memref.load %arg6[%c6_775, %c5_776] : memref<16x16xf32, #tpu.memory_space<smem>>
      %1585 = vector.broadcast %1584 : f32 to vector<8x128xf32>
      %1586 = arith.mulf %608, %1585 : vector<8x128xf32>
      %1587 = arith.addf %1583, %1586 : vector<8x128xf32>
      %c7_777 = arith.constant 7 : index
      %c5_778 = arith.constant 5 : index
      %1588 = memref.load %arg6[%c7_777, %c5_778] : memref<16x16xf32, #tpu.memory_space<smem>>
      %1589 = vector.broadcast %1588 : f32 to vector<8x128xf32>
      %1590 = arith.mulf %676, %1589 : vector<8x128xf32>
      %1591 = arith.addf %1587, %1590 : vector<8x128xf32>
      %c8_779 = arith.constant 8 : index
      %c5_780 = arith.constant 5 : index
      %1592 = memref.load %arg6[%c8_779, %c5_780] : memref<16x16xf32, #tpu.memory_space<smem>>
      %1593 = vector.broadcast %1592 : f32 to vector<8x128xf32>
      %1594 = arith.mulf %744, %1593 : vector<8x128xf32>
      %1595 = arith.addf %1591, %1594 : vector<8x128xf32>
      %c9_781 = arith.constant 9 : index
      %c5_782 = arith.constant 5 : index
      %1596 = memref.load %arg6[%c9_781, %c5_782] : memref<16x16xf32, #tpu.memory_space<smem>>
      %1597 = vector.broadcast %1596 : f32 to vector<8x128xf32>
      %1598 = arith.mulf %812, %1597 : vector<8x128xf32>
      %1599 = arith.addf %1595, %1598 : vector<8x128xf32>
      %c10_783 = arith.constant 10 : index
      %c5_784 = arith.constant 5 : index
      %1600 = memref.load %arg6[%c10_783, %c5_784] : memref<16x16xf32, #tpu.memory_space<smem>>
      %1601 = vector.broadcast %1600 : f32 to vector<8x128xf32>
      %1602 = arith.mulf %880, %1601 : vector<8x128xf32>
      %1603 = arith.addf %1599, %1602 : vector<8x128xf32>
      %c11_785 = arith.constant 11 : index
      %c5_786 = arith.constant 5 : index
      %1604 = memref.load %arg6[%c11_785, %c5_786] : memref<16x16xf32, #tpu.memory_space<smem>>
      %1605 = vector.broadcast %1604 : f32 to vector<8x128xf32>
      %1606 = arith.mulf %948, %1605 : vector<8x128xf32>
      %1607 = arith.addf %1603, %1606 : vector<8x128xf32>
      %c12_787 = arith.constant 12 : index
      %c5_788 = arith.constant 5 : index
      %1608 = memref.load %arg6[%c12_787, %c5_788] : memref<16x16xf32, #tpu.memory_space<smem>>
      %1609 = vector.broadcast %1608 : f32 to vector<8x128xf32>
      %1610 = arith.mulf %1016, %1609 : vector<8x128xf32>
      %1611 = arith.addf %1607, %1610 : vector<8x128xf32>
      %c13_789 = arith.constant 13 : index
      %c5_790 = arith.constant 5 : index
      %1612 = memref.load %arg6[%c13_789, %c5_790] : memref<16x16xf32, #tpu.memory_space<smem>>
      %1613 = vector.broadcast %1612 : f32 to vector<8x128xf32>
      %1614 = arith.mulf %1084, %1613 : vector<8x128xf32>
      %1615 = arith.addf %1611, %1614 : vector<8x128xf32>
      %c14_791 = arith.constant 14 : index
      %c5_792 = arith.constant 5 : index
      %1616 = memref.load %arg6[%c14_791, %c5_792] : memref<16x16xf32, #tpu.memory_space<smem>>
      %1617 = vector.broadcast %1616 : f32 to vector<8x128xf32>
      %1618 = arith.mulf %1152, %1617 : vector<8x128xf32>
      %1619 = arith.addf %1615, %1618 : vector<8x128xf32>
      %c15_793 = arith.constant 15 : index
      %c5_794 = arith.constant 5 : index
      %1620 = memref.load %arg6[%c15_793, %c5_794] : memref<16x16xf32, #tpu.memory_space<smem>>
      %1621 = vector.broadcast %1620 : f32 to vector<8x128xf32>
      %1622 = arith.mulf %1220, %1621 : vector<8x128xf32>
      %1623 = arith.addf %1619, %1622 : vector<8x128xf32>
      %c5_795 = arith.constant 5 : index
      %1624 = memref.load %arg7[%c5_795] : memref<16xf32, #tpu.memory_space<smem>>
      %1625 = vector.broadcast %1624 : f32 to vector<8x128xf32>
      %1626 = arith.addf %1623, %1625 : vector<8x128xf32>
      %cst_796 = arith.constant 0.000000e+00 : f32
      %1627 = vector.broadcast %cst_796 : f32 to vector<8x128xf32>
      %1628 = arith.maximumf %1626, %1627 : vector<8x128xf32>
      %c0_797 = arith.constant 0 : index
      %c6_798 = arith.constant 6 : index
      %1629 = memref.load %arg6[%c0_797, %c6_798] : memref<16x16xf32, #tpu.memory_space<smem>>
      %1630 = vector.broadcast %1629 : f32 to vector<8x128xf32>
      %1631 = arith.mulf %200, %1630 : vector<8x128xf32>
      %c1_799 = arith.constant 1 : index
      %c6_800 = arith.constant 6 : index
      %1632 = memref.load %arg6[%c1_799, %c6_800] : memref<16x16xf32, #tpu.memory_space<smem>>
      %1633 = vector.broadcast %1632 : f32 to vector<8x128xf32>
      %1634 = arith.mulf %268, %1633 : vector<8x128xf32>
      %1635 = arith.addf %1631, %1634 : vector<8x128xf32>
      %c2_801 = arith.constant 2 : index
      %c6_802 = arith.constant 6 : index
      %1636 = memref.load %arg6[%c2_801, %c6_802] : memref<16x16xf32, #tpu.memory_space<smem>>
      %1637 = vector.broadcast %1636 : f32 to vector<8x128xf32>
      %1638 = arith.mulf %336, %1637 : vector<8x128xf32>
      %1639 = arith.addf %1635, %1638 : vector<8x128xf32>
      %c3_803 = arith.constant 3 : index
      %c6_804 = arith.constant 6 : index
      %1640 = memref.load %arg6[%c3_803, %c6_804] : memref<16x16xf32, #tpu.memory_space<smem>>
      %1641 = vector.broadcast %1640 : f32 to vector<8x128xf32>
      %1642 = arith.mulf %404, %1641 : vector<8x128xf32>
      %1643 = arith.addf %1639, %1642 : vector<8x128xf32>
      %c4_805 = arith.constant 4 : index
      %c6_806 = arith.constant 6 : index
      %1644 = memref.load %arg6[%c4_805, %c6_806] : memref<16x16xf32, #tpu.memory_space<smem>>
      %1645 = vector.broadcast %1644 : f32 to vector<8x128xf32>
      %1646 = arith.mulf %472, %1645 : vector<8x128xf32>
      %1647 = arith.addf %1643, %1646 : vector<8x128xf32>
      %c5_807 = arith.constant 5 : index
      %c6_808 = arith.constant 6 : index
      %1648 = memref.load %arg6[%c5_807, %c6_808] : memref<16x16xf32, #tpu.memory_space<smem>>
      %1649 = vector.broadcast %1648 : f32 to vector<8x128xf32>
      %1650 = arith.mulf %540, %1649 : vector<8x128xf32>
      %1651 = arith.addf %1647, %1650 : vector<8x128xf32>
      %c6_809 = arith.constant 6 : index
      %c6_810 = arith.constant 6 : index
      %1652 = memref.load %arg6[%c6_809, %c6_810] : memref<16x16xf32, #tpu.memory_space<smem>>
      %1653 = vector.broadcast %1652 : f32 to vector<8x128xf32>
      %1654 = arith.mulf %608, %1653 : vector<8x128xf32>
      %1655 = arith.addf %1651, %1654 : vector<8x128xf32>
      %c7_811 = arith.constant 7 : index
      %c6_812 = arith.constant 6 : index
      %1656 = memref.load %arg6[%c7_811, %c6_812] : memref<16x16xf32, #tpu.memory_space<smem>>
      %1657 = vector.broadcast %1656 : f32 to vector<8x128xf32>
      %1658 = arith.mulf %676, %1657 : vector<8x128xf32>
      %1659 = arith.addf %1655, %1658 : vector<8x128xf32>
      %c8_813 = arith.constant 8 : index
      %c6_814 = arith.constant 6 : index
      %1660 = memref.load %arg6[%c8_813, %c6_814] : memref<16x16xf32, #tpu.memory_space<smem>>
      %1661 = vector.broadcast %1660 : f32 to vector<8x128xf32>
      %1662 = arith.mulf %744, %1661 : vector<8x128xf32>
      %1663 = arith.addf %1659, %1662 : vector<8x128xf32>
      %c9_815 = arith.constant 9 : index
      %c6_816 = arith.constant 6 : index
      %1664 = memref.load %arg6[%c9_815, %c6_816] : memref<16x16xf32, #tpu.memory_space<smem>>
      %1665 = vector.broadcast %1664 : f32 to vector<8x128xf32>
      %1666 = arith.mulf %812, %1665 : vector<8x128xf32>
      %1667 = arith.addf %1663, %1666 : vector<8x128xf32>
      %c10_817 = arith.constant 10 : index
      %c6_818 = arith.constant 6 : index
      %1668 = memref.load %arg6[%c10_817, %c6_818] : memref<16x16xf32, #tpu.memory_space<smem>>
      %1669 = vector.broadcast %1668 : f32 to vector<8x128xf32>
      %1670 = arith.mulf %880, %1669 : vector<8x128xf32>
      %1671 = arith.addf %1667, %1670 : vector<8x128xf32>
      %c11_819 = arith.constant 11 : index
      %c6_820 = arith.constant 6 : index
      %1672 = memref.load %arg6[%c11_819, %c6_820] : memref<16x16xf32, #tpu.memory_space<smem>>
      %1673 = vector.broadcast %1672 : f32 to vector<8x128xf32>
      %1674 = arith.mulf %948, %1673 : vector<8x128xf32>
      %1675 = arith.addf %1671, %1674 : vector<8x128xf32>
      %c12_821 = arith.constant 12 : index
      %c6_822 = arith.constant 6 : index
      %1676 = memref.load %arg6[%c12_821, %c6_822] : memref<16x16xf32, #tpu.memory_space<smem>>
      %1677 = vector.broadcast %1676 : f32 to vector<8x128xf32>
      %1678 = arith.mulf %1016, %1677 : vector<8x128xf32>
      %1679 = arith.addf %1675, %1678 : vector<8x128xf32>
      %c13_823 = arith.constant 13 : index
      %c6_824 = arith.constant 6 : index
      %1680 = memref.load %arg6[%c13_823, %c6_824] : memref<16x16xf32, #tpu.memory_space<smem>>
      %1681 = vector.broadcast %1680 : f32 to vector<8x128xf32>
      %1682 = arith.mulf %1084, %1681 : vector<8x128xf32>
      %1683 = arith.addf %1679, %1682 : vector<8x128xf32>
      %c14_825 = arith.constant 14 : index
      %c6_826 = arith.constant 6 : index
      %1684 = memref.load %arg6[%c14_825, %c6_826] : memref<16x16xf32, #tpu.memory_space<smem>>
      %1685 = vector.broadcast %1684 : f32 to vector<8x128xf32>
      %1686 = arith.mulf %1152, %1685 : vector<8x128xf32>
      %1687 = arith.addf %1683, %1686 : vector<8x128xf32>
      %c15_827 = arith.constant 15 : index
      %c6_828 = arith.constant 6 : index
      %1688 = memref.load %arg6[%c15_827, %c6_828] : memref<16x16xf32, #tpu.memory_space<smem>>
      %1689 = vector.broadcast %1688 : f32 to vector<8x128xf32>
      %1690 = arith.mulf %1220, %1689 : vector<8x128xf32>
      %1691 = arith.addf %1687, %1690 : vector<8x128xf32>
      %c6_829 = arith.constant 6 : index
      %1692 = memref.load %arg7[%c6_829] : memref<16xf32, #tpu.memory_space<smem>>
      %1693 = vector.broadcast %1692 : f32 to vector<8x128xf32>
      %1694 = arith.addf %1691, %1693 : vector<8x128xf32>
      %cst_830 = arith.constant 0.000000e+00 : f32
      %1695 = vector.broadcast %cst_830 : f32 to vector<8x128xf32>
      %1696 = arith.maximumf %1694, %1695 : vector<8x128xf32>
      %c0_831 = arith.constant 0 : index
      %c7_832 = arith.constant 7 : index
      %1697 = memref.load %arg6[%c0_831, %c7_832] : memref<16x16xf32, #tpu.memory_space<smem>>
      %1698 = vector.broadcast %1697 : f32 to vector<8x128xf32>
      %1699 = arith.mulf %200, %1698 : vector<8x128xf32>
      %c1_833 = arith.constant 1 : index
      %c7_834 = arith.constant 7 : index
      %1700 = memref.load %arg6[%c1_833, %c7_834] : memref<16x16xf32, #tpu.memory_space<smem>>
      %1701 = vector.broadcast %1700 : f32 to vector<8x128xf32>
      %1702 = arith.mulf %268, %1701 : vector<8x128xf32>
      %1703 = arith.addf %1699, %1702 : vector<8x128xf32>
      %c2_835 = arith.constant 2 : index
      %c7_836 = arith.constant 7 : index
      %1704 = memref.load %arg6[%c2_835, %c7_836] : memref<16x16xf32, #tpu.memory_space<smem>>
      %1705 = vector.broadcast %1704 : f32 to vector<8x128xf32>
      %1706 = arith.mulf %336, %1705 : vector<8x128xf32>
      %1707 = arith.addf %1703, %1706 : vector<8x128xf32>
      %c3_837 = arith.constant 3 : index
      %c7_838 = arith.constant 7 : index
      %1708 = memref.load %arg6[%c3_837, %c7_838] : memref<16x16xf32, #tpu.memory_space<smem>>
      %1709 = vector.broadcast %1708 : f32 to vector<8x128xf32>
      %1710 = arith.mulf %404, %1709 : vector<8x128xf32>
      %1711 = arith.addf %1707, %1710 : vector<8x128xf32>
      %c4_839 = arith.constant 4 : index
      %c7_840 = arith.constant 7 : index
      %1712 = memref.load %arg6[%c4_839, %c7_840] : memref<16x16xf32, #tpu.memory_space<smem>>
      %1713 = vector.broadcast %1712 : f32 to vector<8x128xf32>
      %1714 = arith.mulf %472, %1713 : vector<8x128xf32>
      %1715 = arith.addf %1711, %1714 : vector<8x128xf32>
      %c5_841 = arith.constant 5 : index
      %c7_842 = arith.constant 7 : index
      %1716 = memref.load %arg6[%c5_841, %c7_842] : memref<16x16xf32, #tpu.memory_space<smem>>
      %1717 = vector.broadcast %1716 : f32 to vector<8x128xf32>
      %1718 = arith.mulf %540, %1717 : vector<8x128xf32>
      %1719 = arith.addf %1715, %1718 : vector<8x128xf32>
      %c6_843 = arith.constant 6 : index
      %c7_844 = arith.constant 7 : index
      %1720 = memref.load %arg6[%c6_843, %c7_844] : memref<16x16xf32, #tpu.memory_space<smem>>
      %1721 = vector.broadcast %1720 : f32 to vector<8x128xf32>
      %1722 = arith.mulf %608, %1721 : vector<8x128xf32>
      %1723 = arith.addf %1719, %1722 : vector<8x128xf32>
      %c7_845 = arith.constant 7 : index
      %c7_846 = arith.constant 7 : index
      %1724 = memref.load %arg6[%c7_845, %c7_846] : memref<16x16xf32, #tpu.memory_space<smem>>
      %1725 = vector.broadcast %1724 : f32 to vector<8x128xf32>
      %1726 = arith.mulf %676, %1725 : vector<8x128xf32>
      %1727 = arith.addf %1723, %1726 : vector<8x128xf32>
      %c8_847 = arith.constant 8 : index
      %c7_848 = arith.constant 7 : index
      %1728 = memref.load %arg6[%c8_847, %c7_848] : memref<16x16xf32, #tpu.memory_space<smem>>
      %1729 = vector.broadcast %1728 : f32 to vector<8x128xf32>
      %1730 = arith.mulf %744, %1729 : vector<8x128xf32>
      %1731 = arith.addf %1727, %1730 : vector<8x128xf32>
      %c9_849 = arith.constant 9 : index
      %c7_850 = arith.constant 7 : index
      %1732 = memref.load %arg6[%c9_849, %c7_850] : memref<16x16xf32, #tpu.memory_space<smem>>
      %1733 = vector.broadcast %1732 : f32 to vector<8x128xf32>
      %1734 = arith.mulf %812, %1733 : vector<8x128xf32>
      %1735 = arith.addf %1731, %1734 : vector<8x128xf32>
      %c10_851 = arith.constant 10 : index
      %c7_852 = arith.constant 7 : index
      %1736 = memref.load %arg6[%c10_851, %c7_852] : memref<16x16xf32, #tpu.memory_space<smem>>
      %1737 = vector.broadcast %1736 : f32 to vector<8x128xf32>
      %1738 = arith.mulf %880, %1737 : vector<8x128xf32>
      %1739 = arith.addf %1735, %1738 : vector<8x128xf32>
      %c11_853 = arith.constant 11 : index
      %c7_854 = arith.constant 7 : index
      %1740 = memref.load %arg6[%c11_853, %c7_854] : memref<16x16xf32, #tpu.memory_space<smem>>
      %1741 = vector.broadcast %1740 : f32 to vector<8x128xf32>
      %1742 = arith.mulf %948, %1741 : vector<8x128xf32>
      %1743 = arith.addf %1739, %1742 : vector<8x128xf32>
      %c12_855 = arith.constant 12 : index
      %c7_856 = arith.constant 7 : index
      %1744 = memref.load %arg6[%c12_855, %c7_856] : memref<16x16xf32, #tpu.memory_space<smem>>
      %1745 = vector.broadcast %1744 : f32 to vector<8x128xf32>
      %1746 = arith.mulf %1016, %1745 : vector<8x128xf32>
      %1747 = arith.addf %1743, %1746 : vector<8x128xf32>
      %c13_857 = arith.constant 13 : index
      %c7_858 = arith.constant 7 : index
      %1748 = memref.load %arg6[%c13_857, %c7_858] : memref<16x16xf32, #tpu.memory_space<smem>>
      %1749 = vector.broadcast %1748 : f32 to vector<8x128xf32>
      %1750 = arith.mulf %1084, %1749 : vector<8x128xf32>
      %1751 = arith.addf %1747, %1750 : vector<8x128xf32>
      %c14_859 = arith.constant 14 : index
      %c7_860 = arith.constant 7 : index
      %1752 = memref.load %arg6[%c14_859, %c7_860] : memref<16x16xf32, #tpu.memory_space<smem>>
      %1753 = vector.broadcast %1752 : f32 to vector<8x128xf32>
      %1754 = arith.mulf %1152, %1753 : vector<8x128xf32>
      %1755 = arith.addf %1751, %1754 : vector<8x128xf32>
      %c15_861 = arith.constant 15 : index
      %c7_862 = arith.constant 7 : index
      %1756 = memref.load %arg6[%c15_861, %c7_862] : memref<16x16xf32, #tpu.memory_space<smem>>
      %1757 = vector.broadcast %1756 : f32 to vector<8x128xf32>
      %1758 = arith.mulf %1220, %1757 : vector<8x128xf32>
      %1759 = arith.addf %1755, %1758 : vector<8x128xf32>
      %c7_863 = arith.constant 7 : index
      %1760 = memref.load %arg7[%c7_863] : memref<16xf32, #tpu.memory_space<smem>>
      %1761 = vector.broadcast %1760 : f32 to vector<8x128xf32>
      %1762 = arith.addf %1759, %1761 : vector<8x128xf32>
      %cst_864 = arith.constant 0.000000e+00 : f32
      %1763 = vector.broadcast %cst_864 : f32 to vector<8x128xf32>
      %1764 = arith.maximumf %1762, %1763 : vector<8x128xf32>
      %c0_865 = arith.constant 0 : index
      %c8_866 = arith.constant 8 : index
      %1765 = memref.load %arg6[%c0_865, %c8_866] : memref<16x16xf32, #tpu.memory_space<smem>>
      %1766 = vector.broadcast %1765 : f32 to vector<8x128xf32>
      %1767 = arith.mulf %200, %1766 : vector<8x128xf32>
      %c1_867 = arith.constant 1 : index
      %c8_868 = arith.constant 8 : index
      %1768 = memref.load %arg6[%c1_867, %c8_868] : memref<16x16xf32, #tpu.memory_space<smem>>
      %1769 = vector.broadcast %1768 : f32 to vector<8x128xf32>
      %1770 = arith.mulf %268, %1769 : vector<8x128xf32>
      %1771 = arith.addf %1767, %1770 : vector<8x128xf32>
      %c2_869 = arith.constant 2 : index
      %c8_870 = arith.constant 8 : index
      %1772 = memref.load %arg6[%c2_869, %c8_870] : memref<16x16xf32, #tpu.memory_space<smem>>
      %1773 = vector.broadcast %1772 : f32 to vector<8x128xf32>
      %1774 = arith.mulf %336, %1773 : vector<8x128xf32>
      %1775 = arith.addf %1771, %1774 : vector<8x128xf32>
      %c3_871 = arith.constant 3 : index
      %c8_872 = arith.constant 8 : index
      %1776 = memref.load %arg6[%c3_871, %c8_872] : memref<16x16xf32, #tpu.memory_space<smem>>
      %1777 = vector.broadcast %1776 : f32 to vector<8x128xf32>
      %1778 = arith.mulf %404, %1777 : vector<8x128xf32>
      %1779 = arith.addf %1775, %1778 : vector<8x128xf32>
      %c4_873 = arith.constant 4 : index
      %c8_874 = arith.constant 8 : index
      %1780 = memref.load %arg6[%c4_873, %c8_874] : memref<16x16xf32, #tpu.memory_space<smem>>
      %1781 = vector.broadcast %1780 : f32 to vector<8x128xf32>
      %1782 = arith.mulf %472, %1781 : vector<8x128xf32>
      %1783 = arith.addf %1779, %1782 : vector<8x128xf32>
      %c5_875 = arith.constant 5 : index
      %c8_876 = arith.constant 8 : index
      %1784 = memref.load %arg6[%c5_875, %c8_876] : memref<16x16xf32, #tpu.memory_space<smem>>
      %1785 = vector.broadcast %1784 : f32 to vector<8x128xf32>
      %1786 = arith.mulf %540, %1785 : vector<8x128xf32>
      %1787 = arith.addf %1783, %1786 : vector<8x128xf32>
      %c6_877 = arith.constant 6 : index
      %c8_878 = arith.constant 8 : index
      %1788 = memref.load %arg6[%c6_877, %c8_878] : memref<16x16xf32, #tpu.memory_space<smem>>
      %1789 = vector.broadcast %1788 : f32 to vector<8x128xf32>
      %1790 = arith.mulf %608, %1789 : vector<8x128xf32>
      %1791 = arith.addf %1787, %1790 : vector<8x128xf32>
      %c7_879 = arith.constant 7 : index
      %c8_880 = arith.constant 8 : index
      %1792 = memref.load %arg6[%c7_879, %c8_880] : memref<16x16xf32, #tpu.memory_space<smem>>
      %1793 = vector.broadcast %1792 : f32 to vector<8x128xf32>
      %1794 = arith.mulf %676, %1793 : vector<8x128xf32>
      %1795 = arith.addf %1791, %1794 : vector<8x128xf32>
      %c8_881 = arith.constant 8 : index
      %c8_882 = arith.constant 8 : index
      %1796 = memref.load %arg6[%c8_881, %c8_882] : memref<16x16xf32, #tpu.memory_space<smem>>
      %1797 = vector.broadcast %1796 : f32 to vector<8x128xf32>
      %1798 = arith.mulf %744, %1797 : vector<8x128xf32>
      %1799 = arith.addf %1795, %1798 : vector<8x128xf32>
      %c9_883 = arith.constant 9 : index
      %c8_884 = arith.constant 8 : index
      %1800 = memref.load %arg6[%c9_883, %c8_884] : memref<16x16xf32, #tpu.memory_space<smem>>
      %1801 = vector.broadcast %1800 : f32 to vector<8x128xf32>
      %1802 = arith.mulf %812, %1801 : vector<8x128xf32>
      %1803 = arith.addf %1799, %1802 : vector<8x128xf32>
      %c10_885 = arith.constant 10 : index
      %c8_886 = arith.constant 8 : index
      %1804 = memref.load %arg6[%c10_885, %c8_886] : memref<16x16xf32, #tpu.memory_space<smem>>
      %1805 = vector.broadcast %1804 : f32 to vector<8x128xf32>
      %1806 = arith.mulf %880, %1805 : vector<8x128xf32>
      %1807 = arith.addf %1803, %1806 : vector<8x128xf32>
      %c11_887 = arith.constant 11 : index
      %c8_888 = arith.constant 8 : index
      %1808 = memref.load %arg6[%c11_887, %c8_888] : memref<16x16xf32, #tpu.memory_space<smem>>
      %1809 = vector.broadcast %1808 : f32 to vector<8x128xf32>
      %1810 = arith.mulf %948, %1809 : vector<8x128xf32>
      %1811 = arith.addf %1807, %1810 : vector<8x128xf32>
      %c12_889 = arith.constant 12 : index
      %c8_890 = arith.constant 8 : index
      %1812 = memref.load %arg6[%c12_889, %c8_890] : memref<16x16xf32, #tpu.memory_space<smem>>
      %1813 = vector.broadcast %1812 : f32 to vector<8x128xf32>
      %1814 = arith.mulf %1016, %1813 : vector<8x128xf32>
      %1815 = arith.addf %1811, %1814 : vector<8x128xf32>
      %c13_891 = arith.constant 13 : index
      %c8_892 = arith.constant 8 : index
      %1816 = memref.load %arg6[%c13_891, %c8_892] : memref<16x16xf32, #tpu.memory_space<smem>>
      %1817 = vector.broadcast %1816 : f32 to vector<8x128xf32>
      %1818 = arith.mulf %1084, %1817 : vector<8x128xf32>
      %1819 = arith.addf %1815, %1818 : vector<8x128xf32>
      %c14_893 = arith.constant 14 : index
      %c8_894 = arith.constant 8 : index
      %1820 = memref.load %arg6[%c14_893, %c8_894] : memref<16x16xf32, #tpu.memory_space<smem>>
      %1821 = vector.broadcast %1820 : f32 to vector<8x128xf32>
      %1822 = arith.mulf %1152, %1821 : vector<8x128xf32>
      %1823 = arith.addf %1819, %1822 : vector<8x128xf32>
      %c15_895 = arith.constant 15 : index
      %c8_896 = arith.constant 8 : index
      %1824 = memref.load %arg6[%c15_895, %c8_896] : memref<16x16xf32, #tpu.memory_space<smem>>
      %1825 = vector.broadcast %1824 : f32 to vector<8x128xf32>
      %1826 = arith.mulf %1220, %1825 : vector<8x128xf32>
      %1827 = arith.addf %1823, %1826 : vector<8x128xf32>
      %c8_897 = arith.constant 8 : index
      %1828 = memref.load %arg7[%c8_897] : memref<16xf32, #tpu.memory_space<smem>>
      %1829 = vector.broadcast %1828 : f32 to vector<8x128xf32>
      %1830 = arith.addf %1827, %1829 : vector<8x128xf32>
      %cst_898 = arith.constant 0.000000e+00 : f32
      %1831 = vector.broadcast %cst_898 : f32 to vector<8x128xf32>
      %1832 = arith.maximumf %1830, %1831 : vector<8x128xf32>
      %c0_899 = arith.constant 0 : index
      %c9_900 = arith.constant 9 : index
      %1833 = memref.load %arg6[%c0_899, %c9_900] : memref<16x16xf32, #tpu.memory_space<smem>>
      %1834 = vector.broadcast %1833 : f32 to vector<8x128xf32>
      %1835 = arith.mulf %200, %1834 : vector<8x128xf32>
      %c1_901 = arith.constant 1 : index
      %c9_902 = arith.constant 9 : index
      %1836 = memref.load %arg6[%c1_901, %c9_902] : memref<16x16xf32, #tpu.memory_space<smem>>
      %1837 = vector.broadcast %1836 : f32 to vector<8x128xf32>
      %1838 = arith.mulf %268, %1837 : vector<8x128xf32>
      %1839 = arith.addf %1835, %1838 : vector<8x128xf32>
      %c2_903 = arith.constant 2 : index
      %c9_904 = arith.constant 9 : index
      %1840 = memref.load %arg6[%c2_903, %c9_904] : memref<16x16xf32, #tpu.memory_space<smem>>
      %1841 = vector.broadcast %1840 : f32 to vector<8x128xf32>
      %1842 = arith.mulf %336, %1841 : vector<8x128xf32>
      %1843 = arith.addf %1839, %1842 : vector<8x128xf32>
      %c3_905 = arith.constant 3 : index
      %c9_906 = arith.constant 9 : index
      %1844 = memref.load %arg6[%c3_905, %c9_906] : memref<16x16xf32, #tpu.memory_space<smem>>
      %1845 = vector.broadcast %1844 : f32 to vector<8x128xf32>
      %1846 = arith.mulf %404, %1845 : vector<8x128xf32>
      %1847 = arith.addf %1843, %1846 : vector<8x128xf32>
      %c4_907 = arith.constant 4 : index
      %c9_908 = arith.constant 9 : index
      %1848 = memref.load %arg6[%c4_907, %c9_908] : memref<16x16xf32, #tpu.memory_space<smem>>
      %1849 = vector.broadcast %1848 : f32 to vector<8x128xf32>
      %1850 = arith.mulf %472, %1849 : vector<8x128xf32>
      %1851 = arith.addf %1847, %1850 : vector<8x128xf32>
      %c5_909 = arith.constant 5 : index
      %c9_910 = arith.constant 9 : index
      %1852 = memref.load %arg6[%c5_909, %c9_910] : memref<16x16xf32, #tpu.memory_space<smem>>
      %1853 = vector.broadcast %1852 : f32 to vector<8x128xf32>
      %1854 = arith.mulf %540, %1853 : vector<8x128xf32>
      %1855 = arith.addf %1851, %1854 : vector<8x128xf32>
      %c6_911 = arith.constant 6 : index
      %c9_912 = arith.constant 9 : index
      %1856 = memref.load %arg6[%c6_911, %c9_912] : memref<16x16xf32, #tpu.memory_space<smem>>
      %1857 = vector.broadcast %1856 : f32 to vector<8x128xf32>
      %1858 = arith.mulf %608, %1857 : vector<8x128xf32>
      %1859 = arith.addf %1855, %1858 : vector<8x128xf32>
      %c7_913 = arith.constant 7 : index
      %c9_914 = arith.constant 9 : index
      %1860 = memref.load %arg6[%c7_913, %c9_914] : memref<16x16xf32, #tpu.memory_space<smem>>
      %1861 = vector.broadcast %1860 : f32 to vector<8x128xf32>
      %1862 = arith.mulf %676, %1861 : vector<8x128xf32>
      %1863 = arith.addf %1859, %1862 : vector<8x128xf32>
      %c8_915 = arith.constant 8 : index
      %c9_916 = arith.constant 9 : index
      %1864 = memref.load %arg6[%c8_915, %c9_916] : memref<16x16xf32, #tpu.memory_space<smem>>
      %1865 = vector.broadcast %1864 : f32 to vector<8x128xf32>
      %1866 = arith.mulf %744, %1865 : vector<8x128xf32>
      %1867 = arith.addf %1863, %1866 : vector<8x128xf32>
      %c9_917 = arith.constant 9 : index
      %c9_918 = arith.constant 9 : index
      %1868 = memref.load %arg6[%c9_917, %c9_918] : memref<16x16xf32, #tpu.memory_space<smem>>
      %1869 = vector.broadcast %1868 : f32 to vector<8x128xf32>
      %1870 = arith.mulf %812, %1869 : vector<8x128xf32>
      %1871 = arith.addf %1867, %1870 : vector<8x128xf32>
      %c10_919 = arith.constant 10 : index
      %c9_920 = arith.constant 9 : index
      %1872 = memref.load %arg6[%c10_919, %c9_920] : memref<16x16xf32, #tpu.memory_space<smem>>
      %1873 = vector.broadcast %1872 : f32 to vector<8x128xf32>
      %1874 = arith.mulf %880, %1873 : vector<8x128xf32>
      %1875 = arith.addf %1871, %1874 : vector<8x128xf32>
      %c11_921 = arith.constant 11 : index
      %c9_922 = arith.constant 9 : index
      %1876 = memref.load %arg6[%c11_921, %c9_922] : memref<16x16xf32, #tpu.memory_space<smem>>
      %1877 = vector.broadcast %1876 : f32 to vector<8x128xf32>
      %1878 = arith.mulf %948, %1877 : vector<8x128xf32>
      %1879 = arith.addf %1875, %1878 : vector<8x128xf32>
      %c12_923 = arith.constant 12 : index
      %c9_924 = arith.constant 9 : index
      %1880 = memref.load %arg6[%c12_923, %c9_924] : memref<16x16xf32, #tpu.memory_space<smem>>
      %1881 = vector.broadcast %1880 : f32 to vector<8x128xf32>
      %1882 = arith.mulf %1016, %1881 : vector<8x128xf32>
      %1883 = arith.addf %1879, %1882 : vector<8x128xf32>
      %c13_925 = arith.constant 13 : index
      %c9_926 = arith.constant 9 : index
      %1884 = memref.load %arg6[%c13_925, %c9_926] : memref<16x16xf32, #tpu.memory_space<smem>>
      %1885 = vector.broadcast %1884 : f32 to vector<8x128xf32>
      %1886 = arith.mulf %1084, %1885 : vector<8x128xf32>
      %1887 = arith.addf %1883, %1886 : vector<8x128xf32>
      %c14_927 = arith.constant 14 : index
      %c9_928 = arith.constant 9 : index
      %1888 = memref.load %arg6[%c14_927, %c9_928] : memref<16x16xf32, #tpu.memory_space<smem>>
      %1889 = vector.broadcast %1888 : f32 to vector<8x128xf32>
      %1890 = arith.mulf %1152, %1889 : vector<8x128xf32>
      %1891 = arith.addf %1887, %1890 : vector<8x128xf32>
      %c15_929 = arith.constant 15 : index
      %c9_930 = arith.constant 9 : index
      %1892 = memref.load %arg6[%c15_929, %c9_930] : memref<16x16xf32, #tpu.memory_space<smem>>
      %1893 = vector.broadcast %1892 : f32 to vector<8x128xf32>
      %1894 = arith.mulf %1220, %1893 : vector<8x128xf32>
      %1895 = arith.addf %1891, %1894 : vector<8x128xf32>
      %c9_931 = arith.constant 9 : index
      %1896 = memref.load %arg7[%c9_931] : memref<16xf32, #tpu.memory_space<smem>>
      %1897 = vector.broadcast %1896 : f32 to vector<8x128xf32>
      %1898 = arith.addf %1895, %1897 : vector<8x128xf32>
      %cst_932 = arith.constant 0.000000e+00 : f32
      %1899 = vector.broadcast %cst_932 : f32 to vector<8x128xf32>
      %1900 = arith.maximumf %1898, %1899 : vector<8x128xf32>
      %c0_933 = arith.constant 0 : index
      %c10_934 = arith.constant 10 : index
      %1901 = memref.load %arg6[%c0_933, %c10_934] : memref<16x16xf32, #tpu.memory_space<smem>>
      %1902 = vector.broadcast %1901 : f32 to vector<8x128xf32>
      %1903 = arith.mulf %200, %1902 : vector<8x128xf32>
      %c1_935 = arith.constant 1 : index
      %c10_936 = arith.constant 10 : index
      %1904 = memref.load %arg6[%c1_935, %c10_936] : memref<16x16xf32, #tpu.memory_space<smem>>
      %1905 = vector.broadcast %1904 : f32 to vector<8x128xf32>
      %1906 = arith.mulf %268, %1905 : vector<8x128xf32>
      %1907 = arith.addf %1903, %1906 : vector<8x128xf32>
      %c2_937 = arith.constant 2 : index
      %c10_938 = arith.constant 10 : index
      %1908 = memref.load %arg6[%c2_937, %c10_938] : memref<16x16xf32, #tpu.memory_space<smem>>
      %1909 = vector.broadcast %1908 : f32 to vector<8x128xf32>
      %1910 = arith.mulf %336, %1909 : vector<8x128xf32>
      %1911 = arith.addf %1907, %1910 : vector<8x128xf32>
      %c3_939 = arith.constant 3 : index
      %c10_940 = arith.constant 10 : index
      %1912 = memref.load %arg6[%c3_939, %c10_940] : memref<16x16xf32, #tpu.memory_space<smem>>
      %1913 = vector.broadcast %1912 : f32 to vector<8x128xf32>
      %1914 = arith.mulf %404, %1913 : vector<8x128xf32>
      %1915 = arith.addf %1911, %1914 : vector<8x128xf32>
      %c4_941 = arith.constant 4 : index
      %c10_942 = arith.constant 10 : index
      %1916 = memref.load %arg6[%c4_941, %c10_942] : memref<16x16xf32, #tpu.memory_space<smem>>
      %1917 = vector.broadcast %1916 : f32 to vector<8x128xf32>
      %1918 = arith.mulf %472, %1917 : vector<8x128xf32>
      %1919 = arith.addf %1915, %1918 : vector<8x128xf32>
      %c5_943 = arith.constant 5 : index
      %c10_944 = arith.constant 10 : index
      %1920 = memref.load %arg6[%c5_943, %c10_944] : memref<16x16xf32, #tpu.memory_space<smem>>
      %1921 = vector.broadcast %1920 : f32 to vector<8x128xf32>
      %1922 = arith.mulf %540, %1921 : vector<8x128xf32>
      %1923 = arith.addf %1919, %1922 : vector<8x128xf32>
      %c6_945 = arith.constant 6 : index
      %c10_946 = arith.constant 10 : index
      %1924 = memref.load %arg6[%c6_945, %c10_946] : memref<16x16xf32, #tpu.memory_space<smem>>
      %1925 = vector.broadcast %1924 : f32 to vector<8x128xf32>
      %1926 = arith.mulf %608, %1925 : vector<8x128xf32>
      %1927 = arith.addf %1923, %1926 : vector<8x128xf32>
      %c7_947 = arith.constant 7 : index
      %c10_948 = arith.constant 10 : index
      %1928 = memref.load %arg6[%c7_947, %c10_948] : memref<16x16xf32, #tpu.memory_space<smem>>
      %1929 = vector.broadcast %1928 : f32 to vector<8x128xf32>
      %1930 = arith.mulf %676, %1929 : vector<8x128xf32>
      %1931 = arith.addf %1927, %1930 : vector<8x128xf32>
      %c8_949 = arith.constant 8 : index
      %c10_950 = arith.constant 10 : index
      %1932 = memref.load %arg6[%c8_949, %c10_950] : memref<16x16xf32, #tpu.memory_space<smem>>
      %1933 = vector.broadcast %1932 : f32 to vector<8x128xf32>
      %1934 = arith.mulf %744, %1933 : vector<8x128xf32>
      %1935 = arith.addf %1931, %1934 : vector<8x128xf32>
      %c9_951 = arith.constant 9 : index
      %c10_952 = arith.constant 10 : index
      %1936 = memref.load %arg6[%c9_951, %c10_952] : memref<16x16xf32, #tpu.memory_space<smem>>
      %1937 = vector.broadcast %1936 : f32 to vector<8x128xf32>
      %1938 = arith.mulf %812, %1937 : vector<8x128xf32>
      %1939 = arith.addf %1935, %1938 : vector<8x128xf32>
      %c10_953 = arith.constant 10 : index
      %c10_954 = arith.constant 10 : index
      %1940 = memref.load %arg6[%c10_953, %c10_954] : memref<16x16xf32, #tpu.memory_space<smem>>
      %1941 = vector.broadcast %1940 : f32 to vector<8x128xf32>
      %1942 = arith.mulf %880, %1941 : vector<8x128xf32>
      %1943 = arith.addf %1939, %1942 : vector<8x128xf32>
      %c11_955 = arith.constant 11 : index
      %c10_956 = arith.constant 10 : index
      %1944 = memref.load %arg6[%c11_955, %c10_956] : memref<16x16xf32, #tpu.memory_space<smem>>
      %1945 = vector.broadcast %1944 : f32 to vector<8x128xf32>
      %1946 = arith.mulf %948, %1945 : vector<8x128xf32>
      %1947 = arith.addf %1943, %1946 : vector<8x128xf32>
      %c12_957 = arith.constant 12 : index
      %c10_958 = arith.constant 10 : index
      %1948 = memref.load %arg6[%c12_957, %c10_958] : memref<16x16xf32, #tpu.memory_space<smem>>
      %1949 = vector.broadcast %1948 : f32 to vector<8x128xf32>
      %1950 = arith.mulf %1016, %1949 : vector<8x128xf32>
      %1951 = arith.addf %1947, %1950 : vector<8x128xf32>
      %c13_959 = arith.constant 13 : index
      %c10_960 = arith.constant 10 : index
      %1952 = memref.load %arg6[%c13_959, %c10_960] : memref<16x16xf32, #tpu.memory_space<smem>>
      %1953 = vector.broadcast %1952 : f32 to vector<8x128xf32>
      %1954 = arith.mulf %1084, %1953 : vector<8x128xf32>
      %1955 = arith.addf %1951, %1954 : vector<8x128xf32>
      %c14_961 = arith.constant 14 : index
      %c10_962 = arith.constant 10 : index
      %1956 = memref.load %arg6[%c14_961, %c10_962] : memref<16x16xf32, #tpu.memory_space<smem>>
      %1957 = vector.broadcast %1956 : f32 to vector<8x128xf32>
      %1958 = arith.mulf %1152, %1957 : vector<8x128xf32>
      %1959 = arith.addf %1955, %1958 : vector<8x128xf32>
      %c15_963 = arith.constant 15 : index
      %c10_964 = arith.constant 10 : index
      %1960 = memref.load %arg6[%c15_963, %c10_964] : memref<16x16xf32, #tpu.memory_space<smem>>
      %1961 = vector.broadcast %1960 : f32 to vector<8x128xf32>
      %1962 = arith.mulf %1220, %1961 : vector<8x128xf32>
      %1963 = arith.addf %1959, %1962 : vector<8x128xf32>
      %c10_965 = arith.constant 10 : index
      %1964 = memref.load %arg7[%c10_965] : memref<16xf32, #tpu.memory_space<smem>>
      %1965 = vector.broadcast %1964 : f32 to vector<8x128xf32>
      %1966 = arith.addf %1963, %1965 : vector<8x128xf32>
      %cst_966 = arith.constant 0.000000e+00 : f32
      %1967 = vector.broadcast %cst_966 : f32 to vector<8x128xf32>
      %1968 = arith.maximumf %1966, %1967 : vector<8x128xf32>
      %c0_967 = arith.constant 0 : index
      %c11_968 = arith.constant 11 : index
      %1969 = memref.load %arg6[%c0_967, %c11_968] : memref<16x16xf32, #tpu.memory_space<smem>>
      %1970 = vector.broadcast %1969 : f32 to vector<8x128xf32>
      %1971 = arith.mulf %200, %1970 : vector<8x128xf32>
      %c1_969 = arith.constant 1 : index
      %c11_970 = arith.constant 11 : index
      %1972 = memref.load %arg6[%c1_969, %c11_970] : memref<16x16xf32, #tpu.memory_space<smem>>
      %1973 = vector.broadcast %1972 : f32 to vector<8x128xf32>
      %1974 = arith.mulf %268, %1973 : vector<8x128xf32>
      %1975 = arith.addf %1971, %1974 : vector<8x128xf32>
      %c2_971 = arith.constant 2 : index
      %c11_972 = arith.constant 11 : index
      %1976 = memref.load %arg6[%c2_971, %c11_972] : memref<16x16xf32, #tpu.memory_space<smem>>
      %1977 = vector.broadcast %1976 : f32 to vector<8x128xf32>
      %1978 = arith.mulf %336, %1977 : vector<8x128xf32>
      %1979 = arith.addf %1975, %1978 : vector<8x128xf32>
      %c3_973 = arith.constant 3 : index
      %c11_974 = arith.constant 11 : index
      %1980 = memref.load %arg6[%c3_973, %c11_974] : memref<16x16xf32, #tpu.memory_space<smem>>
      %1981 = vector.broadcast %1980 : f32 to vector<8x128xf32>
      %1982 = arith.mulf %404, %1981 : vector<8x128xf32>
      %1983 = arith.addf %1979, %1982 : vector<8x128xf32>
      %c4_975 = arith.constant 4 : index
      %c11_976 = arith.constant 11 : index
      %1984 = memref.load %arg6[%c4_975, %c11_976] : memref<16x16xf32, #tpu.memory_space<smem>>
      %1985 = vector.broadcast %1984 : f32 to vector<8x128xf32>
      %1986 = arith.mulf %472, %1985 : vector<8x128xf32>
      %1987 = arith.addf %1983, %1986 : vector<8x128xf32>
      %c5_977 = arith.constant 5 : index
      %c11_978 = arith.constant 11 : index
      %1988 = memref.load %arg6[%c5_977, %c11_978] : memref<16x16xf32, #tpu.memory_space<smem>>
      %1989 = vector.broadcast %1988 : f32 to vector<8x128xf32>
      %1990 = arith.mulf %540, %1989 : vector<8x128xf32>
      %1991 = arith.addf %1987, %1990 : vector<8x128xf32>
      %c6_979 = arith.constant 6 : index
      %c11_980 = arith.constant 11 : index
      %1992 = memref.load %arg6[%c6_979, %c11_980] : memref<16x16xf32, #tpu.memory_space<smem>>
      %1993 = vector.broadcast %1992 : f32 to vector<8x128xf32>
      %1994 = arith.mulf %608, %1993 : vector<8x128xf32>
      %1995 = arith.addf %1991, %1994 : vector<8x128xf32>
      %c7_981 = arith.constant 7 : index
      %c11_982 = arith.constant 11 : index
      %1996 = memref.load %arg6[%c7_981, %c11_982] : memref<16x16xf32, #tpu.memory_space<smem>>
      %1997 = vector.broadcast %1996 : f32 to vector<8x128xf32>
      %1998 = arith.mulf %676, %1997 : vector<8x128xf32>
      %1999 = arith.addf %1995, %1998 : vector<8x128xf32>
      %c8_983 = arith.constant 8 : index
      %c11_984 = arith.constant 11 : index
      %2000 = memref.load %arg6[%c8_983, %c11_984] : memref<16x16xf32, #tpu.memory_space<smem>>
      %2001 = vector.broadcast %2000 : f32 to vector<8x128xf32>
      %2002 = arith.mulf %744, %2001 : vector<8x128xf32>
      %2003 = arith.addf %1999, %2002 : vector<8x128xf32>
      %c9_985 = arith.constant 9 : index
      %c11_986 = arith.constant 11 : index
      %2004 = memref.load %arg6[%c9_985, %c11_986] : memref<16x16xf32, #tpu.memory_space<smem>>
      %2005 = vector.broadcast %2004 : f32 to vector<8x128xf32>
      %2006 = arith.mulf %812, %2005 : vector<8x128xf32>
      %2007 = arith.addf %2003, %2006 : vector<8x128xf32>
      %c10_987 = arith.constant 10 : index
      %c11_988 = arith.constant 11 : index
      %2008 = memref.load %arg6[%c10_987, %c11_988] : memref<16x16xf32, #tpu.memory_space<smem>>
      %2009 = vector.broadcast %2008 : f32 to vector<8x128xf32>
      %2010 = arith.mulf %880, %2009 : vector<8x128xf32>
      %2011 = arith.addf %2007, %2010 : vector<8x128xf32>
      %c11_989 = arith.constant 11 : index
      %c11_990 = arith.constant 11 : index
      %2012 = memref.load %arg6[%c11_989, %c11_990] : memref<16x16xf32, #tpu.memory_space<smem>>
      %2013 = vector.broadcast %2012 : f32 to vector<8x128xf32>
      %2014 = arith.mulf %948, %2013 : vector<8x128xf32>
      %2015 = arith.addf %2011, %2014 : vector<8x128xf32>
      %c12_991 = arith.constant 12 : index
      %c11_992 = arith.constant 11 : index
      %2016 = memref.load %arg6[%c12_991, %c11_992] : memref<16x16xf32, #tpu.memory_space<smem>>
      %2017 = vector.broadcast %2016 : f32 to vector<8x128xf32>
      %2018 = arith.mulf %1016, %2017 : vector<8x128xf32>
      %2019 = arith.addf %2015, %2018 : vector<8x128xf32>
      %c13_993 = arith.constant 13 : index
      %c11_994 = arith.constant 11 : index
      %2020 = memref.load %arg6[%c13_993, %c11_994] : memref<16x16xf32, #tpu.memory_space<smem>>
      %2021 = vector.broadcast %2020 : f32 to vector<8x128xf32>
      %2022 = arith.mulf %1084, %2021 : vector<8x128xf32>
      %2023 = arith.addf %2019, %2022 : vector<8x128xf32>
      %c14_995 = arith.constant 14 : index
      %c11_996 = arith.constant 11 : index
      %2024 = memref.load %arg6[%c14_995, %c11_996] : memref<16x16xf32, #tpu.memory_space<smem>>
      %2025 = vector.broadcast %2024 : f32 to vector<8x128xf32>
      %2026 = arith.mulf %1152, %2025 : vector<8x128xf32>
      %2027 = arith.addf %2023, %2026 : vector<8x128xf32>
      %c15_997 = arith.constant 15 : index
      %c11_998 = arith.constant 11 : index
      %2028 = memref.load %arg6[%c15_997, %c11_998] : memref<16x16xf32, #tpu.memory_space<smem>>
      %2029 = vector.broadcast %2028 : f32 to vector<8x128xf32>
      %2030 = arith.mulf %1220, %2029 : vector<8x128xf32>
      %2031 = arith.addf %2027, %2030 : vector<8x128xf32>
      %c11_999 = arith.constant 11 : index
      %2032 = memref.load %arg7[%c11_999] : memref<16xf32, #tpu.memory_space<smem>>
      %2033 = vector.broadcast %2032 : f32 to vector<8x128xf32>
      %2034 = arith.addf %2031, %2033 : vector<8x128xf32>
      %cst_1000 = arith.constant 0.000000e+00 : f32
      %2035 = vector.broadcast %cst_1000 : f32 to vector<8x128xf32>
      %2036 = arith.maximumf %2034, %2035 : vector<8x128xf32>
      %c0_1001 = arith.constant 0 : index
      %c12_1002 = arith.constant 12 : index
      %2037 = memref.load %arg6[%c0_1001, %c12_1002] : memref<16x16xf32, #tpu.memory_space<smem>>
      %2038 = vector.broadcast %2037 : f32 to vector<8x128xf32>
      %2039 = arith.mulf %200, %2038 : vector<8x128xf32>
      %c1_1003 = arith.constant 1 : index
      %c12_1004 = arith.constant 12 : index
      %2040 = memref.load %arg6[%c1_1003, %c12_1004] : memref<16x16xf32, #tpu.memory_space<smem>>
      %2041 = vector.broadcast %2040 : f32 to vector<8x128xf32>
      %2042 = arith.mulf %268, %2041 : vector<8x128xf32>
      %2043 = arith.addf %2039, %2042 : vector<8x128xf32>
      %c2_1005 = arith.constant 2 : index
      %c12_1006 = arith.constant 12 : index
      %2044 = memref.load %arg6[%c2_1005, %c12_1006] : memref<16x16xf32, #tpu.memory_space<smem>>
      %2045 = vector.broadcast %2044 : f32 to vector<8x128xf32>
      %2046 = arith.mulf %336, %2045 : vector<8x128xf32>
      %2047 = arith.addf %2043, %2046 : vector<8x128xf32>
      %c3_1007 = arith.constant 3 : index
      %c12_1008 = arith.constant 12 : index
      %2048 = memref.load %arg6[%c3_1007, %c12_1008] : memref<16x16xf32, #tpu.memory_space<smem>>
      %2049 = vector.broadcast %2048 : f32 to vector<8x128xf32>
      %2050 = arith.mulf %404, %2049 : vector<8x128xf32>
      %2051 = arith.addf %2047, %2050 : vector<8x128xf32>
      %c4_1009 = arith.constant 4 : index
      %c12_1010 = arith.constant 12 : index
      %2052 = memref.load %arg6[%c4_1009, %c12_1010] : memref<16x16xf32, #tpu.memory_space<smem>>
      %2053 = vector.broadcast %2052 : f32 to vector<8x128xf32>
      %2054 = arith.mulf %472, %2053 : vector<8x128xf32>
      %2055 = arith.addf %2051, %2054 : vector<8x128xf32>
      %c5_1011 = arith.constant 5 : index
      %c12_1012 = arith.constant 12 : index
      %2056 = memref.load %arg6[%c5_1011, %c12_1012] : memref<16x16xf32, #tpu.memory_space<smem>>
      %2057 = vector.broadcast %2056 : f32 to vector<8x128xf32>
      %2058 = arith.mulf %540, %2057 : vector<8x128xf32>
      %2059 = arith.addf %2055, %2058 : vector<8x128xf32>
      %c6_1013 = arith.constant 6 : index
      %c12_1014 = arith.constant 12 : index
      %2060 = memref.load %arg6[%c6_1013, %c12_1014] : memref<16x16xf32, #tpu.memory_space<smem>>
      %2061 = vector.broadcast %2060 : f32 to vector<8x128xf32>
      %2062 = arith.mulf %608, %2061 : vector<8x128xf32>
      %2063 = arith.addf %2059, %2062 : vector<8x128xf32>
      %c7_1015 = arith.constant 7 : index
      %c12_1016 = arith.constant 12 : index
      %2064 = memref.load %arg6[%c7_1015, %c12_1016] : memref<16x16xf32, #tpu.memory_space<smem>>
      %2065 = vector.broadcast %2064 : f32 to vector<8x128xf32>
      %2066 = arith.mulf %676, %2065 : vector<8x128xf32>
      %2067 = arith.addf %2063, %2066 : vector<8x128xf32>
      %c8_1017 = arith.constant 8 : index
      %c12_1018 = arith.constant 12 : index
      %2068 = memref.load %arg6[%c8_1017, %c12_1018] : memref<16x16xf32, #tpu.memory_space<smem>>
      %2069 = vector.broadcast %2068 : f32 to vector<8x128xf32>
      %2070 = arith.mulf %744, %2069 : vector<8x128xf32>
      %2071 = arith.addf %2067, %2070 : vector<8x128xf32>
      %c9_1019 = arith.constant 9 : index
      %c12_1020 = arith.constant 12 : index
      %2072 = memref.load %arg6[%c9_1019, %c12_1020] : memref<16x16xf32, #tpu.memory_space<smem>>
      %2073 = vector.broadcast %2072 : f32 to vector<8x128xf32>
      %2074 = arith.mulf %812, %2073 : vector<8x128xf32>
      %2075 = arith.addf %2071, %2074 : vector<8x128xf32>
      %c10_1021 = arith.constant 10 : index
      %c12_1022 = arith.constant 12 : index
      %2076 = memref.load %arg6[%c10_1021, %c12_1022] : memref<16x16xf32, #tpu.memory_space<smem>>
      %2077 = vector.broadcast %2076 : f32 to vector<8x128xf32>
      %2078 = arith.mulf %880, %2077 : vector<8x128xf32>
      %2079 = arith.addf %2075, %2078 : vector<8x128xf32>
      %c11_1023 = arith.constant 11 : index
      %c12_1024 = arith.constant 12 : index
      %2080 = memref.load %arg6[%c11_1023, %c12_1024] : memref<16x16xf32, #tpu.memory_space<smem>>
      %2081 = vector.broadcast %2080 : f32 to vector<8x128xf32>
      %2082 = arith.mulf %948, %2081 : vector<8x128xf32>
      %2083 = arith.addf %2079, %2082 : vector<8x128xf32>
      %c12_1025 = arith.constant 12 : index
      %c12_1026 = arith.constant 12 : index
      %2084 = memref.load %arg6[%c12_1025, %c12_1026] : memref<16x16xf32, #tpu.memory_space<smem>>
      %2085 = vector.broadcast %2084 : f32 to vector<8x128xf32>
      %2086 = arith.mulf %1016, %2085 : vector<8x128xf32>
      %2087 = arith.addf %2083, %2086 : vector<8x128xf32>
      %c13_1027 = arith.constant 13 : index
      %c12_1028 = arith.constant 12 : index
      %2088 = memref.load %arg6[%c13_1027, %c12_1028] : memref<16x16xf32, #tpu.memory_space<smem>>
      %2089 = vector.broadcast %2088 : f32 to vector<8x128xf32>
      %2090 = arith.mulf %1084, %2089 : vector<8x128xf32>
      %2091 = arith.addf %2087, %2090 : vector<8x128xf32>
      %c14_1029 = arith.constant 14 : index
      %c12_1030 = arith.constant 12 : index
      %2092 = memref.load %arg6[%c14_1029, %c12_1030] : memref<16x16xf32, #tpu.memory_space<smem>>
      %2093 = vector.broadcast %2092 : f32 to vector<8x128xf32>
      %2094 = arith.mulf %1152, %2093 : vector<8x128xf32>
      %2095 = arith.addf %2091, %2094 : vector<8x128xf32>
      %c15_1031 = arith.constant 15 : index
      %c12_1032 = arith.constant 12 : index
      %2096 = memref.load %arg6[%c15_1031, %c12_1032] : memref<16x16xf32, #tpu.memory_space<smem>>
      %2097 = vector.broadcast %2096 : f32 to vector<8x128xf32>
      %2098 = arith.mulf %1220, %2097 : vector<8x128xf32>
      %2099 = arith.addf %2095, %2098 : vector<8x128xf32>
      %c12_1033 = arith.constant 12 : index
      %2100 = memref.load %arg7[%c12_1033] : memref<16xf32, #tpu.memory_space<smem>>
      %2101 = vector.broadcast %2100 : f32 to vector<8x128xf32>
      %2102 = arith.addf %2099, %2101 : vector<8x128xf32>
      %cst_1034 = arith.constant 0.000000e+00 : f32
      %2103 = vector.broadcast %cst_1034 : f32 to vector<8x128xf32>
      %2104 = arith.maximumf %2102, %2103 : vector<8x128xf32>
      %c0_1035 = arith.constant 0 : index
      %c13_1036 = arith.constant 13 : index
      %2105 = memref.load %arg6[%c0_1035, %c13_1036] : memref<16x16xf32, #tpu.memory_space<smem>>
      %2106 = vector.broadcast %2105 : f32 to vector<8x128xf32>
      %2107 = arith.mulf %200, %2106 : vector<8x128xf32>
      %c1_1037 = arith.constant 1 : index
      %c13_1038 = arith.constant 13 : index
      %2108 = memref.load %arg6[%c1_1037, %c13_1038] : memref<16x16xf32, #tpu.memory_space<smem>>
      %2109 = vector.broadcast %2108 : f32 to vector<8x128xf32>
      %2110 = arith.mulf %268, %2109 : vector<8x128xf32>
      %2111 = arith.addf %2107, %2110 : vector<8x128xf32>
      %c2_1039 = arith.constant 2 : index
      %c13_1040 = arith.constant 13 : index
      %2112 = memref.load %arg6[%c2_1039, %c13_1040] : memref<16x16xf32, #tpu.memory_space<smem>>
      %2113 = vector.broadcast %2112 : f32 to vector<8x128xf32>
      %2114 = arith.mulf %336, %2113 : vector<8x128xf32>
      %2115 = arith.addf %2111, %2114 : vector<8x128xf32>
      %c3_1041 = arith.constant 3 : index
      %c13_1042 = arith.constant 13 : index
      %2116 = memref.load %arg6[%c3_1041, %c13_1042] : memref<16x16xf32, #tpu.memory_space<smem>>
      %2117 = vector.broadcast %2116 : f32 to vector<8x128xf32>
      %2118 = arith.mulf %404, %2117 : vector<8x128xf32>
      %2119 = arith.addf %2115, %2118 : vector<8x128xf32>
      %c4_1043 = arith.constant 4 : index
      %c13_1044 = arith.constant 13 : index
      %2120 = memref.load %arg6[%c4_1043, %c13_1044] : memref<16x16xf32, #tpu.memory_space<smem>>
      %2121 = vector.broadcast %2120 : f32 to vector<8x128xf32>
      %2122 = arith.mulf %472, %2121 : vector<8x128xf32>
      %2123 = arith.addf %2119, %2122 : vector<8x128xf32>
      %c5_1045 = arith.constant 5 : index
      %c13_1046 = arith.constant 13 : index
      %2124 = memref.load %arg6[%c5_1045, %c13_1046] : memref<16x16xf32, #tpu.memory_space<smem>>
      %2125 = vector.broadcast %2124 : f32 to vector<8x128xf32>
      %2126 = arith.mulf %540, %2125 : vector<8x128xf32>
      %2127 = arith.addf %2123, %2126 : vector<8x128xf32>
      %c6_1047 = arith.constant 6 : index
      %c13_1048 = arith.constant 13 : index
      %2128 = memref.load %arg6[%c6_1047, %c13_1048] : memref<16x16xf32, #tpu.memory_space<smem>>
      %2129 = vector.broadcast %2128 : f32 to vector<8x128xf32>
      %2130 = arith.mulf %608, %2129 : vector<8x128xf32>
      %2131 = arith.addf %2127, %2130 : vector<8x128xf32>
      %c7_1049 = arith.constant 7 : index
      %c13_1050 = arith.constant 13 : index
      %2132 = memref.load %arg6[%c7_1049, %c13_1050] : memref<16x16xf32, #tpu.memory_space<smem>>
      %2133 = vector.broadcast %2132 : f32 to vector<8x128xf32>
      %2134 = arith.mulf %676, %2133 : vector<8x128xf32>
      %2135 = arith.addf %2131, %2134 : vector<8x128xf32>
      %c8_1051 = arith.constant 8 : index
      %c13_1052 = arith.constant 13 : index
      %2136 = memref.load %arg6[%c8_1051, %c13_1052] : memref<16x16xf32, #tpu.memory_space<smem>>
      %2137 = vector.broadcast %2136 : f32 to vector<8x128xf32>
      %2138 = arith.mulf %744, %2137 : vector<8x128xf32>
      %2139 = arith.addf %2135, %2138 : vector<8x128xf32>
      %c9_1053 = arith.constant 9 : index
      %c13_1054 = arith.constant 13 : index
      %2140 = memref.load %arg6[%c9_1053, %c13_1054] : memref<16x16xf32, #tpu.memory_space<smem>>
      %2141 = vector.broadcast %2140 : f32 to vector<8x128xf32>
      %2142 = arith.mulf %812, %2141 : vector<8x128xf32>
      %2143 = arith.addf %2139, %2142 : vector<8x128xf32>
      %c10_1055 = arith.constant 10 : index
      %c13_1056 = arith.constant 13 : index
      %2144 = memref.load %arg6[%c10_1055, %c13_1056] : memref<16x16xf32, #tpu.memory_space<smem>>
      %2145 = vector.broadcast %2144 : f32 to vector<8x128xf32>
      %2146 = arith.mulf %880, %2145 : vector<8x128xf32>
      %2147 = arith.addf %2143, %2146 : vector<8x128xf32>
      %c11_1057 = arith.constant 11 : index
      %c13_1058 = arith.constant 13 : index
      %2148 = memref.load %arg6[%c11_1057, %c13_1058] : memref<16x16xf32, #tpu.memory_space<smem>>
      %2149 = vector.broadcast %2148 : f32 to vector<8x128xf32>
      %2150 = arith.mulf %948, %2149 : vector<8x128xf32>
      %2151 = arith.addf %2147, %2150 : vector<8x128xf32>
      %c12_1059 = arith.constant 12 : index
      %c13_1060 = arith.constant 13 : index
      %2152 = memref.load %arg6[%c12_1059, %c13_1060] : memref<16x16xf32, #tpu.memory_space<smem>>
      %2153 = vector.broadcast %2152 : f32 to vector<8x128xf32>
      %2154 = arith.mulf %1016, %2153 : vector<8x128xf32>
      %2155 = arith.addf %2151, %2154 : vector<8x128xf32>
      %c13_1061 = arith.constant 13 : index
      %c13_1062 = arith.constant 13 : index
      %2156 = memref.load %arg6[%c13_1061, %c13_1062] : memref<16x16xf32, #tpu.memory_space<smem>>
      %2157 = vector.broadcast %2156 : f32 to vector<8x128xf32>
      %2158 = arith.mulf %1084, %2157 : vector<8x128xf32>
      %2159 = arith.addf %2155, %2158 : vector<8x128xf32>
      %c14_1063 = arith.constant 14 : index
      %c13_1064 = arith.constant 13 : index
      %2160 = memref.load %arg6[%c14_1063, %c13_1064] : memref<16x16xf32, #tpu.memory_space<smem>>
      %2161 = vector.broadcast %2160 : f32 to vector<8x128xf32>
      %2162 = arith.mulf %1152, %2161 : vector<8x128xf32>
      %2163 = arith.addf %2159, %2162 : vector<8x128xf32>
      %c15_1065 = arith.constant 15 : index
      %c13_1066 = arith.constant 13 : index
      %2164 = memref.load %arg6[%c15_1065, %c13_1066] : memref<16x16xf32, #tpu.memory_space<smem>>
      %2165 = vector.broadcast %2164 : f32 to vector<8x128xf32>
      %2166 = arith.mulf %1220, %2165 : vector<8x128xf32>
      %2167 = arith.addf %2163, %2166 : vector<8x128xf32>
      %c13_1067 = arith.constant 13 : index
      %2168 = memref.load %arg7[%c13_1067] : memref<16xf32, #tpu.memory_space<smem>>
      %2169 = vector.broadcast %2168 : f32 to vector<8x128xf32>
      %2170 = arith.addf %2167, %2169 : vector<8x128xf32>
      %cst_1068 = arith.constant 0.000000e+00 : f32
      %2171 = vector.broadcast %cst_1068 : f32 to vector<8x128xf32>
      %2172 = arith.maximumf %2170, %2171 : vector<8x128xf32>
      %c0_1069 = arith.constant 0 : index
      %c14_1070 = arith.constant 14 : index
      %2173 = memref.load %arg6[%c0_1069, %c14_1070] : memref<16x16xf32, #tpu.memory_space<smem>>
      %2174 = vector.broadcast %2173 : f32 to vector<8x128xf32>
      %2175 = arith.mulf %200, %2174 : vector<8x128xf32>
      %c1_1071 = arith.constant 1 : index
      %c14_1072 = arith.constant 14 : index
      %2176 = memref.load %arg6[%c1_1071, %c14_1072] : memref<16x16xf32, #tpu.memory_space<smem>>
      %2177 = vector.broadcast %2176 : f32 to vector<8x128xf32>
      %2178 = arith.mulf %268, %2177 : vector<8x128xf32>
      %2179 = arith.addf %2175, %2178 : vector<8x128xf32>
      %c2_1073 = arith.constant 2 : index
      %c14_1074 = arith.constant 14 : index
      %2180 = memref.load %arg6[%c2_1073, %c14_1074] : memref<16x16xf32, #tpu.memory_space<smem>>
      %2181 = vector.broadcast %2180 : f32 to vector<8x128xf32>
      %2182 = arith.mulf %336, %2181 : vector<8x128xf32>
      %2183 = arith.addf %2179, %2182 : vector<8x128xf32>
      %c3_1075 = arith.constant 3 : index
      %c14_1076 = arith.constant 14 : index
      %2184 = memref.load %arg6[%c3_1075, %c14_1076] : memref<16x16xf32, #tpu.memory_space<smem>>
      %2185 = vector.broadcast %2184 : f32 to vector<8x128xf32>
      %2186 = arith.mulf %404, %2185 : vector<8x128xf32>
      %2187 = arith.addf %2183, %2186 : vector<8x128xf32>
      %c4_1077 = arith.constant 4 : index
      %c14_1078 = arith.constant 14 : index
      %2188 = memref.load %arg6[%c4_1077, %c14_1078] : memref<16x16xf32, #tpu.memory_space<smem>>
      %2189 = vector.broadcast %2188 : f32 to vector<8x128xf32>
      %2190 = arith.mulf %472, %2189 : vector<8x128xf32>
      %2191 = arith.addf %2187, %2190 : vector<8x128xf32>
      %c5_1079 = arith.constant 5 : index
      %c14_1080 = arith.constant 14 : index
      %2192 = memref.load %arg6[%c5_1079, %c14_1080] : memref<16x16xf32, #tpu.memory_space<smem>>
      %2193 = vector.broadcast %2192 : f32 to vector<8x128xf32>
      %2194 = arith.mulf %540, %2193 : vector<8x128xf32>
      %2195 = arith.addf %2191, %2194 : vector<8x128xf32>
      %c6_1081 = arith.constant 6 : index
      %c14_1082 = arith.constant 14 : index
      %2196 = memref.load %arg6[%c6_1081, %c14_1082] : memref<16x16xf32, #tpu.memory_space<smem>>
      %2197 = vector.broadcast %2196 : f32 to vector<8x128xf32>
      %2198 = arith.mulf %608, %2197 : vector<8x128xf32>
      %2199 = arith.addf %2195, %2198 : vector<8x128xf32>
      %c7_1083 = arith.constant 7 : index
      %c14_1084 = arith.constant 14 : index
      %2200 = memref.load %arg6[%c7_1083, %c14_1084] : memref<16x16xf32, #tpu.memory_space<smem>>
      %2201 = vector.broadcast %2200 : f32 to vector<8x128xf32>
      %2202 = arith.mulf %676, %2201 : vector<8x128xf32>
      %2203 = arith.addf %2199, %2202 : vector<8x128xf32>
      %c8_1085 = arith.constant 8 : index
      %c14_1086 = arith.constant 14 : index
      %2204 = memref.load %arg6[%c8_1085, %c14_1086] : memref<16x16xf32, #tpu.memory_space<smem>>
      %2205 = vector.broadcast %2204 : f32 to vector<8x128xf32>
      %2206 = arith.mulf %744, %2205 : vector<8x128xf32>
      %2207 = arith.addf %2203, %2206 : vector<8x128xf32>
      %c9_1087 = arith.constant 9 : index
      %c14_1088 = arith.constant 14 : index
      %2208 = memref.load %arg6[%c9_1087, %c14_1088] : memref<16x16xf32, #tpu.memory_space<smem>>
      %2209 = vector.broadcast %2208 : f32 to vector<8x128xf32>
      %2210 = arith.mulf %812, %2209 : vector<8x128xf32>
      %2211 = arith.addf %2207, %2210 : vector<8x128xf32>
      %c10_1089 = arith.constant 10 : index
      %c14_1090 = arith.constant 14 : index
      %2212 = memref.load %arg6[%c10_1089, %c14_1090] : memref<16x16xf32, #tpu.memory_space<smem>>
      %2213 = vector.broadcast %2212 : f32 to vector<8x128xf32>
      %2214 = arith.mulf %880, %2213 : vector<8x128xf32>
      %2215 = arith.addf %2211, %2214 : vector<8x128xf32>
      %c11_1091 = arith.constant 11 : index
      %c14_1092 = arith.constant 14 : index
      %2216 = memref.load %arg6[%c11_1091, %c14_1092] : memref<16x16xf32, #tpu.memory_space<smem>>
      %2217 = vector.broadcast %2216 : f32 to vector<8x128xf32>
      %2218 = arith.mulf %948, %2217 : vector<8x128xf32>
      %2219 = arith.addf %2215, %2218 : vector<8x128xf32>
      %c12_1093 = arith.constant 12 : index
      %c14_1094 = arith.constant 14 : index
      %2220 = memref.load %arg6[%c12_1093, %c14_1094] : memref<16x16xf32, #tpu.memory_space<smem>>
      %2221 = vector.broadcast %2220 : f32 to vector<8x128xf32>
      %2222 = arith.mulf %1016, %2221 : vector<8x128xf32>
      %2223 = arith.addf %2219, %2222 : vector<8x128xf32>
      %c13_1095 = arith.constant 13 : index
      %c14_1096 = arith.constant 14 : index
      %2224 = memref.load %arg6[%c13_1095, %c14_1096] : memref<16x16xf32, #tpu.memory_space<smem>>
      %2225 = vector.broadcast %2224 : f32 to vector<8x128xf32>
      %2226 = arith.mulf %1084, %2225 : vector<8x128xf32>
      %2227 = arith.addf %2223, %2226 : vector<8x128xf32>
      %c14_1097 = arith.constant 14 : index
      %c14_1098 = arith.constant 14 : index
      %2228 = memref.load %arg6[%c14_1097, %c14_1098] : memref<16x16xf32, #tpu.memory_space<smem>>
      %2229 = vector.broadcast %2228 : f32 to vector<8x128xf32>
      %2230 = arith.mulf %1152, %2229 : vector<8x128xf32>
      %2231 = arith.addf %2227, %2230 : vector<8x128xf32>
      %c15_1099 = arith.constant 15 : index
      %c14_1100 = arith.constant 14 : index
      %2232 = memref.load %arg6[%c15_1099, %c14_1100] : memref<16x16xf32, #tpu.memory_space<smem>>
      %2233 = vector.broadcast %2232 : f32 to vector<8x128xf32>
      %2234 = arith.mulf %1220, %2233 : vector<8x128xf32>
      %2235 = arith.addf %2231, %2234 : vector<8x128xf32>
      %c14_1101 = arith.constant 14 : index
      %2236 = memref.load %arg7[%c14_1101] : memref<16xf32, #tpu.memory_space<smem>>
      %2237 = vector.broadcast %2236 : f32 to vector<8x128xf32>
      %2238 = arith.addf %2235, %2237 : vector<8x128xf32>
      %cst_1102 = arith.constant 0.000000e+00 : f32
      %2239 = vector.broadcast %cst_1102 : f32 to vector<8x128xf32>
      %2240 = arith.maximumf %2238, %2239 : vector<8x128xf32>
      %c0_1103 = arith.constant 0 : index
      %c15_1104 = arith.constant 15 : index
      %2241 = memref.load %arg6[%c0_1103, %c15_1104] : memref<16x16xf32, #tpu.memory_space<smem>>
      %2242 = vector.broadcast %2241 : f32 to vector<8x128xf32>
      %2243 = arith.mulf %200, %2242 : vector<8x128xf32>
      %c1_1105 = arith.constant 1 : index
      %c15_1106 = arith.constant 15 : index
      %2244 = memref.load %arg6[%c1_1105, %c15_1106] : memref<16x16xf32, #tpu.memory_space<smem>>
      %2245 = vector.broadcast %2244 : f32 to vector<8x128xf32>
      %2246 = arith.mulf %268, %2245 : vector<8x128xf32>
      %2247 = arith.addf %2243, %2246 : vector<8x128xf32>
      %c2_1107 = arith.constant 2 : index
      %c15_1108 = arith.constant 15 : index
      %2248 = memref.load %arg6[%c2_1107, %c15_1108] : memref<16x16xf32, #tpu.memory_space<smem>>
      %2249 = vector.broadcast %2248 : f32 to vector<8x128xf32>
      %2250 = arith.mulf %336, %2249 : vector<8x128xf32>
      %2251 = arith.addf %2247, %2250 : vector<8x128xf32>
      %c3_1109 = arith.constant 3 : index
      %c15_1110 = arith.constant 15 : index
      %2252 = memref.load %arg6[%c3_1109, %c15_1110] : memref<16x16xf32, #tpu.memory_space<smem>>
      %2253 = vector.broadcast %2252 : f32 to vector<8x128xf32>
      %2254 = arith.mulf %404, %2253 : vector<8x128xf32>
      %2255 = arith.addf %2251, %2254 : vector<8x128xf32>
      %c4_1111 = arith.constant 4 : index
      %c15_1112 = arith.constant 15 : index
      %2256 = memref.load %arg6[%c4_1111, %c15_1112] : memref<16x16xf32, #tpu.memory_space<smem>>
      %2257 = vector.broadcast %2256 : f32 to vector<8x128xf32>
      %2258 = arith.mulf %472, %2257 : vector<8x128xf32>
      %2259 = arith.addf %2255, %2258 : vector<8x128xf32>
      %c5_1113 = arith.constant 5 : index
      %c15_1114 = arith.constant 15 : index
      %2260 = memref.load %arg6[%c5_1113, %c15_1114] : memref<16x16xf32, #tpu.memory_space<smem>>
      %2261 = vector.broadcast %2260 : f32 to vector<8x128xf32>
      %2262 = arith.mulf %540, %2261 : vector<8x128xf32>
      %2263 = arith.addf %2259, %2262 : vector<8x128xf32>
      %c6_1115 = arith.constant 6 : index
      %c15_1116 = arith.constant 15 : index
      %2264 = memref.load %arg6[%c6_1115, %c15_1116] : memref<16x16xf32, #tpu.memory_space<smem>>
      %2265 = vector.broadcast %2264 : f32 to vector<8x128xf32>
      %2266 = arith.mulf %608, %2265 : vector<8x128xf32>
      %2267 = arith.addf %2263, %2266 : vector<8x128xf32>
      %c7_1117 = arith.constant 7 : index
      %c15_1118 = arith.constant 15 : index
      %2268 = memref.load %arg6[%c7_1117, %c15_1118] : memref<16x16xf32, #tpu.memory_space<smem>>
      %2269 = vector.broadcast %2268 : f32 to vector<8x128xf32>
      %2270 = arith.mulf %676, %2269 : vector<8x128xf32>
      %2271 = arith.addf %2267, %2270 : vector<8x128xf32>
      %c8_1119 = arith.constant 8 : index
      %c15_1120 = arith.constant 15 : index
      %2272 = memref.load %arg6[%c8_1119, %c15_1120] : memref<16x16xf32, #tpu.memory_space<smem>>
      %2273 = vector.broadcast %2272 : f32 to vector<8x128xf32>
      %2274 = arith.mulf %744, %2273 : vector<8x128xf32>
      %2275 = arith.addf %2271, %2274 : vector<8x128xf32>
      %c9_1121 = arith.constant 9 : index
      %c15_1122 = arith.constant 15 : index
      %2276 = memref.load %arg6[%c9_1121, %c15_1122] : memref<16x16xf32, #tpu.memory_space<smem>>
      %2277 = vector.broadcast %2276 : f32 to vector<8x128xf32>
      %2278 = arith.mulf %812, %2277 : vector<8x128xf32>
      %2279 = arith.addf %2275, %2278 : vector<8x128xf32>
      %c10_1123 = arith.constant 10 : index
      %c15_1124 = arith.constant 15 : index
      %2280 = memref.load %arg6[%c10_1123, %c15_1124] : memref<16x16xf32, #tpu.memory_space<smem>>
      %2281 = vector.broadcast %2280 : f32 to vector<8x128xf32>
      %2282 = arith.mulf %880, %2281 : vector<8x128xf32>
      %2283 = arith.addf %2279, %2282 : vector<8x128xf32>
      %c11_1125 = arith.constant 11 : index
      %c15_1126 = arith.constant 15 : index
      %2284 = memref.load %arg6[%c11_1125, %c15_1126] : memref<16x16xf32, #tpu.memory_space<smem>>
      %2285 = vector.broadcast %2284 : f32 to vector<8x128xf32>
      %2286 = arith.mulf %948, %2285 : vector<8x128xf32>
      %2287 = arith.addf %2283, %2286 : vector<8x128xf32>
      %c12_1127 = arith.constant 12 : index
      %c15_1128 = arith.constant 15 : index
      %2288 = memref.load %arg6[%c12_1127, %c15_1128] : memref<16x16xf32, #tpu.memory_space<smem>>
      %2289 = vector.broadcast %2288 : f32 to vector<8x128xf32>
      %2290 = arith.mulf %1016, %2289 : vector<8x128xf32>
      %2291 = arith.addf %2287, %2290 : vector<8x128xf32>
      %c13_1129 = arith.constant 13 : index
      %c15_1130 = arith.constant 15 : index
      %2292 = memref.load %arg6[%c13_1129, %c15_1130] : memref<16x16xf32, #tpu.memory_space<smem>>
      %2293 = vector.broadcast %2292 : f32 to vector<8x128xf32>
      %2294 = arith.mulf %1084, %2293 : vector<8x128xf32>
      %2295 = arith.addf %2291, %2294 : vector<8x128xf32>
      %c14_1131 = arith.constant 14 : index
      %c15_1132 = arith.constant 15 : index
      %2296 = memref.load %arg6[%c14_1131, %c15_1132] : memref<16x16xf32, #tpu.memory_space<smem>>
      %2297 = vector.broadcast %2296 : f32 to vector<8x128xf32>
      %2298 = arith.mulf %1152, %2297 : vector<8x128xf32>
      %2299 = arith.addf %2295, %2298 : vector<8x128xf32>
      %c15_1133 = arith.constant 15 : index
      %c15_1134 = arith.constant 15 : index
      %2300 = memref.load %arg6[%c15_1133, %c15_1134] : memref<16x16xf32, #tpu.memory_space<smem>>
      %2301 = vector.broadcast %2300 : f32 to vector<8x128xf32>
      %2302 = arith.mulf %1220, %2301 : vector<8x128xf32>
      %2303 = arith.addf %2299, %2302 : vector<8x128xf32>
      %c15_1135 = arith.constant 15 : index
      %2304 = memref.load %arg7[%c15_1135] : memref<16xf32, #tpu.memory_space<smem>>
      %2305 = vector.broadcast %2304 : f32 to vector<8x128xf32>
      %2306 = arith.addf %2303, %2305 : vector<8x128xf32>
      %cst_1136 = arith.constant 0.000000e+00 : f32
      %2307 = vector.broadcast %cst_1136 : f32 to vector<8x128xf32>
      %2308 = arith.maximumf %2306, %2307 : vector<8x128xf32>
      %c0_1137 = arith.constant 0 : index
      %c0_1138 = arith.constant 0 : index
      %2309 = memref.load %arg8[%c0_1137, %c0_1138] : memref<16x1xf32, #tpu.memory_space<smem>>
      %2310 = vector.broadcast %2309 : f32 to vector<8x128xf32>
      %2311 = arith.mulf %1288, %2310 : vector<8x128xf32>
      %c1_1139 = arith.constant 1 : index
      %c0_1140 = arith.constant 0 : index
      %2312 = memref.load %arg8[%c1_1139, %c0_1140] : memref<16x1xf32, #tpu.memory_space<smem>>
      %2313 = vector.broadcast %2312 : f32 to vector<8x128xf32>
      %2314 = arith.mulf %1356, %2313 : vector<8x128xf32>
      %2315 = arith.addf %2311, %2314 : vector<8x128xf32>
      %c2_1141 = arith.constant 2 : index
      %c0_1142 = arith.constant 0 : index
      %2316 = memref.load %arg8[%c2_1141, %c0_1142] : memref<16x1xf32, #tpu.memory_space<smem>>
      %2317 = vector.broadcast %2316 : f32 to vector<8x128xf32>
      %2318 = arith.mulf %1424, %2317 : vector<8x128xf32>
      %2319 = arith.addf %2315, %2318 : vector<8x128xf32>
      %c3_1143 = arith.constant 3 : index
      %c0_1144 = arith.constant 0 : index
      %2320 = memref.load %arg8[%c3_1143, %c0_1144] : memref<16x1xf32, #tpu.memory_space<smem>>
      %2321 = vector.broadcast %2320 : f32 to vector<8x128xf32>
      %2322 = arith.mulf %1492, %2321 : vector<8x128xf32>
      %2323 = arith.addf %2319, %2322 : vector<8x128xf32>
      %c4_1145 = arith.constant 4 : index
      %c0_1146 = arith.constant 0 : index
      %2324 = memref.load %arg8[%c4_1145, %c0_1146] : memref<16x1xf32, #tpu.memory_space<smem>>
      %2325 = vector.broadcast %2324 : f32 to vector<8x128xf32>
      %2326 = arith.mulf %1560, %2325 : vector<8x128xf32>
      %2327 = arith.addf %2323, %2326 : vector<8x128xf32>
      %c5_1147 = arith.constant 5 : index
      %c0_1148 = arith.constant 0 : index
      %2328 = memref.load %arg8[%c5_1147, %c0_1148] : memref<16x1xf32, #tpu.memory_space<smem>>
      %2329 = vector.broadcast %2328 : f32 to vector<8x128xf32>
      %2330 = arith.mulf %1628, %2329 : vector<8x128xf32>
      %2331 = arith.addf %2327, %2330 : vector<8x128xf32>
      %c6_1149 = arith.constant 6 : index
      %c0_1150 = arith.constant 0 : index
      %2332 = memref.load %arg8[%c6_1149, %c0_1150] : memref<16x1xf32, #tpu.memory_space<smem>>
      %2333 = vector.broadcast %2332 : f32 to vector<8x128xf32>
      %2334 = arith.mulf %1696, %2333 : vector<8x128xf32>
      %2335 = arith.addf %2331, %2334 : vector<8x128xf32>
      %c7_1151 = arith.constant 7 : index
      %c0_1152 = arith.constant 0 : index
      %2336 = memref.load %arg8[%c7_1151, %c0_1152] : memref<16x1xf32, #tpu.memory_space<smem>>
      %2337 = vector.broadcast %2336 : f32 to vector<8x128xf32>
      %2338 = arith.mulf %1764, %2337 : vector<8x128xf32>
      %2339 = arith.addf %2335, %2338 : vector<8x128xf32>
      %c8_1153 = arith.constant 8 : index
      %c0_1154 = arith.constant 0 : index
      %2340 = memref.load %arg8[%c8_1153, %c0_1154] : memref<16x1xf32, #tpu.memory_space<smem>>
      %2341 = vector.broadcast %2340 : f32 to vector<8x128xf32>
      %2342 = arith.mulf %1832, %2341 : vector<8x128xf32>
      %2343 = arith.addf %2339, %2342 : vector<8x128xf32>
      %c9_1155 = arith.constant 9 : index
      %c0_1156 = arith.constant 0 : index
      %2344 = memref.load %arg8[%c9_1155, %c0_1156] : memref<16x1xf32, #tpu.memory_space<smem>>
      %2345 = vector.broadcast %2344 : f32 to vector<8x128xf32>
      %2346 = arith.mulf %1900, %2345 : vector<8x128xf32>
      %2347 = arith.addf %2343, %2346 : vector<8x128xf32>
      %c10_1157 = arith.constant 10 : index
      %c0_1158 = arith.constant 0 : index
      %2348 = memref.load %arg8[%c10_1157, %c0_1158] : memref<16x1xf32, #tpu.memory_space<smem>>
      %2349 = vector.broadcast %2348 : f32 to vector<8x128xf32>
      %2350 = arith.mulf %1968, %2349 : vector<8x128xf32>
      %2351 = arith.addf %2347, %2350 : vector<8x128xf32>
      %c11_1159 = arith.constant 11 : index
      %c0_1160 = arith.constant 0 : index
      %2352 = memref.load %arg8[%c11_1159, %c0_1160] : memref<16x1xf32, #tpu.memory_space<smem>>
      %2353 = vector.broadcast %2352 : f32 to vector<8x128xf32>
      %2354 = arith.mulf %2036, %2353 : vector<8x128xf32>
      %2355 = arith.addf %2351, %2354 : vector<8x128xf32>
      %c12_1161 = arith.constant 12 : index
      %c0_1162 = arith.constant 0 : index
      %2356 = memref.load %arg8[%c12_1161, %c0_1162] : memref<16x1xf32, #tpu.memory_space<smem>>
      %2357 = vector.broadcast %2356 : f32 to vector<8x128xf32>
      %2358 = arith.mulf %2104, %2357 : vector<8x128xf32>
      %2359 = arith.addf %2355, %2358 : vector<8x128xf32>
      %c13_1163 = arith.constant 13 : index
      %c0_1164 = arith.constant 0 : index
      %2360 = memref.load %arg8[%c13_1163, %c0_1164] : memref<16x1xf32, #tpu.memory_space<smem>>
      %2361 = vector.broadcast %2360 : f32 to vector<8x128xf32>
      %2362 = arith.mulf %2172, %2361 : vector<8x128xf32>
      %2363 = arith.addf %2359, %2362 : vector<8x128xf32>
      %c14_1165 = arith.constant 14 : index
      %c0_1166 = arith.constant 0 : index
      %2364 = memref.load %arg8[%c14_1165, %c0_1166] : memref<16x1xf32, #tpu.memory_space<smem>>
      %2365 = vector.broadcast %2364 : f32 to vector<8x128xf32>
      %2366 = arith.mulf %2240, %2365 : vector<8x128xf32>
      %2367 = arith.addf %2363, %2366 : vector<8x128xf32>
      %c15_1167 = arith.constant 15 : index
      %c0_1168 = arith.constant 0 : index
      %2368 = memref.load %arg8[%c15_1167, %c0_1168] : memref<16x1xf32, #tpu.memory_space<smem>>
      %2369 = vector.broadcast %2368 : f32 to vector<8x128xf32>
      %2370 = arith.mulf %2308, %2369 : vector<8x128xf32>
      %2371 = arith.addf %2367, %2370 : vector<8x128xf32>
      %c0_1169 = arith.constant 0 : index
      %2372 = memref.load %arg9[%c0_1169] : memref<1xf32, #tpu.memory_space<smem>>
      %2373 = vector.broadcast %2372 : f32 to vector<8x128xf32>
      %2374 = arith.addf %2371, %2373 : vector<8x128xf32>
      %2375 = arith.addf %2374, %4 : vector<8x128xf32>
      %cst_1170 = arith.constant 0.000000e+00 : f32
      %2376 = vector.broadcast %cst_1170 : f32 to vector<8x128xf32>
      %2377 = arith.subf %2376, %2375 : vector<8x128xf32>
      %2378 = math.exp %2377 : vector<8x128xf32>
      %cst_1171 = arith.constant 1.000000e+00 : f32
      %2379 = vector.broadcast %cst_1171 : f32 to vector<8x128xf32>
      %2380 = arith.addf %2379, %2378 : vector<8x128xf32>
      %cst_1172 = arith.constant 1.000000e+00 : f32
      %2381 = vector.broadcast %cst_1172 : f32 to vector<8x128xf32>
      %2382 = arith.divf %2381, %2380 : vector<8x128xf32>
      %2383 = arith.index_cast %2 : i32 to index
      %c0_1173 = arith.constant 0 : index
      %2384 = vector.load %arg10[%2383, %c0_1173] : memref<16x128xf32, #tpu.memory_space<vmem>>, vector<8x128xf32>
      tpu.vector_store %arg10[%2383, %c0_1173], %2382 {strides = array<i32>} : memref<16x128xf32, #tpu.memory_space<vmem>>, vector<8x128xf32>,
    }
    %c2_i32_0 = arith.constant 2 : i32
    return
  }
  func.func @transform_0(%arg0: i32) -> (i32, i32) {
    %c0_i32 = arith.constant 0 : i32
    %c0_i32_0 = arith.constant 0 : i32
    return %arg0, %c0_i32 : i32, i32
  }
  func.func @transform_1(%arg0: i32) -> (i32, i32) {
    %c0_i32 = arith.constant 0 : i32
    %c0_i32_0 = arith.constant 0 : i32
    %c0_i32_1 = arith.constant 0 : i32
    return %c0_i32, %c0_i32_0 : i32, i32
  }
  func.func @transform_2(%arg0: i32) -> i32 {
    %c0_i32 = arith.constant 0 : i32
    %c0_i32_0 = arith.constant 0 : i32
    return %c0_i32 : i32
  }
  func.func @transform_3(%arg0: i32) -> (i32, i32) {
    %c0_i32 = arith.constant 0 : i32
    %c0_i32_0 = arith.constant 0 : i32
    %c0_i32_1 = arith.constant 0 : i32
    return %c0_i32, %c0_i32_0 : i32, i32
  }
  func.func @transform_4(%arg0: i32) -> i32 {
    %c0_i32 = arith.constant 0 : i32
    %c0_i32_0 = arith.constant 0 : i32
    return %c0_i32 : i32
  }
  func.func @transform_5(%arg0: i32) -> (i32, i32) {
    %c0_i32 = arith.constant 0 : i32
    %c0_i32_0 = arith.constant 0 : i32
    %c0_i32_1 = arith.constant 0 : i32
    return %c0_i32, %c0_i32_0 : i32, i32
  }
  func.func @transform_6(%arg0: i32) -> i32 {
    %c0_i32 = arith.constant 0 : i32
    %c0_i32_0 = arith.constant 0 : i32
    return %c0_i32 : i32
  }
  func.func @transform_7(%arg0: i32) -> (i32, i32) {
    %c0_i32 = arith.constant 0 : i32
    %c0_i32_0 = arith.constant 0 : i32
    %c0_i32_1 = arith.constant 0 : i32
    return %c0_i32, %c0_i32_0 : i32, i32
  }
  func.func @transform_8(%arg0: i32) -> i32 {
    %c0_i32 = arith.constant 0 : i32
    %c0_i32_0 = arith.constant 0 : i32
    return %c0_i32 : i32
  }
  func.func @transform_9(%arg0: i32) -> (i32, i32) {
    %c0_i32 = arith.constant 0 : i32
    %c0_i32_0 = arith.constant 0 : i32
    return %arg0, %c0_i32 : i32, i32
  }
}

</mosaic_0001>

<bundles_post_ra>
// kernel: tpu_custom_call.1
= control target key start
LH: loop header
LB: loop body
LE: loop exit
PB: predicated region body
PF: predicated region fallthrough
CT: control target
= control target key end

     0   :  { %s5889_s0 = inlined_call_operand.vmem [shape: f32[16,128], index: 0, kind: input, shape index: {}]   ;;  %s5890_s1 = inlined_call_operand.vmem [shape: f32[1,16], index: 1, kind: input, shape index: {}]   ;;  %s5891_s2 = inlined_call_operand.vmem [shape: f32[16], index: 2, kind: input, shape index: {}]   ;;  %s5892_s3 = inlined_call_operand.hbm [shape: f32[16,16], index: 3, kind: input, shape index: {}]   ;;  %s5893_s4 = inlined_call_operand.vmem [shape: f32[16], index: 4, kind: input, shape index: {}]   ;;  %s5894_s5 = inlined_call_operand.hbm [shape: f32[16,16], index: 5, kind: input, shape index: {}]   ;;  %s5895_s6 = inlined_call_operand.vmem [shape: f32[16], index: 6, kind: input, shape index: {}]   ;;  %s5896_s7 = inlined_call_operand.vmem [shape: f32[16,1], index: 7, kind: input, shape index: {}]   ;;  %s5897_s8 = inlined_call_operand.<no memory space> [shape: f32[1], index: 8, kind: input, shape index: {}]   ;;  %s5898_s9 = inlined_call_operand.hbm [shape: f32[16,128], index: 9, kind: output, shape index: {}]  }
   0x1   :  { %5919 = sst [smem:[#allocation153_spill]] %s5889_s0 }
   0x2   :  { %5920 = sst [smem:[#allocation154_spill]] %s5898_s9 }
   0x3   :  { %14 = sst [smem:[#allocation2]] %s5897_s8 }
   0x4   :  { %15 = vsyncpa [#allocation6], 0 }
   0x5   :  { %16 = vsyncpa [#allocation8], 0 }
   0x6   :  { %17 = vsyncpa [#allocation5], 0 }
   0x7   :  { %18 = vsyncpa [#allocation12], 0 }
   0x8   :  { %19 = vsyncpa [#allocation14], 0  ;;  %s37_s13 = sshll.u32 %s5891_s2, 4  ;;  %s38_s13 = int_to_ptr.vmem [resolvable:$true] %s37_s13 }
   0x9   :  { %20 = vsyncpa [#allocation4], 0  ;;  %s77_s16 = sshll.u32 %s5895_s6, 4  ;;  %s3247_s17 = smov [#allocation7]   ;;  %s78_s16 = int_to_ptr.vmem [resolvable:$true] %s77_s16 }
   0xa   :  { %40 = dma.vmem_to_smem %s38_s13, 16, %s3247_s17, [#allocation8]  }
   0xb   :  { %s3248_s18 = smov [#allocation13]   ;;  %s28_s20 = sshll.u32 %s5890_s1, 4  ;;  %s29_s20 = int_to_ptr.vmem [resolvable:$true] %s28_s20 }
   0xc   :  { %80 = dma.vmem_to_smem %s78_s16, 16, %s3248_s18, [#allocation14]  }
   0xd   :  { %s45_s2 = sshll.u32 %s5892_s3, 4  ;;  %s3249_s23 = smov [#allocation3]   ;;  %s46_s2 = int_to_ptr.hbm [resolvable:$true] %s45_s2 }
   0xe   :  { %31 = dma.vmem_to_smem %s29_s20, 16, %s3249_s23, [#allocation6]  }
   0xf   :  { %s3250_s24 = smov [#allocation9]   ;;  %s5899_s25 = smov 128  }
  0x10   :  { %s5900_s6 = smov 8   ;;  %s57_s28 = sshll.u32 %s5893_s4, 4  ;;  %s58_s28 = int_to_ptr.vmem [resolvable:$true] %s57_s28 }
  0x11   :  { %51 = dma.hbm_to_smem %s46_s2, 256, %s3250_s24, [#allocation5], %s5899_s25, %s5899_s25, %s5900_s6  }
  0x12   :  { %s65_s30 = sshll.u32 %s5894_s5, 4  ;;  %s3253_s3 = smov [#allocation10]   ;;  %s66_s30 = int_to_ptr.hbm [resolvable:$true] %s65_s30 }
  0x13   :  { %60 = dma.vmem_to_smem %s58_s28, 16, %s3253_s3, [#allocation8]  }
  0x14   :  { %s3254_s10 = smov [#allocation11]   ;;  %s85_s13 = sshll.u32 %s5896_s7, 4  ;;  %s86_s13 = int_to_ptr.vmem [resolvable:$true] %s85_s13 }
  0x15   :  { %71 = dma.hbm_to_smem %s66_s30, 256, %s3254_s10, [#allocation12], %s5899_s25, %s5899_s25, %s5900_s6  }
  0x16   :  { %s3255_s14 = smov [#allocation15]  }
  0x17   :  { %91 = dma.vmem_to_smem %s86_s13, 256, %s3255_s14, [#allocation14], %s5899_s25, %s5899_s25, %s5900_s6  }
  0x18   :  { %3229 = dma.done.wait [#allocation6], 16  }
  0x19   :  { %3230 = vsyncadd [#allocation6], 4294967280 }
  0x1a   :  { %3231 = dma.done.wait [#allocation8], 16  }
  0x1b   :  { %3232 = vsyncadd [#allocation8], 4294967280 }
  0x1c   :  { %3233 = dma.done.wait [#allocation5], 256  }
  0x1d   :  { %3234 = vsyncadd [#allocation5], 4294967040 }
  0x1e   :  { %3235 = dma.done.wait [#allocation8], 16  }
  0x1f   :  { %3236 = vsyncadd [#allocation8], 4294967280 }
  0x20   :  { %3237 = dma.done.wait [#allocation12], 256  }
  0x21   :  { %3238 = vsyncadd [#allocation12], 4294967040 }
  0x22   :  { %3239 = dma.done.wait [#allocation14], 272  }
  0x23   :  { %3240 = vsyncadd [#allocation14], 4294967024 }
  0x24   :  { %122 = sfence }
  0x25   :  { %s3340_s4 = smov 0  }
  0x26 LB: > { %5921 = sst [smem:[#allocation24_spill]] %s3245_s4  ;;  %s3245_s4 = sphi %s3340_s4, %s128_s4  }
  0x27   : > { %s3345_s5 = sld [smem:[#allocation3]] }
  0x28   : > { %s3347_s7 = sld [smem:[#allocation7]] }
  0x29   : > { %s3349_s15 = sld [smem:[#allocation3 + $0x1]] }
  0x2a   : > { %s3351_s16 = sld [smem:[#allocation7 + $0x1]] }
  0x2b   : > { %s3353_s17 = sld [smem:[#allocation3 + $0x2]] }
  0x2c   : > { %s3355_s18 = sld [smem:[#allocation7 + $0x2]] }
  0x2d   : > { %s3357_s8 = sld [smem:[#allocation3 + $0x3]]  ;;  %v133_v1 = vstv %s3345_s5 }
  0x2e   : > { %s3359_s19 = sld [smem:[#allocation7 + $0x3]]  ;;  %v136_v6 = vstv %s3347_s7 }
  0x2f   : > { %s3361_s20 = sld [smem:[#allocation3 + $0x4]]  ;;  %v140_v2 = vstv %s3349_s15 }
  0x30   : > { %s3363_s21 = sld [smem:[#allocation7 + $0x4]]  ;;  %v143_v7 = vstv %s3351_s16 }
  0x31   : > { %s3365_s22 = sld [smem:[#allocation3 + $0x5]]  ;;  %v147_v5 = vstv %s3353_s17 }
  0x32   : > { %s3367_s2 = sld [smem:[#allocation7 + $0x5]]  ;;  %v150_v11 = vstv %s3355_s18 }
  0x33   : > { %s3369_s23 = sld [smem:[#allocation3 + $0x6]]  ;;  %v154_v12 = vstv %s3357_s8 }
  0x34   : > { %s3371_s24 = sld [smem:[#allocation7 + $0x6]]  ;;  %v157_v17 = vstv %s3359_s19 }
  0x35   : > { %s3373_s26 = sld [smem:[#allocation3 + $0x7]]  ;;  %v161_v18 = vstv %s3361_s20 }
  0x36   : > { %s3375_s27 = sld [smem:[#allocation7 + $0x7]]  ;;  %v164_v24 = vstv %s3363_s21 }
  0x37   : > { %s3377_s28 = sld [smem:[#allocation3 + $0x8]]  ;;  %v168_v25 = vstv %s3365_s22 }
  0x38   : > { %s3379_s1 = sld [smem:[#allocation7 + $0x8]]  ;;  %v171_v32 = vstv %s3367_s2 }
  0x39   : > { %s3381_s29 = sld [smem:[#allocation3 + $0x9]]  ;;  %v175_v33 = vstv %s3369_s23 }
  0x3a   : > { %s3383_s30 = sld [smem:[#allocation7 + $0x9]]  ;;  %v178_v40 = vstv %s3371_s24 }
  0x3b   : > { %5922 = sst [smem:[#allocation25_spill]] %s3373_s26 }
  0x3c   : > { %5923 = sst [smem:[#allocation26_spill]] %s3375_s27 }
  0x3d   : > { %5924 = sst [smem:[#allocation27_spill]] %s3377_s28 }
  0x3e   : > { %5925 = sst [smem:[#allocation28_spill]] %s3379_s1 }
  0x3f   : > { %5926 = sst [smem:[#allocation29_spill]] %s3381_s29 }
  0x40   : > { %5927 = sst [smem:[#allocation30_spill]] %s3383_s30 }
  0x41   : > { %s3385_s3 = sld [smem:[#allocation3 + $0xa]] }
  0x42   : > { %s3387_s10 = sld [smem:[#allocation7 + $0xa]] }
  0x43   : > { %s3389_s11 = sld [smem:[#allocation3 + $0xb]] }
  0x44   : > { %s3391_s12 = sld [smem:[#allocation7 + $0xb]] }
  0x45   : > { %s3393_s13 = sld [smem:[#allocation3 + $0xc]] }
  0x46   : > { %s3395_s14 = sld [smem:[#allocation7 + $0xc]] }
  0x47   : > { %5928 = sst [smem:[#allocation31_spill]] %s3385_s3 }
  0x48   : > { %5929 = sst [smem:[#allocation32_spill]] %s3387_s10 }
  0x49   : > { %5930 = sst [smem:[#allocation33_spill]] %s3389_s11 }
  0x4a   : > { %5931 = sst [smem:[#allocation34_spill]] %s3391_s12 }
  0x4b   : > { %5932 = sst [smem:[#allocation35_spill]] %s3393_s13 }
  0x4c   : > { %5933 = sst [smem:[#allocation36_spill]] %s3395_s14 }
  0x4d   : > { %s3397_s25 = sld [smem:[#allocation3 + $0xd]] }
  0x4e   : > { %s3399_s6 = sld [smem:[#allocation7 + $0xd]] }
  0x4f   : > { %s3401_s9 = sld [smem:[#allocation3 + $0xe]] }
  0x50   : > { %s3403_s1 = sld [smem:[#allocation7 + $0xe]] }
  0x51   : > { %s3405_s30 = sld [smem:[#allocation3 + $0xf]] }
  0x52   : > { %s3407_s3 = sld [smem:[#allocation7 + $0xf]] }
  0x53   : > { %5934 = sst [smem:[#allocation37_spill]] %s3397_s25 }
  0x54   : > { %5935 = sst [smem:[#allocation38_spill]] %s3399_s6 }
  0x55   : > { %5936 = sst [smem:[#allocation39_spill]] %s3401_s9 }
  0x56   : > { %5937 = sst [smem:[#allocation40_spill]] %s3403_s1 }
  0x57   : > { %5938 = sst [smem:[#allocation41_spill]] %s3405_s30 }
  0x58   : > { %5939 = sst [smem:[#allocation42_spill]] %s3407_s3 }
  0x59   : > { %s3409_s10 = sld [smem:[#allocation9]] }
  0x5a   : > { %s3411_s11 = sld [smem:[#allocation9 + $0x80]] }
  0x5b   : > { %s3413_s12 = sld [smem:[#allocation9 + $0x100]] }
  0x5c   : > { %s3415_s13 = sld [smem:[#allocation9 + $0x180]] }
  0x5d   : > { %s3417_s14 = sld [smem:[#allocation9 + $0x200]] }
  0x5e   : > { %s3419_s25 = sld [smem:[#allocation9 + $0x280]] }
  0x5f   : > { %s3421_s6 = sld [smem:[#allocation9 + $0x300]]  ;;  %v245_v19 = vstv %s3409_s10 }
  0x60   : > { %s3423_s9 = sld [smem:[#allocation9 + $0x380]]  ;;  %v248_v20 = vstv %s3411_s11 }
  0x61   : > { %s3425_s1 = sld [smem:[#allocation9 + $0x400]]  ;;  %v252_v28 = vstv %s3413_s12 }
  0x62   : > { %s3427_s30 = sld [smem:[#allocation9 + $0x480]]  ;;  %v256_v36 = vstv %s3415_s13 }
  0x63   : > { %5940 = sst [smem:[#allocation43_spill]] %s3417_s14 }
  0x64   : > { %5941 = sst [smem:[#allocation44_spill]] %s3419_s25 }
  0x65   : > { %5942 = sst [smem:[#allocation45_spill]] %s3421_s6 }
  0x66   : > { %5943 = sst [smem:[#allocation46_spill]] %s3423_s9 }
  0x67   : > { %5944 = sst [smem:[#allocation47_spill]] %s3425_s1 }
  0x68   : > { %5945 = sst [smem:[#allocation48_spill]] %s3427_s30 }
  0x69   : > { %s3429_s3 = sld [smem:[#allocation9 + $0x500]] }
  0x6a   : > { %s3431_s29 = sld [smem:[#allocation9 + $0x580]] }
  0x6b   : > { %s3433_s28 = sld [smem:[#allocation9 + $0x600]] }
  0x6c   : > { %s3435_s27 = sld [smem:[#allocation9 + $0x680]] }
  0x6d   : > { %s3437_s26 = sld [smem:[#allocation9 + $0x700]] }
  0x6e   : > { %s3439_s14 = sld [smem:[#allocation9 + $0x780]] }
  0x6f   : > { %5946 = sst [smem:[#allocation49_spill]] %s3429_s3 }
  0x70   : > { %5947 = sst [smem:[#allocation50_spill]] %s3431_s29 }
  0x71   : > { %5948 = sst [smem:[#allocation51_spill]] %s3433_s28 }
  0x72   : > { %5949 = sst [smem:[#allocation52_spill]] %s3435_s27 }
  0x73   : > { %5950 = sst [smem:[#allocation53_spill]] %s3437_s26 }
  0x74   : > { %5951 = sst [smem:[#allocation54_spill]] %s3439_s14 }
  0x75   : > { %s3441_s25 = sld [smem:[#allocation10]] }
  0x76   : > { %s3443_s6 = sld [smem:[#allocation9 + $0x1]] }
  0x77   : > { %s3445_s9 = sld [smem:[#allocation9 + $0x81]] }
  0x78   : > { %s3447_s1 = sld [smem:[#allocation9 + $0x101]] }
  0x79   : > { %s3449_s30 = sld [smem:[#allocation9 + $0x181]] }
  0x7a   : > { %s3451_s3 = sld [smem:[#allocation9 + $0x201]] }
  0x7b   : > { %5952 = sst [smem:[#allocation55_spill]] %s3441_s25 }
  0x7c   : > { %5953 = sst [smem:[#allocation56_spill]] %s3443_s6 }
  0x7d   : > { %5954 = sst [smem:[#allocation57_spill]] %s3445_s9 }
  0x7e   : > { %5955 = sst [smem:[#allocation58_spill]] %s3447_s1 }
  0x7f   : > { %5956 = sst [smem:[#allocation59_spill]] %s3449_s30 }
  0x80   : > { %5957 = sst [smem:[#allocation60_spill]] %s3451_s3 }
  0x81   : > { %s3453_s29 = sld [smem:[#allocation9 + $0x281]] }
  0x82   : > { %s3455_s28 = sld [smem:[#allocation9 + $0x301]] }
  0x83   : > { %s3457_s27 = sld [smem:[#allocation9 + $0x381]] }
  0x84   : > { %s3459_s26 = sld [smem:[#allocation9 + $0x401]] }
  0x85   : > { %s3461_s14 = sld [smem:[#allocation9 + $0x481]] }
  0x86   : > { %s3463_s25 = sld [smem:[#allocation9 + $0x501]] }
  0x87   : > { %5958 = sst [smem:[#allocation61_spill]] %s3453_s29 }
  0x88   : > { %5959 = sst [smem:[#allocation62_spill]] %s3455_s28 }
  0x89   : > { %5960 = sst [smem:[#allocation63_spill]] %s3457_s27 }
  0x8a   : > { %5961 = sst [smem:[#allocation64_spill]] %s3459_s26 }
  0x8b   : > { %5962 = sst [smem:[#allocation65_spill]] %s3461_s14 }
  0x8c   : > { %5963 = sst [smem:[#allocation66_spill]] %s3463_s25 }
  0x8d   : > { %s3465_s6 = sld [smem:[#allocation9 + $0x581]] }
  0x8e   : > { %s3467_s9 = sld [smem:[#allocation9 + $0x601]] }
  0x8f   : > { %s3469_s1 = sld [smem:[#allocation9 + $0x681]] }
  0x90   : > { %s3471_s30 = sld [smem:[#allocation9 + $0x701]] }
  0x91   : > { %s3473_s3 = sld [smem:[#allocation9 + $0x781]] }
  0x92   : > { %s3475_s29 = sld [smem:[#allocation10 + $0x1]] }
  0x93   : > { %5964 = sst [smem:[#allocation67_spill]] %s3465_s6 }
  0x94   : > { %5965 = sst [smem:[#allocation68_spill]] %s3467_s9 }
  0x95   : > { %5966 = sst [smem:[#allocation69_spill]] %s3469_s1 }
  0x96   : > { %5967 = sst [smem:[#allocation70_spill]] %s3471_s30 }
  0x97   : > { %5968 = sst [smem:[#allocation71_spill]] %s3473_s3 }
  0x98   : > { %5969 = sst [smem:[#allocation72_spill]] %s3475_s29 }
  0x99   : > { %s3477_s28 = sld [smem:[#allocation9 + $0x2]] }
  0x9a   : > { %s3479_s27 = sld [smem:[#allocation9 + $0x82]] }
  0x9b   : > { %s3481_s26 = sld [smem:[#allocation9 + $0x102]] }
  0x9c   : > { %s3483_s14 = sld [smem:[#allocation9 + $0x182]] }
  0x9d   : > { %s3485_s25 = sld [smem:[#allocation9 + $0x202]] }
  0x9e   : > { %s3487_s6 = sld [smem:[#allocation9 + $0x282]] }
  0x9f   : > { %5970 = sst [smem:[#allocation73_spill]] %s3477_s28 }
  0xa0   : > { %5971 = sst [smem:[#allocation74_spill]] %s3479_s27 }
  0xa1   : > { %5972 = sst [smem:[#allocation75_spill]] %s3481_s26 }
  0xa2   : > { %5973 = sst [smem:[#allocation76_spill]] %s3483_s14 }
  0xa3   : > { %5974 = sst [smem:[#allocation77_spill]] %s3485_s25 }
  0xa4   : > { %5975 = sst [smem:[#allocation78_spill]] %s3487_s6 }
  0xa5   : > { %s3489_s9 = sld [smem:[#allocation9 + $0x302]] }
  0xa6   : > { %s3491_s1 = sld [smem:[#allocation9 + $0x382]] }
  0xa7   : > { %s3493_s30 = sld [smem:[#allocation9 + $0x402]] }
  0xa8   : > { %s3495_s3 = sld [smem:[#allocation9 + $0x482]] }
  0xa9   : > { %s3497_s29 = sld [smem:[#allocation9 + $0x502]] }
  0xaa   : > { %s3499_s28 = sld [smem:[#allocation9 + $0x582]] }
  0xab   : > { %5976 = sst [smem:[#allocation79_spill]] %s3489_s9 }
  0xac   : > { %5977 = sst [smem:[#allocation80_spill]] %s3491_s1 }
  0xad   : > { %5978 = sst [smem:[#allocation81_spill]] %s3493_s30 }
  0xae   : > { %5979 = sst [smem:[#allocation82_spill]] %s3495_s3 }
  0xaf   : > { %5980 = sst [smem:[#allocation83_spill]] %s3497_s29 }
  0xb0   : > { %5981 = sst [smem:[#allocation84_spill]] %s3499_s28 }
  0xb1   : > { %s3501_s27 = sld [smem:[#allocation9 + $0x602]] }
  0xb2   : > { %s3503_s26 = sld [smem:[#allocation9 + $0x682]] }
  0xb3   : > { %s3505_s14 = sld [smem:[#allocation9 + $0x702]] }
  0xb4   : > { %s3507_s25 = sld [smem:[#allocation9 + $0x782]] }
  0xb5   : > { %s3509_s6 = sld [smem:[#allocation10 + $0x2]] }
  0xb6   : > { %s3511_s9 = sld [smem:[#allocation9 + $0x3]] }
  0xb7   : > { %5982 = sst [smem:[#allocation85_spill]] %s3501_s27 }
  0xb8   : > { %5983 = sst [smem:[#allocation86_spill]] %s3503_s26 }
  0xb9   : > { %5984 = sst [smem:[#allocation87_spill]] %s3505_s14 }
  0xba   : > { %5985 = sst [smem:[#allocation88_spill]] %s3507_s25 }
  0xbb   : > { %5986 = sst [smem:[#allocation89_spill]] %s3509_s6 }
  0xbc   : > { %5987 = sst [smem:[#allocation90_spill]] %s3511_s9 }
  0xbd   : > { %s3513_s1 = sld [smem:[#allocation9 + $0x83]] }
  0xbe   : > { %s3515_s30 = sld [smem:[#allocation9 + $0x103]] }
  0xbf   : > { %s3517_s3 = sld [smem:[#allocation9 + $0x183]] }
  0xc0   : > { %s3519_s29 = sld [smem:[#allocation9 + $0x203]] }
  0xc1   : > { %s3521_s28 = sld [smem:[#allocation9 + $0x283]] }
  0xc2   : > { %s3523_s27 = sld [smem:[#allocation9 + $0x303]] }
  0xc3   : > { %5988 = sst [smem:[#allocation91_spill]] %s3513_s1 }
  0xc4   : > { %5989 = sst [smem:[#allocation92_spill]] %s3515_s30 }
  0xc5   : > { %5990 = sst [smem:[#allocation93_spill]] %s3517_s3 }
  0xc6   : > { %5991 = sst [smem:[#allocation94_spill]] %s3519_s29 }
  0xc7   : > { %5992 = sst [smem:[#allocation95_spill]] %s3521_s28 }
  0xc8   : > { %5993 = sst [smem:[#allocation96_spill]] %s3523_s27 }
  0xc9   : > { %s3525_s26 = sld [smem:[#allocation9 + $0x383]] }
  0xca   : > { %s3527_s14 = sld [smem:[#allocation9 + $0x403]] }
  0xcb   : > { %s3529_s25 = sld [smem:[#allocation9 + $0x483]] }
  0xcc   : > { %s3531_s6 = sld [smem:[#allocation9 + $0x503]] }
  0xcd   : > { %s3533_s9 = sld [smem:[#allocation9 + $0x583]] }
  0xce   : > { %s3535_s1 = sld [smem:[#allocation9 + $0x603]] }
  0xcf   : > { %5994 = sst [smem:[#allocation97_spill]] %s3525_s26 }
  0xd0   : > { %5995 = sst [smem:[#allocation98_spill]] %s3527_s14 }
  0xd1   : > { %5996 = sst [smem:[#allocation99_spill]] %s3529_s25 }
  0xd2   : > { %5997 = sst [smem:[#allocation100_spill]] %s3531_s6 }
  0xd3   : > { %5998 = sst [smem:[#allocation101_spill]] %s3533_s9 }
  0xd4   : > { %5999 = sst [smem:[#allocation102_spill]] %s3535_s1 }
  0xd5   : > { %s3537_s30 = sld [smem:[#allocation9 + $0x683]] }
  0xd6   : > { %s3539_s3 = sld [smem:[#allocation9 + $0x703]] }
  0xd7   : > { %s3541_s29 = sld [smem:[#allocation9 + $0x783]] }
  0xd8   : > { %s3543_s28 = sld [smem:[#allocation10 + $0x3]] }
  0xd9   : > { %s3545_s27 = sld [smem:[#allocation9 + $0x4]] }
  0xda   : > { %s3547_s26 = sld [smem:[#allocation9 + $0x84]] }
  0xdb   : > { %6000 = sst [smem:[#allocation103_spill]] %s3537_s30 }
  0xdc   : > { %6001 = sst [smem:[#allocation104_spill]] %s3539_s3 }
  0xdd   : > { %6002 = sst [smem:[#allocation105_spill]] %s3541_s29 }
  0xde   : > { %6003 = sst [smem:[#allocation106_spill]] %s3543_s28 }
  0xdf   : > { %6004 = sst [smem:[#allocation107_spill]] %s3545_s27 }
  0xe0   : > { %6005 = sst [smem:[#allocation108_spill]] %s3547_s26 }
  0xe1   : > { %s3549_s14 = sld [smem:[#allocation9 + $0x104]] }
  0xe2   : > { %s3551_s25 = sld [smem:[#allocation9 + $0x184]] }
  0xe3   : > { %s3553_s6 = sld [smem:[#allocation9 + $0x204]] }
  0xe4   : > { %s3555_s9 = sld [smem:[#allocation9 + $0x284]] }
  0xe5   : > { %s3557_s1 = sld [smem:[#allocation9 + $0x304]] }
  0xe6   : > { %s3559_s30 = sld [smem:[#allocation9 + $0x384]] }
  0xe7   : > { %6006 = sst [smem:[#allocation109_spill]] %s3549_s14 }
  0xe8   : > { %6007 = sst [smem:[#allocation110_spill]] %s3551_s25 }
  0xe9   : > { %6008 = sst [smem:[#allocation111_spill]] %s3553_s6 }
  0xea   : > { %6009 = sst [smem:[#allocation112_spill]] %s3555_s9 }
  0xeb   : > { %6010 = sst [smem:[#allocation113_spill]] %s3557_s1 }
  0xec   : > { %6011 = sst [smem:[#allocation114_spill]] %s3559_s30 }
  0xed   : > { %s3561_s3 = sld [smem:[#allocation9 + $0x404]] }
  0xee   : > { %s3563_s29 = sld [smem:[#allocation9 + $0x484]] }
  0xef   : > { %s3565_s28 = sld [smem:[#allocation9 + $0x504]] }
  0xf0   : > { %s3567_s27 = sld [smem:[#allocation9 + $0x584]] }
  0xf1   : > { %s3569_s26 = sld [smem:[#allocation9 + $0x604]] }
  0xf2   : > { %s3571_s14 = sld [smem:[#allocation9 + $0x684]] }
  0xf3   : > { %6012 = sst [smem:[#allocation115_spill]] %s3561_s3 }
  0xf4   : > { %6013 = sst [smem:[#allocation116_spill]] %s3563_s29 }
  0xf5   : > { %6014 = sst [smem:[#allocation117_spill]] %s3565_s28 }
  0xf6   : > { %6015 = sst [smem:[#allocation118_spill]] %s3567_s27 }
  0xf7   : > { %6016 = sst [smem:[#allocation119_spill]] %s3569_s26 }
  0xf8   : > { %6017 = sst [smem:[#allocation120_spill]] %s3571_s14 }
  0xf9   : > { %s3573_s25 = sld [smem:[#allocation9 + $0x704]] }
  0xfa   : > { %s3575_s6 = sld [smem:[#allocation9 + $0x784]] }
  0xfb   : > { %s3577_s9 = sld [smem:[#allocation10 + $0x4]] }
  0xfc   : > { %s3579_s1 = sld [smem:[#allocation9 + $0x5]] }
  0xfd   : > { %s3581_s30 = sld [smem:[#allocation9 + $0x85]] }
  0xfe   : > { %s3583_s3 = sld [smem:[#allocation9 + $0x105]] }
  0xff   : > { %6018 = sst [smem:[#allocation121_spill]] %s3573_s25 }
 0x100   : > { %6019 = sst [smem:[#allocation122_spill]] %s3575_s6 }
 0x101   : > { %6020 = sst [smem:[#allocation123_spill]] %s3577_s9 }
 0x102   : > { %s3585_s28 = sld [smem:[#allocation9 + $0x185]] }
 0x103   : > { %6021 = sst [smem:[#allocation124_spill]] %s3581_s30 }
 0x104   : > { %6022 = sst [smem:[#allocation125_spill]] %s3583_s3 }
 0x105   : > { %s3587_s27 = sld [smem:[#allocation9 + $0x205]] }
 0x106   : > { %s3589_s26 = sld [smem:[#allocation9 + $0x285]] }
 0x107   : > { %s3591_s14 = sld [smem:[#allocation9 + $0x305]] }
 0x108   : > { %6023 = sst [smem:[#allocation126_spill]] %s3585_s28 }
 0x109   : > { %s3593_s25 = sld [smem:[#allocation9 + $0x385]] }
 0x10a   : > { %s3595_s6 = sld [smem:[#allocation9 + $0x405]] }
 0x10b   : > { %6024 = sst [smem:[#allocation127_spill]] %s3587_s27 }
 0x10c   : > { %6025 = sst [smem:[#allocation128_spill]] %s3589_s26 }
 0x10d   : > { %6026 = sst [smem:[#allocation129_spill]] %s3591_s14 }
 0x10e   : > { %s3597_s9 = sld [smem:[#allocation9 + $0x485]] }
 0x10f   : > { %6027 = sst [smem:[#allocation130_spill]] %s3593_s25 }
 0x110   : > { %6028 = sst [smem:[#allocation131_spill]] %s3595_s6  ;;  %s5906_s6 = sshll.u32 %s3245_s4, 3 }
 0x111   : > { %s3599_s29 = sld [smem:[#allocation9 + $0x505]] }
 0x112   : > { %s3601_s30 = sld [smem:[#allocation9 + $0x585]] }
 0x113   : > { %s3603_s3 = sld [smem:[#allocation9 + $0x605]] }
 0x114   : > { %6029 = sst [smem:[#allocation132_spill]] %s3597_s9 }
 0x115   : > { %s3605_s27 = sld [smem:[#allocation9 + $0x685]] }
 0x116   : > { %s3607_s26 = sld [smem:[#allocation9 + $0x705]] }
 0x117   : > { %6030 = sst [smem:[#allocation133_spill]] %s3599_s29 }
 0x118   : > { %6031 = sst [smem:[#allocation134_spill]] %s3601_s30 }
 0x119   : > { %6032 = sst [smem:[#allocation135_spill]] %s3603_s3 }
 0x11a   : > { %s3609_s14 = sld [smem:[#allocation9 + $0x785]] }
 0x11b   : > { %6033 = sst [smem:[#allocation136_spill]] %s3605_s27 }
 0x11c   : > { %6034 = sst [smem:[#allocation137_spill]] %s3607_s26 }
 0x11d   : > { %s3611_s28 = sld [smem:[#allocation10 + $0x5]] }
 0x11e   : > { %s3613_s25 = sld [smem:[#allocation9 + $0x6]] }
 0x11f   : > { %s3616_s9 = sld [smem:[#allocation9 + $0x86]] }
 0x120   : > { %6035 = sst [smem:[#allocation138_spill]] %s3609_s14 }
 0x121   : > { %s3618_s29 = sld [smem:[#allocation9 + $0x106]] }
 0x122   : > { %s3620_s30 = sld [smem:[#allocation9 + $0x186]] }
 0x123   : > { %6036 = sst [smem:[#allocation139_spill]] %s3611_s28 }
 0x124   : > { %6037 = sst [smem:[#allocation140_spill]] %s3613_s25 }
 0x125   : > { %s6039_s0 = sld [smem:[#allocation153_spill]] }
 0x126   : > { %s3629_s28 = sld [smem:[#allocation9 + $0x206]] }
 0x127   : > { %s3631_s14 = sld [smem:[#allocation9 + $0x286]] }
 0x128   : > { %6038 = sst [smem:[#allocation141_spill]] %s3620_s30 }
 0x129   : > { %s3633_s25 = sld [smem:[#allocation9 + $0x306]] }
 0x12a   : > { %s3640_s30 = sld [smem:[#allocation9 + $0x386]] }
 0x12b   : > { %s3627_s26 = scalar_lea.vmem %s6039_s0, %s5906_s6  ;;  %s3642_s4 = sld [smem:[#allocation9 + $0x406]] }
 0x12c   : > { %6040 = sst [smem:[#allocation142_spill]] %s3627_s26  ;;  %v3636_v0 = vld [vmem:[%s3627_s26] sm:$0xff] }
 0x12d   : > { %s3644_s27 = sld [smem:[#allocation9 + $0x486]]  ;;  %v134_v3 = vmul.f32 %v133_v1, %v3636_v0  ;;  %v141_v4 = vmul.f32 %v140_v2, %v3636_v0  ;;  %v148_v8 = vmul.f32 %v147_v5, %v3636_v0  ;;  %v155_v14 = vmul.f32 %v154_v12, %v3636_v0 }
 0x12e   : > { %s3649_s3 = sld [smem:[#allocation9 + $0x506]]  ;;  %v162_v23 = vmul.f32 %v161_v18, %v3636_v0  ;;  %v169_v31 = vmul.f32 %v168_v25, %v3636_v0  ;;  %v176_v39 = vmul.f32 %v175_v33, %v3636_v0 }
 0x12f   : > { %s3653_s6 = sld [smem:[#allocation9 + $0x586]]  ;;  %v137_v9 = vadd.f32 %v136_v6, %v134_v3  ;;  %v144_v10 = vadd.f32 %v143_v7, %v141_v4  ;;  %v151_v13 = vadd.f32 %v150_v11, %v148_v8  ;;  %v158_v22 = vadd.f32 %v157_v17, %v155_v14 }
 0x130   : > { %s3655_s5 = sld [smem:[#allocation9 + $0x606]]  ;;  %v165_v30 = vadd.f32 %v164_v24, %v162_v23  ;;  %v172_v38 = vadd.f32 %v171_v32, %v169_v31  ;;  %v179_v47 = vadd.f32 %v178_v40, %v176_v39 }
 0x131   : > { %s3658_s15 = sld [smem:[#allocation9 + $0x686]]  ;;  %v3671_v15 = vmax.f32 %v137_v9, 0.0  ;;  %v3673_v16 = vmax.f32 %v144_v10, 0.0  ;;  %v3685_v21 = vmax.f32 %v151_v13, 0.0  ;;  %v3701_v29 = vmax.f32 %v158_v22, 0.0 }
 0x132   : > { %s3662_s17 = sld [smem:[#allocation9 + $0x706]]  ;;  %v3716_v37 = vmax.f32 %v165_v30, 0.0  ;;  %v3736_v49 = vmax.f32 %v172_v38, 0.0  ;;  %v3751_v58 = vmax.f32 %v179_v47, 0.0 }
 0x133   : > { %s3664_s7 = sld [smem:[#allocation9 + $0x786]]  ;;  %v246_v26 = vmul.f32 %v245_v19, %v3671_v15  ;;  %v249_v27 = vmul.f32 %v248_v20, %v3673_v16  ;;  %v253_v35 = vmul.f32 %v252_v28, %v3685_v21  ;;  %v257_v43 = vmul.f32 %v256_v36, %v3701_v29 }
 0x134   : > { %6041 = sst [smem:[#allocation143_spill]] %s3649_s3 }
 0x135   : > { %6042 = sst [smem:[#allocation144_spill]] %s3653_s6  ;;  %v250_v34 = vadd.f32 %v249_v27, %v246_v26 }
 0x136   : > { %6043 = sst [smem:[#allocation145_spill]] %s3655_s5 }
 0x137   : > { %6044 = sst [smem:[#allocation146_spill]] %s3658_s15  ;;  %v254_v42 = vadd.f32 %v253_v35, %v250_v34 }
 0x138   : > { %6045 = sst [smem:[#allocation147_spill]] %s3662_s17 }
 0x139   : > { %6046 = sst [smem:[#allocation148_spill]] %s3664_s7  ;;  %v258_v51 = vadd.f32 %v257_v43, %v254_v42 }
 0x13a   : > { %s3666_s16 = sld [smem:[#allocation10 + $0x6]] }
 0x13b   : > { %s3669_s0 = sld [smem:[#allocation9 + $0x7]] }
 0x13c   : > { %s3677_s18 = sld [smem:[#allocation9 + $0x87]] }
 0x13d   : > { %s3681_s8 = sld [smem:[#allocation9 + $0x107]] }
 0x13e   : > { %s3683_s26 = sld [smem:[#allocation9 + $0x187]] }
 0x13f   : > { %s3694_s19 = sld [smem:[#allocation9 + $0x287]] }
 0x140   : > { %6047 = sst [smem:[#allocation149_spill]] %s3666_s16 }
 0x141   : > { %s3688_s16 = sld [smem:[#allocation9 + $0x207]] }
 0x142   : > { %s3697_s20 = sld [smem:[#allocation9 + $0x307]] }
 0x143   : > { %s3699_s10 = sld [smem:[#allocation9 + $0x387]] }
 0x144   : > { %s6050_s11 = sld [smem:[#allocation25_spill]] }
 0x145   : > { %s3704_s21 = sld [smem:[#allocation9 + $0x407]] }
 0x146   : > { %s6052_s22 = sld [smem:[#allocation43_spill]] }
 0x147   : > { %s6053_s12 = sld [smem:[#allocation56_spill]] }
 0x148   : > { %6048 = sst [smem:[#allocation150_spill]] %s3697_s20 }
 0x149   : > { %6049 = sst [smem:[#allocation151_spill]] %s3699_s10 }
 0x14a   : > { %s3709_s7 = sld [smem:[#allocation9 + $0x487]]  ;;  %v182_v41 = vstv %s6050_s11 }
 0x14b   : > { %6051 = sst [smem:[#allocation25_spill]] %s3704_s21  ;;  %v183_v48 = vmul.f32 %v182_v41, %v3636_v0 }
 0x14c   : > { %s6055_s17 = sld [smem:[#allocation57_spill]]  ;;  %v260_v44 = vstv %s6052_s22 }
 0x14d   : > { %s3712_s15 = sld [smem:[#allocation9 + $0x507]]  ;;  %v312_v45 = vstv %s6053_s12  ;;  %v261_v52 = vmul.f32 %v260_v44, %v3716_v37 }
 0x14e   : > { %s3714_s5 = sld [smem:[#allocation9 + $0x587]]  ;;  %v313_v55 = vmul.f32 %v312_v45, %v3671_v15 }
 0x14f   : > { %s6058_s2 = sld [smem:[#allocation26_spill]]  ;;  %v262_v62 = vadd.f32 %v261_v52, %v258_v51 }
 0x150   : > { %6054 = sst [smem:[#allocation43_spill]] %s3709_s7 }
 0x151   : > { %s3719_s23 = sld [smem:[#allocation9 + $0x607]] }
 0x152   : > { %s6060_s21 = sld [smem:[#allocation27_spill]]  ;;  %v315_v46 = vstv %s6055_s17 }
 0x153   : > { %6056 = sst [smem:[#allocation56_spill]] %s3712_s15  ;;  %v316_v56 = vmul.f32 %v315_v46, %v3673_v16 }
 0x154   : > { %6057 = sst [smem:[#allocation57_spill]] %s3714_s5 }
 0x155   : > { %s6061_s7 = sld [smem:[#allocation44_spill]]  ;;  %v185_v50 = vstv %s6058_s2  ;;  %v317_v3 = vadd.f32 %v316_v56, %v313_v55 }
 0x156   : > { %s3724_s13 = sld [smem:[#allocation9 + $0x687]]  ;;  %v186_v59 = vadd.f32 %v185_v50, %v183_v48 }
 0x157   : > { %6059 = sst [smem:[#allocation26_spill]] %s3719_s23 }
 0x158   : > { %s3727_s15 = sld [smem:[#allocation9 + $0x707]]  ;;  %v189_v53 = vstv %s6060_s21  ;;  %v3768_v6 = vmax.f32 %v186_v59, 0.0 }
 0x159   : > { %s6064_s5 = sld [smem:[#allocation58_spill]]  ;;  %v190_v60 = vmul.f32 %v189_v53, %v3636_v0 }
 0x15a   : > { %s3731_s6 = sld [smem:[#allocation9 + $0x787]] }
 0x15b   : > { %s3734_s24 = sld [smem:[#allocation10 + $0x7]]  ;;  %v264_v54 = vstv %s6061_s7 }
 0x15c   : > { %6062 = sst [smem:[#allocation27_spill]] %s3724_s13  ;;  %v265_v63 = vmul.f32 %v264_v54, %v3736_v49 }
 0x15d   : > { %s6067_s11 = sld [smem:[#allocation29_spill]] }
 0x15e   : > { %6063 = sst [smem:[#allocation44_spill]] %s3727_s15  ;;  %v266_v11 = vadd.f32 %v265_v63, %v262_v62 }
 0x15f   : > { %s3740_s22 = sld [smem:[#allocation9 + $0x8]]  ;;  %v319_v57 = vstv %s6064_s5 }
 0x160   : > { %6065 = sst [smem:[#allocation58_spill]] %s3731_s6  ;;  %v320_v4 = vmul.f32 %v319_v57, %v3685_v21 }
 0x161   : > { %6066 = sst [smem:[#allocation152_spill]] %s3734_s24 }
 0x162   : > { %s6068_s15 = sld [smem:[#allocation28_spill]]  ;;  %v321_v14 = vadd.f32 %v320_v4, %v317_v3 }
 0x163   : > { %s6069_s12 = sld [smem:[#allocation45_spill]]  ;;  %v196_v61 = vstv %s6067_s11 }
 0x164   : > { %s3746_s17 = sld [smem:[#allocation9 + $0x88]]  ;;  %v197_v7 = vmul.f32 %v196_v61, %v3636_v0 }
 0x165   : > { %s6070_s24 = sld [smem:[#allocation59_spill]] }
 0x166   : > { %s3749_s6 = sld [smem:[#allocation9 + $0x108]] }
 0x167   : > { %s6072_s2 = sld [smem:[#allocation31_spill]] }
 0x168   : > { %s3753_s13 = sld [smem:[#allocation9 + $0x188]]  ;;  %v192_v1 = vstv %s6068_s15 }
 0x169   : > { %s6074_s7 = sld [smem:[#allocation30_spill]]  ;;  %v268_v2 = vstv %s6069_s12  ;;  %v193_v9 = vadd.f32 %v192_v1, %v190_v60 }
 0x16a   : > { %s3758_s21 = sld [smem:[#allocation9 + $0x208]]  ;;  %v269_v12 = vmul.f32 %v268_v2, %v3751_v58 }
 0x16b   : > { %s6076_s23 = sld [smem:[#allocation46_spill]]  ;;  %v323_v5 = vstv %s6070_s24  ;;  %v3789_v23 = vmax.f32 %v193_v9, 0.0 }
 0x16c   : > { %6071 = sst [smem:[#allocation29_spill]] %s3749_s6  ;;  %v324_v17 = vmul.f32 %v323_v5, %v3701_v29  ;;  %v270_v25 = vadd.f32 %v269_v12, %v266_v11 }
 0x16d   : > { %s3763_s5 = sld [smem:[#allocation9 + $0x288]]  ;;  %v203_v8 = vstv %s6072_s2 }
 0x16e   : > { %6073 = sst [smem:[#allocation28_spill]] %s3753_s13  ;;  %v204_v18 = vmul.f32 %v203_v8, %v3636_v0  ;;  %v325_v28 = vadd.f32 %v324_v17, %v321_v14 }
 0x16f   : > { %s6078_s10 = sld [smem:[#allocation60_spill]]  ;;  %v199_v10 = vstv %s6074_s7 }
 0x170   : > { %6075 = sst [smem:[#allocation45_spill]] %s3758_s21  ;;  %v200_v20 = vadd.f32 %v199_v10, %v197_v7 }
 0x171   : > { %s3766_s13 = sld [smem:[#allocation9 + $0x308]]  ;;  %v272_v13 = vstv %s6076_s23 }
 0x172   : > { %s6080_s11 = sld [smem:[#allocation32_spill]]  ;;  %v273_v26 = vmul.f32 %v272_v13, %v3768_v6  ;;  %v3802_v33 = vmax.f32 %v200_v20, 0.0 }
 0x173   : > { %6077 = sst [smem:[#allocation59_spill]] %s3763_s5 }
 0x174   : > { %s3772_s6 = sld [smem:[#allocation9 + $0x388]]  ;;  %v274_v38 = vadd.f32 %v273_v26, %v270_v25 }
 0x175   : > { %s6082_s15 = sld [smem:[#allocation33_spill]]  ;;  %v327_v19 = vstv %s6078_s10 }
 0x176   : > { %s3776_s12 = sld [smem:[#allocation9 + $0x408]]  ;;  %v328_v30 = vmul.f32 %v327_v19, %v3716_v37 }
 0x177   : > { %6079 = sst [smem:[#allocation31_spill]] %s3766_s13 }
 0x178   : > { %s6084_s24 = sld [smem:[#allocation47_spill]]  ;;  %v206_v22 = vstv %s6080_s11  ;;  %v329_v41 = vadd.f32 %v328_v30, %v325_v28 }
 0x179   : > { %s3780_s13 = sld [smem:[#allocation9 + $0x488]]  ;;  %v207_v31 = vadd.f32 %v206_v22, %v204_v18 }
 0x17a   : > { %6081 = sst [smem:[#allocation30_spill]] %s3772_s6 }
 0x17b   : > { %s6086_s2 = sld [smem:[#allocation61_spill]]  ;;  %v210_v24 = vstv %s6082_s15  ;;  %v3816_v43 = vmax.f32 %v207_v31, 0.0 }
 0x17c   : > { %6083 = sst [smem:[#allocation46_spill]] %s3776_s12  ;;  %v211_v34 = vmul.f32 %v210_v24, %v3636_v0 }
 0x17d   : > { %s3784_s6 = sld [smem:[#allocation9 + $0x508]] }
 0x17e   : > { %s3787_s7 = sld [smem:[#allocation9 + $0x588]]  ;;  %v276_v27 = vstv %s6084_s24 }
 0x17f   : > { %6085 = sst [smem:[#allocation60_spill]] %s3780_s13  ;;  %v277_v39 = vmul.f32 %v276_v27, %v3789_v23 }
 0x180   : > { %s6089_s5 = sld [smem:[#allocation34_spill]] }
 0x181   : > { %s6090_s12 = sld [smem:[#allocation35_spill]]  ;;  %v331_v32 = vstv %s6086_s2  ;;  %v278_v52 = vadd.f32 %v277_v39, %v274_v38 }
 0x182   : > { %s3793_s23 = sld [smem:[#allocation9 + $0x608]]  ;;  %v332_v42 = vmul.f32 %v331_v32, %v3736_v49 }
 0x183   : > { %6087 = sst [smem:[#allocation32_spill]] %s3784_s6 }
 0x184   : > { %6088 = sst [smem:[#allocation33_spill]] %s3787_s7  ;;  %v333_v55 = vadd.f32 %v332_v42, %v329_v41 }
 0x185   : > { %s6092_s13 = sld [smem:[#allocation48_spill]] }
 0x186   : > { %s3797_s10 = sld [smem:[#allocation9 + $0x688]]  ;;  %v213_v35 = vstv %s6089_s5 }
 0x187   : > { %s6094_s11 = sld [smem:[#allocation62_spill]]  ;;  %v217_v36 = vstv %s6090_s12  ;;  %v214_v45 = vadd.f32 %v213_v35, %v211_v34 }
 0x188   : > { %6091 = sst [smem:[#allocation47_spill]] %s3793_s23  ;;  %v218_v46 = vmul.f32 %v217_v36, %v3636_v0 }
 0x189   : > { %s3800_s7 = sld [smem:[#allocation9 + $0x708]]  ;;  %v3844_v1 = vmax.f32 %v214_v45, 0.0 }
 0x18a   : > { %s6096_s15 = sld [smem:[#allocation73_spill]] }
 0x18b   : > { %s3805_s6 = sld [smem:[#allocation9 + $0x788]]  ;;  %v280_v40 = vstv %s6092_s13 }
 0x18c   : > { %6093 = sst [smem:[#allocation61_spill]] %s3797_s10  ;;  %v281_v53 = vmul.f32 %v280_v40, %v3802_v33 }
 0x18d   : > { %s6098_s23 = sld [smem:[#allocation74_spill]]  ;;  %v335_v44 = vstv %s6094_s11 }
 0x18e   : > { %s6099_s24 = sld [smem:[#allocation36_spill]]  ;;  %v336_v56 = vmul.f32 %v335_v44, %v3751_v58  ;;  %v282_v3 = vadd.f32 %v281_v53, %v278_v52 }
 0x18f   : > { %6095 = sst [smem:[#allocation34_spill]] %s3800_s7 }
 0x190   : > { %s6100_s21 = sld [smem:[#allocation37_spill]]  ;;  %v379_v47 = vstv %s6096_s15  ;;  %v337_v8 = vadd.f32 %v336_v56, %v333_v55 }
 0x191   : > { %6097 = sst [smem:[#allocation35_spill]] %s3805_s6  ;;  %v380_v59 = vmul.f32 %v379_v47, %v3671_v15 }
 0x192   : > { %s3810_s10 = sld [smem:[#allocation10 + $0x8]] }
 0x193   : > { %s6102_s2 = sld [smem:[#allocation49_spill]]  ;;  %v382_v48 = vstv %s6098_s23 }
 0x194   : > { %s3814_s7 = sld [smem:[#allocation9 + $0x9]]  ;;  %v220_v50 = vstv %s6099_s24  ;;  %v383_v60 = vmul.f32 %v382_v48, %v3673_v16 }
 0x195   : > { %s6104_s6 = sld [smem:[#allocation63_spill]]  ;;  %v221_v61 = vadd.f32 %v220_v50, %v218_v46 }
 0x196   : > { %s3819_s5 = sld [smem:[#allocation9 + $0x89]]  ;;  %v224_v51 = vstv %s6100_s21  ;;  %v384_v11 = vadd.f32 %v383_v60, %v380_v59 }
 0x197   : > { %s3824_s12 = sld [smem:[#allocation9 + $0x109]]  ;;  %v225_v62 = vmul.f32 %v224_v51, %v3636_v0  ;;  %v3859_v13 = vmax.f32 %v221_v61, 0.0 }
 0x198   : > { %6101 = sst [smem:[#allocation48_spill]] %s3810_s10 }
 0x199   : > { %s6107_s13 = sld [smem:[#allocation75_spill]]  ;;  %v284_v54 = vstv %s6102_s2 }
 0x19a   : > { %6103 = sst [smem:[#allocation62_spill]] %s3814_s7  ;;  %v285_v4 = vmul.f32 %v284_v54, %v3816_v43 }
 0x19b   : > { %s6108_s10 = sld [smem:[#allocation38_spill]]  ;;  %v339_v57 = vstv %s6104_s6 }
 0x19c   : > { %6105 = sst [smem:[#allocation73_spill]] %s3819_s5  ;;  %v340_v9 = vmul.f32 %v339_v57, %v3768_v6  ;;  %v286_v20 = vadd.f32 %v285_v4, %v282_v3 }
 0x19d   : > { %6106 = sst [smem:[#allocation74_spill]] %s3824_s12 }
 0x19e   : > { %s3829_s7 = sld [smem:[#allocation9 + $0x189]]  ;;  %v341_v26 = vadd.f32 %v340_v9, %v337_v8 }
 0x19f   : > { %s6110_s11 = sld [smem:[#allocation39_spill]]  ;;  %v386_v63 = vstv %s6107_s13 }
 0x1a0   : > { %s6111_s5 = sld [smem:[#allocation50_spill]]  ;;  %v387_v12 = vmul.f32 %v386_v63, %v3685_v21 }
 0x1a1   : > { %s3833_s3 = sld [smem:[#allocation9 + $0x209]]  ;;  %v227_v2 = vstv %s6108_s10 }
 0x1a2   : > { %s6113_s21 = sld [smem:[#allocation64_spill]]  ;;  %v228_v14 = vadd.f32 %v227_v2, %v225_v62  ;;  %v388_v30 = vadd.f32 %v387_v12, %v384_v11 }
 0x1a3   : > { %s3838_s23 = sld [smem:[#allocation9 + $0x289]] }
 0x1a4   : > { %6109 = sst [smem:[#allocation36_spill]] %s3829_s7  ;;  %v3878_v32 = vmax.f32 %v228_v14, 0.0 }
 0x1a5   : > { %s3842_s15 = sld [smem:[#allocation9 + $0x309]]  ;;  %v231_v5 = vstv %s6110_s11 }
 0x1a6   : > { %s6116_s24 = sld [smem:[#allocation76_spill]]  ;;  %v288_v7 = vstv %s6111_s5  ;;  %v232_v18 = vmul.f32 %v231_v5, %v3636_v0 }
 0x1a7   : > { %6112 = sst [smem:[#allocation37_spill]] %s3833_s3  ;;  %v289_v22 = vmul.f32 %v288_v7, %v3844_v1 }
 0x1a8   : > { %s6117_s6 = sld [smem:[#allocation41_spill]]  ;;  %v343_v10 = vstv %s6113_s21 }
 0x1a9   : > { %6114 = sst [smem:[#allocation49_spill]] %s3838_s23  ;;  %v344_v27 = vmul.f32 %v343_v10, %v3789_v23  ;;  %v290_v39 = vadd.f32 %v289_v22, %v286_v20 }
 0x1aa   : > { %s3848_s2 = sld [smem:[#allocation9 + $0x389]] }
 0x1ab   : > { %6115 = sst [smem:[#allocation63_spill]] %s3842_s15  ;;  %v345_v42 = vadd.f32 %v344_v27, %v341_v26 }
 0x1ac   : > { %s6119_s23 = sld [smem:[#allocation40_spill]]  ;;  %v390_v17 = vstv %s6116_s24 }
 0x1ad   : > { %s6120_s3 = sld [smem:[#allocation51_spill]]  ;;  %v391_v31 = vmul.f32 %v390_v17, %v3701_v29 }
 0x1ae   : > { %s3853_s13 = sld [smem:[#allocation9 + $0x409]]  ;;  %v238_v19 = vstv %s6117_s6 }
 0x1af   : > { %s6122_s10 = sld [smem:[#allocation65_spill]]  ;;  %v239_v34 = vmul.f32 %v238_v19, %v3636_v0  ;;  %v392_v45 = vadd.f32 %v391_v31, %v388_v30 }
 0x1b0   : > { %6118 = sst [smem:[#allocation75_spill]] %s3848_s2 }
 0x1b1   : > { %s3857_s15 = sld [smem:[#allocation9 + $0x489]] }
 0x1b2   : > { %s3862_s11 = sld [smem:[#allocation9 + $0x509]]  ;;  %v234_v24 = vstv %s6119_s23 }
 0x1b3   : > { %s6125_s5 = sld [smem:[#allocation77_spill]]  ;;  %v292_v25 = vstv %s6120_s3  ;;  %v235_v36 = vadd.f32 %v234_v24, %v232_v18 }
 0x1b4   : > { %6121 = sst [smem:[#allocation38_spill]] %s3853_s13  ;;  %v293_v40 = vmul.f32 %v292_v25, %v3859_v13 }
 0x1b5   : > { %s6126_s21 = sld [smem:[#allocation42_spill]]  ;;  %v347_v28 = vstv %s6122_s10  ;;  %v3899_v50 = vmax.f32 %v235_v36, 0.0 }
 0x1b6   : > { %s3867_s13 = sld [smem:[#allocation9 + $0x589]]  ;;  %v348_v44 = vmul.f32 %v347_v28, %v3802_v33  ;;  %v294_v51 = vadd.f32 %v293_v40, %v290_v39 }
 0x1b7   : > { %6123 = sst [smem:[#allocation39_spill]] %s3857_s15 }
 0x1b8   : > { %6124 = sst [smem:[#allocation50_spill]] %s3862_s11  ;;  %v349_v54 = vadd.f32 %v348_v44, %v345_v42  ;;  %v580_v44 = vstv %s3579_s1 }
 0x1b9   : > { %s6128_s15 = sld [smem:[#allocation52_spill]]  ;;  %v394_v35 = vstv %s6125_s5 }
 0x1ba   : > { %s3872_s2 = sld [smem:[#allocation9 + $0x609]]  ;;  %v395_v46 = vmul.f32 %v394_v35, %v3716_v37 }
 0x1bb   : > { %s6130_s24 = sld [smem:[#allocation66_spill]]  ;;  %v241_v38 = vstv %s6126_s21 }
 0x1bc   : > { %6127 = sst [smem:[#allocation64_spill]] %s3867_s13  ;;  %v242_v47 = vadd.f32 %v241_v38, %v239_v34  ;;  %v396_v57 = vadd.f32 %v395_v46, %v392_v45 }
 0x1bd   : > { %s3876_s6 = sld [smem:[#allocation9 + $0x689]] }
 0x1be   : > { %s6132_s23 = sld [smem:[#allocation78_spill]]  ;;  %v3912_v60 = vmax.f32 %v242_v47, 0.0 }
 0x1bf   : > { %s3882_s3 = sld [smem:[#allocation9 + $0x709]]  ;;  %v296_v41 = vstv %s6128_s15 }
 0x1c0   : > { %6129 = sst [smem:[#allocation76_spill]] %s3872_s2  ;;  %v297_v52 = vmul.f32 %v296_v41, %v3878_v32 }
 0x1c1   : > { %s3886_s10 = sld [smem:[#allocation9 + $0x789]]  ;;  %v351_v0 = vstv %s6130_s24 }
 0x1c2   : > { %s6135_s2 = sld [smem:[#allocation53_spill]]  ;;  %v352_v55 = vmul.f32 %v351_v0, %v3816_v43  ;;  %v298_v62 = vadd.f32 %v297_v52, %v294_v51 }
 0x1c3   : > { %6131 = sst [smem:[#allocation41_spill]] %s3876_s6 }
 0x1c4   : > { %s3890_s6 = sld [smem:[#allocation10 + $0x9]]  ;;  %v398_v48 = vstv %s6132_s23  ;;  %v353_v3 = vadd.f32 %v352_v55, %v349_v54 }
 0x1c5   : > { %6133 = sst [smem:[#allocation40_spill]] %s3882_s3  ;;  %v399_v59 = vmul.f32 %v398_v48, %v3736_v49 }
 0x1c6   : > { %s6137_s13 = sld [smem:[#allocation67_spill]] }
 0x1c7   : > { %6134 = sst [smem:[#allocation51_spill]] %s3886_s10  ;;  %v400_v7 = vadd.f32 %v399_v59, %v396_v57  ;;  %v581_v57 = vmul.f32 %v580_v44, %v3671_v15 }
 0x1c8   : > { %s3894_s5 = sld [smem:[#allocation9 + $0xa]]  ;;  %v300_v53 = vstv %s6135_s2 }
 0x1c9   : > { %s6139_s21 = sld [smem:[#allocation79_spill]]  ;;  %v301_v63 = vmul.f32 %v300_v53, %v3899_v50 }
 0x1ca   : > { %6136 = sst [smem:[#allocation65_spill]] %s3890_s6 }
 0x1cb   : > { %s3897_s3 = sld [smem:[#allocation9 + $0x8a]]  ;;  %v302_v12 = vadd.f32 %v301_v63, %v298_v62 }
 0x1cc   : > { %s6141_s15 = sld [smem:[#allocation54_spill]]  ;;  %v355_v56 = vstv %s6137_s13 }
 0x1cd   : > { %s3902_s10 = sld [smem:[#allocation9 + $0x10a]]  ;;  %v356_v4 = vmul.f32 %v355_v56, %v3844_v1 }
 0x1ce   : > { %6138 = sst [smem:[#allocation77_spill]] %s3894_s5 }
 0x1cf   : > { %s6143_s24 = sld [smem:[#allocation68_spill]]  ;;  %v402_v61 = vstv %s6139_s21  ;;  %v357_v19 = vadd.f32 %v356_v4, %v353_v3 }
 0x1d0   : > { %s3906_s6 = sld [smem:[#allocation9 + $0x18a]]  ;;  %v403_v8 = vmul.f32 %v402_v61, %v3751_v58 }
 0x1d1   : > { %6140 = sst [smem:[#allocation42_spill]] %s3897_s3 }
 0x1d2   : > { %s3910_s23 = sld [smem:[#allocation9 + $0x20a]]  ;;  %v304_v2 = vstv %s6141_s15  ;;  %v404_v26 = vadd.f32 %v403_v8, %v400_v7 }
 0x1d3   : > { %6142 = sst [smem:[#allocation52_spill]] %s3902_s10  ;;  %v305_v9 = vmul.f32 %v304_v2, %v3912_v60 }
 0x1d4   : > { %s6146_s11 = sld [smem:[#allocation69_spill]] }
 0x1d5   : > { %s6147_s3 = sld [smem:[#allocation80_spill]]  ;;  %v359_v5 = vstv %s6143_s24  ;;  %v306_v36 = vadd.f32 %v305_v9, %v302_v12 }
 0x1d6   : > { %6144 = sst [smem:[#allocation66_spill]] %s3906_s6  ;;  %v360_v20 = vmul.f32 %v359_v5, %v3859_v13 }
 0x1d7   : > { %s3915_s5 = sld [smem:[#allocation9 + $0x28a]] }
 0x1d8   : > { %6145 = sst [smem:[#allocation78_spill]] %s3910_s23  ;;  %v361_v41 = vadd.f32 %v360_v20, %v357_v19 }
 0x1d9   : > { %s6149_s2 = sld [smem:[#allocation55_spill]] }
 0x1da   : > { %s6150_s10 = sld [smem:[#allocation90_spill]]  ;;  %v363_v10 = vstv %s6146_s11 }
 0x1db   : > { %s6151_s6 = sld [smem:[#allocation91_spill]]  ;;  %v406_v11 = vstv %s6147_s3  ;;  %v364_v25 = vmul.f32 %v363_v10, %v3878_v32 }
 0x1dc   : > { %s3919_s13 = sld [smem:[#allocation9 + $0x30a]]  ;;  %v407_v27 = vmul.f32 %v406_v11, %v3768_v6 }
 0x1dd   : > { %6148 = sst [smem:[#allocation53_spill]] %s3915_s5  ;;  %v365_v61 = vadd.f32 %v364_v25, %v361_v41 }
 0x1de   : > { %s3922_s23 = sld [smem:[#allocation9 + $0x38a]]  ;;  %v408_v51 = vadd.f32 %v407_v27, %v404_v26 }
 0x1df   : > { %s6154_s7 = sld [smem:[#allocation70_spill]]  ;;  %v308_v14 = vstv %s6149_s2 }
 0x1e0   : > { %s6155_s12 = sld [smem:[#allocation71_spill]]  ;;  %v446_v17 = vstv %s6150_s10  ;;  %v309_v55 = vadd.f32 %v308_v14, %v306_v36 }
 0x1e1   : > { %s3926_s21 = sld [smem:[#allocation9 + $0x40a]]  ;;  %v449_v18 = vstv %s6151_s6  ;;  %v447_v30 = vmul.f32 %v446_v17, %v3671_v15 }
 0x1e2   : > { %6152 = sst [smem:[#allocation67_spill]] %s3919_s13  ;;  %v450_v31 = vmul.f32 %v449_v18, %v3673_v16  ;;  %v3995_v12 = vmax.f32 %v309_v55, 0.0 }
 0x1e3   : > { %s6157_s15 = sld [smem:[#allocation81_spill]] }
 0x1e4   : > { %6153 = sst [smem:[#allocation79_spill]] %s3922_s23  ;;  %v451_v52 = vadd.f32 %v450_v31, %v447_v30 }
 0x1e5   : > { %s3931_s5 = sld [smem:[#allocation9 + $0x48a]]  ;;  %v367_v22 = vstv %s6154_s7 }
 0x1e6   : > { %s6159_s13 = sld [smem:[#allocation107_spill]]  ;;  %v371_v24 = vstv %s6155_s12  ;;  %v368_v38 = vmul.f32 %v367_v22, %v3899_v50 }
 0x1e7   : > { %6156 = sst [smem:[#allocation54_spill]] %s3926_s21  ;;  %v3956_v39 = vmul.f32 %v371_v24, %v3912_v60 }
 0x1e8   : > { %s6160_s23 = sld [smem:[#allocation108_spill]]  ;;  %v369_v19 = vadd.f32 %v368_v38, %v365_v61 }
 0x1e9   : > { %s3936_s24 = sld [smem:[#allocation9 + $0x50a]]  ;;  %v410_v28 = vstv %s6157_s15 }
 0x1ea   : > { %s6162_s21 = sld [smem:[#allocation92_spill]]  ;;  %v411_v45 = vmul.f32 %v410_v28, %v3789_v23  ;;  %v373_v44 = vadd.f32 %v3956_v39, %v369_v19 }
 0x1eb   : > { %6158 = sst [smem:[#allocation68_spill]] %s3931_s5 }
 0x1ec   : > { %s3941_s20 = sld [smem:[#allocation9 + $0x58a]]  ;;  %v513_v34 = vstv %s6159_s13  ;;  %v412_v8 = vadd.f32 %v411_v45, %v408_v51 }
 0x1ed   : > { %s6164_s11 = sld [smem:[#allocation72_spill]]  ;;  %v514_v47 = vmul.f32 %v513_v34, %v3671_v15 }
 0x1ee   : > { %s6165_s3 = sld [smem:[#allocation124_spill]]  ;;  %v516_v35 = vstv %s6160_s23 }
 0x1ef   : > { %6161 = sst [smem:[#allocation69_spill]] %s3936_s24  ;;  %v517_v48 = vmul.f32 %v516_v35, %v3673_v16 }
 0x1f0   : > { %s3946_s6 = sld [smem:[#allocation9 + $0x60a]]  ;;  %v453_v40 = vstv %s6162_s21 }
 0x1f1   : > { %s6167_s10 = sld [smem:[#allocation82_spill]]  ;;  %v454_v53 = vmul.f32 %v453_v40, %v3685_v21  ;;  %v518_v5 = vadd.f32 %v517_v48, %v514_v47 }
 0x1f2   : > { %6163 = sst [smem:[#allocation80_spill]] %s3941_s20 }
 0x1f3   : > { %s3952_s7 = sld [smem:[#allocation9 + $0x68a]]  ;;  %v375_v42 = vstv %s6164_s11  ;;  %v455_v9 = vadd.f32 %v454_v53, %v451_v52  ;;  %v650_v52 = vstv %s3616_s9 }
 0x1f4   : > { %s6169_s12 = sld [smem:[#allocation109_spill]]  ;;  %v583_v0 = vstv %s6165_s3 }
 0x1f5   : > { %s3959_s2 = sld [smem:[#allocation9 + $0x70a]]  ;;  %v584_v59 = vmul.f32 %v583_v0, %v3673_v16 }
 0x1f6   : > { %6166 = sst [smem:[#allocation55_spill]] %s3946_s6 }
 0x1f7   : > { %s6171_s15 = sld [smem:[#allocation93_spill]]  ;;  %v414_v46 = vstv %s6167_s10  ;;  %v585_v17 = vadd.f32 %v584_v59, %v581_v57 }
 0x1f8   : > { %s3964_s6 = sld [smem:[#allocation9 + $0x78a]]  ;;  %v415_v62 = vmul.f32 %v414_v46, %v3802_v33 }
 0x1f9   : > { %6168 = sst [smem:[#allocation90_spill]] %s3952_s7 }
 0x1fa   : > { %s6173_s23 = sld [smem:[#allocation83_spill]]  ;;  %v520_v54 = vstv %s6169_s12  ;;  %v416_v30 = vadd.f32 %v415_v62, %v412_v8  ;;  %v654_v8 = vstv %s3618_s29 }
 0x1fb   : > { %6170 = sst [smem:[#allocation91_spill]] %s3959_s2  ;;  %v521_v7 = vmul.f32 %v520_v54, %v3685_v21 }
 0x1fc   : > { %s6174_s13 = sld [smem:[#allocation125_spill]] }
 0x1fd   : > { %s3970_s7 = sld [smem:[#allocation10 + $0xa]]  ;;  %v457_v56 = vstv %s6171_s15  ;;  %v522_v27 = vadd.f32 %v521_v7, %v518_v5 }
 0x1fe   : > { %6172 = sst [smem:[#allocation70_spill]] %s3964_s6  ;;  %v458_v10 = vmul.f32 %v457_v56, %v3701_v29 }
 0x1ff   : > { %s6176_s21 = sld [smem:[#allocation84_spill]] }
 0x200   : > { %s6177_s2 = sld [smem:[#allocation85_spill]]  ;;  %v418_v63 = vstv %s6173_s23  ;;  %v459_v31 = vadd.f32 %v458_v10, %v455_v9 }
 0x201   : > { %s3974_s1 = sld [smem:[#allocation9 + $0xb]]  ;;  %v419_v20 = vmul.f32 %v418_v63, %v3816_v43 }
 0x202   : > { %s6178_s3 = sld [smem:[#allocation110_spill]]  ;;  %v587_v2 = vstv %s6174_s13 }
 0x203   : > { %6175 = sst [smem:[#allocation71_spill]] %s3970_s7  ;;  %v588_v18 = vmul.f32 %v587_v2, %v3685_v21  ;;  %v420_v53 = vadd.f32 %v419_v20, %v416_v30 }
 0x204   : > { %s3979_s10 = sld [smem:[#allocation9 + $0x8b]] }
 0x205   : > { %s6179_s7 = sld [smem:[#allocation94_spill]]  ;;  %v422_v3 = vstv %s6176_s21  ;;  %v589_v40 = vadd.f32 %v588_v18, %v585_v17  ;;  %v376_v17 = vadd.f32 %v375_v42, %v373_v44 }
 0x206   : > { %s3984_s6 = sld [smem:[#allocation9 + $0x10b]]  ;;  %v426_v4 = vstv %s6177_s2  ;;  %v423_v25 = vmul.f32 %v422_v3, %v3844_v1  ;;  %v651_v3 = vmul.f32 %v650_v52, %v3673_v16 }
 0x207   : > { %s6180_s12 = sld [smem:[#allocation86_spill]]  ;;  %v4008_v26 = vmul.f32 %v426_v4, %v3859_v13 }
 0x208   : > { %s6181_s15 = sld [smem:[#allocation126_spill]]  ;;  %v524_v11 = vstv %s6178_s3  ;;  %v424_v9 = vadd.f32 %v423_v25, %v420_v53  ;;  %v655_v25 = vmul.f32 %v654_v8, %v3685_v21 }
 0x209   : > { %s3989_s20 = sld [smem:[#allocation9 + $0x18b]]  ;;  %v525_v28 = vmul.f32 %v524_v11, %v3701_v29 }
 0x20a   : > { %s3993_s24 = sld [smem:[#allocation9 + $0x20b]] }
 0x20b   : > { %v461_v14 = vstv %s6179_s7  ;;  %s6184_s2 = sld [smem:[#allocation111_spill]]  ;;  %v526_v47 = vadd.f32 %v525_v28, %v522_v27 }
 0x20c   : > { %s3999_s23 = sld [smem:[#allocation9 + $0x28b]]  ;;  %v462_v34 = vmul.f32 %v461_v14, %v3716_v37 }
 0x20d   : > { %s6186_s13 = sld [smem:[#allocation95_spill]]  ;;  %v430_v22 = vstv %s6180_s12 }
 0x20e   : > { %v591_v24 = vstv %s6181_s15  ;;  %s4004_s21 = sld [smem:[#allocation9 + $0x30b]]  ;;  %v4018_v36 = vmul.f32 %v430_v22, %v3878_v32  ;;  %v463_v54 = vadd.f32 %v462_v34, %v459_v31  ;;  %v428_v34 = vadd.f32 %v4008_v26, %v424_v9 }
 0x20f   : > { %6182 = sst [smem:[#allocation81_spill]] %s3989_s20  ;;  %v592_v41 = vmul.f32 %v591_v24, %v3701_v29 }
 0x210   : > { %6183 = sst [smem:[#allocation107_spill]] %s3993_s24 }
 0x211   : > { %s6188_s3 = sld [smem:[#allocation87_spill]]  ;;  %v528_v35 = vstv %s6184_s2  ;;  %v593_v59 = vadd.f32 %v592_v41, %v589_v40  ;;  %v4084_v41 = vmax.f32 %v376_v17, 0.0 }
 0x212   : > { %6185 = sst [smem:[#allocation108_spill]] %s3999_s23  ;;  %v529_v48 = vmul.f32 %v528_v35, %v3716_v37 }
 0x213   : > { %s6189_s7 = sld [smem:[#allocation88_spill]]  ;;  %v465_v38 = vstv %s6186_s13 }
 0x214   : > { %6187 = sst [smem:[#allocation92_spill]] %s4004_s21  ;;  %v466_v55 = vmul.f32 %v465_v38, %v3736_v49  ;;  %v530_v5 = vadd.f32 %v529_v48, %v526_v47 }
 0x215   : > { %s6190_s5 = sld [smem:[#allocation127_spill]] }
 0x216   : > { %s4011_s23 = sld [smem:[#allocation9 + $0x38b]]  ;;  %v467_v10 = vadd.f32 %v466_v55, %v463_v54  ;;  %v662_v54 = vstv %s3629_s28  ;;  %v432_v55 = vadd.f32 %v4018_v36, %v428_v34 }
 0x217   : > { %s6192_s12 = sld [smem:[#allocation140_spill]]  ;;  %v434_v0 = vstv %s6188_s3  ;;  %v663_v36 = vmul.f32 %v662_v54, %v3716_v37 }
 0x218   : > { %s4015_s15 = sld [smem:[#allocation9 + $0x40b]]  ;;  %v4040_v56 = vmul.f32 %v434_v0, %v3899_v50 }
 0x219   : > { %s6194_s21 = sld [smem:[#allocation112_spill]]  ;;  %v438_v45 = vstv %s6189_s7 }
 0x21a   : > { %s4022_s24 = sld [smem:[#allocation9 + $0x48b]]  ;;  %v4047_v62 = vmul.f32 %v438_v45, %v3912_v60 }
 0x21b   : > { %v595_v46 = vstv %s6190_s5  ;;  %s4028_s20 = sld [smem:[#allocation9 + $0x50b]] }
 0x21c   : > { %6191 = sst [smem:[#allocation72_spill]] %s4011_s23  ;;  %v596_v61 = vmul.f32 %v595_v46, %v3716_v37 }
 0x21d   : > { %s6196_s23 = sld [smem:[#allocation96_spill]]  ;;  %v647_v51 = vstv %s6192_s12 }
 0x21e   : > { %6193 = sst [smem:[#allocation124_spill]] %s4015_s15  ;;  %v648_v2 = vmul.f32 %v647_v51, %v3671_v15  ;;  %v597_v19 = vadd.f32 %v596_v61, %v593_v59 }
 0x21f   : > { %s6198_s2 = sld [smem:[#allocation128_spill]]  ;;  %v532_v39 = vstv %s6194_s21 }
 0x220   : > { %6195 = sst [smem:[#allocation82_spill]] %s4022_s24  ;;  %v533_v7 = vmul.f32 %v532_v39, %v3736_v49  ;;  %v652_v27 = vadd.f32 %v651_v3, %v648_v2  ;;  %v714_v2 = vstv %s3669_s0  ;;  %v717_v3 = vstv %s3677_s18 }
 0x221   : > { %6197 = sst [smem:[#allocation109_spill]] %s4028_s20 }
 0x222   : > { %s4033_s13 = sld [smem:[#allocation9 + $0x58b]]  ;;  %v534_v30 = vadd.f32 %v533_v7, %v530_v5  ;;  %v656_v47 = vadd.f32 %v655_v25, %v652_v27  ;;  %v721_v25 = vstv %s3681_s8 }
 0x223   : > { %s6200_s15 = sld [smem:[#allocation89_spill]]  ;;  %v469_v57 = vstv %s6196_s23 }
 0x224   : > { %s4037_s3 = sld [smem:[#allocation9 + $0x60b]]  ;;  %v470_v11 = vmul.f32 %v469_v57, %v3751_v58 }
 0x225   : > { %s6202_s5 = sld [smem:[#allocation113_spill]]  ;;  %v599_v63 = vstv %s6198_s2 }
 0x226   : > { %s4044_s9 = sld [smem:[#allocation9 + $0x68b]]  ;;  %v600_v20 = vmul.f32 %v599_v63, %v3736_v49  ;;  %v471_v35 = vadd.f32 %v470_v11, %v467_v10 }
 0x227   : > { %s6204_s7 = sld [smem:[#allocation97_spill]] }
 0x228   : > { %6199 = sst [smem:[#allocation93_spill]] %s4033_s13  ;;  %v601_v0 = vadd.f32 %v600_v20, %v597_v19  ;;  %v715_v19 = vmul.f32 %v714_v2, %v3671_v15  ;;  %v718_v20 = vmul.f32 %v717_v3, %v3673_v16 }
 0x229   : > { %s4052_s21 = sld [smem:[#allocation9 + $0x70b]]  ;;  %v442_v4 = vstv %s6200_s15 }
 0x22a   : > { %6201 = sst [smem:[#allocation83_spill]] %s4037_s3 }
 0x22b   : > { %s6206_s12 = sld [smem:[#allocation98_spill]]  ;;  %v536_v14 = vstv %s6202_s5 }
 0x22c   : > { %6203 = sst [smem:[#allocation125_spill]] %s4044_s9  ;;  %v537_v31 = vmul.f32 %v536_v14, %v3751_v58  ;;  %v666_v14 = vstv %s3631_s14 }
 0x22d   : > { %s6207_s23 = sld [smem:[#allocation129_spill]]  ;;  %v473_v18 = vstv %s6204_s7 }
 0x22e   : > { %s4057_s9 = sld [smem:[#allocation9 + $0x78b]]  ;;  %v474_v38 = vmul.f32 %v473_v18, %v3768_v6  ;;  %v538_v52 = vadd.f32 %v537_v31, %v534_v30 }
 0x22f   : > { %6205 = sst [smem:[#allocation84_spill]] %s4052_s21 }
 0x230   : > { %s6209_s3 = sld [smem:[#allocation99_spill]]  ;;  %v475_v39 = vadd.f32 %v474_v38, %v471_v35 }
 0x231   : > { %s6210_s2 = sld [smem:[#allocation141_spill]]  ;;  %v477_v22 = vstv %s6206_s12 }
 0x232   : > { %s4061_s13 = sld [smem:[#allocation10 + $0xb]]  ;;  %v478_v44 = vmul.f32 %v477_v22, %v3789_v23 }
 0x233   : > { %s6212_s21 = sld [smem:[#allocation114_spill]]  ;;  %v603_v24 = vstv %s6207_s23 }
 0x234   : > { %6208 = sst [smem:[#allocation85_spill]] %s4057_s9  ;;  %v604_v45 = vmul.f32 %v603_v24, %v3751_v58  ;;  %v479_v22 = vadd.f32 %v478_v44, %v475_v39 }
 0x235   : > { %s4067_s20 = sld [smem:[#allocation9 + $0xc]] }
 0x236   : > { %s4072_s29 = sld [smem:[#allocation9 + $0x8c]]  ;;  %v481_v28 = vstv %s6209_s3  ;;  %v605_v61 = vadd.f32 %v604_v45, %v601_v0  ;;  %v719_v0 = vadd.f32 %v718_v20, %v715_v19  ;;  %v722_v45 = vmul.f32 %v721_v25, %v3685_v21 }
 0x237   : > { %s6213_s5 = sld [smem:[#allocation130_spill]]  ;;  %v658_v42 = vstv %s6210_s2  ;;  %v482_v26 = vmul.f32 %v481_v28, %v3802_v33  ;;  %v436_v28 = vadd.f32 %v4040_v56, %v432_v55 }
 0x238   : > { %6211 = sst [smem:[#allocation110_spill]] %s4061_s13  ;;  %v659_v48 = vmul.f32 %v658_v42, %v3701_v29  ;;  %v667_v42 = vmul.f32 %v666_v14, %v3736_v49  ;;  %v723_v2 = vadd.f32 %v722_v45, %v719_v0  ;;  %v682_v45 = vstv %s3644_s27 }
 0x239   : > { %s4077_s11 = sld [smem:[#allocation9 + $0x10c]]  ;;  %v540_v40 = vstv %s6212_s21 }
 0x23a   : > { %s6214_s7 = sld [smem:[#allocation100_spill]]  ;;  %v541_v53 = vmul.f32 %v540_v40, %v3768_v6  ;;  %v660_v8 = vadd.f32 %v659_v48, %v656_v47  ;;  %v670_v40 = vstv %s3633_s25 }
 0x23b   : > { %s4082_s12 = sld [smem:[#allocation9 + $0x18c]]  ;;  %v671_v55 = vmul.f32 %v670_v40, %v3751_v58 }
 0x23c   : > { %s6215_s3 = sld [smem:[#allocation101_spill]]  ;;  %v542_v10 = vadd.f32 %v541_v53, %v538_v52  ;;  %v664_v31 = vadd.f32 %v663_v36, %v660_v8 }
 0x23d   : > { %s6216_s23 = sld [smem:[#allocation115_spill]]  ;;  %v607_v46 = vstv %s6213_s5 }
 0x23e   : > { %s4088_s2 = sld [smem:[#allocation9 + $0x20c]]  ;;  %v608_v63 = vmul.f32 %v607_v46, %v3768_v6  ;;  %v483_v46 = vadd.f32 %v482_v26, %v479_v22  ;;  %v668_v54 = vadd.f32 %v667_v42, %v664_v31  ;;  %v678_v22 = vstv %s3642_s4 }
 0x23f   : > { %s4093_s21 = sld [smem:[#allocation9 + $0x28c]]  ;;  %v733_v42 = vstv %s3694_s19  ;;  %v679_v40 = vmul.f32 %v678_v22, %v3789_v23 }
 0x240   : > { %v485_v51 = vstv %s6214_s7  ;;  %s6218_s13 = sld [smem:[#allocation131_spill]]  ;;  %v609_v24 = vadd.f32 %v608_v63, %v605_v61 }
 0x241   : > { %s4098_s9 = sld [smem:[#allocation9 + $0x30c]]  ;;  %v486_v5 = vmul.f32 %v485_v51, %v3816_v43  ;;  %v725_v51 = vstv %s3683_s26 }
 0x242   : > { %v489_v57 = vstv %s6215_s3  ;;  %s4103_s5 = sld [smem:[#allocation9 + $0x38c]]  ;;  %v726_v3 = vmul.f32 %v725_v51, %v3701_v29  ;;  %v784_v51 = vstv %s3746_s17 }
 0x243   : > { %v544_v59 = vstv %s6216_s23  ;;  %s6219_s24 = sld [smem:[#allocation102_spill]]  ;;  %v4116_v9 = vmul.f32 %v489_v57, %v3844_v1 }
 0x244   : > { %s4108_s7 = sld [smem:[#allocation9 + $0x40c]]  ;;  %v545_v11 = vmul.f32 %v544_v59, %v3789_v23  ;;  %v674_v59 = vstv %s3640_s30 }
 0x245   : > { %6217 = sst [smem:[#allocation94_spill]] %s4093_s21 }
 0x246   : > { %s6220_s21 = sld [smem:[#allocation116_spill]]  ;;  %v611_v7 = vstv %s6218_s13  ;;  %v546_v35 = vadd.f32 %v545_v11, %v542_v10  ;;  %v729_v10 = vstv %s3688_s16  ;;  %v4175_v11 = vadd.f32 %v4047_v62, %v436_v28 }
 0x247   : > { %s4113_s28 = sld [smem:[#allocation9 + $0x48c]]  ;;  %v612_v27 = vmul.f32 %v611_v7, %v3789_v23  ;;  %v487_v7 = vadd.f32 %v486_v5, %v483_v46  ;;  %v730_v25 = vmul.f32 %v729_v10, %v3716_v37 }
 0x248   : > { %s6222_s3 = sld [smem:[#allocation132_spill]] }
 0x249   : > { %s4120_s0 = sld [smem:[#allocation9 + $0x50c]]  ;;  %v493_v17 = vstv %s6219_s24  ;;  %v613_v47 = vadd.f32 %v612_v27, %v609_v24  ;;  %v727_v27 = vadd.f32 %v726_v3, %v723_v2  ;;  %v491_v28 = vadd.f32 %v4116_v9, %v487_v7 }
 0x24a   : > { %s6224_s18 = sld [smem:[#allocation103_spill]]  ;;  %v4143_v44 = vmul.f32 %v493_v17, %v3859_v13  ;;  %v672_v17 = vadd.f32 %v671_v55, %v668_v54  ;;  %v785_v3 = vmul.f32 %v784_v51, %v3673_v16 }
 0x24b   : > { %s4126_s13 = sld [smem:[#allocation9 + $0x58c]]  ;;  %v731_v46 = vadd.f32 %v730_v25, %v727_v27 }
 0x24c   : > { %v548_v18 = vstv %s6220_s21  ;;  %s6226_s23 = sld [smem:[#allocation117_spill]] }
 0x24d   : > { %6221 = sst [smem:[#allocation86_spill]] %s4113_s28  ;;  %v549_v38 = vmul.f32 %v548_v18, %v3802_v33  ;;  %v675_v18 = vmul.f32 %v674_v59, %v3768_v6 }
 0x24e   : > { %s4130_s28 = sld [smem:[#allocation9 + $0x60c]]  ;;  %v615_v30 = vstv %s6222_s3 }
 0x24f   : > { %6223 = sst [smem:[#allocation126_spill]] %s4120_s0  ;;  %v616_v48 = vmul.f32 %v615_v30, %v3802_v33  ;;  %v550_v26 = vadd.f32 %v549_v38, %v546_v35  ;;  %v676_v38 = vadd.f32 %v675_v18, %v672_v17 }
 0x250   : > { %s4135_s14 = sld [smem:[#allocation9 + $0x68c]]  ;;  %v497_v34 = vstv %s6224_s18 }
 0x251   : > { %6225 = sst [smem:[#allocation111_spill]] %s4126_s13  ;;  %v4154_v52 = vmul.f32 %v497_v34, %v3878_v32  ;;  %v617_v8 = vadd.f32 %v616_v48, %v613_v47  ;;  %v734_v47 = vmul.f32 %v733_v42, %v3736_v49  ;;  %v781_v48 = vstv %s3740_s22 }
 0x252   : > { %s6229_s24 = sld [smem:[#allocation133_spill]]  ;;  %v552_v56 = vstv %s6226_s23  ;;  %v680_v59 = vadd.f32 %v679_v40, %v676_v38  ;;  %v4257_v40 = vadd.f32 %v442_v4, %v4175_v11 }
 0x253   : > { %s4140_s21 = sld [smem:[#allocation9 + $0x70c]]  ;;  %v553_v57 = vmul.f32 %v552_v56, %v3816_v43 }
 0x254   : > { %6227 = sst [smem:[#allocation95_spill]] %s4130_s28 }
 0x255   : > { %s6231_s8 = sld [smem:[#allocation104_spill]]  ;;  %v554_v19 = vadd.f32 %v553_v57, %v550_v26 }
 0x256   : > { %6228 = sst [smem:[#allocation87_spill]] %s4135_s14 }
 0x257   : > { %s4147_s3 = sld [smem:[#allocation9 + $0x78c]] }
 0x258   : > { %s6233_s14 = sld [smem:[#allocation105_spill]]  ;;  %v619_v53 = vstv %s6229_s24 }
 0x259   : > { %6230 = sst [smem:[#allocation88_spill]] %s4140_s21  ;;  %v620_v36 = vmul.f32 %v619_v53, %v3816_v43  ;;  %v495_v53 = vadd.f32 %v4143_v44, %v491_v28  ;;  %v782_v44 = vmul.f32 %v781_v48, %v3671_v15 }
 0x25a   : > { %s6234_s18 = sld [smem:[#allocation118_spill]] }
 0x25b   : > { %s4151_s25 = sld [smem:[#allocation10 + $0xc]]  ;;  %v501_v39 = vstv %s6231_s8  ;;  %v621_v30 = vadd.f32 %v620_v36, %v617_v8  ;;  %v735_v8 = vadd.f32 %v734_v47, %v731_v46  ;;  %v786_v28 = vadd.f32 %v785_v3, %v782_v44 }
 0x25c   : > { %s4158_s23 = sld [smem:[#allocation9 + $0xd]]  ;;  %v4182_v5 = vmul.f32 %v501_v39, %v3899_v50 }
 0x25d   : > { %6232 = sst [smem:[#allocation127_spill]] %s4147_s3 }
 0x25e   : > { %s6236_s3 = sld [smem:[#allocation134_spill]]  ;;  %v505_v61 = vstv %s6233_s14 }
 0x25f   : > { %s4163_s21 = sld [smem:[#allocation9 + $0x8d]]  ;;  %v4189_v62 = vmul.f32 %v505_v61, %v3912_v60  ;;  %v683_v61 = vmul.f32 %v682_v45, %v3802_v33 }
 0x260   : > { %v556_v63 = vstv %s6234_s18  ;;  %s4168_s26 = sld [smem:[#allocation9 + $0x10d]] }
 0x261   : > { %6235 = sst [smem:[#allocation140_spill]] %s4151_s25  ;;  %v557_v20 = vmul.f32 %v556_v63, %v3844_v1 }
 0x262   : > { %s6237_s24 = sld [smem:[#allocation119_spill]] }
 0x263   : > { %s4172_s8 = sld [smem:[#allocation9 + $0x18d]]  ;;  %v558_v56 = vadd.f32 %v557_v20, %v554_v19 }
 0x264   : > { %v623_v14 = vstv %s6236_s3  ;;  %s4179_s30 = sld [smem:[#allocation9 + $0x20d]] }
 0x265   : > { %s6238_s14 = sld [smem:[#allocation106_spill]]  ;;  %v624_v31 = vmul.f32 %v623_v14, %v3844_v1  ;;  %v499_v14 = vadd.f32 %v4154_v52, %v495_v53 }
 0x266   : > { %s6239_s18 = sld [smem:[#allocation135_spill]] }
 0x267   : > { %s4186_s16 = sld [smem:[#allocation9 + $0x28d]]  ;;  %v625_v54 = vadd.f32 %v624_v31, %v621_v30  ;;  %v503_v51 = vadd.f32 %v4182_v5, %v499_v14 }
 0x268   : > { %v560_v24 = vstv %s6237_s24  ;;  %s6240_s3 = sld [smem:[#allocation120_spill]] }
 0x269   : > { %s4193_s25 = sld [smem:[#allocation9 + $0x30d]]  ;;  %v561_v9 = vmul.f32 %v560_v24, %v3859_v13  ;;  %v684_v24 = vadd.f32 %v683_v61, %v680_v59 }
 0x26a   : > { %s4198_s4 = sld [smem:[#allocation9 + $0x38d]] }
 0x26b   : > { %v509_v34 = vstv %s6238_s14  ;;  %s6243_s24 = sld [smem:[#allocation150_spill]]  ;;  %v562_v7 = vadd.f32 %v561_v9, %v558_v56 }
 0x26c   : > { %v627_v35 = vstv %s6239_s18  ;;  %s4203_s28 = sld [smem:[#allocation9 + $0x40d]] }
 0x26d   : > { %s6245_s13 = sld [smem:[#allocation136_spill]]  ;;  %v628_v55 = vmul.f32 %v627_v35, %v3859_v13 }
 0x26e   : > { %v564_v0 = vstv %s6240_s3  ;;  %s6247_s0 = sld [smem:[#allocation121_spill]] }
 0x26f   : > { %6241 = sst [smem:[#allocation112_spill]] %s4193_s25  ;;  %v565_v26 = vmul.f32 %v564_v0, %v3878_v32  ;;  %v629_v17 = vadd.f32 %v628_v55, %v625_v54 }
 0x270   : > { %6242 = sst [smem:[#allocation96_spill]] %s4198_s4 }
 0x271   : > { %s4208_s25 = sld [smem:[#allocation9 + $0x48d]]  ;;  %v737_v39 = vstv %s6243_s24  ;;  %v566_v31 = vadd.f32 %v565_v26, %v562_v7  ;;  %v507_v7 = vadd.f32 %v4189_v62, %v503_v51 }
 0x272   : > { %6244 = sst [smem:[#allocation128_spill]] %s4203_s28  ;;  %v738_v36 = vmul.f32 %v737_v39, %v3751_v58 }
 0x273   : > { %s6248_s19 = sld [smem:[#allocation143_spill]]  ;;  %v631_v57 = vstv %s6245_s13 }
 0x274   : > { %s4213_s18 = sld [smem:[#allocation9 + $0x50d]]  ;;  %v568_v63 = vstv %s6247_s0  ;;  %v632_v18 = vmul.f32 %v631_v57, %v3878_v32  ;;  %v739_v42 = vadd.f32 %v738_v36, %v735_v8 }
 0x275   : > { %s6250_s28 = sld [smem:[#allocation29_spill]]  ;;  %v569_v20 = vmul.f32 %v568_v63, %v3899_v50 }
 0x276   : > { %s4218_s3 = sld [smem:[#allocation9 + $0x58d]]  ;;  %v633_v56 = vadd.f32 %v632_v18, %v629_v17 }
 0x277   : > { %6246 = sst [smem:[#allocation89_spill]] %s4208_s25  ;;  %v570_v54 = vadd.f32 %v569_v20, %v566_v31 }
 0x278   : > { %s6252_s27 = sld [smem:[#allocation151_spill]] }
 0x279   : > { %s4223_s22 = sld [smem:[#allocation9 + $0x60d]]  ;;  %v686_v2 = vstv %s6248_s19 }
 0x27a   : > { %6249 = sst [smem:[#allocation113_spill]] %s4213_s18  ;;  %v687_v27 = vmul.f32 %v686_v2, %v3816_v43 }
 0x27b   : > { %s6254_s17 = sld [smem:[#allocation137_spill]]  ;;  %v788_v10 = vstv %s6250_s28 }
 0x27c   : > { %6251 = sst [smem:[#allocation97_spill]] %s4218_s3  ;;  %v789_v30 = vmul.f32 %v788_v10, %v3685_v21  ;;  %v688_v46 = vadd.f32 %v687_v27, %v684_v24 }
 0x27d   : > { %s4229_s18 = sld [smem:[#allocation9 + $0x68d]] }
 0x27e   : > { %s6256_s24 = sld [smem:[#allocation122_spill]]  ;;  %v741_v19 = vstv %s6252_s27  ;;  %v790_v11 = vadd.f32 %v789_v30, %v786_v28  ;;  %v510_v30 = vadd.f32 %v509_v34, %v507_v7 }
 0x27f   : > { %6253 = sst [smem:[#allocation98_spill]] %s4223_s22  ;;  %v742_v35 = vmul.f32 %v741_v19, %v3768_v6 }
 0x280   : > { %s6257_s3 = sld [smem:[#allocation144_spill]] }
 0x281   : > { %s4233_s13 = sld [smem:[#allocation9 + $0x70d]]  ;;  %v635_v22 = vstv %s6254_s17  ;;  %v743_v55 = vadd.f32 %v742_v35, %v739_v42 }
 0x282   : > { %s6259_s0 = sld [smem:[#allocation28_spill]]  ;;  %v636_v9 = vmul.f32 %v635_v22, %v3899_v50 }
 0x283   : > { %6255 = sst [smem:[#allocation129_spill]] %s4229_s18 }
 0x284   : > { %s4238_s19 = sld [smem:[#allocation9 + $0x78d]]  ;;  %v572_v25 = vstv %s6256_s24  ;;  %v637_v57 = vadd.f32 %v636_v9, %v633_v56 }
 0x285   : > { %s6261_s18 = sld [smem:[#allocation25_spill]]  ;;  %v573_v4 = vmul.f32 %v572_v25, %v3912_v60 }
 0x286   : > { %s4243_s28 = sld [smem:[#allocation10 + $0xd]]  ;;  %v690_v52 = vstv %s6257_s3 }
 0x287   : > { %6258 = sst [smem:[#allocation99_spill]] %s4233_s13  ;;  %v691_v47 = vmul.f32 %v690_v52, %v3844_v1  ;;  %v574_v14 = vadd.f32 %v573_v4, %v570_v54  ;;  %v4328_v54 = vmax.f32 %v510_v30, 0.0 }
 0x288   : > { %s6263_s13 = sld [smem:[#allocation138_spill]]  ;;  %v792_v38 = vstv %s6259_s0 }
 0x289   : > { %s6264_s22 = sld [smem:[#allocation145_spill]]  ;;  %v793_v53 = vmul.f32 %v792_v38, %v3701_v29  ;;  %v692_v63 = vadd.f32 %v691_v47, %v688_v46 }
 0x28a   : > { %6260 = sst [smem:[#allocation141_spill]] %s4238_s19 }
 0x28b   : > { %s4248_s27 = sld [smem:[#allocation9 + $0xe]]  ;;  %v745_v0 = vstv %s6261_s18  ;;  %v794_v36 = vadd.f32 %v793_v53, %v790_v11  ;;  %v4326_v53 = vmax.f32 %v4257_v40, 0.0 }
 0x28c   : > { %6262 = sst [smem:[#allocation114_spill]] %s4243_s28  ;;  %v746_v39 = vmul.f32 %v745_v0, %v3789_v23 }
 0x28d   : > { %s4252_s17 = sld [smem:[#allocation9 + $0x8e]] }
 0x28e   : > { %s6266_s3 = sld [smem:[#allocation45_spill]]  ;;  %v639_v45 = vstv %s6263_s13  ;;  %v747_v17 = vadd.f32 %v746_v39, %v743_v55 }
 0x28f   : > { %s4261_s24 = sld [smem:[#allocation9 + $0x10e]]  ;;  %v694_v48 = vstv %s6264_s22  ;;  %v640_v5 = vmul.f32 %v639_v45, %v3912_v60 }
 0x290   : > { %s6268_s28 = sld [smem:[#allocation43_spill]]  ;;  %v695_v59 = vmul.f32 %v694_v48, %v3859_v13 }
 0x291   : > { %s4266_s0 = sld [smem:[#allocation9 + $0x18e]]  ;;  %v641_v27 = vadd.f32 %v640_v5, %v637_v57 }
 0x292   : > { %s6270_s15 = sld [smem:[#allocation146_spill]]  ;;  %v696_v25 = vadd.f32 %v695_v59, %v692_v63 }
 0x293   : > { %6265 = sst [smem:[#allocation130_spill]] %s4252_s17 }
 0x294   : > { %s6271_s19 = sld [smem:[#allocation62_spill]]  ;;  %v796_v26 = vstv %s6266_s3 }
 0x295   : > { %6267 = sst [smem:[#allocation100_spill]] %s4261_s24  ;;  %v797_v10 = vmul.f32 %v796_v26, %v3716_v37 }
 0x296   : > { %s6272_s25 = sld [smem:[#allocation73_spill]]  ;;  %v749_v61 = vstv %s6268_s28 }
 0x297   : > { %6269 = sst [smem:[#allocation101_spill]] %s4266_s0  ;;  %v750_v18 = vmul.f32 %v749_v61, %v3802_v33  ;;  %v798_v42 = vadd.f32 %v797_v10, %v794_v36 }
 0x298   : > { %s4271_s18 = sld [smem:[#allocation9 + $0x20e]]  ;;  %v698_v2 = vstv %s6270_s15 }
 0x299   : > { %s6274_s13 = sld [smem:[#allocation123_spill]]  ;;  %v699_v20 = vmul.f32 %v698_v2, %v3878_v32  ;;  %v751_v56 = vadd.f32 %v750_v18, %v747_v17 }
 0x29a   : > { %s4275_s22 = sld [smem:[#allocation9 + $0x28e]]  ;;  %v848_v44 = vstv %s6271_s19 }
 0x29b   : > { %s6276_s0 = sld [smem:[#allocation59_spill]]  ;;  %v849_v22 = vmul.f32 %v848_v44, %v3671_v15  ;;  %v700_v51 = vadd.f32 %v699_v20, %v696_v25 }
 0x29c   : > { %s4280_s4 = sld [smem:[#allocation9 + $0x30e]]  ;;  %v851_v3 = vstv %s6272_s25 }
 0x29d   : > { %s6278_s24 = sld [smem:[#allocation56_spill]]  ;;  %v852_v24 = vmul.f32 %v851_v3, %v3673_v16 }
 0x29e   : > { %6273 = sst [smem:[#allocation115_spill]] %s4271_s18 }
 0x29f   : > { %s4285_s18 = sld [smem:[#allocation9 + $0x38e]]  ;;  %v576_v8 = vstv %s6274_s13  ;;  %v853_v47 = vadd.f32 %v852_v24, %v849_v22 }
 0x2a0   : > { %6275 = sst [smem:[#allocation131_spill]] %s4275_s22  ;;  %v577_v38 = vadd.f32 %v576_v8, %v574_v14 }
 0x2a1   : > { %s6280_s3 = sld [smem:[#allocation147_spill]]  ;;  %v800_v19 = vstv %s6276_s0 }
 0x2a2   : > { %6277 = sst [smem:[#allocation102_spill]] %s4280_s4  ;;  %v801_v35 = vmul.f32 %v800_v19, %v3736_v49  ;;  %v4333_v26 = vmax.f32 %v577_v38, 0.0 }
 0x2a3   : > { %s6281_s22 = sld [smem:[#allocation74_spill]]  ;;  %v753_v62 = vstv %s6278_s24 }
 0x2a4   : > { %s4290_s17 = sld [smem:[#allocation9 + $0x40e]]  ;;  %v754_v9 = vmul.f32 %v753_v62, %v3816_v43  ;;  %v802_v55 = vadd.f32 %v801_v35, %v798_v42 }
 0x2a5   : > { %6279 = sst [smem:[#allocation116_spill]] %s4285_s18 }
 0x2a6   : > { %s6283_s28 = sld [smem:[#allocation139_spill]]  ;;  %v755_v57 = vadd.f32 %v754_v9, %v751_v56 }
 0x2a7   : > { %s4294_s25 = sld [smem:[#allocation9 + $0x48e]]  ;;  %v702_v52 = vstv %s6280_s3 }
 0x2a8   : > { %s6285_s19 = sld [smem:[#allocation31_spill]]  ;;  %v703_v45 = vmul.f32 %v702_v52, %v3899_v50 }
 0x2a9   : > { %s4300_s15 = sld [smem:[#allocation9 + $0x50e]]  ;;  %v855_v28 = vstv %s6281_s22 }
 0x2aa   : > { %6282 = sst [smem:[#allocation132_spill]] %s4290_s17  ;;  %v856_v34 = vmul.f32 %v855_v28, %v3685_v21  ;;  %v704_v3 = vadd.f32 %v703_v45, %v700_v51  ;;  %v985_v51 = vstv %s3979_s10 }
 0x2ab   : > { %s6287_s13 = sld [smem:[#allocation57_spill]] }
 0x2ac   : > { %s4304_s17 = sld [smem:[#allocation9 + $0x58e]]  ;;  %v643_v31 = vstv %s6283_s28  ;;  %v857_v63 = vadd.f32 %v856_v34, %v853_v47 }
 0x2ad   : > { %6284 = sst [smem:[#allocation103_spill]] %s4294_s25  ;;  %v644_v48 = vadd.f32 %v643_v31, %v641_v27 }
 0x2ae   : > { %s6289_s0 = sld [smem:[#allocation148_spill]]  ;;  %v804_v0 = vstv %s6285_s19 }
 0x2af   : > { %6286 = sst [smem:[#allocation117_spill]] %s4300_s15  ;;  %v805_v39 = vmul.f32 %v804_v0, %v3751_v58  ;;  %v4344_v44 = vmax.f32 %v644_v48, 0.0  ;;  %v982_v48 = vstv %s3974_s1 }
 0x2b0   : > { %s6290_s24 = sld [smem:[#allocation36_spill]] }
 0x2b1   : > { %s4310_s25 = sld [smem:[#allocation9 + $0x60e]]  ;;  %v757_v46 = vstv %s6287_s13  ;;  %v806_v36 = vadd.f32 %v805_v39, %v802_v55 }
 0x2b2   : > { %6288 = sst [smem:[#allocation133_spill]] %s4304_s17  ;;  %v758_v5 = vmul.f32 %v757_v46, %v3844_v1 }
 0x2b3   : > { %s4314_s15 = sld [smem:[#allocation9 + $0x68e]] }
 0x2b4   : > { %s6293_s14 = sld [smem:[#allocation30_spill]]  ;;  %v706_v4 = vstv %s6289_s0  ;;  %v759_v18 = vadd.f32 %v758_v5, %v755_v57 }
 0x2b5   : > { %s4319_s22 = sld [smem:[#allocation9 + $0x70e]]  ;;  %v707_v40 = vmul.f32 %v706_v4, %v3912_v60 }
 0x2b6   : > { %s6295_s3 = sld [smem:[#allocation26_spill]]  ;;  %v859_v11 = vstv %s6290_s24 }
 0x2b7   : > { %6291 = sst [smem:[#allocation104_spill]] %s4310_s25  ;;  %v860_v2 = vmul.f32 %v859_v11, %v3701_v29  ;;  %v708_v52 = vadd.f32 %v707_v40, %v704_v3  ;;  %v986_v3 = vmul.f32 %v985_v51, %v3673_v16 }
 0x2b8   : > { %s4323_s28 = sld [smem:[#allocation9 + $0x78e]] }
 0x2b9   : > { %6292 = sst [smem:[#allocation105_spill]] %s4314_s15  ;;  %v861_v27 = vadd.f32 %v860_v2, %v857_v63  ;;  %v983_v2 = vmul.f32 %v982_v48, %v3671_v15 }
 0x2ba   : > { %s6297_s19 = sld [smem:[#allocation149_spill]]  ;;  %v808_v59 = vstv %s6293_s14 }
 0x2bb   : > { %6294 = sst [smem:[#allocation118_spill]] %s4319_s22  ;;  %v809_v10 = vmul.f32 %v808_v59, %v3768_v6 }
 0x2bc   : > { %s6298_s13 = sld [smem:[#allocation37_spill]]  ;;  %v761_v61 = vstv %s6295_s3 }
 0x2bd   : > { %s4331_s15 = sld [smem:[#allocation10 + $0xe]]  ;;  %v762_v19 = vmul.f32 %v761_v61, %v3859_v13  ;;  %v810_v35 = vadd.f32 %v809_v10, %v806_v36  ;;  %v989_v10 = vstv %s3984_s6 }
 0x2be   : > { %6296 = sst [smem:[#allocation134_spill]] %s4323_s28 }
 0x2bf   : > { %s6300_s0 = sld [smem:[#allocation77_spill]]  ;;  %v763_v9 = vadd.f32 %v762_v19, %v759_v18 }
 0x2c0   : > { %s6301_s24 = sld [smem:[#allocation42_spill]]  ;;  %v710_v7 = vstv %s6297_s19 }
 0x2c1   : > { %s4337_s28 = sld [smem:[#allocation9 + $0xf]]  ;;  %v711_v4 = vadd.f32 %v710_v7, %v708_v52  ;;  %v987_v52 = vadd.f32 %v986_v3, %v983_v2  ;;  %v1056_v2 = vstv %s4077_s11 }
 0x2c2   : > { %s6303_s22 = sld [smem:[#allocation27_spill]]  ;;  %v863_v8 = vstv %s6298_s13 }
 0x2c3   : > { %6299 = sst [smem:[#allocation119_spill]] %s4331_s15  ;;  %v864_v25 = vmul.f32 %v863_v8, %v3716_v37 }
 0x2c4   : > { %s6304_s25 = sld [smem:[#allocation46_spill]] }
 0x2c5   : > { %s4342_s17 = sld [smem:[#allocation9 + $0x8f]]  ;;  %v915_v14 = vstv %s6300_s0  ;;  %v865_v47 = vadd.f32 %v864_v25, %v861_v27 }
 0x2c6   : > { %s6306_s15 = sld [smem:[#allocation44_spill]]  ;;  %v918_v17 = vstv %s6301_s24  ;;  %v916_v30 = vmul.f32 %v915_v14, %v3671_v15  ;;  %v4406_v14 = vmax.f32 %v711_v4, 0.0 }
 0x2c7   : > { %6302 = sst [smem:[#allocation106_spill]] %s4337_s28  ;;  %v919_v31 = vmul.f32 %v918_v17, %v3673_v16 }
 0x2c8   : > { %s6307_s18 = sld [smem:[#allocation58_spill]]  ;;  %v765_v20 = vstv %s6303_s22 }
 0x2c9   : > { %s4348_s14 = sld [smem:[#allocation9 + $0x10f]]  ;;  %v766_v42 = vmul.f32 %v765_v20, %v3878_v32  ;;  %v920_v55 = vadd.f32 %v919_v31, %v916_v30 }
 0x2ca   : > { %s6308_s4 = sld [smem:[#allocation49_spill]]  ;;  %v812_v62 = vstv %s6304_s25 }
 0x2cb   : > { %6305 = sst [smem:[#allocation135_spill]] %s4342_s17  ;;  %v813_v38 = vmul.f32 %v812_v62, %v3789_v23  ;;  %v767_v61 = vadd.f32 %v766_v42, %v763_v9  ;;  %v1049_v9 = vstv %s4067_s20 }
 0x2cc   : > { %s4353_s3 = sld [smem:[#allocation9 + $0x18f]]  ;;  %v769_v22 = vstv %s6306_s15 }
 0x2cd   : > { %s6309_s17 = sld [smem:[#allocation52_spill]]  ;;  %v770_v0 = vmul.f32 %v769_v22, %v3899_v50  ;;  %v814_v57 = vadd.f32 %v813_v38, %v810_v35 }
 0x2ce   : > { %s4358_s28 = sld [smem:[#allocation9 + $0x20f]]  ;;  %v773_v24 = vstv %s6307_s18 }
 0x2cf   : > { %s6310_s19 = sld [smem:[#allocation60_spill]]  ;;  %v4377_v45 = vmul.f32 %v773_v24, %v3912_v60  ;;  %v771_v27 = vadd.f32 %v770_v0, %v767_v61  ;;  %v1052_v0 = vstv %s4072_s29 }
 0x2d0   : > { %s4363_s13 = sld [smem:[#allocation9 + $0x28f]]  ;;  %v867_v28 = vstv %s6308_s4 }
 0x2d1   : > { %s4368_s22 = sld [smem:[#allocation9 + $0x30f]]  ;;  %v868_v34 = vmul.f32 %v867_v28, %v3736_v49  ;;  %v990_v28 = vmul.f32 %v989_v10, %v3685_v21 }
 0x2d2   : > { %s6312_s25 = sld [smem:[#allocation63_spill]] }
 0x2d3   : > { %v922_v56 = vstv %s6309_s17  ;;  %s4373_s18 = sld [smem:[#allocation9 + $0x38f]]  ;;  %v869_v8 = vadd.f32 %v868_v34, %v865_v47 }
 0x2d4   : > { %s6314_s4 = sld [smem:[#allocation32_spill]]  ;;  %v923_v39 = vmul.f32 %v922_v56, %v3685_v21 }
 0x2d5   : > { %s6315_s15 = sld [smem:[#allocation66_spill]]  ;;  %v816_v46 = vstv %s6310_s19 }
 0x2d6   : > { %s4380_s0 = sld [smem:[#allocation9 + $0x40f]]  ;;  %v817_v5 = vmul.f32 %v816_v46, %v3802_v33  ;;  %v924_v18 = vadd.f32 %v923_v39, %v920_v55 }
 0x2d7   : > { %6311 = sst [smem:[#allocation120_spill]] %s4368_s22 }
 0x2d8   : > { %s6317_s24 = sld [smem:[#allocation33_spill]]  ;;  %v871_v11 = vstv %s6312_s25  ;;  %v818_v20 = vadd.f32 %v817_v5, %v814_v57  ;;  %v1050_v5 = vmul.f32 %v1049_v9, %v3671_v15 }
 0x2d9   : > { %6313 = sst [smem:[#allocation150_spill]] %s4373_s18  ;;  %v872_v36 = vmul.f32 %v871_v11, %v3751_v58  ;;  %v991_v11 = vadd.f32 %v990_v28, %v987_v52  ;;  %v775_v52 = vadd.f32 %v4377_v45, %v771_v27 }
 0x2da   : > { %s4385_s17 = sld [smem:[#allocation9 + $0x48f]]  ;;  %v820_v59 = vstv %s6314_s4 }
 0x2db   : > { %s6319_s18 = sld [smem:[#allocation152_spill]]  ;;  %v926_v40 = vstv %s6315_s15  ;;  %v821_v62 = vmul.f32 %v820_v59, %v3816_v43  ;;  %v873_v30 = vadd.f32 %v872_v36, %v869_v8  ;;  %v1053_v59 = vmul.f32 %v1052_v0, %v3673_v16 }
 0x2dc   : > { %6316 = sst [smem:[#allocation136_spill]] %s4380_s0  ;;  %v927_v19 = vmul.f32 %v926_v40, %v3701_v29 }
 0x2dd   : > { %s4389_s22 = sld [smem:[#allocation9 + $0x50f]]  ;;  %v822_v46 = vadd.f32 %v821_v62, %v818_v20 }
 0x2de   : > { %s6321_s19 = sld [smem:[#allocation75_spill]]  ;;  %v824_v63 = vstv %s6317_s24  ;;  %v928_v38 = vadd.f32 %v927_v19, %v924_v18 }
 0x2df   : > { %s4394_s0 = sld [smem:[#allocation9 + $0x58f]]  ;;  %v825_v22 = vmul.f32 %v824_v63, %v3844_v1 }
 0x2e0   : > { %6318 = sst [smem:[#allocation121_spill]] %s4385_s17 }
 0x2e1   : > { %s6323_s1 = sld [smem:[#allocation78_spill]]  ;;  %v777_v7 = vstv %s6319_s18  ;;  %v826_v3 = vadd.f32 %v825_v22, %v822_v46  ;;  %v1057_v22 = vmul.f32 %v1056_v2, %v3685_v21 }
 0x2e2   : > { %s4399_s10 = sld [smem:[#allocation9 + $0x60f]] }
 0x2e3   : > { %6320 = sst [smem:[#allocation143_spill]] %s4389_s22 }
 0x2e4   : > { %s6325_s25 = sld [smem:[#allocation47_spill]]  ;;  %v875_v17 = vstv %s6321_s19 }
 0x2e5   : > { %6322 = sst [smem:[#allocation29_spill]] %s4394_s0  ;;  %v876_v31 = vmul.f32 %v875_v17, %v3768_v6 }
 0x2e6   : > { %s4404_s22 = sld [smem:[#allocation9 + $0x68f]] }
 0x2e7   : > { %s6327_s4 = sld [smem:[#allocation38_spill]]  ;;  %v930_v24 = vstv %s6323_s1  ;;  %v877_v39 = vadd.f32 %v876_v31, %v873_v30  ;;  %v1060_v31 = vstv %s4082_s12 }
 0x2e8   : > { %6324 = sst [smem:[#allocation151_spill]] %s4399_s10  ;;  %v931_v56 = vmul.f32 %v930_v24, %v3716_v37 }
 0x2e9   : > { %s6328_s15 = sld [smem:[#allocation81_spill]] }
 0x2ea   : > { %s4410_s24 = sld [smem:[#allocation9 + $0x70f]]  ;;  %v828_v25 = vstv %s6325_s25  ;;  %v932_v61 = vadd.f32 %v931_v56, %v928_v38 }
 0x2eb   : > { %s4415_s6 = sld [smem:[#allocation9 + $0x78f]]  ;;  %v829_v47 = vmul.f32 %v828_v25, %v3859_v13  ;;  %v1054_v25 = vadd.f32 %v1053_v59, %v1050_v5 }
 0x2ec   : > { %6326 = sst [smem:[#allocation137_spill]] %s4404_s22 }
 0x2ed   : > { %s6331_s19 = sld [smem:[#allocation61_spill]]  ;;  %v879_v42 = vstv %s6327_s4 }
 0x2ee   : > { %s6332_s22 = sld [smem:[#allocation53_spill]]  ;;  %v880_v51 = vmul.f32 %v879_v42, %v3789_v23  ;;  %v830_v42 = vadd.f32 %v829_v47, %v826_v3 }
 0x2ef   : > { %s4419_s10 = sld [smem:[#allocation10 + $0xf]]  ;;  %v993_v35 = vstv %s6328_s15 }
 0x2f0   : > { %6329 = sst [smem:[#allocation122_spill]] %s4410_s24  ;;  %v994_v55 = vmul.f32 %v993_v35, %v3701_v29  ;;  %v881_v62 = vadd.f32 %v880_v51, %v877_v39  ;;  %v778_v51 = vadd.f32 %v777_v7, %v775_v52 }
 0x2f1   : > { %6330 = sst [smem:[#allocation144_spill]] %s4415_s6 }
 0x2f2   : > { %s6334_s24 = sld [smem:[#allocation39_spill]]  ;;  %v995_v19 = vadd.f32 %v994_v55, %v991_v11  ;;  %v1064_v55 = vstv %s4088_s2 }
 0x2f3   : > { %s4424_s0 = sld [smem:[#allocation11]]  ;;  %v832_v34 = vstv %s6331_s19 }
 0x2f4   : > { %s6335_s1 = sld [smem:[#allocation107_spill]]  ;;  %v934_v48 = vstv %s6332_s22  ;;  %v833_v40 = vmul.f32 %v832_v34, %v3878_v32  ;;  %v1058_v34 = vadd.f32 %v1057_v22, %v1054_v25 }
 0x2f5   : > { %6333 = sst [smem:[#allocation28_spill]] %s4419_s10  ;;  %v935_v63 = vmul.f32 %v934_v48, %v3736_v49  ;;  %v1061_v48 = vmul.f32 %v1060_v31, %v3701_v29 }
 0x2f6   : > { %s4429_s25 = sld [smem:[#allocation11 + $0x80]]  ;;  %v834_v39 = vadd.f32 %v833_v40, %v830_v42  ;;  %v1065_v40 = vmul.f32 %v1064_v55, %v3716_v37  ;;  %v1123_v55 = vstv %s4168_s26 }
 0x2f7   : > { %s4434_s10 = sld [smem:[#allocation11 + $0x100]]  ;;  %v936_v28 = vadd.f32 %v935_v63, %v932_v61 }
 0x2f8   : > { %s6336_s4 = sld [smem:[#allocation34_spill]]  ;;  %v883_v4 = vstv %s6334_s24 }
 0x2f9   : > { %s6337_s15 = sld [smem:[#allocation35_spill]]  ;;  %v884_v17 = vmul.f32 %v883_v4, %v3802_v33 }
 0x2fa   : > { %s6338_s6 = sld [smem:[#allocation67_spill]]  ;;  %v997_v57 = vstv %s6335_s1 }
 0x2fb   : > { %s4439_s20 = sld [smem:[#allocation11 + $0x180]]  ;;  %v998_v20 = vmul.f32 %v997_v57, %v3716_v37  ;;  %v885_v46 = vadd.f32 %v884_v17, %v881_v62 }
 0x2fc   : > { %s6339_s29 = sld [smem:[#allocation50_spill]] }
 0x2fd   : > { %s4444_s22 = sld [smem:[#allocation11 + $0x200]]  ;;  %v999_v27 = vadd.f32 %v998_v20, %v995_v19 }
 0x2fe   : > { %s6341_s19 = sld [smem:[#allocation108_spill]]  ;;  %v836_v8 = vstv %s6336_s4 }
 0x2ff   : > { %s4449_s24 = sld [smem:[#allocation11 + $0x280]]  ;;  %v840_v36 = vstv %s6337_s15  ;;  %v837_v35 = vmul.f32 %v836_v8, %v3899_v50 }
 0x300   : > { %v938_v10 = vstv %s6338_s6  ;;  %s4454_s1 = sld [smem:[#allocation11 + $0x300]]  ;;  %v841_v38 = vmul.f32 %v840_v36, %v3912_v60  ;;  %v1062_v36 = vadd.f32 %v1061_v48, %v1058_v34 }
 0x301   : > { %s6342_s17 = sld [smem:[#allocation79_spill]]  ;;  %v939_v30 = vmul.f32 %v938_v10, %v3751_v58  ;;  %v4504_v10 = vmax.f32 %v778_v51, 0.0  ;;  %v838_v20 = vadd.f32 %v837_v35, %v834_v39 }
 0x302   : > { %v887_v18 = vstv %s6339_s29  ;;  %s6344_s11 = sld [smem:[#allocation64_spill]]  ;;  %v1066_v35 = vadd.f32 %v1065_v40, %v1062_v36  ;;  %v1124_v40 = vmul.f32 %v1123_v55, %v3685_v21 }
 0x303   : > { %6340 = sst [smem:[#allocation25_spill]] %s4444_s22  ;;  %v888_v9 = vmul.f32 %v887_v18, %v3816_v43  ;;  %v940_v4 = vadd.f32 %v939_v30, %v936_v28  ;;  %v1116_v28 = vstv %s4158_s23  ;;  %v1119_v30 = vstv %s4163_s21 }
 0x304   : > { %s4459_s22 = sld [smem:[#allocation11 + $0x380]]  ;;  %v1001_v24 = vstv %s6341_s19  ;;  %v1117_v34 = vmul.f32 %v1116_v28, %v3671_v15  ;;  %v1120_v48 = vmul.f32 %v1119_v30, %v3673_v16 }
 0x305   : > { %s4463_s4 = sld [smem:[#allocation11 + $0x400]]  ;;  %v1002_v0 = vmul.f32 %v1001_v24, %v3736_v49  ;;  %v889_v3 = vadd.f32 %v888_v9, %v885_v46  ;;  %v842_v46 = vadd.f32 %v841_v38, %v838_v20  ;;  %v1127_v20 = vstv %s4172_s8 }
 0x306   : > { %s6346_s6 = sld [smem:[#allocation92_spill]]  ;;  %v1121_v36 = vadd.f32 %v1120_v48, %v1117_v34 }
 0x307   : > { %s4468_s15 = sld [smem:[#allocation11 + $0x480]]  ;;  %v942_v56 = vstv %s6342_s17  ;;  %v1003_v2 = vadd.f32 %v1002_v0, %v999_v27  ;;  %v1072_v0 = vstv %s4098_s9 }
 0x308   : > { %s4473_s29 = sld [smem:[#allocation11 + $0x500]]  ;;  %v891_v45 = vstv %s6344_s11  ;;  %v943_v11 = vmul.f32 %v942_v56, %v3768_v6 }
 0x309   : > { %s6349_s19 = sld [smem:[#allocation48_spill]]  ;;  %v892_v5 = vmul.f32 %v891_v45, %v3844_v1 }
 0x30a   : > { %6343 = sst [smem:[#allocation138_spill]] %s4459_s22  ;;  %v944_v17 = vadd.f32 %v943_v11, %v940_v4 }
 0x30b   : > { %6345 = sst [smem:[#allocation145_spill]] %s4463_s4  ;;  %v893_v31 = vadd.f32 %v892_v5, %v889_v3 }
 0x30c   : > { %s6350_s4 = sld [smem:[#allocation54_spill]]  ;;  %v1005_v47 = vstv %s6346_s6 }
 0x30d   : > { %6347 = sst [smem:[#allocation45_spill]] %s4468_s15  ;;  %v1006_v7 = vmul.f32 %v1005_v47, %v3751_v58 }
 0x30e   : > { %6348 = sst [smem:[#allocation43_spill]] %s4473_s29 }
 0x30f   : > { %s4478_s12 = sld [smem:[#allocation11 + $0x580]]  ;;  %v844_v57 = vstv %s6349_s19  ;;  %v1007_v22 = vadd.f32 %v1006_v7, %v1003_v2  ;;  %v1076_v7 = vstv %s4103_s5 }
 0x310   : > { %s6352_s15 = sld [smem:[#allocation76_spill]] }
 0x311   : > { %s6353_s22 = sld [smem:[#allocation41_spill]] }
 0x312   : > { %s4482_s17 = sld [smem:[#allocation11 + $0x600]]  ;;  %v946_v59 = vstv %s6350_s4 }
 0x313   : > { %s6355_s29 = sld [smem:[#allocation72_spill]]  ;;  %v947_v18 = vmul.f32 %v946_v59, %v3789_v23  ;;  %v1073_v59 = vmul.f32 %v1072_v0, %v3751_v58  ;;  %v1131_v0 = vstv %s4179_s30 }
 0x314   : > { %s4488_s11 = sld [smem:[#allocation11 + $0x680]] }
 0x315   : > { %6351 = sst [smem:[#allocation146_spill]] %s4478_s12  ;;  %v948_v45 = vadd.f32 %v947_v18, %v944_v17  ;;  %v845_v17 = vadd.f32 %v844_v57, %v842_v46 }
 0x316   : > { %s6357_s12 = sld [smem:[#allocation94_spill]]  ;;  %v895_v61 = vstv %s6352_s15 }
 0x317   : > { %s4493_s6 = sld [smem:[#allocation11 + $0x700]]  ;;  %v899_v63 = vstv %s6353_s22  ;;  %v896_v62 = vmul.f32 %v895_v61, %v3859_v13 }
 0x318   : > { %6354 = sst [smem:[#allocation62_spill]] %s4482_s17  ;;  %v900_v24 = vmul.f32 %v899_v63, %v3878_v32 }
 0x319   : > { %s6359_s18 = sld [smem:[#allocation68_spill]]  ;;  %v1009_v8 = vstv %s6355_s29  ;;  %v897_v39 = vadd.f32 %v896_v62, %v893_v31  ;;  %v1080_v31 = vstv %s4108_s7 }
 0x31a   : > { %6356 = sst [smem:[#allocation73_spill]] %s4488_s11  ;;  %v1010_v52 = vmul.f32 %v1009_v8, %v3768_v6  ;;  %v1081_v48 = vmul.f32 %v1080_v31, %v3789_v23 }
 0x31b   : > { %s4498_s17 = sld [smem:[#allocation11 + $0x780]]  ;;  %v901_v62 = vadd.f32 %v900_v24, %v897_v39  ;;  %v1128_v24 = vmul.f32 %v1127_v20, %v3701_v29 }
 0x31c   : > { %s4502_s2 = sld [smem:[#allocation13]]  ;;  %v1068_v19 = vstv %s6357_s12  ;;  %v1011_v4 = vadd.f32 %v1010_v52, %v1007_v22  ;;  %v1077_v52 = vmul.f32 %v1076_v7, %v3768_v6  ;;  %v1135_v7 = vstv %s4186_s16 }
 0x31d   : > { %6358 = sst [smem:[#allocation123_spill]] %s4493_s6  ;;  %v1069_v56 = vmul.f32 %v1068_v19, %v3736_v49 }
 0x31e   : > { %s6362_s4 = sld [smem:[#allocation124_spill]] }
 0x31f   : > { %s4508_s22 = sld [smem:[#allocation11 + $0x1]]  ;;  %v950_v25 = vstv %s6359_s18  ;;  %v1070_v38 = vadd.f32 %v1069_v56, %v1066_v35  ;;  %v1125_v56 = vadd.f32 %v1124_v40, %v1121_v36  ;;  %v1183_v40 = vstv %s4248_s27 }
 0x320   : > { %s6363_s15 = sld [smem:[#allocation40_spill]]  ;;  %v951_v27 = vmul.f32 %v950_v25, %v3802_v33  ;;  %v1184_v31 = vmul.f32 %v1183_v40, %v3671_v15 }
 0x321   : > { %6360 = sst [smem:[#allocation59_spill]] %s4498_s17  ;;  %v1074_v22 = vadd.f32 %v1073_v59, %v1070_v38  ;;  %v1129_v38 = vadd.f32 %v1128_v24, %v1125_v56  ;;  %v1132_v59 = vmul.f32 %v1131_v0, %v3716_v37 }
 0x322   : > { %6361 = sst [smem:[#allocation56_spill]] %s4502_s2  ;;  %v952_v63 = vadd.f32 %v951_v27, %v948_v45 }
 0x323   : > { %s4513_s29 = sld [smem:[#allocation11 + $0x81]]  ;;  %v1078_v34 = vadd.f32 %v1077_v52, %v1074_v22  ;;  %v1133_v52 = vadd.f32 %v1132_v59, %v1129_v38 }
 0x324   : > { %s6364_s2 = sld [smem:[#allocation69_spill]]  ;;  %v1013_v42 = vstv %s6362_s4 }
 0x325   : > { %s4518_s17 = sld [smem:[#allocation11 + $0x101]]  ;;  %v1014_v11 = vmul.f32 %v1013_v42, %v3789_v23 }
 0x326   : > { %s6365_s12 = sld [smem:[#allocation51_spill]]  ;;  %v903_v9 = vstv %s6363_s15 }
 0x327   : > { %s4522_s6 = sld [smem:[#allocation11 + $0x181]]  ;;  %v904_v61 = vmul.f32 %v903_v9, %v3899_v50  ;;  %v1015_v18 = vadd.f32 %v1014_v11, %v1011_v4  ;;  %v4573_v9 = vmax.f32 %v845_v17, 0.0 }
 0x328   : > { %s6366_s18 = sld [smem:[#allocation82_spill]] }
 0x329   : > { %s4527_s11 = sld [smem:[#allocation11 + $0x201]]  ;;  %v905_v46 = vadd.f32 %v904_v61, %v901_v62 }
 0x32a   : > { %v954_v47 = vstv %s6364_s2  ;;  %s4532_s21 = sld [smem:[#allocation11 + $0x281]] }
 0x32b   : > { %s6368_s23 = sld [smem:[#allocation80_spill]]  ;;  %v955_v2 = vmul.f32 %v954_v47, %v3816_v43 }
 0x32c   : > { %v907_v51 = vstv %s6365_s12  ;;  %s4537_s4 = sld [smem:[#allocation11 + $0x301]] }
 0x32d   : > { %s4541_s9 = sld [smem:[#allocation11 + $0x381]]  ;;  %v908_v3 = vmul.f32 %v907_v51, %v3912_v60  ;;  %v956_v30 = vadd.f32 %v955_v2, %v952_v63 }
 0x32e   : > { %v1017_v5 = vstv %s6366_s18  ;;  %s6371_s2 = sld [smem:[#allocation109_spill]] }
 0x32f   : > { %s4546_s15 = sld [smem:[#allocation11 + $0x401]]  ;;  %v1018_v19 = vmul.f32 %v1017_v5, %v3802_v33 }
 0x330   : > { %6367 = sst [smem:[#allocation147_spill]] %s4532_s21 }
 0x331   : > { %s6373_s26 = sld [smem:[#allocation65_spill]]  ;;  %v958_v8 = vstv %s6368_s23  ;;  %v1019_v45 = vadd.f32 %v1018_v19, %v1015_v18  ;;  %v4603_v18 = vadd.f32 %v908_v3, %v905_v46 }
 0x332   : > { %6369 = sst [smem:[#allocation74_spill]] %s4537_s4  ;;  %v959_v57 = vmul.f32 %v958_v8, %v3844_v1  ;;  %v1082_v8 = vadd.f32 %v1081_v48, %v1078_v34 }
 0x333   : > { %6370 = sst [smem:[#allocation139_spill]] %s4541_s9 }
 0x334   : > { %s4551_s12 = sld [smem:[#allocation11 + $0x481]]  ;;  %v1021_v25 = vstv %s6371_s2  ;;  %v960_v51 = vadd.f32 %v959_v57, %v956_v30  ;;  %v1136_v30 = vmul.f32 %v1135_v7, %v3736_v49 }
 0x335   : > { %6372 = sst [smem:[#allocation31_spill]] %s4546_s15  ;;  %v1022_v27 = vmul.f32 %v1021_v25, %v3816_v43 }
 0x336   : > { %s6375_s18 = sld [smem:[#allocation55_spill]]  ;;  %v1137_v34 = vadd.f32 %v1136_v30, %v1133_v52 }
 0x337   : > { %s6376_s9 = sld [smem:[#allocation90_spill]]  ;;  %v911_v28 = vstv %s6373_s26  ;;  %v1023_v61 = vadd.f32 %v1022_v27, %v1019_v45 }
 0x338   : > { %s4557_s5 = sld [smem:[#allocation11 + $0x501]] }
 0x339   : > { %s4561_s23 = sld [smem:[#allocation11 + $0x581]] }
 0x33a   : > { %6374 = sst [smem:[#allocation57_spill]] %s4551_s12 }
 0x33b   : > { %s6379_s12 = sld [smem:[#allocation93_spill]] }
 0x33c   : > { %s4566_s19 = sld [smem:[#allocation11 + $0x601]]  ;;  %v962_v42 = vstv %s6375_s18 }
 0x33d   : > { %v966_v35 = vstv %s6376_s9  ;;  %s6381_s8 = sld [smem:[#allocation86_spill]]  ;;  %v963_v4 = vmul.f32 %v962_v42, %v3859_v13 }
 0x33e   : > { %6377 = sst [smem:[#allocation148_spill]] %s4557_s5  ;;  %v967_v11 = vmul.f32 %v966_v35, %v3878_v32 }
 0x33f   : > { %6378 = sst [smem:[#allocation36_spill]] %s4561_s23  ;;  %v964_v19 = vadd.f32 %v963_v4, %v960_v51 }
 0x340   : > { %s4571_s2 = sld [smem:[#allocation11 + $0x681]] }
 0x341   : > { %s6383_s5 = sld [smem:[#allocation91_spill]]  ;;  %v1025_v47 = vstv %s6379_s12  ;;  %v968_v27 = vadd.f32 %v967_v11, %v964_v19 }
 0x342   : > { %6380 = sst [smem:[#allocation30_spill]] %s4566_s19  ;;  %v1026_v63 = vmul.f32 %v1025_v47, %v3844_v1 }
 0x343   : > { %s6384_s23 = sld [smem:[#allocation70_spill]]  ;;  %v1084_v55 = vstv %s6381_s8 }
 0x344   : > { %s4577_s15 = sld [smem:[#allocation11 + $0x701]]  ;;  %v1085_v36 = vmul.f32 %v1084_v55, %v3802_v33  ;;  %v1027_v35 = vadd.f32 %v1026_v63, %v1023_v61 }
 0x345   : > { %s6386_s7 = sld [smem:[#allocation83_spill]] }
 0x346   : > { %6382 = sst [smem:[#allocation26_spill]] %s4571_s2  ;;  %v1086_v56 = vadd.f32 %v1085_v36, %v1082_v8 }
 0x347   : > { %s4581_s9 = sld [smem:[#allocation11 + $0x781]]  ;;  %v970_v39 = vstv %s6383_s5 }
 0x348   : > { %s6388_s18 = sld [smem:[#allocation130_spill]]  ;;  %v971_v20 = vmul.f32 %v970_v39, %v3899_v50 }
 0x349   : > { %s4586_s30 = sld [smem:[#allocation13 + $0x1]]  ;;  %v974_v5 = vstv %s6384_s23 }
 0x34a   : > { %6385 = sst [smem:[#allocation149_spill]] %s4577_s15  ;;  %v975_v25 = vmul.f32 %v974_v5, %v3912_v60 }
 0x34b   : > { %s6390_s12 = sld [smem:[#allocation126_spill]]  ;;  %v1029_v2 = vstv %s6386_s7 }
 0x34c   : > { %s4591_s15 = sld [smem:[#allocation11 + $0x2]]  ;;  %v1030_v3 = vmul.f32 %v1029_v2, %v3859_v13  ;;  %v972_v2 = vadd.f32 %v971_v20, %v968_v27 }
 0x34d   : > { %6387 = sst [smem:[#allocation37_spill]] %s4581_s9 }
 0x34e   : > { %s6391_s9 = sld [smem:[#allocation125_spill]]  ;;  %v1186_v17 = vstv %s6388_s18  ;;  %v1031_v38 = vadd.f32 %v1030_v3, %v1027_v35 }
 0x34f   : > { %6389 = sst [smem:[#allocation77_spill]] %s4586_s30  ;;  %v1187_v42 = vmul.f32 %v1186_v17, %v3673_v16 }
 0x350   : > { %s4596_s2 = sld [smem:[#allocation11 + $0x82]] }
 0x351   : > { %s6392_s8 = sld [smem:[#allocation112_spill]]  ;;  %v1088_v62 = vstv %s6390_s12  ;;  %v1188_v5 = vadd.f32 %v1187_v42, %v1184_v31  ;;  %v976_v31 = vadd.f32 %v975_v25, %v972_v2 }
 0x352   : > { %s4601_s5 = sld [smem:[#allocation11 + $0x102]]  ;;  %v1089_v24 = vmul.f32 %v1088_v62, %v3816_v43  ;;  %v1257_v62 = vstv %s4348_s14 }
 0x353   : > { %s6393_s23 = sld [smem:[#allocation100_spill]] }
 0x354   : > { %s4607_s30 = sld [smem:[#allocation11 + $0x182]]  ;;  %v1033_v22 = vstv %s6391_s9  ;;  %v1090_v59 = vadd.f32 %v1089_v24, %v1086_v56  ;;  %v1258_v56 = vmul.f32 %v1257_v62, %v3685_v21  ;;  %v912_v24 = vadd.f32 %v911_v28, %v4603_v18 }
 0x355   : > { %s6395_s16 = sld [smem:[#allocation71_spill]]  ;;  %v1034_v46 = vmul.f32 %v1033_v22, %v3878_v32 }
 0x356   : > { %s6396_s7 = sld [smem:[#allocation111_spill]] }
 0x357   : > { %s4612_s27 = sld [smem:[#allocation11 + $0x202]]  ;;  %v1139_v57 = vstv %s6392_s8 }
 0x358   : > { %s6398_s18 = sld [smem:[#allocation106_spill]]  ;;  %v1140_v48 = vmul.f32 %v1139_v57, %v3751_v58 }
 0x359   : > { %s6399_s12 = sld [smem:[#allocation135_spill]]  ;;  %v1190_v45 = vstv %s6393_s23 }
 0x35a   : > { %6394 = sst [smem:[#allocation42_spill]] %s4607_s30  ;;  %v1191_v11 = vmul.f32 %v1190_v45, %v3685_v21  ;;  %v1141_v17 = vadd.f32 %v1140_v48, %v1137_v34 }
 0x35b   : > { %s4618_s19 = sld [smem:[#allocation11 + $0x282]]  ;;  %v978_v0 = vstv %s6395_s16 }
 0x35c   : > { %s6401_s4 = sld [smem:[#allocation84_spill]]  ;;  %v1092_v47 = vstv %s6396_s7  ;;  %v1192_v52 = vadd.f32 %v1191_v11, %v1188_v5  ;;  %v4686_v11 = vmax.f32 %v912_v24, 0.0 }
 0x35d   : > { %6397 = sst [smem:[#allocation27_spill]] %s4612_s27  ;;  %v1093_v61 = vmul.f32 %v1092_v47, %v3844_v1 }
 0x35e   : > { %s6402_s9 = sld [smem:[#allocation96_spill]]  ;;  %v1250_v51 = vstv %s6398_s18 }
 0x35f   : > { %s4622_s21 = sld [smem:[#allocation11 + $0x302]]  ;;  %v1253_v4 = vstv %s6399_s12  ;;  %v1251_v8 = vmul.f32 %v1250_v51, %v3671_v15  ;;  %v1094_v30 = vadd.f32 %v1093_v61, %v1090_v59  ;;  %v1265_v61 = vstv %s4358_s28 }
 0x360   : > { %s6403_s8 = sld [smem:[#allocation101_spill]]  ;;  %v1254_v36 = vmul.f32 %v1253_v4, %v3673_v16  ;;  %v1035_v16 = vadd.f32 %v1034_v46, %v1031_v38  ;;  %v1261_v46 = vstv %s4353_s3  ;;  %v979_v4 = vadd.f32 %v978_v0, %v976_v31 }
 0x361   : > { %6400 = sst [smem:[#allocation46_spill]] %s4618_s19  ;;  %v1262_v5 = vmul.f32 %v1261_v46, %v3701_v29  ;;  %v1320_v31 = vstv %s4429_s25 }
 0x362   : > { %s4627_s27 = sld [smem:[#allocation11 + $0x382]]  ;;  %v1037_v55 = vstv %s6401_s4  ;;  %v1255_v35 = vadd.f32 %v1254_v36, %v1251_v8 }
 0x363   : > { %s6405_s19 = sld [smem:[#allocation95_spill]]  ;;  %v1038_v40 = vmul.f32 %v1037_v55, %v3899_v50 }
 0x364   : > { %s4632_s30 = sld [smem:[#allocation11 + $0x402]]  ;;  %v1143_v39 = vstv %s6402_s9 }
 0x365   : > { %s4637_s23 = sld [smem:[#allocation11 + $0x482]]  ;;  %v1144_v19 = vmul.f32 %v1143_v39, %v3768_v6  ;;  %v1039_v21 = vadd.f32 %v1038_v40, %v1035_v16  ;;  %v1259_v39 = vadd.f32 %v1258_v56, %v1255_v35  ;;  %v1269_v16 = vstv %s4363_s13 }
 0x366   : > { %s6407_s16 = sld [smem:[#allocation85_spill]]  ;;  %v1194_v63 = vstv %s6403_s8  ;;  %v1270_v46 = vmul.f32 %v1269_v16, %v3736_v49  ;;  %v1387_v16 = vstv %s4513_s29 }
 0x367   : > { %s6408_s7 = sld [smem:[#allocation128_spill]]  ;;  %v1195_v15 = vmul.f32 %v1194_v63, %v3701_v29  ;;  %v1145_v45 = vadd.f32 %v1144_v19, %v1141_v17  ;;  %v4701_v17 = vmax.f32 %v979_v4, 0.0  ;;  %v1263_v62 = vadd.f32 %v1262_v5, %v1259_v39 }
 0x368   : > { %6404 = sst [smem:[#allocation44_spill]] %s4627_s27 }
 0x369   : > { %s4641_s27 = sld [smem:[#allocation11 + $0x502]]  ;;  %v1096_v7 = vstv %s6405_s19  ;;  %v1196_v34 = vadd.f32 %v1195_v15, %v1192_v52 }
 0x36a   : > { %s6410_s4 = sld [smem:[#allocation115_spill]]  ;;  %v1097_v3 = vmul.f32 %v1096_v7, %v3859_v13 }
 0x36b   : > { %6406 = sst [smem:[#allocation58_spill]] %s4637_s23 }
 0x36c   : > { %s4646_s18 = sld [smem:[#allocation11 + $0x582]]  ;;  %v1041_v22 = vstv %s6407_s16  ;;  %v1098_v28 = vadd.f32 %v1097_v3, %v1094_v30 }
 0x36d   : > { %s6412_s12 = sld [smem:[#allocation87_spill]]  ;;  %v1147_v20 = vstv %s6408_s7  ;;  %v1042_v47 = vmul.f32 %v1041_v22, %v3912_v60  ;;  %v1266_v22 = vmul.f32 %v1265_v61, %v3716_v37 }
 0x36e   : > { %s4651_s9 = sld [smem:[#allocation11 + $0x602]]  ;;  %v1148_v27 = vmul.f32 %v1147_v20, %v3789_v23 }
 0x36f   : > { %6409 = sst [smem:[#allocation49_spill]] %s4641_s27  ;;  %v1043_v29 = vadd.f32 %v1042_v47, %v1039_v21 }
 0x370   : > { %s4656_s19 = sld [smem:[#allocation11 + $0x682]]  ;;  %v1198_v57 = vstv %s6410_s4  ;;  %v1149_v38 = vadd.f32 %v1148_v27, %v1145_v45  ;;  %v1267_v27 = vadd.f32 %v1266_v22, %v1263_v62 }
 0x371   : > { %s6415_s8 = sld [smem:[#allocation89_spill]]  ;;  %v1199_v48 = vmul.f32 %v1198_v57, %v3716_v37  ;;  %v1317_v57 = vstv %s4424_s0 }
 0x372   : > { %6411 = sst [smem:[#allocation52_spill]] %s4646_s18 }
 0x373   : > { %s4660_s18 = sld [smem:[#allocation11 + $0x702]]  ;;  %v1100_v42 = vstv %s6412_s12  ;;  %v1200_v0 = vadd.f32 %v1199_v48, %v1196_v34  ;;  %v1318_v34 = vmul.f32 %v1317_v57, %v3995_v12  ;;  %v1321_v48 = vmul.f32 %v1320_v31, %v4084_v41 }
 0x374   : > { %6413 = sst [smem:[#allocation60_spill]] %s4651_s9  ;;  %v1101_v18 = vmul.f32 %v1100_v42, %v3878_v32 }
 0x375   : > { %s6417_s14 = sld [smem:[#allocation131_spill]] }
 0x376   : > { %6414 = sst [smem:[#allocation63_spill]] %s4656_s19  ;;  %v1102_v8 = vadd.f32 %v1101_v18, %v1098_v28 }
 0x377   : > { %s4664_s16 = sld [smem:[#allocation11 + $0x782]]  ;;  %v1151_v25 = vstv %s6415_s8 }
 0x378   : > { %s6419_s7 = sld [smem:[#allocation88_spill]]  ;;  %v1152_v59 = vmul.f32 %v1151_v25, %v3802_v33 }
 0x379   : > { %6416 = sst [smem:[#allocation32_spill]] %s4660_s18 }
 0x37a   : > { %s4671_s19 = sld [smem:[#allocation13 + $0x2]]  ;;  %v1153_v20 = vadd.f32 %v1152_v59, %v1149_v38  ;;  %v1271_v59 = vadd.f32 %v1270_v46, %v1267_v27  ;;  %v1388_v27 = vmul.f32 %v1387_v16, %v4084_v41 }
 0x37b   : > { %s4676_s4 = sld [smem:[#allocation11 + $0x3]]  ;;  %v1202_v51 = vstv %s6417_s14 }
 0x37c   : > { %s6421_s12 = sld [smem:[#allocation110_spill]]  ;;  %v1203_v7 = vmul.f32 %v1202_v51, %v3736_v49  ;;  %v1324_v49 = vstv %s4434_s10 }
 0x37d   : > { %6418 = sst [smem:[#allocation66_spill]] %s4664_s16 }
 0x37e   : > { %s6422_s26 = sld [smem:[#allocation113_spill]]  ;;  %v1104_v55 = vstv %s6419_s7  ;;  %v1204_v30 = vadd.f32 %v1203_v7, %v1200_v0  ;;  %v1322_v0 = vadd.f32 %v1321_v48, %v1318_v34  ;;  %v1325_v7 = vmul.f32 %v1324_v49, %v4326_v53 }
 0x37f   : > { %s4680_s16 = sld [smem:[#allocation11 + $0x83]]  ;;  %v1105_v36 = vmul.f32 %v1104_v55, %v3899_v50  ;;  %v1391_v34 = vstv %s4518_s17 }
 0x380   : > { %6420 = sst [smem:[#allocation33_spill]] %s4671_s19  ;;  %v1326_v57 = vadd.f32 %v1325_v7, %v1322_v0  ;;  %v1395_v0 = vstv %s4522_s6 }
 0x381   : > { %s6423_s3 = sld [smem:[#allocation102_spill]]  ;;  %v1106_v42 = vadd.f32 %v1105_v36, %v1102_v8 }
 0x382   : > { %s4684_s8 = sld [smem:[#allocation11 + $0x103]]  ;;  %v1045_v63 = vstv %s6421_s12 }
 0x383   : > { %s6424_s19 = sld [smem:[#allocation127_spill]]  ;;  %v1046_v37 = vadd.f32 %v1045_v63, %v1043_v29 }
 0x384   : > { %s4690_s18 = sld [smem:[#allocation11 + $0x183]]  ;;  %v1155_v2 = vstv %s6422_s26 }
 0x385   : > { %s6425_s14 = sld [smem:[#allocation97_spill]]  ;;  %v1156_v52 = vmul.f32 %v1155_v2, %v3816_v43  ;;  %v4736_v51 = vmax.f32 %v1046_v37, 0.0 }
 0x386   : > { %s4695_s7 = sld [smem:[#allocation11 + $0x203]] }
 0x387   : > { %v1206_v40 = vstv %s6423_s3  ;;  %s4699_s9 = sld [smem:[#allocation11 + $0x283]]  ;;  %v1157_v21 = vadd.f32 %v1156_v52, %v1153_v20 }
 0x388   : > { %s6426_s28 = sld [smem:[#allocation116_spill]]  ;;  %v1207_v3 = vmul.f32 %v1206_v40, %v3751_v58  ;;  %v1328_v40 = vstv %s4439_s20 }
 0x389   : > { %v1108_v19 = vstv %s6424_s19  ;;  %s4705_s12 = sld [smem:[#allocation11 + $0x303]]  ;;  %v1329_v31 = vmul.f32 %v1328_v40, %v4328_v54 }
 0x38a   : > { %s6428_s26 = sld [smem:[#allocation140_spill]]  ;;  %v1109_v35 = vmul.f32 %v1108_v19, %v3912_v60  ;;  %v1208_v28 = vadd.f32 %v1207_v3, %v1204_v30 }
 0x38b   : > { %s6429_s27 = sld [smem:[#allocation98_spill]]  ;;  %v1159_v15 = vstv %s6425_s14 }
 0x38c   : > { %s4710_s23 = sld [smem:[#allocation11 + $0x383]]  ;;  %v1160_v47 = vmul.f32 %v1159_v15, %v3844_v1  ;;  %v1110_v4 = vadd.f32 %v1109_v35, %v1106_v42  ;;  %v1384_v15 = vstv %s4508_s22 }
 0x38d   : > { %s6430_s3 = sld [smem:[#allocation120_spill]] }
 0x38e   : > { %s4715_s19 = sld [smem:[#allocation11 + $0x403]]  ;;  %v1210_v56 = vstv %s6426_s28  ;;  %v1161_v29 = vadd.f32 %v1160_v47, %v1157_v21 }
 0x38f   : > { %6427 = sst [smem:[#allocation152_spill]] %s4705_s12  ;;  %v1211_v18 = vmul.f32 %v1210_v56, %v3768_v6 }
 0x390   : > { %s4719_s12 = sld [smem:[#allocation11 + $0x483]]  ;;  %v1112_v24 = vstv %s6428_s26 }
 0x391   : > { %v1163_v45 = vstv %s6429_s27  ;;  %s6432_s13 = sld [smem:[#allocation132_spill]]  ;;  %v1212_v8 = vadd.f32 %v1211_v18, %v1208_v28  ;;  %v1330_v28 = vadd.f32 %v1329_v31, %v1326_v57  ;;  %v1399_v31 = vstv %s4527_s11 }
 0x392   : > { %s4724_s14 = sld [smem:[#allocation11 + $0x503]]  ;;  %v1164_v55 = vmul.f32 %v1163_v45, %v3859_v13  ;;  %v1385_v45 = vmul.f32 %v1384_v15, %v3995_v12  ;;  %v1458_v15 = vstv %s4601_s5 }
 0x393   : > { %s6434_s0 = sld [smem:[#allocation129_spill]]  ;;  %v1273_v25 = vstv %s6430_s3 }
 0x394   : > { %s6435_s25 = sld [smem:[#allocation99_spill]]  ;;  %v1274_v61 = vmul.f32 %v1273_v25, %v3751_v58  ;;  %v1113_v58 = vadd.f32 %v1112_v24, %v1110_v4  ;;  %v1165_v37 = vadd.f32 %v1164_v55, %v1161_v29 }
 0x395   : > { %s4730_s28 = sld [smem:[#allocation11 + $0x583]] }
 0x396   : > { %6431 = sst [smem:[#allocation75_spill]] %s4719_s12  ;;  %v1275_v20 = vadd.f32 %v1274_v61, %v1271_v59  ;;  %v4783_v46 = vmax.f32 %v1113_v58, 0.0  ;;  %v1454_v59 = vstv %s4596_s2  ;;  %v1340_v58 = vstv %s4454_s1 }
 0x397   : > { %s6437_s12 = sld [smem:[#allocation141_spill]]  ;;  %v1214_v39 = vstv %s6432_s13 }
 0x398   : > { %6433 = sst [smem:[#allocation78_spill]] %s4724_s14  ;;  %v1215_v36 = vmul.f32 %v1214_v39, %v3789_v23  ;;  %v1336_v39 = vstv %s4449_s24 }
 0x399   : > { %s6438_s27 = sld [smem:[#allocation150_spill]]  ;;  %v1167_v5 = vstv %s6434_s0 }
 0x39a   : > { %s4734_s26 = sld [smem:[#allocation11 + $0x603]]  ;;  %v1171_v38 = vstv %s6435_s25  ;;  %v1168_v19 = vmul.f32 %v1167_v5, %v3878_v32  ;;  %v1216_v42 = vadd.f32 %v1215_v36, %v1212_v8  ;;  %v1392_v5 = vmul.f32 %v1391_v34, %v4326_v53 }
 0x39b   : > { %6436 = sst [smem:[#allocation47_spill]] %s4730_s28  ;;  %v1172_v62 = vmul.f32 %v1171_v38, %v3899_v50  ;;  %v1451_v38 = vstv %s4591_s15  ;;  %v1337_v36 = vmul.f32 %v1336_v39, %v4344_v44 }
 0x39c   : > { %s4740_s3 = sld [smem:[#allocation11 + $0x683]]  ;;  %v1169_v49 = vadd.f32 %v1168_v19, %v1165_v37  ;;  %v1452_v19 = vmul.f32 %v1451_v38, %v3995_v12 }
 0x39d   : > { %s6441_s28 = sld [smem:[#allocation103_spill]]  ;;  %v1175_v63 = vstv %s6437_s12 }
 0x39e   : > { %s4745_s14 = sld [smem:[#allocation11 + $0x703]]  ;;  %v4767_v30 = vmul.f32 %v1175_v63, %v3912_v60 }
 0x39f   : > { %v1277_v2 = vstv %s6438_s27  ;;  %s4750_s10 = sld [smem:[#allocation11 + $0x783]] }
 0x3a0   : > { %6439 = sst [smem:[#allocation38_spill]] %s4734_s26  ;;  %v1278_v52 = vmul.f32 %v1277_v2, %v3768_v6 }
 0x3a1   : > { %s6444_s13 = sld [smem:[#allocation136_spill]] }
 0x3a2   : > { %6440 = sst [smem:[#allocation81_spill]] %s4740_s3  ;;  %v1279_v47 = vadd.f32 %v1278_v52, %v1275_v20  ;;  %v1396_v52 = vmul.f32 %v1395_v0, %v4328_v54 }
 0x3a3   : > { %s4754_s0 = sld [smem:[#allocation13 + $0x3]]  ;;  %v1218_v22 = vstv %s6441_s28 }
 0x3a4   : > { %6442 = sst [smem:[#allocation61_spill]] %s4745_s14  ;;  %v1219_v6 = vmul.f32 %v1218_v22, %v3802_v33  ;;  %v1173_v22 = vadd.f32 %v1172_v62, %v1169_v49 }
 0x3a5   : > { %6443 = sst [smem:[#allocation53_spill]] %s4750_s10 }
 0x3a6   : > { %s6446_s12 = sld [smem:[#allocation25_spill]]  ;;  %v1220_v4 = vadd.f32 %v1219_v6, %v1216_v42  ;;  %v1341_v6 = vmul.f32 %v1340_v58, %v4406_v14 }
 0x3a7   : > { %s4759_s25 = sld [smem:[#allocation11 + $0x4]]  ;;  %v1281_v3 = vstv %s6444_s13 }
 0x3a8   : > { %s6447_s27 = sld [smem:[#allocation114_spill]]  ;;  %v1282_v25 = vmul.f32 %v1281_v3, %v3789_v23  ;;  %v1389_v23 = vadd.f32 %v1388_v27, %v1385_v45 }
 0x3a9   : > { %6445 = sst [smem:[#allocation39_spill]] %s4754_s0 }
 0x3aa   : > { %s6448_s10 = sld [smem:[#allocation117_spill]]  ;;  %v1283_v63 = vadd.f32 %v1282_v25, %v1279_v47  ;;  %v1393_v20 = vadd.f32 %v1392_v5, %v1389_v23  ;;  %v1400_v25 = vmul.f32 %v1399_v31, %v4333_v26 }
 0x3ab   : > { %s4764_s14 = sld [smem:[#allocation11 + $0x84]] }
 0x3ac   : > { %s4771_s20 = sld [smem:[#allocation11 + $0x104]]  ;;  %v1332_v35 = vstv %s6446_s12  ;;  %v1397_v47 = vadd.f32 %v1396_v52, %v1393_v20 }
 0x3ad   : > { %s6449_s28 = sld [smem:[#allocation133_spill]]  ;;  %v1333_v18 = vmul.f32 %v1332_v35, %v4333_v26 }
 0x3ae   : > { %s6450_s0 = sld [smem:[#allocation121_spill]]  ;;  %v1179_v56 = vstv %s6447_s27 }
 0x3af   : > { %s4775_s22 = sld [smem:[#allocation11 + $0x184]]  ;;  %v1334_v8 = vadd.f32 %v1333_v18, %v1330_v28 }
 0x3b0   : > { %v1222_v24 = vstv %s6448_s10  ;;  %s4781_s29 = sld [smem:[#allocation11 + $0x204]] }
 0x3b1   : > { %s4787_s13 = sld [smem:[#allocation11 + $0x284]]  ;;  %v1223_v55 = vmul.f32 %v1222_v24, %v3816_v43  ;;  %v1338_v62 = vadd.f32 %v1337_v36, %v1334_v8 }
 0x3b2   : > { %s4792_s10 = sld [smem:[#allocation11 + $0x304]] }
 0x3b3   : > { %v1226_v48 = vstv %s6449_s28  ;;  %s6452_s12 = sld [smem:[#allocation104_spill]]  ;;  %v1224_v40 = vadd.f32 %v1223_v55, %v1220_v4  ;;  %v1342_v55 = vadd.f32 %v1341_v6, %v1338_v62  ;;  %v1518_v6 = vstv %s4676_s4 }
 0x3b4   : > { %v1285_v21 = vstv %s6450_s0  ;;  %s6453_s3 = sld [smem:[#allocation143_spill]]  ;;  %v1227_v61 = vmul.f32 %v1226_v48, %v3844_v1 }
 0x3b5   : > { %s4796_s26 = sld [smem:[#allocation11 + $0x384]]  ;;  %v1286_v2 = vmul.f32 %v1285_v21, %v3802_v33  ;;  %v1455_v33 = vmul.f32 %v1454_v59, %v4084_v41 }
 0x3b6   : > { %s4801_s17 = sld [smem:[#allocation11 + $0x404]]  ;;  %v1228_v35 = vadd.f32 %v1227_v61, %v1224_v40  ;;  %v1401_v61 = vadd.f32 %v1400_v25, %v1397_v47 }
 0x3b7   : > { %s4806_s0 = sld [smem:[#allocation11 + $0x484]]  ;;  %v1287_v3 = vadd.f32 %v1286_v2, %v1283_v63  ;;  %v1456_v45 = vadd.f32 %v1455_v33, %v1452_v19 }
 0x3b8   : > { %6451 = sst [smem:[#allocation107_spill]] %s4792_s10 }
 0x3b9   : > { %s6457_s24 = sld [smem:[#allocation105_spill]]  ;;  %v1230_v7 = vstv %s6452_s12 }
 0x3ba   : > { %v1289_v29 = vstv %s6453_s3  ;;  %s4811_s15 = sld [smem:[#allocation11 + $0x504]]  ;;  %v1231_v37 = vmul.f32 %v1230_v7, %v3859_v13 }
 0x3bb   : > { %6454 = sst [smem:[#allocation34_spill]] %s4796_s26  ;;  %v1290_v57 = vmul.f32 %v1289_v29, %v3816_v43  ;;  %v1459_v43 = vmul.f32 %v1458_v15, %v4326_v53 }
 0x3bc   : > { %6455 = sst [smem:[#allocation35_spill]] %s4801_s17  ;;  %v1232_v23 = vadd.f32 %v1231_v37, %v1228_v35  ;;  %v1521_v35 = vstv %s4680_s16 }
 0x3bd   : > { %6456 = sst [smem:[#allocation67_spill]] %s4806_s0  ;;  %v1291_v21 = vadd.f32 %v1290_v57, %v1287_v3  ;;  %v1460_v38 = vadd.f32 %v1459_v43, %v1456_v45 }
 0x3be   : > { %s6459_s2 = sld [smem:[#allocation29_spill]] }
 0x3bf   : > { %s4816_s28 = sld [smem:[#allocation11 + $0x584]]  ;;  %v1234_v16 = vstv %s6457_s24 }
 0x3c0   : > { %6458 = sst [smem:[#allocation50_spill]] %s4811_s15  ;;  %v1235_v27 = vmul.f32 %v1234_v16, %v3878_v32 }
 0x3c1   : > { %s6461_s6 = sld [smem:[#allocation138_spill]] }
 0x3c2   : > { %s4820_s3 = sld [smem:[#allocation11 + $0x604]]  ;;  %v1236_v19 = vadd.f32 %v1235_v27, %v1232_v23 }
 0x3c3   : > { %s6463_s12 = sld [smem:[#allocation42_spill]] }
 0x3c4   : > { %s4825_s1 = sld [smem:[#allocation11 + $0x684]]  ;;  %v1293_v42 = vstv %s6459_s2 }
 0x3c5   : > { %6460 = sst [smem:[#allocation108_spill]] %s4816_s28  ;;  %v1294_v28 = vmul.f32 %v1293_v42, %v3844_v1  ;;  %v1177_v1 = vadd.f32 %v4767_v30, %v1173_v22 }
 0x3c6   : > { %s6465_s15 = sld [smem:[#allocation118_spill]] }
 0x3c7   : > { %s6466_s28 = sld [smem:[#allocation147_spill]]  ;;  %v1344_v24 = vstv %s6461_s6  ;;  %v1295_v7 = vadd.f32 %v1294_v28, %v1291_v21  ;;  %v1519_v28 = vmul.f32 %v1518_v6, %v3995_v12 }
 0x3c8   : > { %6462 = sst [smem:[#allocation79_spill]] %s4820_s3  ;;  %v1345_v39 = vmul.f32 %v1344_v24, %v4504_v10 }
 0x3c9   : > { %s4830_s0 = sld [smem:[#allocation11 + $0x704]]  ;;  %v1462_v34 = vstv %s6463_s12 }
 0x3ca   : > { %6464 = sst [smem:[#allocation64_spill]] %s4825_s1  ;;  %v1463_v59 = vmul.f32 %v1462_v34, %v4328_v54  ;;  %v1346_v40 = vadd.f32 %v1345_v39, %v1342_v55  ;;  %v1474_v34 = vstv %s4622_s21  ;;  %v1525_v55 = vstv %s4684_s8 }
 0x3cb   : > { %s6468_s5 = sld [smem:[#allocation134_spill]]  ;;  %v1180_v39 = vadd.f32 %v1179_v56, %v1177_v1  ;;  %v1526_v1 = vmul.f32 %v1525_v55, %v4326_v53 }
 0x3cc   : > { %s6469_s24 = sld [smem:[#allocation151_spill]]  ;;  %v1238_v48 = vstv %s6465_s15  ;;  %v1464_v22 = vadd.f32 %v1463_v59, %v1460_v38  ;;  %v1475_v38 = vmul.f32 %v1474_v34, %v4406_v14 }
 0x3cd   : > { %s4834_s11 = sld [smem:[#allocation11 + $0x784]]  ;;  %v1403_v18 = vstv %s6466_s28  ;;  %v1239_v0 = vmul.f32 %v1238_v48, %v3899_v50 }
 0x3ce   : > { %s6471_s1 = sld [smem:[#allocation145_spill]]  ;;  %v1404_v63 = vmul.f32 %v1403_v18, %v4344_v44  ;;  %v1522_v18 = vmul.f32 %v1521_v35, %v4084_v41 }
 0x3cf   : > { %6467 = sst [smem:[#allocation92_spill]] %s4830_s0  ;;  %v1240_v24 = vadd.f32 %v1239_v0, %v1236_v19  ;;  %v4931_v19 = vmax.f32 %v1180_v39, 0.0 }
 0x3d0   : > { %s4839_s2 = sld [smem:[#allocation13 + $0x4]]  ;;  %v1405_v52 = vadd.f32 %v1404_v63, %v1401_v61  ;;  %v1523_v56 = vadd.f32 %v1522_v18, %v1519_v28  ;;  %v1537_v28 = vstv %s4699_s9 }
 0x3d1   : > { %s6473_s0 = sld [smem:[#allocation27_spill]]  ;;  %v1242_v49 = vstv %s6468_s5 }
 0x3d2   : > { %s4844_s6 = sld [smem:[#allocation11 + $0x5]]  ;;  %v1297_v4 = vstv %s6469_s24  ;;  %v1243_v36 = vmul.f32 %v1242_v49, %v3912_v60 }
 0x3d3   : > { %6470 = sst [smem:[#allocation48_spill]] %s4834_s11  ;;  %v1298_v29 = vmul.f32 %v1297_v4, %v3859_v13 }
 0x3d4   : > { %s6474_s11 = sld [smem:[#allocation74_spill]]  ;;  %v1348_v5 = vstv %s6471_s1  ;;  %v1244_v59 = vadd.f32 %v1243_v36, %v1240_v24 }
 0x3d5   : > { %s4849_s3 = sld [smem:[#allocation11 + $0x85]]  ;;  %v1349_v58 = vmul.f32 %v1348_v5, %v4573_v9  ;;  %v1299_v3 = vadd.f32 %v1298_v29, %v1295_v7 }
 0x3d6   : > { %6472 = sst [smem:[#allocation54_spill]] %s4839_s2 }
 0x3d7   : > { %s6475_s12 = sld [smem:[#allocation137_spill]]  ;;  %v1466_v2 = vstv %s6473_s0  ;;  %v1350_v42 = vadd.f32 %v1349_v58, %v1346_v40 }
 0x3d8   : > { %s4853_s15 = sld [smem:[#allocation11 + $0x105]]  ;;  %v1467_v13 = vmul.f32 %v1466_v2, %v4333_v26 }
 0x3d9   : > { %s6476_s28 = sld [smem:[#allocation45_spill]] }
 0x3da   : > { %s4858_s5 = sld [smem:[#allocation11 + $0x185]]  ;;  %v1407_v8 = vstv %s6474_s11  ;;  %v1468_v43 = vadd.f32 %v1467_v13, %v1464_v22  ;;  %v1482_v13 = vstv %s4632_s30 }
 0x3db   : > { %s6477_s24 = sld [smem:[#allocation119_spill]]  ;;  %v1408_v15 = vmul.f32 %v1407_v8, %v4406_v14 }
 0x3dc   : > { %s6478_s1 = sld [smem:[#allocation46_spill]] }
 0x3dd   : > { %s4863_s2 = sld [smem:[#allocation11 + $0x205]]  ;;  %v1301_v30 = vstv %s6475_s12  ;;  %v1409_v47 = vadd.f32 %v1408_v15, %v1405_v52 }
 0x3de   : > { %s6480_s17 = sld [smem:[#allocation122_spill]]  ;;  %v1302_v57 = vmul.f32 %v1301_v30, %v3878_v32  ;;  %v1529_v30 = vstv %s4690_s18 }
 0x3df   : > { %s6481_s26 = sld [smem:[#allocation139_spill]]  ;;  %v1352_v33 = vstv %s6476_s28 }
 0x3e0   : > { %s4868_s0 = sld [smem:[#allocation11 + $0x285]]  ;;  %v1353_v62 = vmul.f32 %v1352_v33, %v4686_v11  ;;  %v1303_v49 = vadd.f32 %v1302_v57, %v1299_v3  ;;  %v1530_v3 = vmul.f32 %v1529_v30, %v4328_v54 }
 0x3e1   : > { %s4872_s11 = sld [smem:[#allocation11 + $0x305]]  ;;  %v1246_v20 = vstv %s6477_s24 }
 0x3e2   : > { %v1470_v16 = vstv %s6478_s1  ;;  %s4877_s12 = sld [smem:[#allocation11 + $0x385]]  ;;  %v1354_v4 = vadd.f32 %v1353_v62, %v1350_v42  ;;  %v1247_v52 = vadd.f32 %v1246_v20, %v1244_v59  ;;  %v1533_v42 = vstv %s4695_s7 }
 0x3e3   : > { %6479 = sst [smem:[#allocation76_spill]] %s4863_s2  ;;  %v1471_v32 = vmul.f32 %v1470_v16, %v4344_v44  ;;  %v1527_v16 = vadd.f32 %v1526_v1, %v1523_v56  ;;  %v1483_v20 = vmul.f32 %v1482_v13, %v4573_v9  ;;  %v1588_v13 = vstv %s4764_s14 }
 0x3e4   : > { %s6484_s2 = sld [smem:[#allocation43_spill]]  ;;  %v1305_v31 = vstv %s6480_s17 }
 0x3e5   : > { %v1411_v37 = vstv %s6481_s26  ;;  %s4882_s28 = sld [smem:[#allocation11 + $0x405]]  ;;  %v1306_v27 = vmul.f32 %v1305_v31, %v3899_v50  ;;  %v1472_v5 = vadd.f32 %v1471_v32, %v1468_v43  ;;  %v4956_v32 = vmax.f32 %v1247_v52, 0.0 }
 0x3e6   : > { %6482 = sst [smem:[#allocation41_spill]] %s4868_s0  ;;  %v1412_v25 = vmul.f32 %v1411_v37, %v4504_v10 }
 0x3e7   : > { %6483 = sst [smem:[#allocation72_spill]] %s4872_s11  ;;  %v1307_v29 = vadd.f32 %v1306_v27, %v1303_v49  ;;  %v1476_v58 = vadd.f32 %v1475_v38, %v1472_v5  ;;  %v1538_v38 = vmul.f32 %v1537_v28, %v4344_v44 }
 0x3e8   : > { %s6486_s0 = sld [smem:[#allocation144_spill]]  ;;  %v1413_v61 = vadd.f32 %v1412_v25, %v1409_v47  ;;  %v1531_v47 = vadd.f32 %v1530_v3, %v1527_v16  ;;  %v1534_v25 = vmul.f32 %v1533_v42, %v4333_v26 }
 0x3e9   : > { %s6487_s11 = sld [smem:[#allocation31_spill]] }
 0x3ea   : > { %s4887_s10 = sld [smem:[#allocation11 + $0x485]]  ;;  %v1356_v45 = vstv %s6484_s2  ;;  %v1535_v5 = vadd.f32 %v1534_v25, %v1531_v47 }
 0x3eb   : > { %6485 = sst [smem:[#allocation94_spill]] %s4882_s28  ;;  %v1357_v50 = vmul.f32 %v1356_v45, %v4701_v17 }
 0x3ec   : > { %s4891_s17 = sld [smem:[#allocation11 + $0x505]]  ;;  %v1539_v30 = vadd.f32 %v1538_v38, %v1535_v5  ;;  %v1652_v38 = vstv %s4844_s6 }
 0x3ed   : > { %s6490_s26 = sld [smem:[#allocation146_spill]]  ;;  %v1358_v8 = vadd.f32 %v1357_v50, %v1354_v4 }
 0x3ee   : > { %s4896_s4 = sld [smem:[#allocation11 + $0x585]]  ;;  %v1309_v48 = vstv %s6486_s0 }
 0x3ef   : > { %v1415_v21 = vstv %s6487_s11  ;;  %s6492_s16 = sld [smem:[#allocation44_spill]]  ;;  %v1310_v0 = vmul.f32 %v1309_v48, %v3912_v60 }
 0x3f0   : > { %6488 = sst [smem:[#allocation68_spill]] %s4887_s10  ;;  %v1416_v63 = vmul.f32 %v1415_v21, %v4573_v9 }
 0x3f1   : > { %s4902_s2 = sld [smem:[#allocation11 + $0x605]]  ;;  %v1311_v57 = vadd.f32 %v1310_v0, %v1307_v29 }
 0x3f2   : > { %6489 = sst [smem:[#allocation124_spill]] %s4891_s17  ;;  %v1417_v33 = vadd.f32 %v1416_v63, %v1413_v61 }
 0x3f3   : > { %s6494_s1 = sld [smem:[#allocation57_spill]]  ;;  %v1360_v23 = vstv %s6490_s26 }
 0x3f4   : > { %6491 = sst [smem:[#allocation40_spill]] %s4896_s4  ;;  %v1361_v36 = vmul.f32 %v1360_v23, %v4736_v51 }
 0x3f5   : > { %s4906_s17 = sld [smem:[#allocation11 + $0x685]]  ;;  %v1478_v2 = vstv %s6492_s16 }
 0x3f6   : > { %s4912_s21 = sld [smem:[#allocation11 + $0x705]]  ;;  %v1479_v60 = vmul.f32 %v1478_v2, %v4504_v10  ;;  %v1362_v31 = vadd.f32 %v1361_v36, %v1358_v8 }
 0x3f7   : > { %6493 = sst [smem:[#allocation69_spill]] %s4902_s2 }
 0x3f8   : > { %s6497_s0 = sld [smem:[#allocation62_spill]]  ;;  %v1480_v35 = vadd.f32 %v1479_v60, %v1476_v58  ;;  %v1545_v58 = vstv %s4710_s23 }
 0x3f9   : > { %s4916_s11 = sld [smem:[#allocation11 + $0x785]]  ;;  %v1419_v7 = vstv %s6494_s1 }
 0x3fa   : > { %s4921_s8 = sld [smem:[#allocation13 + $0x5]]  ;;  %v1420_v22 = vmul.f32 %v1419_v7, %v4686_v11  ;;  %v1484_v49 = vadd.f32 %v1483_v20, %v1480_v35  ;;  %v1589_v35 = vmul.f32 %v1588_v13, %v4084_v41  ;;  %v1659_v13 = vstv %s4853_s15 }
 0x3fb   : > { %6495 = sst [smem:[#allocation51_spill]] %s4906_s17 }
 0x3fc   : > { %6496 = sst [smem:[#allocation82_spill]] %s4912_s21  ;;  %v1421_v24 = vadd.f32 %v1420_v22, %v1417_v33  ;;  %v1585_v22 = vstv %s4759_s25 }
 0x3fd   : > { %s6500_s27 = sld [smem:[#allocation148_spill]] }
 0x3fe   : > { %s4925_s26 = sld [smem:[#allocation11 + $0x6]]  ;;  %v1364_v40 = vstv %s6497_s0 }
 0x3ff   : > { %6498 = sst [smem:[#allocation80_spill]] %s4916_s11  ;;  %v1365_v37 = vmul.f32 %v1364_v40, %v4783_v46 }
 0x400   : > { %6499 = sst [smem:[#allocation109_spill]] %s4921_s8 }
 0x401   : > { %s4929_s16 = sld [smem:[#allocation11 + $0x86]]  ;;  %v1366_v48 = vadd.f32 %v1365_v37, %v1362_v31  ;;  %v1546_v37 = vmul.f32 %v1545_v58, %v4504_v10 }
 0x402   : > { %s6501_s1 = sld [smem:[#allocation28_spill]] }
 0x403   : > { %s6502_s11 = sld [smem:[#allocation73_spill]]  ;;  %v1423_v15 = vstv %s6500_s27 }
 0x404   : > { %s4935_s8 = sld [smem:[#allocation11 + $0x106]]  ;;  %v1424_v45 = vmul.f32 %v1423_v15, %v4701_v17 }
 0x405   : > { %s6503_s18 = sld [smem:[#allocation58_spill]] }
 0x406   : > { %s4941_s0 = sld [smem:[#allocation11 + $0x186]]  ;;  %v1425_v50 = vadd.f32 %v1424_v45, %v1421_v24  ;;  %v1592_v24 = vstv %s4771_s20 }
 0x407   : > { %s6504_s21 = sld [smem:[#allocation36_spill]] }
 0x408   : > { %s4945_s17 = sld [smem:[#allocation11 + $0x206]]  ;;  %v1313_v62 = vstv %s6501_s1 }
 0x409   : > { %v1368_v6 = vstv %s6502_s11  ;;  %s6505_s30 = sld [smem:[#allocation123_spill]]  ;;  %v1314_v34 = vadd.f32 %v1313_v62, %v1311_v57  ;;  %v1549_v62 = vstv %s4715_s19 }
 0x40a   : > { %s4950_s24 = sld [smem:[#allocation11 + $0x286]]  ;;  %v1369_v21 = vmul.f32 %v1368_v6, %v4931_v19  ;;  %v1586_v6 = vmul.f32 %v1585_v22, %v3995_v12 }
 0x40b   : > { %v1486_v43 = vstv %s6503_s18  ;;  %s4954_s27 = sld [smem:[#allocation11 + $0x306]]  ;;  %v4978_v59 = vmax.f32 %v1314_v34, 0.0 }
 0x40c   : > { %s6506_s7 = sld [smem:[#allocation49_spill]]  ;;  %v1487_v4 = vmul.f32 %v1486_v43, %v4686_v11  ;;  %v1370_v61 = vadd.f32 %v1369_v21, %v1366_v48  ;;  %v1550_v21 = vmul.f32 %v1549_v62, %v4573_v9 }
 0x40d   : > { %v1427_v27 = vstv %s6504_s21  ;;  %s6507_s11 = sld [smem:[#allocation30_spill]] }
 0x40e   : > { %s4960_s1 = sld [smem:[#allocation11 + $0x386]]  ;;  %v1428_v55 = vmul.f32 %v1427_v27, %v4736_v51  ;;  %v1488_v7 = vadd.f32 %v1487_v4, %v1484_v49  ;;  %v1590_v49 = vadd.f32 %v1589_v35, %v1586_v6  ;;  %v1593_v4 = vmul.f32 %v1592_v24, %v4326_v53 }
 0x40f   : > { %s4964_s2 = sld [smem:[#allocation11 + $0x406]]  ;;  %v1372_v18 = vstv %s6505_s30  ;;  %v1604_v6 = vstv %s4787_s13 }
 0x410   : > { %s6509_s18 = sld [smem:[#allocation152_spill]]  ;;  %v1373_v63 = vmul.f32 %v1372_v18, %v4956_v32  ;;  %v1429_v1 = vadd.f32 %v1428_v55, %v1425_v50 }
 0x411   : > { %s6510_s4 = sld [smem:[#allocation59_spill]] }
 0x412   : > { %s4968_s21 = sld [smem:[#allocation11 + $0x486]]  ;;  %v1490_v39 = vstv %s6506_s7  ;;  %v1374_v60 = vadd.f32 %v1373_v63, %v1370_v61  ;;  %v1655_v61 = vstv %s4849_s3 }
 0x413   : > { %s4972_s10 = sld [smem:[#allocation11 + $0x506]]  ;;  %v1431_v23 = vstv %s6507_s11  ;;  %v1491_v56 = vmul.f32 %v1490_v39, %v4701_v17  ;;  %v1596_v39 = vstv %s4775_s22  ;;  %v1656_v58 = vmul.f32 %v1655_v61, %v4084_v41 }
 0x414   : > { %6508 = sst [smem:[#allocation65_spill]] %s4960_s1  ;;  %v1432_v29 = vmul.f32 %v1431_v23, %v4783_v46 }
 0x415   : > { %s6512_s1 = sld [smem:[#allocation26_spill]]  ;;  %v1492_v15 = vadd.f32 %v1491_v56, %v1488_v7 }
 0x416   : > { %s6513_s28 = sld [smem:[#allocation52_spill]]  ;;  %v1541_v2 = vstv %s6509_s18  ;;  %v1433_v3 = vadd.f32 %v1432_v29, %v1429_v1  ;;  %v1594_v29 = vadd.f32 %v1593_v4, %v1590_v49  ;;  %v1605_v49 = vmul.f32 %v1604_v6, %v4344_v44 }
 0x417   : > { %s4976_s9 = sld [smem:[#allocation11 + $0x586]]  ;;  %v1376_v0 = vstv %s6510_s4  ;;  %v1542_v40 = vmul.f32 %v1541_v2, %v4406_v14 }
 0x418   : > { %s4982_s30 = sld [smem:[#allocation11 + $0x606]]  ;;  %v1377_v33 = vmul.f32 %v1376_v0, %v4978_v59 }
 0x419   : > { %6511 = sst [smem:[#allocation55_spill]] %s4972_s10  ;;  %v1543_v42 = vadd.f32 %v1542_v40, %v1539_v30  ;;  %v1600_v30 = vstv %s4781_s29  ;;  %v1653_v40 = vmul.f32 %v1652_v38, %v3995_v12 }
 0x41a   : > { %s4986_s7 = sld [smem:[#allocation11 + $0x686]]  ;;  %v1378_v20 = vadd.f32 %v1377_v33, %v1374_v60 }
 0x41b   : > { %v1435_v8 = vstv %s6512_s1  ;;  %s6517_s11 = sld [smem:[#allocation149_spill]]  ;;  %v1547_v28 = vadd.f32 %v1546_v37, %v1543_v42  ;;  %v1601_v42 = vmul.f32 %v1600_v30, %v4333_v26  ;;  %v1657_v35 = vadd.f32 %v1656_v58, %v1653_v40 }
 0x41c   : > { %v1494_v36 = vstv %s6513_s28  ;;  %s6519_s10 = sld [smem:[#allocation60_spill]]  ;;  %v1436_v52 = vmul.f32 %v1435_v8, %v4931_v19  ;;  %v1597_v8 = vmul.f32 %v1596_v39, %v4328_v54 }
 0x41d   : > { %6514 = sst [smem:[#allocation90_spill]] %s4976_s9  ;;  %v1495_v16 = vmul.f32 %v1494_v36, %v4736_v51  ;;  %v1551_v56 = vadd.f32 %v1550_v21, %v1547_v28 }
 0x41e   : > { %6515 = sst [smem:[#allocation93_spill]] %s4982_s30  ;;  %v1437_v25 = vadd.f32 %v1436_v52, %v1433_v3  ;;  %v1722_v3 = vstv %s4929_s16  ;;  %v1598_v37 = vadd.f32 %v1597_v8, %v1594_v29 }
 0x41f   : > { %s4991_s9 = sld [smem:[#allocation11 + $0x706]]  ;;  %v1496_v27 = vadd.f32 %v1495_v16, %v1492_v15  ;;  %v1719_v16 = vstv %s4925_s26 }
 0x420   : > { %6516 = sst [smem:[#allocation86_spill]] %s4986_s7 }
 0x421   : > { %s4995_s4 = sld [smem:[#allocation11 + $0x786]]  ;;  %v1439_v57 = vstv %s6517_s11 }
 0x422   : > { %s5000_s18 = sld [smem:[#allocation13 + $0x6]]  ;;  %v1498_v31 = vstv %s6519_s10  ;;  %v1440_v34 = vmul.f32 %v1439_v57, %v4956_v32 }
 0x423   : > { %s6522_s28 = sld [smem:[#allocation56_spill]]  ;;  %v1499_v47 = vmul.f32 %v1498_v31, %v4783_v46 }
 0x424   : > { %s6523_s1 = sld [smem:[#allocation37_spill]]  ;;  %v1441_v63 = vadd.f32 %v1440_v34, %v1437_v25 }
 0x425   : > { %6518 = sst [smem:[#allocation91_spill]] %s4991_s9  ;;  %v1500_v23 = vadd.f32 %v1499_v47, %v1496_v27  ;;  %v1723_v27 = vmul.f32 %v1722_v3, %v4084_v41 }
 0x426   : > { %s5004_s9 = sld [smem:[#allocation11 + $0x7]] }
 0x427   : > { %6520 = sst [smem:[#allocation70_spill]] %s4995_s4 }
 0x428   : > { %6521 = sst [smem:[#allocation83_spill]] %s5000_s18 }
 0x429   : > { %s5009_s23 = sld [smem:[#allocation11 + $0x87]]  ;;  %v1380_v45 = vstv %s6522_s28 }
 0x42a   : > { %s6524_s14 = sld [smem:[#allocation63_spill]]  ;;  %v1443_v43 = vstv %s6523_s1  ;;  %v5033_v50 = vadd.f32 %v1380_v45, %v1378_v20  ;;  %v1660_v20 = vmul.f32 %v1659_v13, %v4326_v53  ;;  %v1663_v45 = vstv %s4858_s5 }
 0x42b   : > { %s6525_s25 = sld [smem:[#allocation75_spill]]  ;;  %v1444_v55 = vmul.f32 %v1443_v43, %v4978_v59  ;;  %v1720_v43 = vmul.f32 %v1719_v16, %v3995_v12 }
 0x42c   : > { %s5014_s18 = sld [smem:[#allocation11 + $0x107]]  ;;  %v1382_v36 = vmax.f32 %v5033_v50, 0.0  ;;  %v1661_v39 = vadd.f32 %v1660_v20, %v1657_v35 }
 0x42d   : > { %s5017_s4 = sld [smem:[#allocation11 + $0x187]]  ;;  %v1445_v52 = vadd.f32 %v1444_v55, %v1441_v63  ;;  %v1724_v61 = vadd.f32 %v1723_v27, %v1720_v43 }
 0x42e   : > { %s5022_s10 = sld [smem:[#allocation11 + $0x207]] }
 0x42f   : > { %s5027_s19 = sld [smem:[#allocation11 + $0x287]] }
 0x430   : > { %v1502_v48 = vstv %s6524_s14  ;;  %s6526_s20 = sld [smem:[#allocation77_spill]] }
 0x431   : > { %s6527_s11 = sld [smem:[#allocation32_spill]]  ;;  %v1553_v18 = vstv %s6525_s25  ;;  %v1503_v5 = vmul.f32 %v1502_v48, %v4931_v19  ;;  %v1726_v48 = vstv %s4935_s8 }
 0x432   : > { %s5031_s28 = sld [smem:[#allocation11 + $0x307]]  ;;  %v1554_v7 = vmul.f32 %v1553_v18, %v4686_v11  ;;  %v1602_v18 = vadd.f32 %v1601_v42, %v1598_v37  ;;  %v1727_v63 = vmul.f32 %v1726_v48, %v4326_v53 }
 0x433   : > { %s6528_s1 = sld [smem:[#allocation78_spill]]  ;;  %v1504_v60 = vadd.f32 %v1503_v5, %v1500_v23  ;;  %v1664_v23 = vmul.f32 %v1663_v45, %v4328_v54  ;;  %v1789_v45 = vstv %s5009_s23 }
 0x434   : > { %s5037_s14 = sld [smem:[#allocation11 + $0x387]]  ;;  %v1555_v57 = vadd.f32 %v1554_v7, %v1551_v56  ;;  %v1730_v56 = vstv %s4941_s0  ;;  %v1606_v8 = vadd.f32 %v1605_v49, %v1602_v18  ;;  %v1738_v18 = vstv %s4950_s24 }
 0x435   : > { %s5042_s25 = sld [smem:[#allocation11 + $0x407]] }
 0x436   : > { %v1447_v2 = vstv %s6526_s20  ;;  %s6529_s7 = sld [smem:[#allocation66_spill]] }
 0x437   : > { %v1506_v0 = vstv %s6527_s11  ;;  %s5047_s30 = sld [smem:[#allocation11 + $0x487]]  ;;  %v5083_v47 = vadd.f32 %v1447_v2, %v1445_v52  ;;  %v1728_v52 = vadd.f32 %v1727_v63, %v1724_v61  ;;  %v1793_v61 = vstv %s5014_s18 }
 0x438   : > { %s5051_s22 = sld [smem:[#allocation11 + $0x507]]  ;;  %v1507_v33 = vmul.f32 %v1506_v0, %v4956_v32 }
 0x439   : > { %v1557_v1 = vstv %s6528_s1  ;;  %s6532_s3 = sld [smem:[#allocation47_spill]]  ;;  %v1449_v2 = vmax.f32 %v5083_v47, 0.0 }
 0x43a   : > { %s5057_s6 = sld [smem:[#allocation11 + $0x587]]  ;;  %v1558_v15 = vmul.f32 %v1557_v1, %v4701_v17  ;;  %v1508_v24 = vadd.f32 %v1507_v33, %v1504_v60  ;;  %v1665_v60 = vadd.f32 %v1664_v23, %v1661_v39  ;;  %v1790_v39 = vmul.f32 %v1789_v45, %v4084_v41 }
 0x43b   : > { %s5062_s20 = sld [smem:[#allocation11 + $0x607]] }
 0x43c   : > { %v1510_v22 = vstv %s6529_s7  ;;  %s5067_s29 = sld [smem:[#allocation11 + $0x687]]  ;;  %v1559_v21 = vadd.f32 %v1558_v15, %v1555_v57  ;;  %v1731_v15 = vmul.f32 %v1730_v56, %v4328_v54  ;;  %v1739_v56 = vmul.f32 %v1738_v18, %v4344_v44 }
 0x43d   : > { %6530 = sst [smem:[#allocation130_spill]] %s5047_s30  ;;  %v1511_v62 = vmul.f32 %v1510_v22, %v4978_v59  ;;  %v1801_v18 = vstv %s5022_s10 }
 0x43e   : > { %6531 = sst [smem:[#allocation126_spill]] %s5051_s22 }
 0x43f   : > { %s6536_s11 = sld [smem:[#allocation33_spill]]  ;;  %v1561_v31 = vstv %s6532_s3  ;;  %v1512_v5 = vadd.f32 %v1511_v62, %v1508_v24  ;;  %v1786_v24 = vstv %s5004_s9 }
 0x440   : > { %6533 = sst [smem:[#allocation125_spill]] %s5057_s6  ;;  %v1562_v34 = vmul.f32 %v1561_v31, %v4736_v51  ;;  %v1734_v31 = vstv %s4945_s17 }
 0x441   : > { %6534 = sst [smem:[#allocation112_spill]] %s5062_s20 }
 0x442   : > { %6535 = sst [smem:[#allocation100_spill]] %s5067_s29  ;;  %v1563_v1 = vadd.f32 %v1562_v34, %v1559_v21  ;;  %v1735_v34 = vmul.f32 %v1734_v31, %v4333_v26  ;;  %v1797_v31 = vstv %s5017_s4 }
 0x443   : > { %s5071_s1 = sld [smem:[#allocation11 + $0x707]] }
 0x444   : > { %s6538_s15 = sld [smem:[#allocation38_spill]] }
 0x445   : > { %s5076_s26 = sld [smem:[#allocation11 + $0x787]]  ;;  %v1514_v25 = vstv %s6536_s11 }
 0x446   : > { %s6540_s16 = sld [smem:[#allocation81_spill]]  ;;  %v5118_v22 = vadd.f32 %v1514_v25, %v1512_v5  ;;  %v1732_v25 = vadd.f32 %v1731_v15, %v1728_v52 }
 0x447   : > { %s6541_s7 = sld [smem:[#allocation107_spill]] }
 0x448   : > { %s5081_s3 = sld [smem:[#allocation13 + $0x7]]  ;;  %v1516_v43 = vmax.f32 %v5118_v22, 0.0 }
 0x449   : > { %6537 = sst [smem:[#allocation71_spill]] %s5071_s1 }
 0x44a   : > { %s6543_s1 = sld [smem:[#allocation76_spill]]  ;;  %v1565_v28 = vstv %s6538_s15 }
 0x44b   : > { %6539 = sst [smem:[#allocation111_spill]] %s5076_s26  ;;  %v1566_v0 = vmul.f32 %v1565_v28, %v4783_v46 }
 0x44c   : > { %s5088_s13 = sld [smem:[#allocation11 + $0x8]]  ;;  %v1569_v4 = vstv %s6540_s16 }
 0x44d   : > { %s6544_s26 = sld [smem:[#allocation61_spill]]  ;;  %v1608_v55 = vstv %s6541_s7  ;;  %v1570_v40 = vmul.f32 %v1569_v4, %v4931_v19  ;;  %v1567_v37 = vadd.f32 %v1566_v0, %v1563_v1  ;;  %v1679_v0 = vstv %s4877_s12 }
 0x44e   : > { %6542 = sst [smem:[#allocation106_spill]] %s5081_s3  ;;  %v1609_v30 = vmul.f32 %v1608_v55, %v4406_v14  ;;  %v1787_v55 = vmul.f32 %v1786_v24, %v3995_v12  ;;  %v1680_v15 = vmul.f32 %v1679_v0, %v4504_v10  ;;  %v1802_v0 = vmul.f32 %v1801_v18, %v4333_v26 }
 0x44f   : > { %s5092_s5 = sld [smem:[#allocation11 + $0x88]]  ;;  %v1571_v49 = vadd.f32 %v1570_v40, %v1567_v37 }
 0x450   : > { %s6545_s3 = sld [smem:[#allocation53_spill]]  ;;  %v1667_v38 = vstv %s6543_s1  ;;  %v1610_v42 = vadd.f32 %v1609_v30, %v1606_v8  ;;  %v1742_v30 = vstv %s4954_s27 }
 0x451   : > { %s5097_s11 = sld [smem:[#allocation11 + $0x108]]  ;;  %v1668_v33 = vmul.f32 %v1667_v38, %v4333_v26 }
 0x452   : > { %s6546_s8 = sld [smem:[#allocation34_spill]] }
 0x453   : > { %s5101_s15 = sld [smem:[#allocation11 + $0x188]]  ;;  %v1573_v7 = vstv %s6544_s26  ;;  %v1669_v35 = vadd.f32 %v1668_v33, %v1665_v60  ;;  %v1791_v60 = vadd.f32 %v1790_v39, %v1787_v55  ;;  %v1794_v33 = vmul.f32 %v1793_v61, %v4326_v53 }
 0x454   : > { %s6547_s29 = sld [smem:[#allocation41_spill]]  ;;  %v1574_v16 = vmul.f32 %v1573_v7, %v4956_v32  ;;  %v1736_v7 = vadd.f32 %v1735_v34, %v1732_v25  ;;  %v1853_v25 = vstv %s5088_s13 }
 0x455   : > { %s5107_s16 = sld [smem:[#allocation11 + $0x208]]  ;;  %v1795_v45 = vadd.f32 %v1794_v33, %v1791_v60  ;;  %v1856_v34 = vstv %s5092_s5 }
 0x456   : > { %v1577_v29 = vstv %s6545_s3  ;;  %s6548_s7 = sld [smem:[#allocation39_spill]]  ;;  %v1575_v40 = vadd.f32 %v1574_v16, %v1571_v49  ;;  %v1857_v61 = vmul.f32 %v1856_v34, %v4084_v41 }
 0x457   : > { %s5111_s1 = sld [smem:[#allocation11 + $0x288]]  ;;  %v5126_v3 = vmul.f32 %v1577_v29, %v4978_v59 }
 0x458   : > { %v1612_v58 = vstv %s6546_s8  ;;  %s6549_s20 = sld [smem:[#allocation35_spill]] }
 0x459   : > { %s5116_s26 = sld [smem:[#allocation11 + $0x308]]  ;;  %v1613_v62 = vmul.f32 %v1612_v58, %v4504_v10  ;;  %v1579_v49 = vadd.f32 %v5126_v3, %v1575_v40  ;;  %v1805_v40 = vstv %s5027_s19 }
 0x45a   : > { %v1671_v13 = vstv %s6547_s29  ;;  %s5122_s0 = sld [smem:[#allocation11 + $0x388]] }
 0x45b   : > { %s6551_s3 = sld [smem:[#allocation72_spill]]  ;;  %v1672_v20 = vmul.f32 %v1671_v13, %v4344_v44  ;;  %v1614_v23 = vadd.f32 %v1613_v62, %v1610_v42  ;;  %v1740_v42 = vadd.f32 %v1739_v56, %v1736_v7  ;;  %v1743_v62 = vmul.f32 %v1742_v30, %v4406_v14 }
 0x45c   : > { %v1581_v57 = vstv %s6548_s7  ;;  %s5130_s8 = sld [smem:[#allocation11 + $0x408]]  ;;  %v1860_v7 = vstv %s5097_s11 }
 0x45d   : > { %s6552_s6 = sld [smem:[#allocation67_spill]]  ;;  %v1673_v5 = vadd.f32 %v1672_v20, %v1669_v35  ;;  %v1744_v55 = vadd.f32 %v1743_v62, %v1740_v42  ;;  %v1806_v62 = vmul.f32 %v1805_v40, %v4344_v44 }
 0x45e   : > { %s6553_s29 = sld [smem:[#allocation50_spill]]  ;;  %v1616_v6 = vstv %s6549_s20 }
 0x45f   : > { %s5134_s22 = sld [smem:[#allocation11 + $0x488]]  ;;  %v1617_v48 = vmul.f32 %v1616_v6, %v4573_v9 }
 0x460   : > { %6550 = sst [smem:[#allocation135_spill]] %s5122_s0 }
 0x461   : > { %s6554_s0 = sld [smem:[#allocation108_spill]]  ;;  %v1675_v27 = vstv %s6551_s3  ;;  %v1618_v13 = vadd.f32 %v1617_v48, %v1614_v23 }
 0x462   : > { %s5139_s30 = sld [smem:[#allocation11 + $0x508]]  ;;  %v1676_v38 = vmul.f32 %v1675_v27, %v4406_v14  ;;  %v1798_v27 = vmul.f32 %v1797_v31, %v4328_v54  ;;  %v1861_v31 = vmul.f32 %v1860_v7, %v4326_v53 }
 0x463   : > { %s5144_s17 = sld [smem:[#allocation11 + $0x588]]  ;;  %v1620_v21 = vstv %s6552_s6 }
 0x464   : > { %v1624_v28 = vstv %s6553_s29  ;;  %s5150_s20 = sld [smem:[#allocation11 + $0x608]]  ;;  %v1621_v63 = vmul.f32 %v1620_v21, %v4686_v11  ;;  %v1677_v52 = vadd.f32 %v1676_v38, %v1673_v5  ;;  %v1750_v5 = vstv %s4964_s2 }
 0x465   : > { %s6555_s9 = sld [smem:[#allocation79_spill]]  ;;  %v1625_v1 = vmul.f32 %v1624_v28, %v4701_v17  ;;  %v1854_v38 = vmul.f32 %v1853_v25, %v3995_v12 }
 0x466   : > { %s5155_s23 = sld [smem:[#allocation11 + $0x688]]  ;;  %v1622_v48 = vadd.f32 %v1621_v63, %v1618_v13  ;;  %v1681_v21 = vadd.f32 %v1680_v15, %v1677_v52  ;;  %v1799_v63 = vadd.f32 %v1798_v27, %v1795_v45  ;;  %v1751_v13 = vmul.f32 %v1750_v5, %v4573_v9 }
 0x467   : > { %v1628_v4 = vstv %s6554_s0  ;;  %s6557_s3 = sld [smem:[#allocation64_spill]]  ;;  %v5237_v52 = vadd.f32 %v1581_v57, %v1579_v49  ;;  %v1754_v15 = vstv %s4968_s21  ;;  %v1809_v45 = vstv %s5031_s28 }
 0x468   : > { %s5159_s6 = sld [smem:[#allocation11 + $0x708]]  ;;  %v5168_v29 = vmul.f32 %v1628_v4, %v4736_v51  ;;  %v1626_v56 = vadd.f32 %v1625_v1, %v1622_v48  ;;  %v1858_v1 = vadd.f32 %v1857_v61, %v1854_v38  ;;  %v1803_v42 = vadd.f32 %v1802_v0, %v1799_v63 }
 0x469   : > { %s5164_s24 = sld [smem:[#allocation11 + $0x788]]  ;;  %v1755_v25 = vmul.f32 %v1754_v15, %v4686_v11  ;;  %v1813_v38 = vstv %s5037_s14 }
 0x46a   : > { %s6560_s0 = sld [smem:[#allocation94_spill]]  ;;  %v1630_v57 = vadd.f32 %v5168_v29, %v1626_v56  ;;  %v1862_v18 = vadd.f32 %v1861_v31, %v1858_v1  ;;  %v1872_v1 = vstv %s5111_s1 }
 0x46b   : > { %v1632_v8 = vstv %s6555_s9  ;;  %s5172_s18 = sld [smem:[#allocation13 + $0x8]] }
 0x46c   : > { %6556 = sst [smem:[#allocation84_spill]] %s5155_s23  ;;  %v5183_v16 = vmul.f32 %v1632_v8, %v4783_v46 }
 0x46d   : > { %s6562_s29 = sld [smem:[#allocation92_spill]]  ;;  %v1636_v58 = vstv %s6557_s3 }
 0x46e   : > { %6558 = sst [smem:[#allocation96_spill]] %s5159_s6  ;;  %v5190_v6 = vmul.f32 %v1636_v58, %v4931_v19  ;;  %v1634_v0 = vadd.f32 %v5183_v16, %v1630_v57  ;;  %v1814_v16 = vmul.f32 %v1813_v38, %v4504_v10 }
 0x46f   : > { %6559 = sst [smem:[#allocation101_spill]] %s5164_s24 }
 0x470   : > { %s6563_s12 = sld [smem:[#allocation48_spill]]  ;;  %v1683_v37 = vstv %s6560_s0 }
 0x471   : > { %6561 = sst [smem:[#allocation95_spill]] %s5172_s18  ;;  %v1684_v28 = vmul.f32 %v1683_v37, %v4573_v9 }
 0x472   : > { %s6564_s6 = sld [smem:[#allocation65_spill]] }
 0x473   : > { %s5176_s23 = sld [smem:[#allocation11 + $0x9]]  ;;  %v1640_v35 = vstv %s6562_s29  ;;  %v1685_v8 = vadd.f32 %v1684_v28, %v1681_v21 }
 0x474   : > { %s5180_s27 = sld [smem:[#allocation11 + $0x89]]  ;;  %v5212_v23 = vmul.f32 %v1640_v35, %v4956_v32  ;;  %v1864_v35 = vstv %s5101_s15 }
 0x475   : > { %s5187_s9 = sld [smem:[#allocation11 + $0x109]]  ;;  %v1865_v29 = vmul.f32 %v1864_v35, %v4328_v54  ;;  %v1638_v35 = vadd.f32 %v5190_v6, %v1634_v0 }
 0x476   : > { %s6565_s3 = sld [smem:[#allocation68_spill]]  ;;  %v1644_v20 = vstv %s6563_s12 }
 0x477   : > { %s5195_s4 = sld [smem:[#allocation11 + $0x189]]  ;;  %v5220_v3 = vmul.f32 %v1644_v20, %v4978_v59 }
 0x478   : > { %v1746_v24 = vstv %s6564_s6  ;;  %s5200_s0 = sld [smem:[#allocation11 + $0x209]] }
 0x479   : > { %s5204_s18 = sld [smem:[#allocation11 + $0x289]]  ;;  %v1747_v39 = vmul.f32 %v1746_v24, %v4504_v10  ;;  %v1920_v34 = vstv %s5176_s23 }
 0x47a   : > { %s5209_s6 = sld [smem:[#allocation11 + $0x309]]  ;;  %v1923_v48 = vstv %s5180_s27  ;;  %v1921_v61 = vmul.f32 %v1920_v34, %v3995_v12  ;;  %v1873_v34 = vmul.f32 %v1872_v1, %v4344_v44 }
 0x47b   : > { %s6566_s13 = sld [smem:[#allocation54_spill]]  ;;  %v1748_v33 = vadd.f32 %v1747_v39, %v1744_v55  ;;  %v1810_v55 = vmul.f32 %v1809_v45, %v4406_v14  ;;  %v1868_v39 = vstv %s5107_s16  ;;  %v1924_v63 = vmul.f32 %v1923_v48, %v4084_v41 }
 0x47c   : > { %v1687_v4 = vstv %s6565_s3  ;;  %s6567_s5 = sld [smem:[#allocation124_spill]] }
 0x47d   : > { %s5217_s10 = sld [smem:[#allocation11 + $0x389]]  ;;  %v1688_v30 = vmul.f32 %v1687_v4, %v4686_v11  ;;  %v1752_v27 = vadd.f32 %v1751_v13, %v1748_v33  ;;  %v1807_v4 = vadd.f32 %v1806_v62, %v1803_v42  ;;  %v1869_v33 = vmul.f32 %v1868_v39, %v4333_v26 }
 0x47e   : > { %s5224_s29 = sld [smem:[#allocation11 + $0x409]]  ;;  %v1925_v42 = vadd.f32 %v1924_v63, %v1921_v61  ;;  %v1935_v38 = vstv %s5200_s0 }
 0x47f   : > { %s6568_s12 = sld [smem:[#allocation40_spill]]  ;;  %v1689_v20 = vadd.f32 %v1688_v30, %v1685_v8  ;;  %v1756_v7 = vadd.f32 %v1755_v25, %v1752_v27  ;;  %v1927_v8 = vstv %s5187_s9  ;;  %v1811_v15 = vadd.f32 %v1810_v55, %v1807_v4 }
 0x480   : > { %s5228_s2 = sld [smem:[#allocation11 + $0x489]]  ;;  %v1928_v62 = vmul.f32 %v1927_v8, %v4326_v53  ;;  %v1642_v55 = vadd.f32 %v5212_v23, %v1638_v35 }
 0x481   : > { %v1648_v58 = vstv %s6566_s13  ;;  %s5233_s3 = sld [smem:[#allocation11 + $0x509]] }
 0x482   : > { %v1691_v60 = vstv %s6567_s5  ;;  %s5241_s19 = sld [smem:[#allocation11 + $0x589]] }
 0x483   : > { %s6569_s11 = sld [smem:[#allocation55_spill]]  ;;  %v1692_v24 = vmul.f32 %v1691_v60, %v4701_v17  ;;  %v1866_v60 = vadd.f32 %v1865_v29, %v1862_v18 }
 0x484   : > { %s5246_s5 = sld [smem:[#allocation11 + $0x609]] }
 0x485   : > { %v1695_v37 = vstv %s6568_s12  ;;  %s6570_s7 = sld [smem:[#allocation69_spill]]  ;;  %v1693_v5 = vadd.f32 %v1692_v24, %v1689_v20  ;;  %v1931_v24 = vstv %s5195_s4  ;;  %v1870_v25 = vadd.f32 %v1869_v33, %v1866_v60 }
 0x486   : > { %s5251_s21 = sld [smem:[#allocation11 + $0x689]]  ;;  %v1696_v21 = vmul.f32 %v1695_v37, %v4736_v51  ;;  %v1817_v37 = vstv %s5042_s25  ;;  %v1932_v4 = vmul.f32 %v1931_v24, %v4328_v54  ;;  %v1884_v24 = vstv %s5130_s8 }
 0x487   : > { %s5256_s12 = sld [smem:[#allocation11 + $0x709]]  ;;  %v1818_v6 = vmul.f32 %v1817_v37, %v4573_v9  ;;  %v1874_v0 = vadd.f32 %v1873_v34, %v1870_v25 }
 0x488   : > { %s5261_s15 = sld [smem:[#allocation11 + $0x789]]  ;;  %v1697_v31 = vadd.f32 %v1696_v21, %v1693_v5  ;;  %v1815_v21 = vadd.f32 %v1814_v16, %v1811_v15  ;;  %v1646_v15 = vadd.f32 %v5220_v3, %v1642_v55 }
 0x489   : > { %v1758_v28 = vstv %s6569_s11  ;;  %s6574_s28 = sld [smem:[#allocation90_spill]] }
 0x48a   : > { %s6576_s23 = sld [smem:[#allocation51_spill]]  ;;  %v1759_v56 = vmul.f32 %v1758_v28, %v4701_v17  ;;  %v1876_v28 = vstv %s5116_s26  ;;  %v1819_v8 = vadd.f32 %v1818_v6, %v1815_v21  ;;  %v5361_v55 = vadd.f32 %v1648_v58, %v1646_v15 }
 0x48b   : > { %v1699_v49 = vstv %s6570_s7  ;;  %s5271_s27 = sld [smem:[#allocation11 + $0xa]]  ;;  %v1947_v58 = vstv %s5217_s10 }
 0x48c   : > { %6571 = sst [smem:[#allocation85_spill]] %s5251_s21  ;;  %v1700_v30 = vmul.f32 %v1699_v49, %v4783_v46  ;;  %v1760_v57 = vadd.f32 %v1759_v56, %v1756_v7  ;;  %v1929_v49 = vadd.f32 %v1928_v62, %v1925_v42  ;;  %v1877_v7 = vmul.f32 %v1876_v28, %v4406_v14 }
 0x48d   : > { %6572 = sst [smem:[#allocation128_spill]] %s5256_s12  ;;  %v1943_v28 = vstv %s5209_s6 }
 0x48e   : > { %6573 = sst [smem:[#allocation115_spill]] %s5261_s15  ;;  %v1701_v18 = vadd.f32 %v1700_v30, %v1697_v31  ;;  %v1933_v33 = vadd.f32 %v1932_v4, %v1929_v49  ;;  %v1939_v31 = vstv %s5204_s18  ;;  %v1878_v62 = vadd.f32 %v1877_v7, %v1874_v0 }
 0x48f   : > { %s5266_s21 = sld [smem:[#allocation13 + $0x9]]  ;;  %v1762_v40 = vstv %s6574_s28  ;;  %v1940_v34 = vmul.f32 %v1939_v31, %v4344_v44  ;;  %v1944_v7 = vmul.f32 %v1943_v28, %v4406_v14  ;;  %v1650_v31 = vmax.f32 %v5361_v55, 0.0 }
 0x490   : > { %s5276_s16 = sld [smem:[#allocation11 + $0x8a]]  ;;  %v1703_v13 = vstv %s6576_s23  ;;  %v1763_v20 = vmul.f32 %v1762_v40, %v4736_v51 }
 0x491   : > { %s5281_s14 = sld [smem:[#allocation11 + $0x10a]]  ;;  %v1704_v45 = vmul.f32 %v1703_v13, %v4931_v19  ;;  %v1936_v13 = vmul.f32 %v1935_v38, %v4333_v26  ;;  %v1987_v49 = vstv %s5271_s27  ;;  %v1888_v38 = vstv %s5134_s22 }
 0x492   : > { %s6577_s11 = sld [smem:[#allocation93_spill]]  ;;  %v1764_v39 = vadd.f32 %v1763_v20, %v1760_v57 }
 0x493   : > { %s5286_s7 = sld [smem:[#allocation11 + $0x18a]]  ;;  %v1705_v40 = vadd.f32 %v1704_v45, %v1701_v18  ;;  %v1937_v25 = vadd.f32 %v1936_v13, %v1933_v33  ;;  %v1583_v13 = vmax.f32 %v5237_v52, 0.0 }
 0x494   : > { %s6578_s9 = sld [smem:[#allocation82_spill]] }
 0x495   : > { %6575 = sst [smem:[#allocation87_spill]] %s5266_s21  ;;  %v1941_v0 = vadd.f32 %v1940_v34, %v1937_v25 }
 0x496   : > { %s5290_s28 = sld [smem:[#allocation11 + $0x20a]]  ;;  %v1990_v4 = vstv %s5276_s16 }
 0x497   : > { %s6579_s21 = sld [smem:[#allocation130_spill]]  ;;  %v1994_v33 = vstv %s5281_s14 }
 0x498   : > { %s5295_s23 = sld [smem:[#allocation11 + $0x28a]]  ;;  %v1766_v27 = vstv %s6577_s11 }
 0x499   : > { %s5300_s25 = sld [smem:[#allocation11 + $0x30a]]  ;;  %v1767_v5 = vmul.f32 %v1766_v27, %v4783_v46  ;;  %v1998_v34 = vstv %s5286_s7 }
 0x49a   : > { %v1707_v48 = vstv %s6578_s9  ;;  %s6580_s1 = sld [smem:[#allocation86_spill]] }
 0x49b   : > { %s5305_s15 = sld [smem:[#allocation11 + $0x38a]]  ;;  %v1708_v61 = vmul.f32 %v1707_v48, %v4956_v32  ;;  %v1768_v16 = vadd.f32 %v1767_v5, %v1764_v39 }
 0x49c   : > { %s6581_s4 = sld [smem:[#allocation80_spill]] }
 0x49d   : > { %v1821_v29 = vstv %s6579_s21  ;;  %s6582_s11 = sld [smem:[#allocation135_spill]]  ;;  %v1709_v45 = vadd.f32 %v1708_v61, %v1705_v40 }
 0x49e   : > { %s5309_s12 = sld [smem:[#allocation11 + $0x40a]]  ;;  %v1822_v23 = vmul.f32 %v1821_v29, %v4686_v11  ;;  %v1885_v29 = vmul.f32 %v1884_v24, %v4573_v9  ;;  %v1995_v24 = vmul.f32 %v1994_v33, %v4326_v53 }
 0x49f   : > { %s6584_s24 = sld [smem:[#allocation126_spill]] }
 0x4a0   : > { %s5314_s9 = sld [smem:[#allocation11 + $0x48a]]  ;;  %v1770_v63 = vstv %s6580_s1  ;;  %v1823_v20 = vadd.f32 %v1822_v23, %v1819_v8  ;;  %v1988_v8 = vmul.f32 %v1987_v49, %v3995_v12  ;;  %v1991_v23 = vmul.f32 %v1990_v4, %v4084_v41 }
 0x4a1   : > { %s5319_s26 = sld [smem:[#allocation11 + $0x50a]]  ;;  %v1771_v1 = vmul.f32 %v1770_v63, %v4931_v19 }
 0x4a2   : > { %v1711_v56 = vstv %s6581_s4  ;;  %s6586_s21 = sld [smem:[#allocation91_spill]] }
 0x4a3   : > { %v1880_v30 = vstv %s6582_s11  ;;  %s6587_s0 = sld [smem:[#allocation109_spill]]  ;;  %v1712_v37 = vmul.f32 %v1711_v56, %v4978_v59  ;;  %v1772_v48 = vadd.f32 %v1771_v1, %v1768_v16  ;;  %v1892_v1 = vstv %s5139_s30 }
 0x4a4   : > { %6583 = sst [smem:[#allocation89_spill]] %s5309_s12  ;;  %v1881_v35 = vmul.f32 %v1880_v30, %v4504_v10  ;;  %v1893_v25 = vmul.f32 %v1892_v1, %v4701_v17 }
 0x4a5   : > { %s5324_s12 = sld [smem:[#allocation11 + $0x58a]]  ;;  %v1825_v60 = vstv %s6584_s24  ;;  %v1713_v61 = vadd.f32 %v1712_v37, %v1709_v45 }
 0x4a6   : > { %s5328_s1 = sld [smem:[#allocation11 + $0x60a]]  ;;  %v1826_v3 = vmul.f32 %v1825_v60, %v4701_v17  ;;  %v1882_v18 = vadd.f32 %v1881_v35, %v1878_v62  ;;  %v1889_v60 = vmul.f32 %v1888_v38, %v4686_v11  ;;  %v1948_v62 = vmul.f32 %v1947_v58, %v4504_v10 }
 0x4a7   : > { %6585 = sst [smem:[#allocation131_spill]] %s5319_s26  ;;  %v1999_v38 = vmul.f32 %v1998_v34, %v4328_v54 }
 0x4a8   : > { %s6588_s26 = sld [smem:[#allocation125_spill]]  ;;  %v1774_v42 = vstv %s6586_s21  ;;  %v1827_v39 = vadd.f32 %v1826_v3, %v1823_v20  ;;  %v1886_v40 = vadd.f32 %v1885_v29, %v1882_v18  ;;  %v1951_v20 = vstv %s5224_s29 }
 0x4a9   : > { %s5333_s4 = sld [smem:[#allocation11 + $0x68a]]  ;;  %v1715_v57 = vstv %s6587_s0  ;;  %v1775_v21 = vmul.f32 %v1774_v42, %v4956_v32  ;;  %v1945_v42 = vadd.f32 %v1944_v7, %v1941_v0  ;;  %v1992_v3 = vadd.f32 %v1991_v23, %v1988_v8 }
 0x4aa   : > { %s6589_s11 = sld [smem:[#allocation70_spill]]  ;;  %v5391_v35 = vadd.f32 %v1715_v57, %v1713_v61  ;;  %v1952_v49 = vmul.f32 %v1951_v20, %v4573_v9  ;;  %v2002_v7 = vstv %s5290_s28  ;;  %v1900_v23 = vstv %s5150_s20 }
 0x4ab   : > { %s5338_s24 = sld [smem:[#allocation11 + $0x70a]]  ;;  %v1776_v30 = vadd.f32 %v1775_v21, %v1772_v48  ;;  %v1949_v29 = vadd.f32 %v1948_v62, %v1945_v42  ;;  %v1901_v20 = vmul.f32 %v1900_v23, %v4783_v46 }
 0x4ac   : > { %s5343_s18 = sld [smem:[#allocation11 + $0x78a]]  ;;  %v1717_v4 = vmax.f32 %v5391_v35, 0.0 }
 0x4ad   : > { %s5347_s21 = sld [smem:[#allocation13 + $0xa]] }
 0x4ae   : > { %v1829_v27 = vstv %s6588_s26  ;;  %s6592_s0 = sld [smem:[#allocation112_spill]] }
 0x4af   : > { %s5357_s8 = sld [smem:[#allocation11 + $0x8b]]  ;;  %v1830_v5 = vmul.f32 %v1829_v27, %v4736_v51  ;;  %v1890_v27 = vadd.f32 %v1889_v60, %v1886_v40 }
 0x4b0   : > { %v1778_v6 = vstv %s6589_s11  ;;  %s5365_s26 = sld [smem:[#allocation11 + $0x10b]] }
 0x4b1   : > { %6590 = sst [smem:[#allocation88_spill]] %s5338_s24  ;;  %v1779_v56 = vmul.f32 %v1778_v6, %v4978_v59  ;;  %v1831_v15 = vadd.f32 %v1830_v5, %v1827_v39  ;;  %v1896_v6 = vstv %s5144_s17  ;;  %v1955_v39 = vstv %s5228_s2 }
 0x4b2   : > { %s5352_s24 = sld [smem:[#allocation11 + $0xb]]  ;;  %v1996_v5 = vadd.f32 %v1995_v24, %v1992_v3  ;;  %v1897_v0 = vmul.f32 %v1896_v6, %v4736_v51  ;;  %v1956_v40 = vmul.f32 %v1955_v39, %v4686_v11  ;;  %v2006_v3 = vstv %s5295_s23 }
 0x4b3   : > { %6591 = sst [smem:[#allocation110_spill]] %s5347_s21  ;;  %v1780_v45 = vadd.f32 %v1779_v56, %v1776_v30  ;;  %v1953_v30 = vadd.f32 %v1952_v49, %v1949_v29 }
 0x4b4   : > { %v1833_v63 = vstv %s6592_s0  ;;  %s5369_s6 = sld [smem:[#allocation11 + $0x18b]]  ;;  %v2000_v1 = vadd.f32 %v1999_v38, %v1996_v5  ;;  %v2010_v38 = vstv %s5300_s25 }
 0x4b5   : > { %s6593_s13 = sld [smem:[#allocation100_spill]]  ;;  %v1834_v16 = vmul.f32 %v1833_v63, %v4783_v46  ;;  %v1894_v63 = vadd.f32 %v1893_v25, %v1890_v27  ;;  %v2057_v33 = vstv %s5357_s8  ;;  %v1957_v34 = vadd.f32 %v1956_v40, %v1953_v30 }
 0x4b6   : > { %s5375_s27 = sld [smem:[#allocation11 + $0x20b]]  ;;  %v2058_v25 = vmul.f32 %v2057_v33, %v4084_v41 }
 0x4b7   : > { %s5379_s22 = sld [smem:[#allocation11 + $0x28b]]  ;;  %v1835_v21 = vadd.f32 %v1834_v16, %v1831_v15  ;;  %v1959_v16 = vstv %s5233_s3  ;;  %v1898_v62 = vadd.f32 %v1897_v0, %v1894_v63  ;;  %v1967_v0 = vstv %s5246_s5 }
 0x4b8   : > { %s5384_s10 = sld [smem:[#allocation11 + $0x30b]]  ;;  %v2054_v60 = vstv %s5352_s24 }
 0x4b9   : > { %s6594_s16 = sld [smem:[#allocation83_spill]]  ;;  %v2055_v27 = vmul.f32 %v2054_v60, %v3995_v12  ;;  %v1902_v49 = vadd.f32 %v1901_v20, %v1898_v62 }
 0x4ba   : > { %s5389_s14 = sld [smem:[#allocation11 + $0x38b]]  ;;  %v2065_v23 = vstv %s5369_s6 }
 0x4bb   : > { %v1837_v37 = vstv %s6593_s13  ;;  %s6595_s11 = sld [smem:[#allocation71_spill]] }
 0x4bc   : > { %s6596_s0 = sld [smem:[#allocation111_spill]]  ;;  %v1838_v57 = vmul.f32 %v1837_v37, %v4931_v19  ;;  %v2003_v37 = vmul.f32 %v2002_v7, %v4333_v26  ;;  %v2059_v7 = vadd.f32 %v2058_v25, %v2055_v27 }
 0x4bd   : > { %s5395_s30 = sld [smem:[#allocation11 + $0x40b]] }
 0x4be   : > { %s5399_s13 = sld [smem:[#allocation11 + $0x48b]]  ;;  %v1839_v56 = vadd.f32 %v1838_v57, %v1835_v21  ;;  %v1963_v21 = vstv %s5241_s19  ;;  %v2061_v57 = vstv %s5365_s26  ;;  %v2004_v6 = vadd.f32 %v2003_v37, %v2000_v1 }
 0x4bf   : > { %v1782_v48 = vstv %s6594_s16  ;;  %s5404_s29 = sld [smem:[#allocation11 + $0x50b]]  ;;  %v1964_v63 = vmul.f32 %v1963_v21, %v4736_v51 }
 0x4c0   : > { %s5409_s21 = sld [smem:[#allocation11 + $0x58b]]  ;;  %v5416_v61 = vadd.f32 %v1782_v48, %v1780_v45  ;;  %v1960_v48 = vmul.f32 %v1959_v16, %v4701_v17  ;;  %v2011_v16 = vmul.f32 %v2010_v38, %v4406_v14 }
 0x4c1   : > { %v1841_v28 = vstv %s6595_s11  ;;  %s5414_s7 = sld [smem:[#allocation11 + $0x60b]] }
 0x4c2   : > { %v1845_v18 = vstv %s6596_s0  ;;  %s6597_s17 = sld [smem:[#allocation106_spill]]  ;;  %v1842_v58 = vmul.f32 %v1841_v28, %v4956_v32  ;;  %v1784_v42 = vmax.f32 %v5416_v61, 0.0  ;;  %v2007_v28 = vmul.f32 %v2006_v3, %v4344_v44 }
 0x4c3   : > { %s5420_s16 = sld [smem:[#allocation11 + $0xc]]  ;;  %v1846_v8 = vmul.f32 %v1845_v18, %v4978_v59  ;;  %v2014_v3 = vstv %s5305_s15 }
 0x4c4   : > { %s5425_s2 = sld [smem:[#allocation11 + $0x8c]]  ;;  %v1843_v24 = vadd.f32 %v1842_v58, %v1839_v56  ;;  %v2062_v56 = vmul.f32 %v2061_v57, %v4326_v53  ;;  %v1961_v58 = vadd.f32 %v1960_v48, %v1957_v34  ;;  %v2008_v33 = vadd.f32 %v2007_v28, %v2004_v6 }
 0x4c5   : > { %s6598_s11 = sld [smem:[#allocation84_spill]]  ;;  %v2069_v34 = vstv %s5375_s27  ;;  %v2015_v28 = vmul.f32 %v2014_v3, %v4504_v10 }
 0x4c6   : > { %s5430_s0 = sld [smem:[#allocation11 + $0x68b]]  ;;  %v1847_v60 = vadd.f32 %v1846_v8, %v1843_v24  ;;  %v2063_v8 = vadd.f32 %v2062_v56, %v2059_v7  ;;  %v2066_v24 = vmul.f32 %v2065_v23, %v4328_v54  ;;  %v1965_v25 = vadd.f32 %v1964_v63, %v1961_v58 }
 0x4c7   : > { %s5435_s28 = sld [smem:[#allocation11 + $0x10c]]  ;;  %v2012_v6 = vadd.f32 %v2011_v16, %v2008_v33  ;;  %v2070_v7 = vmul.f32 %v2069_v34, %v4333_v26 }
 0x4c8   : > { %v1849_v15 = vstv %s6597_s17  ;;  %s5440_s20 = sld [smem:[#allocation11 + $0x70b]] }
 0x4c9   : > { %s6599_s3 = sld [smem:[#allocation96_spill]]  ;;  %v2121_v18 = vstv %s5420_s16 }
 0x4ca   : > { %s5445_s24 = sld [smem:[#allocation11 + $0x78b]]  ;;  %v2124_v29 = vstv %s5425_s2  ;;  %v2122_v30 = vmul.f32 %v2121_v18, %v3995_v12 }
 0x4cb   : > { %v1904_v45 = vstv %s6598_s11  ;;  %s5450_s8 = sld [smem:[#allocation13 + $0xb]]  ;;  %v2125_v40 = vmul.f32 %v2124_v29, %v4084_v41  ;;  %v5497_v29 = vadd.f32 %v1849_v15, %v1847_v60  ;;  %v2073_v15 = vstv %s5379_s22 }
 0x4cc   : > { %s5455_s23 = sld [smem:[#allocation11 + $0x18c]]  ;;  %v1905_v39 = vmul.f32 %v1904_v45, %v4931_v19  ;;  %v1968_v45 = vmul.f32 %v1967_v0, %v4783_v46  ;;  %v2067_v0 = vadd.f32 %v2066_v24, %v2063_v8  ;;  %v2022_v60 = vstv %s5314_s9 }
 0x4cd   : > { %s5460_s11 = sld [smem:[#allocation11 + $0x20c]]  ;;  %v2128_v1 = vstv %s5435_s28  ;;  %v2126_v48 = vadd.f32 %v2125_v40, %v2122_v30  ;;  %v2016_v30 = vadd.f32 %v2015_v28, %v2012_v6  ;;  %v1851_v16 = vmax.f32 %v5497_v29, 0.0 }
 0x4ce   : > { %s6602_s19 = sld [smem:[#allocation101_spill]]  ;;  %v1906_v37 = vadd.f32 %v1905_v39, %v1902_v49  ;;  %v2129_v21 = vmul.f32 %v2128_v1, %v4326_v53  ;;  %v1969_v56 = vadd.f32 %v1968_v45, %v1965_v25  ;;  %v2071_v3 = vadd.f32 %v2070_v7, %v2067_v0 }
 0x4cf   : > { %v1908_v5 = vstv %s6599_s3  ;;  %s5465_s26 = sld [smem:[#allocation11 + $0x28c]]  ;;  %v2074_v45 = vmul.f32 %v2073_v15, %v4344_v44  ;;  %v2023_v24 = vmul.f32 %v2022_v60, %v4686_v11  ;;  %v2030_v28 = vstv %s5324_s12 }
 0x4d0   : > { %6600 = sst [smem:[#allocation113_spill]] %s5445_s24  ;;  %v1909_v62 = vmul.f32 %v1908_v5, %v4956_v32  ;;  %v2130_v58 = vadd.f32 %v2129_v21, %v2126_v48 }
 0x4d1   : > { %6601 = sst [smem:[#allocation102_spill]] %s5450_s8 }
 0x4d2   : > { %s6603_s16 = sld [smem:[#allocation85_spill]]  ;;  %v2132_v18 = vstv %s5455_s23  ;;  %v1910_v49 = vadd.f32 %v1909_v62, %v1906_v37 }
 0x4d3   : > { %s5470_s25 = sld [smem:[#allocation11 + $0x30c]]  ;;  %v2133_v23 = vmul.f32 %v2132_v18, %v4328_v54  ;;  %v2136_v33 = vstv %s5460_s11 }
 0x4d4   : > { %s5474_s5 = sld [smem:[#allocation11 + $0x38c]]  ;;  %v1912_v20 = vstv %s6602_s19  ;;  %v2137_v34 = vmul.f32 %v2136_v33, %v4333_v26 }
 0x4d5   : > { %s5479_s6 = sld [smem:[#allocation11 + $0x40c]]  ;;  %v1913_v57 = vmul.f32 %v1912_v20, %v4978_v59  ;;  %v2134_v25 = vadd.f32 %v2133_v23, %v2130_v58 }
 0x4d6   : > { %s6604_s2 = sld [smem:[#allocation95_spill]] }
 0x4d7   : > { %s6605_s3 = sld [smem:[#allocation89_spill]]  ;;  %v1914_v1 = vadd.f32 %v1913_v57, %v1910_v49  ;;  %v2140_v57 = vstv %s5465_s26 }
 0x4d8   : > { %v1971_v27 = vstv %s6603_s16  ;;  %s5484_s28 = sld [smem:[#allocation11 + $0x48c]]  ;;  %v2141_v15 = vmul.f32 %v2140_v57, %v4344_v44  ;;  %v2031_v57 = vmul.f32 %v2030_v28, %v4736_v51 }
 0x4d9   : > { %s6606_s8 = sld [smem:[#allocation128_spill]]  ;;  %v1972_v38 = vmul.f32 %v1971_v27, %v4931_v19  ;;  %v2077_v27 = vstv %s5384_s10 }
 0x4da   : > { %s5488_s15 = sld [smem:[#allocation11 + $0x50c]]  ;;  %v2078_v18 = vmul.f32 %v2077_v27, %v4406_v14 }
 0x4db   : > { %s5493_s19 = sld [smem:[#allocation11 + $0x58c]]  ;;  %v1973_v8 = vadd.f32 %v1972_v38, %v1969_v56  ;;  %v2075_v38 = vadd.f32 %v2074_v45, %v2071_v3  ;;  %v2138_v56 = vadd.f32 %v2137_v34, %v2134_v25  ;;  %v2034_v45 = vstv %s5328_s1 }
 0x4dc   : > { %v1916_v39 = vstv %s6604_s2  ;;  %s5501_s27 = sld [smem:[#allocation11 + $0x60c]]  ;;  %v2035_v28 = vmul.f32 %v2034_v45, %v4783_v46 }
 0x4dd   : > { %v2018_v5 = vstv %s6605_s3  ;;  %s6607_s16 = sld [smem:[#allocation131_spill]]  ;;  %v2079_v34 = vadd.f32 %v2078_v18, %v2075_v38  ;;  %v5576_v38 = vadd.f32 %v1916_v39, %v1914_v1 }
 0x4de   : > { %s5506_s23 = sld [smem:[#allocation11 + $0xd]]  ;;  %v2019_v40 = vmul.f32 %v2018_v5, %v4573_v9 }
 0x4df   : > { %v1975_v63 = vstv %s6606_s8  ;;  %s6608_s24 = sld [smem:[#allocation115_spill]] }
 0x4e0   : > { %s5510_s17 = sld [smem:[#allocation11 + $0x8d]]  ;;  %v1976_v37 = vmul.f32 %v1975_v63, %v4956_v32  ;;  %v2020_v48 = vadd.f32 %v2019_v40, %v2016_v30  ;;  %v2081_v63 = vstv %s5389_s14  ;;  %v2144_v40 = vstv %s5470_s25 }
 0x4e1   : > { %s5515_s8 = sld [smem:[#allocation11 + $0x10d]] }
 0x4e2   : > { %s5520_s22 = sld [smem:[#allocation11 + $0x18d]]  ;;  %v2024_v30 = vadd.f32 %v2023_v24, %v2020_v48  ;;  %v1977_v25 = vadd.f32 %v1976_v37, %v1973_v8  ;;  %v2082_v24 = vmul.f32 %v2081_v63, %v4504_v10  ;;  %v2148_v37 = vstv %s5474_s5 }
 0x4e3   : > { %v2026_v62 = vstv %s6607_s16  ;;  %s5525_s9 = sld [smem:[#allocation11 + $0x20d]]  ;;  %v2038_v63 = vstv %s5333_s4  ;;  %v2149_v39 = vmul.f32 %v2148_v37, %v4504_v10 }
 0x4e4   : > { %s5529_s11 = sld [smem:[#allocation11 + $0x68c]]  ;;  %v2027_v21 = vmul.f32 %v2026_v62, %v4701_v17  ;;  %v2188_v6 = vstv %s5506_s23  ;;  %v2039_v45 = vmul.f32 %v2038_v63, %v4931_v19 }
 0x4e5   : > { %v1979_v20 = vstv %s6608_s24  ;;  %s5533_s24 = sld [smem:[#allocation11 + $0x70c]]  ;;  %v2189_v49 = vmul.f32 %v2188_v6, %v3995_v12  ;;  %v2142_v6 = vadd.f32 %v2141_v15, %v2138_v56 }
 0x4e6   : > { %v2191_v5 = vstv %s5510_s17  ;;  %s5540_s10 = sld [smem:[#allocation11 + $0x28d]]  ;;  %v1980_v62 = vmul.f32 %v1979_v20, %v4978_v59  ;;  %v2085_v20 = vstv %s5395_s30 }
 0x4e7   : > { %s6609_s3 = sld [smem:[#allocation87_spill]]  ;;  %v2192_v0 = vmul.f32 %v2191_v5, %v4084_v41  ;;  %v2195_v7 = vstv %s5515_s8  ;;  %v2028_v5 = vadd.f32 %v2027_v21, %v2024_v30  ;;  %v2083_v21 = vadd.f32 %v2082_v24, %v2079_v34 }
 0x4e8   : > { %s5543_s16 = sld [smem:[#allocation11 + $0x78c]]  ;;  %v2196_v58 = vmul.f32 %v2195_v7, %v4326_v53  ;;  %v2199_v23 = vstv %s5520_s22  ;;  %v1981_v7 = vadd.f32 %v1980_v62, %v1977_v25  ;;  %v2086_v15 = vmul.f32 %v2085_v20, %v4573_v9 }
 0x4e9   : > { %s5550_s12 = sld [smem:[#allocation11 + $0x30d]]  ;;  %v2193_v60 = vadd.f32 %v2192_v0, %v2189_v49  ;;  %v2200_v33 = vmul.f32 %v2199_v23, %v4328_v54  ;;  %v2203_v27 = vstv %s5525_s9  ;;  %v2145_v49 = vmul.f32 %v2144_v40, %v4406_v14 }
 0x4ea   : > { %s5554_s14 = sld [smem:[#allocation11 + $0x38d]]  ;;  %v2204_v18 = vmul.f32 %v2203_v27, %v4333_v26  ;;  %v2089_v23 = vstv %s5399_s13  ;;  %v2032_v1 = vadd.f32 %v2031_v57, %v2028_v5  ;;  %v2152_v40 = vstv %s5479_s6 }
 0x4eb   : > { %s5560_s26 = sld [smem:[#allocation11 + $0x40d]]  ;;  %v2197_v48 = vadd.f32 %v2196_v58, %v2193_v60  ;;  %v2046_v58 = vstv %s5343_s18  ;;  %v2146_v30 = vadd.f32 %v2145_v49, %v2142_v6  ;;  %v1918_v62 = vmax.f32 %v5576_v38, 0.0 }
 0x4ec   : > { %s5563_s25 = sld [smem:[#allocation11 + $0x48d]]  ;;  %v2207_v0 = vstv %s5540_s10  ;;  %v5605_v34 = vmul.f32 %v2046_v58, %v4978_v59  ;;  %v2087_v24 = vadd.f32 %v2086_v15, %v2083_v21  ;;  %v2093_v57 = vstv %s5404_s29 }
 0x4ed   : > { %v1983_v3 = vstv %s6609_s3  ;;  %s6610_s23 = sld [smem:[#allocation88_spill]]  ;;  %v2201_v8 = vadd.f32 %v2200_v33, %v2197_v48  ;;  %v2208_v33 = vmul.f32 %v2207_v0, %v4344_v44  ;;  %v2090_v48 = vmul.f32 %v2089_v23, %v4686_v11 }
 0x4ee   : > { %s5568_s1 = sld [smem:[#allocation11 + $0x50d]]  ;;  %v2150_v6 = vadd.f32 %v2149_v39, %v2146_v30  ;;  %v2153_v49 = vmul.f32 %v2152_v40, %v4573_v9  ;;  %v2156_v5 = vstv %s5484_s28  ;;  %v5616_v37 = vadd.f32 %v1983_v3, %v1981_v7 }
 0x4ef   : > { %s5572_s17 = sld [smem:[#allocation11 + $0x58d]]  ;;  %v2205_v60 = vadd.f32 %v2204_v18, %v2201_v8  ;;  %v2211_v25 = vstv %s5550_s12  ;;  %v2036_v8 = vadd.f32 %v2035_v28, %v2032_v1  ;;  %v2094_v0 = vmul.f32 %v2093_v57, %v4701_v17 }
 0x4f0   : > { %s5581_s30 = sld [smem:[#allocation11 + $0x60d]]  ;;  %v2212_v63 = vmul.f32 %v2211_v25, %v4406_v14  ;;  %v2215_v21 = vstv %s5554_s14  ;;  %v2091_v58 = vadd.f32 %v2090_v48, %v2087_v24  ;;  %v2157_v3 = vmul.f32 %v2156_v5, %v4686_v11 }
 0x4f1   : > { %s5585_s5 = sld [smem:[#allocation11 + $0x68d]]  ;;  %v2209_v18 = vadd.f32 %v2208_v33, %v2205_v60  ;;  %v2154_v23 = vadd.f32 %v2153_v49, %v2150_v6  ;;  %v2160_v30 = vstv %s5488_s15  ;;  %v2216_v60 = vmul.f32 %v2215_v21, %v4504_v10 }
 0x4f2   : > { %s5590_s2 = sld [smem:[#allocation11 + $0xe]]  ;;  %v2219_v24 = vstv %s5560_s26  ;;  %v2040_v49 = vadd.f32 %v2039_v45, %v2036_v8 }
 0x4f3   : > { %v2042_v56 = vstv %s6610_s23  ;;  %s6611_s4 = sld [smem:[#allocation110_spill]]  ;;  %v2213_v40 = vadd.f32 %v2212_v63, %v2209_v18  ;;  %v2101_v18 = vstv %s5414_s7  ;;  %v2158_v21 = vadd.f32 %v2157_v3, %v2154_v23 }
 0x4f4   : > { %s5594_s8 = sld [smem:[#allocation11 + $0x8e]]  ;;  %v5599_v27 = vmul.f32 %v2042_v56, %v4956_v32  ;;  %v2097_v56 = vstv %s5409_s21  ;;  %v2220_v45 = vmul.f32 %v2219_v24, %v4573_v9  ;;  %v2223_v3 = vstv %s5563_s25 }
 0x4f5   : > { %s5602_s18 = sld [smem:[#allocation11 + $0x10e]]  ;;  %v2098_v5 = vmul.f32 %v2097_v56, %v4736_v51  ;;  %v2095_v56 = vadd.f32 %v2094_v0, %v2091_v58 }
 0x4f6   : > { %s5609_s13 = sld [smem:[#allocation11 + $0x18e]] }
 0x4f7   : > { %s5614_s6 = sld [smem:[#allocation11 + $0x20e]] }
 0x4f8   : > { %s5619_s22 = sld [smem:[#allocation11 + $0x28e]]  ;;  %v2255_v15 = vstv %s5590_s2 }
 0x4f9   : > { %v2050_v20 = vstv %s6611_s4  ;;  %s5625_s29 = sld [smem:[#allocation11 + $0x30e]]  ;;  %v2256_v28 = vmul.f32 %v2255_v15, %v3995_v12  ;;  %v2161_v15 = vmul.f32 %v2160_v30, %v4701_v17 }
 0x4fa   : > { %v2258_v7 = vstv %s5594_s8  ;;  %s5630_s28 = sld [smem:[#allocation11 + $0x38e]] }
 0x4fb   : > { %s5633_s9 = sld [smem:[#allocation11 + $0x70d]]  ;;  %v2259_v39 = vmul.f32 %v2258_v7, %v4084_v41  ;;  %v2262_v1 = vstv %s5602_s18  ;;  %v2162_v24 = vadd.f32 %v2161_v15, %v2158_v21  ;;  %v1985_v15 = vmax.f32 %v5616_v37, 0.0 }
 0x4fc   : > { %s5638_s21 = sld [smem:[#allocation11 + $0x78d]]  ;;  %v2263_v33 = vmul.f32 %v2262_v1, %v4326_v53  ;;  %v2266_v25 = vstv %s5609_s13  ;;  %v2217_v1 = vadd.f32 %v2216_v60, %v2213_v40  ;;  %v2105_v40 = vstv %s5430_s0 }
 0x4fd   : > { %v2260_v48 = vadd.f32 %v2259_v39, %v2256_v28  ;;  %v2267_v57 = vmul.f32 %v2266_v25, %v4328_v54  ;;  %v2270_v6 = vstv %s5614_s6  ;;  %s5645_s15 = sld [smem:[#allocation11 + $0x40e]]  ;;  %v2164_v39 = vstv %s5493_s19 }
 0x4fe   : > { %v2274_v63 = vstv %s5619_s22  ;;  %s5650_s10 = sld [smem:[#allocation11 + $0x48e]]  ;;  %v2271_v28 = vmul.f32 %v2270_v6, %v4333_v26  ;;  %v2102_v25 = vmul.f32 %v2101_v18, %v4783_v46  ;;  %v2168_v6 = vstv %s5501_s27 }
 0x4ff   : > { %v2264_v7 = vadd.f32 %v2263_v33, %v2260_v48  ;;  %s5654_s3 = sld [smem:[#allocation11 + $0x50e]]  ;;  %v2278_v8 = vstv %s5625_s29  ;;  %v2275_v30 = vmul.f32 %v2274_v63, %v4344_v44  ;;  %v2044_v33 = vadd.f32 %v5599_v27, %v2040_v49 }
 0x500   : > { %s5659_s12 = sld [smem:[#allocation11 + $0x58e]]  ;;  %v2282_v60 = vstv %s5630_s28  ;;  %v2165_v48 = vmul.f32 %v2164_v39, %v4736_v51  ;;  %v2279_v58 = vmul.f32 %v2278_v8, %v4406_v14  ;;  %v2221_v27 = vadd.f32 %v2220_v45, %v2217_v1 }
 0x501   : > { %v2268_v23 = vadd.f32 %v2267_v57, %v2264_v7  ;;  %s5663_s7 = sld [smem:[#allocation11 + $0x60e]]  ;;  %v2109_v57 = vstv %s5440_s20  ;;  %v2224_v49 = vmul.f32 %v2223_v3, %v4686_v11  ;;  %v2099_v18 = vadd.f32 %v2098_v5, %v2095_v56 }
 0x502   : > { %s5669_s19 = sld [smem:[#allocation11 + $0x68e]]  ;;  %v2227_v63 = vstv %s5568_s1  ;;  %v2283_v21 = vmul.f32 %v2282_v60, %v4504_v10  ;;  %v2106_v39 = vmul.f32 %v2105_v40, %v4931_v19  ;;  %v2166_v45 = vadd.f32 %v2165_v48, %v2162_v24 }
 0x503   : > { %v2272_v0 = vadd.f32 %v2271_v28, %v2268_v23  ;;  %s5673_s14 = sld [smem:[#allocation11 + $0x70e]]  ;;  %v5686_v28 = vadd.f32 %v5605_v34, %v2044_v33  ;;  %v2286_v1 = vstv %s5645_s15  ;;  %v2169_v5 = vmul.f32 %v2168_v6, %v4783_v46 }
 0x504   : > { %s5678_s26 = sld [smem:[#allocation11 + $0xf]]  ;;  %v2172_v8 = vstv %s5529_s11  ;;  %v2110_v3 = vmul.f32 %v2109_v57, %v4956_v32  ;;  %v2225_v23 = vadd.f32 %v2224_v49, %v2221_v27  ;;  %v2228_v34 = vmul.f32 %v2227_v63, %v4701_v17 }
 0x505   : > { %v2276_v7 = vadd.f32 %v2275_v30, %v2272_v0  ;;  %s5682_s0 = sld [smem:[#allocation11 + $0x8f]]  ;;  %v2231_v30 = vstv %s5572_s17  ;;  %v2103_v33 = vadd.f32 %v2102_v25, %v2099_v18  ;;  %v2287_v24 = vmul.f32 %v2286_v1, %v4573_v9 }
 0x506   : > { %s6612_s25 = sld [smem:[#allocation113_spill]]  ;;  %v2173_v48 = vmul.f32 %v2172_v8, %v4931_v19  ;;  %v2176_v0 = vstv %s5533_s24  ;;  %v2170_v6 = vadd.f32 %v2169_v5, %v2166_v45  ;;  %v2232_v25 = vmul.f32 %v2231_v30, %v4736_v51 }
 0x507   : > { %s5690_s20 = sld [smem:[#allocation11 + $0x10f]]  ;;  %v2280_v56 = vadd.f32 %v2279_v58, %v2276_v7  ;;  %v2290_v58 = vstv %s5650_s10  ;;  %v2229_v18 = vadd.f32 %v2228_v34, %v2225_v23  ;;  %v2235_v63 = vstv %s5581_s30 }
 0x508   : > { %s5694_s27 = sld [smem:[#allocation11 + $0x18f]]  ;;  %v2291_v45 = vmul.f32 %v2290_v58, %v4686_v11  ;;  %v2107_v30 = vadd.f32 %v2106_v39, %v2103_v33  ;;  %v2236_v58 = vmul.f32 %v2235_v63, %v4783_v46 }
 0x509   : > { %s5699_s23 = sld [smem:[#allocation11 + $0x20f]]  ;;  %v2284_v60 = vadd.f32 %v2283_v21, %v2280_v56 }
 0x50a   : > { %s5703_s11 = sld [smem:[#allocation11 + $0x28f]]  ;;  %v2322_v57 = vstv %s5678_s26 }
 0x50b   : > { %s5709_s1 = sld [smem:[#allocation11 + $0x30f]]  ;;  %v2323_v27 = vmul.f32 %v2322_v57, %v3995_v12  ;;  %v2325_v49 = vstv %s5682_s0  ;;  %v2288_v1 = vadd.f32 %v2287_v24, %v2284_v60  ;;  %v2294_v12 = vstv %s5654_s3 }
 0x50c   : > { %v2113_v40 = vstv %s6612_s25  ;;  %s5714_s17 = sld [smem:[#allocation11 + $0x38f]]  ;;  %v2326_v7 = vmul.f32 %v2325_v49, %v4084_v41  ;;  %v2177_v41 = vmul.f32 %v2176_v0, %v4956_v32  ;;  %v2180_v60 = vstv %s5543_s16 }
 0x50d   : > { %s5717_s2 = sld [smem:[#allocation11 + $0x78e]]  ;;  %v2329_v21 = vstv %s5690_s20  ;;  %v2292_v49 = vadd.f32 %v2291_v45, %v2288_v1  ;;  %v2295_v39 = vmul.f32 %v2294_v12, %v4701_v17  ;;  %v2233_v0 = vadd.f32 %v2232_v25, %v2229_v18 }
 0x50e   : > { %v2330_v5 = vmul.f32 %v2329_v21, %v4326_v53  ;;  %v2333_v8 = vstv %s5694_s27  ;;  %s5724_s24 = sld [smem:[#allocation11 + $0x40f]]  ;;  %v2327_v56 = vadd.f32 %v2326_v7, %v2323_v27  ;;  %v2174_v53 = vadd.f32 %v2173_v48, %v2170_v6 }
 0x50f   : > { %v2334_v23 = vmul.f32 %v2333_v8, %v4328_v54  ;;  %v2337_v34 = vstv %s5699_s23  ;;  %s5729_s30 = sld [smem:[#allocation11 + $0x48f]]  ;;  %v2239_v54 = vstv %s5585_s5  ;;  %v2298_v7 = vstv %s5659_s12 }
 0x510   : > { %v2341_v24 = vstv %s5703_s11  ;;  %s5734_s8 = sld [smem:[#allocation11 + $0x50f]]  ;;  %v2331_v57 = vadd.f32 %v2330_v5, %v2327_v56  ;;  %v2338_v27 = vmul.f32 %v2337_v34, %v4333_v26  ;;  %v2111_v6 = vadd.f32 %v2110_v3, %v2107_v30 }
 0x511   : > { %s5738_s18 = sld [smem:[#allocation11 + $0x58f]]  ;;  %v2345_v33 = vstv %s5709_s1  ;;  %v2342_v48 = vmul.f32 %v2341_v24, %v4344_v44  ;;  %v2114_v26 = vmul.f32 %v2113_v40, %v4978_v59  ;;  %v2181_v63 = vmul.f32 %v2180_v60, %v4978_v59 }
 0x512   : > { %s5743_s13 = sld [smem:[#allocation11 + $0x60f]]  ;;  %v2335_v21 = vadd.f32 %v2334_v23, %v2331_v57  ;;  %v2349_v1 = vstv %s5714_s17  ;;  %v2178_v45 = vadd.f32 %v2177_v41, %v2174_v53  ;;  %v2240_v25 = vmul.f32 %v2239_v54, %v4931_v19 }
 0x513   : > { %s5747_s16 = sld [smem:[#allocation11 + $0x68f]]  ;;  %v2346_v44 = vmul.f32 %v2345_v33, %v4406_v14  ;;  %v2243_v3 = vstv %s5633_s9  ;;  %v2296_v5 = vadd.f32 %v2295_v39, %v2292_v49  ;;  %v2299_v40 = vmul.f32 %v2298_v7, %v4736_v51 }
 0x514   : > { %s5752_s5 = sld [smem:[#allocation11 + $0x70f]]  ;;  %v2339_v18 = vadd.f32 %v2338_v27, %v2335_v21  ;;  %v2353_v8 = vstv %s5724_s24  ;;  %v2237_v12 = vadd.f32 %v2236_v58, %v2233_v0  ;;  %v2302_v56 = vstv %s5663_s7 }
 0x515   : > { %s6613_s6 = sld [smem:[#allocation102_spill]]  ;;  %v2350_v34 = vmul.f32 %v2349_v1, %v4504_v10  ;;  %v5770_v14 = vadd.f32 %v2050_v20, %v5686_v28  ;;  %v5772_v30 = vadd.f32 %v2114_v26, %v2111_v6  ;;  %v2357_v60 = vstv %s5729_s30 }
 0x516   : > { %s5756_s22 = sld [smem:[#allocation11 + $0x78f]]  ;;  %v2343_v23 = vadd.f32 %v2342_v48, %v2339_v18  ;;  %v5778_v24 = vadd.f32 %v2181_v63, %v2178_v45  ;;  %v2306_v53 = vstv %s5669_s19  ;;  %v2354_v10 = vmul.f32 %v2353_v8, %v4573_v9 }
 0x517   : > { %s5761_s29 = sld [smem:[#allocation15]]  ;;  %v2244_v20 = vmul.f32 %v2243_v3, %v4956_v32  ;;  %v2300_v28 = vadd.f32 %v2299_v40, %v2296_v5  ;;  %v2303_v57 = vmul.f32 %v2302_v56, %v4783_v46  ;;  %v2361_v27 = vstv %s5734_s8 }
 0x518   : > { %s5765_s28 = sld [smem:[#allocation15 + $0x80]]  ;;  %v2347_v58 = vadd.f32 %v2346_v44, %v2343_v23  ;;  %v2241_v54 = vadd.f32 %v2240_v25, %v2237_v12  ;;  %v2247_v49 = vstv %s5638_s21  ;;  %v2358_v33 = vmul.f32 %v2357_v60, %v4686_v11 }
 0x519   : > { %s5776_s9 = sld [smem:[#allocation15 + $0x100]]  ;;  %v2307_v9 = vmul.f32 %v2306_v53, %v4931_v19  ;;  %v2310_v0 = vstv %s5673_s14  ;;  %v2365_v7 = vstv %s5738_s18  ;;  %v2362_v6 = vmul.f32 %v2361_v27, %v4701_v17 }
 0x51a   : > { %s5782_s15 = sld [smem:[#allocation15 + $0x180]]  ;;  %v2351_v39 = vadd.f32 %v2350_v34, %v2347_v58  ;;  %v2304_v11 = vadd.f32 %v2303_v57, %v2300_v28  ;;  %v2369_v1 = vstv %s5743_s13  ;;  %v2366_v44 = vmul.f32 %v2365_v7, %v4736_v51 }
 0x51b   : > { %v2117_v41 = vstv %s6613_s6  ;;  %s5787_s4 = sld [smem:[#allocation15 + $0x200]]  ;;  %v2311_v5 = vmul.f32 %v2310_v0, %v4956_v32  ;;  %v2370_v22 = vmul.f32 %v2369_v1, %v4783_v46  ;;  %v2377_v8 = vstv %s5752_s5 }
 0x51c   : > { %s5791_s10 = sld [smem:[#allocation15 + $0x280]]  ;;  %v2355_v48 = vadd.f32 %v2354_v10, %v2351_v39  ;;  %v2245_v46 = vadd.f32 %v2244_v20, %v2241_v54  ;;  %v2248_v60 = vmul.f32 %v2247_v49, %v4978_v59  ;;  %v2378_v58 = vmul.f32 %v2377_v8, %v4956_v32 }
 0x51d   : > { %v2389_v21 = vstv %s5761_s29  ;;  %s5797_s3 = sld [smem:[#allocation15 + $0x300]]  ;;  %v2381_v10 = vstv %s5756_s22  ;;  %v2118_v35 = vadd.f32 %v2117_v41, %v5772_v30  ;;  %v2052_v61 = vmax.f32 %v5770_v14, 0.0 }
 0x51e   : > { %v2390_v26 = vmul.f32 %v2389_v21, %v1382_v36  ;;  %v2392_v63 = vstv %s5765_s28  ;;  %s5803_s21 = sld [smem:[#allocation15 + $0x380]]  ;;  %v2359_v18 = vadd.f32 %v2358_v33, %v2355_v48  ;;  %v2373_v36 = vstv %s5747_s16 }
 0x51f   : > { %s5805_s12 = sld [smem:[#allocation13 + $0xc]]  ;;  %v2393_v45 = vmul.f32 %v2392_v63, %v1449_v2  ;;  %v2396_v25 = vstv %s5776_s9  ;;  %v2374_v23 = vmul.f32 %v2373_v36, %v4931_v19  ;;  %v2249_v32 = vadd.f32 %v2248_v60, %v2245_v46 }
 0x520   : > { %v2397_v17 = vmul.f32 %v2396_v25, %v1516_v43  ;;  %v2400_v50 = vstv %s5782_s15  ;;  %s5815_s7 = sld [smem:[#allocation15 + $0x400]]  ;;  %v2363_v51 = vadd.f32 %v2362_v6, %v2359_v18  ;;  %v2308_v43 = vadd.f32 %v2307_v9, %v2304_v11 }
 0x521   : > { %s5817_s19 = sld [smem:[#allocation13 + $0xd]]  ;;  %v2394_v3 = vadd.f32 %v2393_v45, %v2390_v26  ;;  %v2401_v47 = vmul.f32 %v2400_v50, %v1583_v13  ;;  %v2404_v2 = vstv %s5787_s4  ;;  %v2314_v13 = vstv %s5717_s2 }
 0x522   : > { %v2408_v40 = vstv %s5791_s10  ;;  %s5826_s14 = sld [smem:[#allocation15 + $0x480]]  ;;  %v2405_v52 = vmul.f32 %v2404_v2, %v1650_v31  ;;  %v2367_v56 = vadd.f32 %v2366_v44, %v2363_v51  ;;  %v2312_v28 = vadd.f32 %v2311_v5, %v2308_v43 }
 0x523   : > { %s5828_s26 = sld [smem:[#allocation13 + $0xe]]  ;;  %v2398_v12 = vadd.f32 %v2397_v17, %v2394_v3  ;;  %v2412_v34 = vstv %s5797_s3  ;;  %v2409_v55 = vmul.f32 %v2408_v40, %v1717_v4  ;;  %v2315_v20 = vmul.f32 %v2314_v13, %v4978_v59 }
 0x524   : > { %s5836_s0 = sld [smem:[#allocation15 + $0x500]]  ;;  %v2371_v31 = vadd.f32 %v2370_v22, %v2367_v56  ;;  %v2416_v19 = vstv %s5803_s21  ;;  %v2413_v27 = vmul.f32 %v2412_v34, %v1784_v42  ;;  %v2382_v39 = vmul.f32 %v2381_v10, %v4978_v59 }
 0x525   : > { %s5839_s25 = sld [smem:[#allocation13 + $0xf]]  ;;  %v2402_v53 = vadd.f32 %v2401_v47, %v2398_v12  ;;  %v2184_v4 = vstv %s5805_s12  ;;  %v2417_v9 = vmul.f32 %v2416_v19, %v1851_v16  ;;  %v2316_v7 = vadd.f32 %v2315_v20, %v2312_v28 }
 0x526   : > { %s5846_s20 = sld [smem:[#allocation15 + $0x580]]  ;;  %v2375_v54 = vadd.f32 %v2374_v23, %v2371_v31  ;;  %v2420_v49 = vstv %s5815_s7  ;;  %v2185_v41 = vadd.f32 %v2184_v4, %v5778_v24  ;;  %v2119_v48 = vmax.f32 %v2118_v35, 0.0 }
 0x527   : > { %v2406_v57 = vadd.f32 %v2405_v52, %v2402_v53  ;;  %s5856_s27 = sld [smem:[#allocation15 + $0x600]]  ;;  %v2251_v42 = vstv %s5817_s19  ;;  %v2421_v59 = vmul.f32 %v2420_v49, %v1918_v62 }
 0x528   : > { %v2379_v0 = vadd.f32 %v2378_v58, %v2375_v54  ;;  %v2424_v30 = vstv %s5826_s14  ;;  %s5864_s23 = sld [smem:[#allocation15 + $0x680]]  ;;  %v2252_v14 = vadd.f32 %v2251_v42, %v2249_v32  ;;  %v2186_v24 = vmax.f32 %v2185_v41, 0.0 }
 0x529   : > { %v2410_v33 = vadd.f32 %v2409_v55, %v2406_v57  ;;  %v2318_v29 = vstv %s5828_s26  ;;  %s3092_s11 = sld [smem:[#allocation15 + $0x700]]  ;;  %v2425_v63 = vmul.f32 %v2424_v30, %v1985_v15 }
 0x52a   : > { %v2428_v16 = vstv %s5836_s0  ;;  %v2383_v6 = vadd.f32 %v2382_v39, %v2379_v0  ;;  %s3093_s1 = sld [smem:[#allocation15 + $0x780]]  ;;  %v2319_v45 = vadd.f32 %v2318_v29, %v2316_v7  ;;  %v2253_v18 = vmax.f32 %v2252_v14, 0.0 }
 0x52b   : > { %v2414_v21 = vadd.f32 %v2413_v27, %v2410_v33  ;;  %v2385_v11 = vstv %s5839_s25  ;;  %v2429_v38 = vmul.f32 %v2428_v16, %v2052_v61  ;;  %s6614_s17 = sld [smem:[#allocation142_spill]] }
 0x52c   : > { %v2432_v1 = vstv %s5846_s20  ;;  %v2386_v44 = vadd.f32 %v2385_v11, %v2383_v6  ;;  %v2320_v3 = vmax.f32 %v2319_v45, 0.0  ;;  %s2451_s2 = sld [smem:[#allocation2]] }
 0x52d   : > { %v2418_v26 = vadd.f32 %v2417_v9, %v2414_v21  ;;  %v2436_v62 = vstv %s5856_s27  ;;  %v2433_v50 = vmul.f32 %v2432_v1, %v2119_v48  ;;  %s6615_s24 = sld [smem:[#allocation24_spill]] }
 0x52e   : > { %v2440_v36 = vstv %s5864_s23  ;;  %v2437_v2 = vmul.f32 %v2436_v62, %v2186_v24  ;;  %v2387_v37 = vmax.f32 %v2386_v44, 0.0 }
 0x52f   : > { %v2422_v25 = vadd.f32 %v2421_v59, %v2418_v26  ;;  %v2444_v5 = vstv %s3092_s11  ;;  %v2441_v51 = vmul.f32 %v2440_v36, %v2253_v18 }
 0x530   : > { %v2448_v22 = vstv %s3093_s1  ;;  %v2445_v43 = vmul.f32 %v2444_v5, %v2320_v3 }
 0x531   : > { %v2426_v17 = vadd.f32 %v2425_v63, %v2422_v25  ;;  %v2449_v12 = vmul.f32 %v2448_v22, %v2387_v37  ;;  %v3116_v34 = vld [vmem:[%s6614_s17] sm:$0xff] }
 0x532   : > { %v2452_v13 = vstv %s2451_s2 }
 0x533   : > { %v2430_v47 = vadd.f32 %v2429_v38, %v2426_v17  ;;  %s6616_s30 = sshll.u32 %s6615_s24, 3  ;;  %s128_s4 = sadd.s32 1, %s6615_s24  }
 0x534   : > { %s2474_s8 = scalar_lea.vmem [#allocation16], %s6616_s30  ;;  %p125_p0 = scmp.ge.s32.totalorder %s128_s4, 2  }
 0x535   : > { %v2434_v15 = vadd.f32 %v2433_v50, %v2430_v47  ;;  %s6617_s16 = sld [smem:[#allocation154_spill]] (%p125_p0)  ;;  %s3256_s6 = smov (%p125_p0), [#allocation16]  }
 0x536   :  { %s2480_s22 = sshll.u32 (%p125_p0), %s3256_s6, 4  ;;  %s6618_s29 = smov (%p125_p0), 8   ;;  %s2481_s22 = int_to_ptr.vmem [resolvable:$true] %s2480_s22 }
 0x537   : > { %v2438_v40 = vadd.f32 %v2437_v2, %v2434_v15  ;;  %s6619_s28 = smov (%p125_p0), 128  }
 0x539   : > { %v2442_v8 = vadd.f32 %v2441_v51, %v2438_v40 }
 0x53b   : > { %v2446_v52 = vadd.f32 %v2445_v43, %v2442_v8  ;;  %s2482_s5 = sshll.u32 (%p125_p0), %s6617_s16, 4  ;;  %s2483_s5 = int_to_ptr.hbm [resolvable:$true] %s2482_s5 }
 0x53d   : > { %v2450_v56 = vadd.f32 %v2449_v12, %v2446_v52 }
 0x53f   : > { %v2453_v23 = vadd.f32 %v2452_v13, %v2450_v56 }
 0x541   : > { %v2454_v46 = vadd.f32 %v3116_v34, %v2453_v23 }
 0x543   : > { %v2455_v60 = vsub.f32 0.0, %v2454_v46 }
 0x545   : > { %v2456_v53 = vmul.f32 1.442695, %v2455_v60 }
 0x547   : > { %3112 = vpow2.f32 %v2456_v53 }
 0x54d   : > { %v3113_v55 = vpop.eup %3112 }
 0x54e   : > { %v2458_v31 = vadd.f32 1.0, %v3113_v55 }
 0x550   : > { %3114 = vrcp.f32 %v2458_v31  ;;  %v2470_v19 = vand.u32 2147483648, %v2458_v31  ;;  %vm2464_vm0 = vweird.f32 %v2458_v31  ;;  %v2468_v20 = vand.u32 2147483647, %v2458_v31 }
 0x552   : > { %v2471_v27 = vor.u32 1.1754944e-38, %v2470_v19  ;;  %vm2469_vm3 = vcmp.eq.f32.partialorder %v2468_v20, 8.507059e+37 }
 0x556   : > { %v3115_v58 = vpop.eup %3114 }
 0x557   : > { %v2460_v10 = vmul.f32 %v3115_v58, %v2458_v31  ;;  %vm2465_vm1 = vweird.f32 %v3115_v58 }
 0x558   : > { %vm2466_vm2 = vmor %vm2464_vm0, %vm2465_vm1 }
 0x559   : > { %v2461_v28 = vsub.f32 1.0, %v2460_v10 }
 0x55b   : > { %v2462_v57 = vmul.f32 %v3115_v58, %v2461_v28 }
 0x55d   : > { %v2463_v35 = vadd.f32 %v3115_v58, %v2462_v57  ;;  %127 = sbr.rel (!%p125_p0) target bundleno = 38 (0x26), region = 93 }
 0x55f   : > { %v2467_v4 = vsel %vm2466_vm2, %v3115_v58, %v2463_v35 }
 0x560   : > { %v2472_v54 = vsel %vm2469_vm3, %v2471_v27, %v2467_v4 }
 0x561   : > { %2475 = vst [vmem:[%s2474_s8] sm:$0xff] %v2472_v54 }
 0x562   :  { %2488 = dma.vmem_to_hbm [thread:$0]  %s2481_s22, 256, %s2483_s5, [#allocation4], %s6619_s28, %s6619_s28, %s6618_s29  }
 0x563   :  { %3241 = dma.done.wait [#allocation4], 256  }
 0x564   :  { %3242 = vsyncadd [#allocation4], 4294967040 }
 0x565   :  { %2493 = vsyncpa [#allocation4], 1 }
 0x566   :  { %2494 = vsyncpa [#allocation5], 1 }
 0x567   :  { %2495 = vsyncpa [#allocation12], 1 }
 0x568   :  { %2496 = vsyncpa [#allocation6], 1 }
 0x569   :  { %2497 = vsyncpa [#allocation8], 1 }
 0x56a   :  { %2498 = vsyncpa [#allocation14], 1 }

</bundles_post_ra>
